<compile_context>
chip_gen: v5e
topology: v5e:2x2
jax: 0.10.0
libtpu: 0.0.40
codegen_flags: <defaults>
</compile_context>

<pallas_src>
import math
import numpy as np
import jax
import jax.numpy as jnp
from jax.experimental import pallas as pl
from jax.experimental.pallas import tpu as pltpu


# ---------------------------------------------------------------------------
# Host-side constant masks (tiny; avoids any in-kernel integer div/mod).
# ---------------------------------------------------------------------------

def build_masks(H, W, C):
    """Per-channel roll-bit masks and per-token column / border masks."""
    N = H * W
    nb_h = max(1, (H - 1).bit_length())
    nb_w = max(1, (W - 1).bit_length())
    c = np.arange(C)
    sh_h = c % H                     # +c roll along H
    sh_wp = c % W                    # +c roll along W
    sh_wm = (-c) % W                 # -c roll along W

    def bits(s, nb):
        return np.stack([((s >> k) & 1) for k in range(nb)]
                        ).astype(np.float32)[:, :, None]          # (nb, C, 1)

    h_idx = np.arange(N) // W
    w_idx = np.arange(N) % W
    colsel = np.stack([(w_idx < (1 << k)) for k in range(nb_w)]
                      ).astype(np.float32)[:, None, :]             # (nb_w,1,N)
    dwm = []
    for dh in (-1, 0, 1):
        for dw in (-1, 0, 1):
            ok = ((h_idx + dh >= 0) & (h_idx + dh < H) &
                  (w_idx + dw >= 0) & (w_idx + dw < W))
            dwm.append(ok)
    dwm = np.stack(dwm).astype(np.float32)[:, None, :]             # (9,1,N)
    return {
        "mH": jnp.asarray(bits(sh_h, nb_h)),
        "mWp": jnp.asarray(bits(sh_wp, nb_w)),
        "mWm": jnp.asarray(bits(sh_wm, nb_w)),
        "colsel": jnp.asarray(colsel),
        "dwm": jnp.asarray(dwm),
    }


def _bcast_spec(shape):
    zeros = (0,) * len(shape)
    return pl.BlockSpec(shape, lambda b, _z=zeros: _z)


# ---------------------------------------------------------------------------
# Stage 1: shifted-MLP branches + LayerNorm + fc5(+residual) + DWConv+1x1+ReLU
# Layout inside the kernel: (C, N) per image, tokens on the lane axis.
# ---------------------------------------------------------------------------

def _make_stage1_kernel(H, W, C, nb_h, nb_w):
    N = H * W
    f32 = jnp.float32
    HIGH = jax.lax.Precision.HIGHEST

    def mm(w, v):                                   # (Cout,Cin) @ (Cin,N)
        return jnp.dot(w, v, preferred_element_type=f32, precision=HIGH)

    def gelu(v):                                    # exact erf GELU (torch default)
        return 0.5 * v * (1.0 + jax.lax.erf(v * 0.7071067811865476))

    def kernel(x_ref,
               w1_ref, b1_ref, w2_ref, b2_ref, w3_ref, b3_ref, w4_ref, b4_ref,
               lng1_ref, lng2_ref, lnb1_ref, lnb2_ref,
               w5a_ref, w5b_ref, b5_ref,
               wd_ref, wp_ref, bpe_ref,
               mH_ref, mWp_ref, mWm_ref, csel_ref, dwm_ref,
               x1_ref, y_ref):
        xb = x_ref[0].astype(f32)                               # (C, N)

        # hoisted per-bit select masks (shared across both roll_h / roll_w uses)
        bit_h = [mH_ref[k] != 0.0 for k in range(nb_h)]         # (C,1) each
        bit_wp = [mWp_ref[k] != 0.0 for k in range(nb_w)]
        bit_wm = [mWm_ref[k] != 0.0 for k in range(nb_w)]
        col_lt = [csel_ref[k] != 0.0 for k in range(nb_w)]      # (1,N) each

        def roll_h(v, bits):
            # per-channel roll by +s along H == flat token roll by s*W (exact)
            out = v
            for k in range(nb_h):
                r = pltpu.roll(out, ((1 << k) * W) % N, axis=1)
                out = jnp.where(bits[k], r, out)
            return out

        def roll_w(v, bits):
            # per-channel roll along W (wrap within each image row): select
            # between flat rolls by t and by t-W on the column-index mask.
            out = v
            for k in range(nb_w):
                t = 1 << k
                r_in = pltpu.roll(out, t % N, axis=1)
                r_wrap = pltpu.roll(out, (t - W) % N, axis=1)
                out = jnp.where(bits[k], jnp.where(col_lt[k], r_wrap, r_in), out)
            return out

        # ---- branch 1: roll(+c,H) -> fc1 -> GELU -> roll(+c,W) -> fc2 (+x)
        h = roll_h(xb, bit_h)
        h = gelu(mm(w1_ref[...], h) + b1_ref[...])
        h = roll_w(h, bit_wp)
        br1 = mm(w2_ref[...], h) + b2_ref[...] + xb

        # ---- branch 2: roll(-c,W) -> fc3 -> GELU -> roll(+c,H) -> fc4 (+x)
        g = roll_w(xb, bit_wm)
        g = gelu(mm(w3_ref[...], g) + b3_ref[...])
        g = roll_h(g, bit_h)
        br2 = mm(w4_ref[...], g) + b4_ref[...] + xb

        # ---- LayerNorm over the 2C concatenated features (cat never built)
        inv2c = 1.0 / (2 * C)
        mean = (jnp.sum(br1, axis=0, keepdims=True)
                + jnp.sum(br2, axis=0, keepdims=True)) * inv2c
        d1 = br1 - mean
        d2 = br2 - mean
        var = (jnp.sum(d1 * d1, axis=0, keepdims=True)
               + jnp.sum(d2 * d2, axis=0, keepdims=True)) * inv2c
        inv = jax.lax.rsqrt(var + 1e-5)
        n1 = d1 * inv * lng1_ref[...] + lnb1_ref[...]
        n2 = d2 * inv * lng2_ref[...] + lnb2_ref[...]
        # fc5 on cat([n1; n2]) as a split-K pair of dots, + residual
        x1 = mm(w5a_ref[...], n1) + mm(w5b_ref[...], n2) + b5_ref[...] + xb
        x1_ref[0] = x1.astype(x1_ref.dtype)

        # ---- conv branch: 3x3 depthwise via 8 neighbor rolls + border masks,
        #      pointwise 1x1 on the MXU, ReLU.  (BatchNorm applied in stage 2.)
        acc = wd_ref[4] * xb                                    # center tap
        tap = 0
        for dh in (-1, 0, 1):
            for dw in (-1, 0, 1):
                if dh == 0 and dw == 0:
                    tap += 1
                    continue
                shift = (-(dh * W + dw)) % N                    # out[i]=x[i+off]
                nbr = pltpu.roll(xb, shift, axis=1)
                acc = acc + wd_ref[tap] * (dwm_ref[tap] * nbr)
                tap += 1
        y = jnp.maximum(mm(wp_ref[...], acc) + bpe_ref[...], 0.0)
        y_ref[0] = y.astype(y_ref.dtype)

    return kernel


def lo2_stage1(x_cn, p, masks, H, W):
    B, C, N = x_cn.shape
    nb_h = masks["mH"].shape[0]
    nb_w = masks["mWp"].shape[0]
    kernel = _make_stage1_kernel(H, W, C, nb_h, nb_w)
    bp_eff = p["bp"] + p["wp"] @ p["bd"]          # fold dw bias through 1x1 conv

    in_specs = [
        pl.BlockSpec((1, C, N), lambda b: (b, 0, 0)),                 # x (C,N)
        _bcast_spec((C, C)), _bcast_spec((C, 1)),                     # w1, b1
        _bcast_spec((C, C)), _bcast_spec((C, 1)),                     # w2, b2
        _bcast_spec((C, C)), _bcast_spec((C, 1)),                     # w3, b3
        _bcast_spec((C, C)), _bcast_spec((C, 1)),                     # w4, b4
        _bcast_spec((C, 1)), _bcast_spec((C, 1)),                     # ln_g halves
        _bcast_spec((C, 1)), _bcast_spec((C, 1)),                     # ln_b halves
        _bcast_spec((C, C)), _bcast_spec((C, C)), _bcast_spec((C, 1)),  # w5a,w5b,b5
        _bcast_spec((9, C, 1)), _bcast_spec((C, C)), _bcast_spec((C, 1)),  # wd,wp,bp_eff
        _bcast_spec((nb_h, C, 1)), _bcast_spec((nb_w, C, 1)), _bcast_spec((nb_w, C, 1)),
        _bcast_spec((nb_w, 1, N)), _bcast_spec((9, 1, N)),
    ]
    out_specs = (
        pl.BlockSpec((1, C, N), lambda b: (b, 0, 0)),   # x1 (token path result)
        pl.BlockSpec((1, C, N), lambda b: (b, 0, 0)),   # y  (conv path, pre-BN)
    )
    out_shape = (
        jax.ShapeDtypeStruct((B, C, N), x_cn.dtype),
        jax.ShapeDtypeStruct((B, C, N), x_cn.dtype),
    )
    return pl.pallas_call(
        kernel,
        out_shape=out_shape,
        grid_spec=pltpu.PrefetchScalarGridSpec(
            num_scalar_prefetch=0, grid=(B,),
            in_specs=in_specs, out_specs=out_specs),
        compiler_params=pltpu.CompilerParams(dimension_semantics=("parallel",)),
    )(x_cn,
      p["w1"], p["b1"], p["w2"], p["b2"], p["w3"], p["b3"], p["w4"], p["b4"],
      p["ln_g"][:C], p["ln_g"][C:], p["ln_b"][:C], p["ln_b"][C:],
      p["w5"][:, :C], p["w5"][:, C:], p["b5"],
      p["wd"], p["wp"], bp_eff,
      masks["mH"], masks["mWp"], masks["mWm"], masks["colsel"], masks["dwm"])


# ---------------------------------------------------------------------------
# Stage 2: BatchNorm affine (precomputed scale/bias) fused with fc6 (split-K)
# ---------------------------------------------------------------------------

def _make_stage2_kernel():
    f32 = jnp.float32
    HIGH = jax.lax.Precision.HIGHEST

    def kernel(x1_ref, y_ref, a_ref, c_ref, w6a_ref, w6b_ref, b6_ref, o_ref):
        x1 = x1_ref[0].astype(f32)                       # (C, N)
        ybn = y_ref[0].astype(f32) * a_ref[...] + c_ref[...]
        out = (jnp.dot(w6a_ref[...], x1, preferred_element_type=f32, precision=HIGH)
               + jnp.dot(w6b_ref[...], ybn, preferred_element_type=f32, precision=HIGH)
               + b6_ref[...])
        o_ref[0] = out.astype(o_ref.dtype)

    return kernel


def lo2_stage2(x1, y, bn_a, bn_c, p, C):
    B, _, N = x1.shape
    return pl.pallas_call(
        _make_stage2_kernel(),
        out_shape=jax.ShapeDtypeStruct((B, C, N), x1.dtype),
        grid_spec=pltpu.PrefetchScalarGridSpec(
            num_scalar_prefetch=0, grid=(B,),
            in_specs=[
                pl.BlockSpec((1, C, N), lambda b: (b, 0, 0)),   # x1
                pl.BlockSpec((1, C, N), lambda b: (b, 0, 0)),   # y
                _bcast_spec((C, 1)), _bcast_spec((C, 1)),       # bn scale, bias
                _bcast_spec((C, C)), _bcast_spec((C, C)),       # w6 halves
                _bcast_spec((C, 1)),                            # b6
            ],
            out_specs=pl.BlockSpec((1, C, N), lambda b: (b, 0, 0))),
        compiler_params=pltpu.CompilerParams(dimension_semantics=("parallel",)),
    )(x1, y, bn_a, bn_c, p["w6"][:, :C], p["w6"][:, C:], p["b6"])


# ---------------------------------------------------------------------------
# Lo2Block forward
# ---------------------------------------------------------------------------

def lo2_block_forward(x, p, masks, H, W):
    B, N, C = x.shape
    x_cn = jnp.swapaxes(x, 1, 2)                       # (B, C, N): lane-dense
    x1, y = lo2_stage1(x_cn, p, masks, H, W)
    # BatchNorm2d training-mode batch statistics (two-pass, numerically stable),
    # computed once here instead of per grid step / per TensorCore.
    # TODO(synk): running mean/var buffers are not tracked, so eval-mode PyTorch
    #             (which uses running statistics) will differ.
    mean = jnp.mean(y, axis=(0, 2))                                     # (C,)
    var = jnp.mean(jnp.square(y - mean[None, :, None]), axis=(0, 2))    # biased
    bn_a = p["bn_g"] * jax.lax.rsqrt(var[:, None] + 1e-5)               # (C,1)
    bn_c = p["bn_b"] - mean[:, None] * bn_a
    out_cn = lo2_stage2(x1, y, bn_a, bn_c, p, C)
    return jnp.swapaxes(out_cn, 1, 2)                  # (B, N, C)


# ---------------------------------------------------------------------------
# Deterministic parameter init (mirrors the module's _init_weights recipe);
# linear weights are stored (out_features, in_features), biases (out, 1).
# ---------------------------------------------------------------------------

def init_params(key, C):
    ks = jax.random.split(key, 8)

    def lin(k, fin, fout):
        # trunc_normal(std=0.02) approximated by normal(std=0.02); bias = 0
        return (jax.random.normal(k, (fout, fin), jnp.float32) * 0.02,
                jnp.zeros((fout, 1), jnp.float32))

    p = {}
    p["w1"], p["b1"] = lin(ks[0], C, C)
    p["w2"], p["b2"] = lin(ks[1], C, C)
    p["w3"], p["b3"] = lin(ks[2], C, C)
    p["w4"], p["b4"] = lin(ks[3], C, C)
    p["w5"], p["b5"] = lin(ks[4], 2 * C, C)
    p["w6"], p["b6"] = lin(ks[5], 2 * C, C)
    p["ln_g"] = jnp.ones((2 * C, 1), jnp.float32)
    p["ln_b"] = jnp.zeros((2 * C, 1), jnp.float32)
    # depthwise 3x3 (groups=C): fan_out = 3*3*C // C = 9; tap = (dh+1)*3+(dw+1)
    p["wd"] = jax.random.normal(ks[6], (9, C, 1), jnp.float32) * math.sqrt(2.0 / 9.0)
    p["bd"] = jnp.zeros((C, 1), jnp.float32)
    # pointwise 1x1: fan_out = C
    p["wp"] = jax.random.normal(ks[7], (C, C), jnp.float32) * math.sqrt(2.0 / C)
    p["bp"] = jnp.zeros((C, 1), jnp.float32)
    p["bn_g"] = jnp.ones((C, 1), jnp.float32)
    p["bn_b"] = jnp.zeros((C, 1), jnp.float32)
    return p


if __name__ == "__main__":
    B, C, H, W = 2, 32, 16, 16         # dim=32, mlp_ratio=1 -> hidden=32
    N = H * W
    key = jax.random.PRNGKey(0)
    k_param, k_x = jax.random.split(key)
    params = init_params(k_param, C)
    masks = build_masks(H, W, C)
    x = jax.random.normal(k_x, (B, N, C), jnp.float32)

    fwd = jax.jit(lo2_block_forward, static_argnums=(3, 4))
    out = fwd(x, params, masks, H, W)
    jax.block_until_ready(out)
    assert out.shape == (B, N, C) and out.dtype == jnp.float32
    print("KERNEL_OK")
</pallas_src>

<mosaic_0001>
module attributes {stable_mosaic.version = 11 : i64} {
  func.func @kernel(%arg0: i32, %arg1: memref<1x32x256xf32, #tpu.memory_space<vmem>>, %arg2: memref<1x32x256xf32, #tpu.memory_space<vmem>>, %arg3: memref<32x1xf32, #tpu.memory_space<vmem>>, %arg4: memref<32x1xf32, #tpu.memory_space<vmem>>, %arg5: memref<32x32xf32, #tpu.memory_space<vmem>>, %arg6: memref<32x32xf32, #tpu.memory_space<vmem>>, %arg7: memref<32x1xf32, #tpu.memory_space<vmem>>, %arg8: memref<1x32x256xf32, #tpu.memory_space<vmem>>) attributes {dimension_semantics = [#tpu.dimension_semantics<parallel>], iteration_bounds = array<i64: 2>, scalar_prefetch = 0 : i64, scratch_operands = 0 : i64, tpu.core_type = #tpu.core_type<tc>, window_params = [{transform_indices = @transform_0, window_bounds = array<i64: 1, 32, 256>}, {transform_indices = @transform_1, window_bounds = array<i64: 1, 32, 256>}, {pipeline_mode = #tpu.pipeline_mode<synchronous>, transform_indices = @transform_2, window_bounds = array<i64: 32, 1>}, {pipeline_mode = #tpu.pipeline_mode<synchronous>, transform_indices = @transform_3, window_bounds = array<i64: 32, 1>}, {pipeline_mode = #tpu.pipeline_mode<synchronous>, transform_indices = @transform_4, window_bounds = array<i64: 32, 32>}, {pipeline_mode = #tpu.pipeline_mode<synchronous>, transform_indices = @transform_5, window_bounds = array<i64: 32, 32>}, {pipeline_mode = #tpu.pipeline_mode<synchronous>, transform_indices = @transform_6, window_bounds = array<i64: 32, 1>}, {transform_indices = @transform_7, window_bounds = array<i64: 1, 32, 256>}]} {
    %c0 = arith.constant 0 : index
    %c0_0 = arith.constant 0 : index
    %c0_1 = arith.constant 0 : index
    %0 = vector.load %arg1[%c0, %c0_0, %c0_1] : memref<1x32x256xf32, #tpu.memory_space<vmem>>, vector<1x32x256xf32>
    %1 = vector.shape_cast %0 : vector<1x32x256xf32> to vector<32x256xf32>
    %c0_2 = arith.constant 0 : index
    %c0_3 = arith.constant 0 : index
    %c0_4 = arith.constant 0 : index
    %2 = vector.load %arg2[%c0_2, %c0_3, %c0_4] : memref<1x32x256xf32, #tpu.memory_space<vmem>>, vector<1x32x256xf32>
    %3 = vector.shape_cast %2 : vector<1x32x256xf32> to vector<32x256xf32>
    %c0_5 = arith.constant 0 : index
    %c0_6 = arith.constant 0 : index
    %4 = vector.load %arg3[%c0_5, %c0_6] : memref<32x1xf32, #tpu.memory_space<vmem>>, vector<32x1xf32>
    %5 = vector.broadcast %4 : vector<32x1xf32> to vector<32x256xf32>
    %6 = arith.mulf %3, %5 : vector<32x256xf32>
    %c0_7 = arith.constant 0 : index
    %c0_8 = arith.constant 0 : index
    %7 = vector.load %arg4[%c0_7, %c0_8] : memref<32x1xf32, #tpu.memory_space<vmem>>, vector<32x1xf32>
    %8 = vector.broadcast %7 : vector<32x1xf32> to vector<32x256xf32>
    %9 = arith.addf %6, %8 : vector<32x256xf32>
    %c0_9 = arith.constant 0 : index
    %c0_10 = arith.constant 0 : index
    %10 = vector.load %arg5[%c0_9, %c0_10] : memref<32x32xf32, #tpu.memory_space<vmem>>, vector<32x32xf32>
    %cst = arith.constant dense<0.000000e+00> : vector<32x256xf32>
    %11 = tpu.matmul %10, %1, %cst {dimension_numbers = #tpu.dot_dimension_numbers<[1], [0], [0], [1], [0, 0, 1, 1], [], []>, precision = #tpu.contract_precision<fp32>} : vector<32x32xf32>, vector<32x256xf32>, vector<32x256xf32> -> vector<32x256xf32>
    %c0_11 = arith.constant 0 : index
    %c0_12 = arith.constant 0 : index
    %12 = vector.load %arg6[%c0_11, %c0_12] : memref<32x32xf32, #tpu.memory_space<vmem>>, vector<32x32xf32>
    %cst_13 = arith.constant dense<0.000000e+00> : vector<32x256xf32>
    %13 = tpu.matmul %12, %9, %cst_13 {dimension_numbers = #tpu.dot_dimension_numbers<[1], [0], [0], [1], [0, 0, 1, 1], [], []>, precision = #tpu.contract_precision<fp32>} : vector<32x32xf32>, vector<32x256xf32>, vector<32x256xf32> -> vector<32x256xf32>
    %14 = arith.addf %11, %13 : vector<32x256xf32>
    %c0_14 = arith.constant 0 : index
    %c0_15 = arith.constant 0 : index
    %15 = vector.load %arg7[%c0_14, %c0_15] : memref<32x1xf32, #tpu.memory_space<vmem>>, vector<32x1xf32>
    %16 = vector.broadcast %15 : vector<32x1xf32> to vector<32x256xf32>
    %17 = arith.addf %14, %16 : vector<32x256xf32>
    %c0_16 = arith.constant 0 : index
    %c0_17 = arith.constant 0 : index
    %c0_18 = arith.constant 0 : index
    %18 = vector.load %arg8[%c0_16, %c0_17, %c0_18] : memref<1x32x256xf32, #tpu.memory_space<vmem>>, vector<1x32x256xf32>
    %19 = vector.shape_cast %18 : vector<1x32x256xf32> to vector<32x256xf32>
    %20 = vector.shape_cast %17 : vector<32x256xf32> to vector<1x32x256xf32>
    tpu.vector_store %arg8[%c0_16, %c0_17, %c0_18], %20 {strides = array<i32>} : memref<1x32x256xf32, #tpu.memory_space<vmem>>, vector<1x32x256xf32>,
    return
  }
  func.func @transform_0(%arg0: i32) -> (i32, i32, i32) {
    %c0_i32 = arith.constant 0 : i32
    %c0_i32_0 = arith.constant 0 : i32
    %c0_i32_1 = arith.constant 0 : i32
    return %arg0, %c0_i32, %c0_i32_0 : i32, i32, i32
  }
  func.func @transform_1(%arg0: i32) -> (i32, i32, i32) {
    %c0_i32 = arith.constant 0 : i32
    %c0_i32_0 = arith.constant 0 : i32
    %c0_i32_1 = arith.constant 0 : i32
    return %arg0, %c0_i32, %c0_i32_0 : i32, i32, i32
  }
  func.func @transform_2(%arg0: i32) -> (i32, i32) {
    %c0_i32 = arith.constant 0 : i32
    %c0_i32_0 = arith.constant 0 : i32
    %c0_i32_1 = arith.constant 0 : i32
    return %c0_i32, %c0_i32_0 : i32, i32
  }
  func.func @transform_3(%arg0: i32) -> (i32, i32) {
    %c0_i32 = arith.constant 0 : i32
    %c0_i32_0 = arith.constant 0 : i32
    %c0_i32_1 = arith.constant 0 : i32
    return %c0_i32, %c0_i32_0 : i32, i32
  }
  func.func @transform_4(%arg0: i32) -> (i32, i32) {
    %c0_i32 = arith.constant 0 : i32
    %c0_i32_0 = arith.constant 0 : i32
    %c0_i32_1 = arith.constant 0 : i32
    return %c0_i32, %c0_i32_0 : i32, i32
  }
  func.func @transform_5(%arg0: i32) -> (i32, i32) {
    %c0_i32 = arith.constant 0 : i32
    %c0_i32_0 = arith.constant 0 : i32
    %c0_i32_1 = arith.constant 0 : i32
    return %c0_i32, %c0_i32_0 : i32, i32
  }
  func.func @transform_6(%arg0: i32) -> (i32, i32) {
    %c0_i32 = arith.constant 0 : i32
    %c0_i32_0 = arith.constant 0 : i32
    %c0_i32_1 = arith.constant 0 : i32
    return %c0_i32, %c0_i32_0 : i32, i32
  }
  func.func @transform_7(%arg0: i32) -> (i32, i32, i32) {
    %c0_i32 = arith.constant 0 : i32
    %c0_i32_0 = arith.constant 0 : i32
    %c0_i32_1 = arith.constant 0 : i32
    return %arg0, %c0_i32, %c0_i32_0 : i32, i32, i32
  }
}

module attributes {stable_mosaic.version = 11 : i64} {
  func.func @kernel(%arg0: i32, %arg1: memref<1x32x256xf32, #tpu.memory_space<vmem>>, %arg2: memref<32x32xf32, #tpu.memory_space<vmem>>, %arg3: memref<32x1xf32, #tpu.memory_space<vmem>>, %arg4: memref<32x32xf32, #tpu.memory_space<vmem>>, %arg5: memref<32x1xf32, #tpu.memory_space<vmem>>, %arg6: memref<32x32xf32, #tpu.memory_space<vmem>>, %arg7: memref<32x1xf32, #tpu.memory_space<vmem>>, %arg8: memref<32x32xf32, #tpu.memory_space<vmem>>, %arg9: memref<32x1xf32, #tpu.memory_space<vmem>>, %arg10: memref<32x1xf32, #tpu.memory_space<vmem>>, %arg11: memref<32x1xf32, #tpu.memory_space<vmem>>, %arg12: memref<32x1xf32, #tpu.memory_space<vmem>>, %arg13: memref<32x1xf32, #tpu.memory_space<vmem>>, %arg14: memref<32x32xf32, #tpu.memory_space<vmem>>, %arg15: memref<32x32xf32, #tpu.memory_space<vmem>>, %arg16: memref<32x1xf32, #tpu.memory_space<vmem>>, %arg17: memref<9x32x1xf32, #tpu.memory_space<vmem>>, %arg18: memref<32x32xf32, #tpu.memory_space<vmem>>, %arg19: memref<32x1xf32, #tpu.memory_space<vmem>>, %arg20: memref<4x32x1xf32, #tpu.memory_space<vmem>>, %arg21: memref<4x32x1xf32, #tpu.memory_space<vmem>>, %arg22: memref<4x32x1xf32, #tpu.memory_space<vmem>>, %arg23: memref<4x1x256xf32, #tpu.memory_space<vmem>>, %arg24: memref<9x1x256xf32, #tpu.memory_space<vmem>>, %arg25: memref<1x32x256xf32, #tpu.memory_space<vmem>>, %arg26: memref<1x32x256xf32, #tpu.memory_space<vmem>>) attributes {dimension_semantics = [#tpu.dimension_semantics<parallel>], iteration_bounds = array<i64: 2>, scalar_prefetch = 0 : i64, scratch_operands = 0 : i64, tpu.core_type = #tpu.core_type<tc>, window_params = [{transform_indices = @transform_0, window_bounds = array<i64: 1, 32, 256>}, {pipeline_mode = #tpu.pipeline_mode<synchronous>, transform_indices = @transform_1, window_bounds = array<i64: 32, 32>}, {pipeline_mode = #tpu.pipeline_mode<synchronous>, transform_indices = @transform_2, window_bounds = array<i64: 32, 1>}, {pipeline_mode = #tpu.pipeline_mode<synchronous>, transform_indices = @transform_3, window_bounds = array<i64: 32, 32>}, {pipeline_mode = #tpu.pipeline_mode<synchronous>, transform_indices = @transform_4, window_bounds = array<i64: 32, 1>}, {pipeline_mode = #tpu.pipeline_mode<synchronous>, transform_indices = @transform_5, window_bounds = array<i64: 32, 32>}, {pipeline_mode = #tpu.pipeline_mode<synchronous>, transform_indices = @transform_6, window_bounds = array<i64: 32, 1>}, {pipeline_mode = #tpu.pipeline_mode<synchronous>, transform_indices = @transform_7, window_bounds = array<i64: 32, 32>}, {pipeline_mode = #tpu.pipeline_mode<synchronous>, transform_indices = @transform_8, window_bounds = array<i64: 32, 1>}, {pipeline_mode = #tpu.pipeline_mode<synchronous>, transform_indices = @transform_9, window_bounds = array<i64: 32, 1>}, {pipeline_mode = #tpu.pipeline_mode<synchronous>, transform_indices = @transform_10, window_bounds = array<i64: 32, 1>}, {pipeline_mode = #tpu.pipeline_mode<synchronous>, transform_indices = @transform_11, window_bounds = array<i64: 32, 1>}, {pipeline_mode = #tpu.pipeline_mode<synchronous>, transform_indices = @transform_12, window_bounds = array<i64: 32, 1>}, {pipeline_mode = #tpu.pipeline_mode<synchronous>, transform_indices = @transform_13, window_bounds = array<i64: 32, 32>}, {pipeline_mode = #tpu.pipeline_mode<synchronous>, transform_indices = @transform_14, window_bounds = array<i64: 32, 32>}, {pipeline_mode = #tpu.pipeline_mode<synchronous>, transform_indices = @transform_15, window_bounds = array<i64: 32, 1>}, {pipeline_mode = #tpu.pipeline_mode<synchronous>, transform_indices = @transform_16, window_bounds = array<i64: 9, 32, 1>}, {pipeline_mode = #tpu.pipeline_mode<synchronous>, transform_indices = @transform_17, window_bounds = array<i64: 32, 32>}, {pipeline_mode = #tpu.pipeline_mode<synchronous>, transform_indices = @transform_18, window_bounds = array<i64: 32, 1>}, {pipeline_mode = #tpu.pipeline_mode<synchronous>, transform_indices = @transform_19, window_bounds = array<i64: 4, 32, 1>}, {pipeline_mode = #tpu.pipeline_mode<synchronous>, transform_indices = @transform_20, window_bounds = array<i64: 4, 32, 1>}, {pipeline_mode = #tpu.pipeline_mode<synchronous>, transform_indices = @transform_21, window_bounds = array<i64: 4, 32, 1>}, {pipeline_mode = #tpu.pipeline_mode<synchronous>, transform_indices = @transform_22, window_bounds = array<i64: 4, 1, 256>}, {pipeline_mode = #tpu.pipeline_mode<synchronous>, transform_indices = @transform_23, window_bounds = array<i64: 9, 1, 256>}, {transform_indices = @transform_24, window_bounds = array<i64: 1, 32, 256>}, {transform_indices = @transform_25, window_bounds = array<i64: 1, 32, 256>}]} {
    %c0 = arith.constant 0 : index
    %c0_0 = arith.constant 0 : index
    %c0_1 = arith.constant 0 : index
    %0 = vector.load %arg1[%c0, %c0_0, %c0_1] : memref<1x32x256xf32, #tpu.memory_space<vmem>>, vector<1x32x256xf32>
    %1 = vector.shape_cast %0 : vector<1x32x256xf32> to vector<32x256xf32>
    %c0_2 = arith.constant 0 : index
    %c0_3 = arith.constant 0 : index
    %c0_4 = arith.constant 0 : index
    %2 = vector.load %arg20[%c0_2, %c0_3, %c0_4] : memref<4x32x1xf32, #tpu.memory_space<vmem>>, vector<1x32x1xf32>
    %3 = vector.shape_cast %2 : vector<1x32x1xf32> to vector<32x1xf32>
    %cst = arith.constant 0.000000e+00 : f32
    %4 = vector.broadcast %cst : f32 to vector<32x1xf32>
    %5 = arith.cmpf one, %3, %4 : vector<32x1xf32>
    %c1 = arith.constant 1 : index
    %c0_5 = arith.constant 0 : index
    %c0_6 = arith.constant 0 : index
    %6 = vector.load %arg20[%c1, %c0_5, %c0_6] : memref<4x32x1xf32, #tpu.memory_space<vmem>>, vector<1x32x1xf32>
    %7 = vector.shape_cast %6 : vector<1x32x1xf32> to vector<32x1xf32>
    %cst_7 = arith.constant 0.000000e+00 : f32
    %8 = vector.broadcast %cst_7 : f32 to vector<32x1xf32>
    %9 = arith.cmpf one, %7, %8 : vector<32x1xf32>
    %c2 = arith.constant 2 : index
    %c0_8 = arith.constant 0 : index
    %c0_9 = arith.constant 0 : index
    %10 = vector.load %arg20[%c2, %c0_8, %c0_9] : memref<4x32x1xf32, #tpu.memory_space<vmem>>, vector<1x32x1xf32>
    %11 = vector.shape_cast %10 : vector<1x32x1xf32> to vector<32x1xf32>
    %cst_10 = arith.constant 0.000000e+00 : f32
    %12 = vector.broadcast %cst_10 : f32 to vector<32x1xf32>
    %13 = arith.cmpf one, %11, %12 : vector<32x1xf32>
    %c3 = arith.constant 3 : index
    %c0_11 = arith.constant 0 : index
    %c0_12 = arith.constant 0 : index
    %14 = vector.load %arg20[%c3, %c0_11, %c0_12] : memref<4x32x1xf32, #tpu.memory_space<vmem>>, vector<1x32x1xf32>
    %15 = vector.shape_cast %14 : vector<1x32x1xf32> to vector<32x1xf32>
    %cst_13 = arith.constant 0.000000e+00 : f32
    %16 = vector.broadcast %cst_13 : f32 to vector<32x1xf32>
    %17 = arith.cmpf one, %15, %16 : vector<32x1xf32>
    %c0_14 = arith.constant 0 : index
    %c0_15 = arith.constant 0 : index
    %c0_16 = arith.constant 0 : index
    %18 = vector.load %arg21[%c0_14, %c0_15, %c0_16] : memref<4x32x1xf32, #tpu.memory_space<vmem>>, vector<1x32x1xf32>
    %19 = vector.shape_cast %18 : vector<1x32x1xf32> to vector<32x1xf32>
    %cst_17 = arith.constant 0.000000e+00 : f32
    %20 = vector.broadcast %cst_17 : f32 to vector<32x1xf32>
    %21 = arith.cmpf one, %19, %20 : vector<32x1xf32>
    %c1_18 = arith.constant 1 : index
    %c0_19 = arith.constant 0 : index
    %c0_20 = arith.constant 0 : index
    %22 = vector.load %arg21[%c1_18, %c0_19, %c0_20] : memref<4x32x1xf32, #tpu.memory_space<vmem>>, vector<1x32x1xf32>
    %23 = vector.shape_cast %22 : vector<1x32x1xf32> to vector<32x1xf32>
    %cst_21 = arith.constant 0.000000e+00 : f32
    %24 = vector.broadcast %cst_21 : f32 to vector<32x1xf32>
    %25 = arith.cmpf one, %23, %24 : vector<32x1xf32>
    %c2_22 = arith.constant 2 : index
    %c0_23 = arith.constant 0 : index
    %c0_24 = arith.constant 0 : index
    %26 = vector.load %arg21[%c2_22, %c0_23, %c0_24] : memref<4x32x1xf32, #tpu.memory_space<vmem>>, vector<1x32x1xf32>
    %27 = vector.shape_cast %26 : vector<1x32x1xf32> to vector<32x1xf32>
    %cst_25 = arith.constant 0.000000e+00 : f32
    %28 = vector.broadcast %cst_25 : f32 to vector<32x1xf32>
    %29 = arith.cmpf one, %27, %28 : vector<32x1xf32>
    %c3_26 = arith.constant 3 : index
    %c0_27 = arith.constant 0 : index
    %c0_28 = arith.constant 0 : index
    %30 = vector.load %arg21[%c3_26, %c0_27, %c0_28] : memref<4x32x1xf32, #tpu.memory_space<vmem>>, vector<1x32x1xf32>
    %31 = vector.shape_cast %30 : vector<1x32x1xf32> to vector<32x1xf32>
    %cst_29 = arith.constant 0.000000e+00 : f32
    %32 = vector.broadcast %cst_29 : f32 to vector<32x1xf32>
    %33 = arith.cmpf one, %31, %32 : vector<32x1xf32>
    %c0_30 = arith.constant 0 : index
    %c0_31 = arith.constant 0 : index
    %c0_32 = arith.constant 0 : index
    %34 = vector.load %arg22[%c0_30, %c0_31, %c0_32] : memref<4x32x1xf32, #tpu.memory_space<vmem>>, vector<1x32x1xf32>
    %35 = vector.shape_cast %34 : vector<1x32x1xf32> to vector<32x1xf32>
    %cst_33 = arith.constant 0.000000e+00 : f32
    %36 = vector.broadcast %cst_33 : f32 to vector<32x1xf32>
    %37 = arith.cmpf one, %35, %36 : vector<32x1xf32>
    %c1_34 = arith.constant 1 : index
    %c0_35 = arith.constant 0 : index
    %c0_36 = arith.constant 0 : index
    %38 = vector.load %arg22[%c1_34, %c0_35, %c0_36] : memref<4x32x1xf32, #tpu.memory_space<vmem>>, vector<1x32x1xf32>
    %39 = vector.shape_cast %38 : vector<1x32x1xf32> to vector<32x1xf32>
    %cst_37 = arith.constant 0.000000e+00 : f32
    %40 = vector.broadcast %cst_37 : f32 to vector<32x1xf32>
    %41 = arith.cmpf one, %39, %40 : vector<32x1xf32>
    %c2_38 = arith.constant 2 : index
    %c0_39 = arith.constant 0 : index
    %c0_40 = arith.constant 0 : index
    %42 = vector.load %arg22[%c2_38, %c0_39, %c0_40] : memref<4x32x1xf32, #tpu.memory_space<vmem>>, vector<1x32x1xf32>
    %43 = vector.shape_cast %42 : vector<1x32x1xf32> to vector<32x1xf32>
    %cst_41 = arith.constant 0.000000e+00 : f32
    %44 = vector.broadcast %cst_41 : f32 to vector<32x1xf32>
    %45 = arith.cmpf one, %43, %44 : vector<32x1xf32>
    %c3_42 = arith.constant 3 : index
    %c0_43 = arith.constant 0 : index
    %c0_44 = arith.constant 0 : index
    %46 = vector.load %arg22[%c3_42, %c0_43, %c0_44] : memref<4x32x1xf32, #tpu.memory_space<vmem>>, vector<1x32x1xf32>
    %47 = vector.shape_cast %46 : vector<1x32x1xf32> to vector<32x1xf32>
    %cst_45 = arith.constant 0.000000e+00 : f32
    %48 = vector.broadcast %cst_45 : f32 to vector<32x1xf32>
    %49 = arith.cmpf one, %47, %48 : vector<32x1xf32>
    %c0_46 = arith.constant 0 : index
    %c0_47 = arith.constant 0 : index
    %c0_48 = arith.constant 0 : index
    %50 = vector.load %arg23[%c0_46, %c0_47, %c0_48] : memref<4x1x256xf32, #tpu.memory_space<vmem>>, vector<1x1x256xf32>
    %51 = vector.shape_cast %50 : vector<1x1x256xf32> to vector<1x256xf32>
    %cst_49 = arith.constant 0.000000e+00 : f32
    %52 = vector.broadcast %cst_49 : f32 to vector<1x256xf32>
    %53 = arith.cmpf one, %51, %52 : vector<1x256xf32>
    %c1_50 = arith.constant 1 : index
    %c0_51 = arith.constant 0 : index
    %c0_52 = arith.constant 0 : index
    %54 = vector.load %arg23[%c1_50, %c0_51, %c0_52] : memref<4x1x256xf32, #tpu.memory_space<vmem>>, vector<1x1x256xf32>
    %55 = vector.shape_cast %54 : vector<1x1x256xf32> to vector<1x256xf32>
    %cst_53 = arith.constant 0.000000e+00 : f32
    %56 = vector.broadcast %cst_53 : f32 to vector<1x256xf32>
    %57 = arith.cmpf one, %55, %56 : vector<1x256xf32>
    %c2_54 = arith.constant 2 : index
    %c0_55 = arith.constant 0 : index
    %c0_56 = arith.constant 0 : index
    %58 = vector.load %arg23[%c2_54, %c0_55, %c0_56] : memref<4x1x256xf32, #tpu.memory_space<vmem>>, vector<1x1x256xf32>
    %59 = vector.shape_cast %58 : vector<1x1x256xf32> to vector<1x256xf32>
    %cst_57 = arith.constant 0.000000e+00 : f32
    %60 = vector.broadcast %cst_57 : f32 to vector<1x256xf32>
    %61 = arith.cmpf one, %59, %60 : vector<1x256xf32>
    %c3_58 = arith.constant 3 : index
    %c0_59 = arith.constant 0 : index
    %c0_60 = arith.constant 0 : index
    %62 = vector.load %arg23[%c3_58, %c0_59, %c0_60] : memref<4x1x256xf32, #tpu.memory_space<vmem>>, vector<1x1x256xf32>
    %63 = vector.shape_cast %62 : vector<1x1x256xf32> to vector<1x256xf32>
    %cst_61 = arith.constant 0.000000e+00 : f32
    %64 = vector.broadcast %cst_61 : f32 to vector<1x256xf32>
    %65 = arith.cmpf one, %63, %64 : vector<1x256xf32>
    %c16_i32 = arith.constant 16 : i32
    %66 = tpu.dynamic_rotate %1 by %c16_i32 dim 1 : vector<32x256xf32>, i32 -> vector<32x256xf32>
    %67 = vector.shape_cast %5 : vector<32x1xi1> to vector<32x1xi1>
    %68 = vector.broadcast %67 : vector<32x1xi1> to vector<32x256xi1>
    %69 = arith.select %68, %66, %1 : vector<32x256xi1>, vector<32x256xf32>
    %c32_i32 = arith.constant 32 : i32
    %70 = tpu.dynamic_rotate %69 by %c32_i32 dim 1 : vector<32x256xf32>, i32 -> vector<32x256xf32>
    %71 = vector.shape_cast %9 : vector<32x1xi1> to vector<32x1xi1>
    %72 = vector.broadcast %71 : vector<32x1xi1> to vector<32x256xi1>
    %73 = arith.select %72, %70, %69 : vector<32x256xi1>, vector<32x256xf32>
    %c64_i32 = arith.constant 64 : i32
    %74 = tpu.dynamic_rotate %73 by %c64_i32 dim 1 : vector<32x256xf32>, i32 -> vector<32x256xf32>
    %75 = vector.shape_cast %13 : vector<32x1xi1> to vector<32x1xi1>
    %76 = vector.broadcast %75 : vector<32x1xi1> to vector<32x256xi1>
    %77 = arith.select %76, %74, %73 : vector<32x256xi1>, vector<32x256xf32>
    %c128_i32 = arith.constant 128 : i32
    %78 = tpu.dynamic_rotate %77 by %c128_i32 dim 1 : vector<32x256xf32>, i32 -> vector<32x256xf32>
    %79 = vector.shape_cast %17 : vector<32x1xi1> to vector<32x1xi1>
    %80 = vector.broadcast %79 : vector<32x1xi1> to vector<32x256xi1>
    %81 = arith.select %80, %78, %77 : vector<32x256xi1>, vector<32x256xf32>
    %c0_62 = arith.constant 0 : index
    %c0_63 = arith.constant 0 : index
    %82 = vector.load %arg2[%c0_62, %c0_63] : memref<32x32xf32, #tpu.memory_space<vmem>>, vector<32x32xf32>
    %cst_64 = arith.constant dense<0.000000e+00> : vector<32x256xf32>
    %83 = tpu.matmul %82, %81, %cst_64 {dimension_numbers = #tpu.dot_dimension_numbers<[1], [0], [0], [1], [0, 0, 1, 1], [], []>, precision = #tpu.contract_precision<fp32>} : vector<32x32xf32>, vector<32x256xf32>, vector<32x256xf32> -> vector<32x256xf32>
    %c0_65 = arith.constant 0 : index
    %c0_66 = arith.constant 0 : index
    %84 = vector.load %arg3[%c0_65, %c0_66] : memref<32x1xf32, #tpu.memory_space<vmem>>, vector<32x1xf32>
    %85 = vector.broadcast %84 : vector<32x1xf32> to vector<32x256xf32>
    %86 = arith.addf %83, %85 : vector<32x256xf32>
    %cst_67 = arith.constant 5.000000e-01 : f32
    %87 = vector.broadcast %cst_67 : f32 to vector<32x256xf32>
    %88 = arith.mulf %87, %86 : vector<32x256xf32>
    %cst_68 = arith.constant 0.707106769 : f32
    %89 = vector.broadcast %cst_68 : f32 to vector<32x256xf32>
    %90 = arith.mulf %86, %89 : vector<32x256xf32>
    %91 = math.erf %90 : vector<32x256xf32>
    %cst_69 = arith.constant 1.000000e+00 : f32
    %92 = vector.broadcast %cst_69 : f32 to vector<32x256xf32>
    %93 = arith.addf %92, %91 : vector<32x256xf32>
    %94 = arith.mulf %88, %93 : vector<32x256xf32>
    %c1_i32 = arith.constant 1 : i32
    %95 = tpu.dynamic_rotate %94 by %c1_i32 dim 1 : vector<32x256xf32>, i32 -> vector<32x256xf32>
    %c241_i32 = arith.constant 241 : i32
    %96 = tpu.dynamic_rotate %94 by %c241_i32 dim 1 : vector<32x256xf32>, i32 -> vector<32x256xf32>
    %97 = vector.shape_cast %53 : vector<1x256xi1> to vector<1x256xi1>
    %98 = vector.broadcast %97 : vector<1x256xi1> to vector<32x256xi1>
    %99 = arith.select %98, %96, %95 : vector<32x256xi1>, vector<32x256xf32>
    %100 = vector.shape_cast %21 : vector<32x1xi1> to vector<32x1xi1>
    %101 = vector.broadcast %100 : vector<32x1xi1> to vector<32x256xi1>
    %102 = arith.select %101, %99, %94 : vector<32x256xi1>, vector<32x256xf32>
    %c2_i32 = arith.constant 2 : i32
    %103 = tpu.dynamic_rotate %102 by %c2_i32 dim 1 : vector<32x256xf32>, i32 -> vector<32x256xf32>
    %c242_i32 = arith.constant 242 : i32
    %104 = tpu.dynamic_rotate %102 by %c242_i32 dim 1 : vector<32x256xf32>, i32 -> vector<32x256xf32>
    %105 = vector.shape_cast %57 : vector<1x256xi1> to vector<1x256xi1>
    %106 = vector.broadcast %105 : vector<1x256xi1> to vector<32x256xi1>
    %107 = arith.select %106, %104, %103 : vector<32x256xi1>, vector<32x256xf32>
    %108 = vector.shape_cast %25 : vector<32x1xi1> to vector<32x1xi1>
    %109 = vector.broadcast %108 : vector<32x1xi1> to vector<32x256xi1>
    %110 = arith.select %109, %107, %102 : vector<32x256xi1>, vector<32x256xf32>
    %c4_i32 = arith.constant 4 : i32
    %111 = tpu.dynamic_rotate %110 by %c4_i32 dim 1 : vector<32x256xf32>, i32 -> vector<32x256xf32>
    %c244_i32 = arith.constant 244 : i32
    %112 = tpu.dynamic_rotate %110 by %c244_i32 dim 1 : vector<32x256xf32>, i32 -> vector<32x256xf32>
    %113 = vector.shape_cast %61 : vector<1x256xi1> to vector<1x256xi1>
    %114 = vector.broadcast %113 : vector<1x256xi1> to vector<32x256xi1>
    %115 = arith.select %114, %112, %111 : vector<32x256xi1>, vector<32x256xf32>
    %116 = vector.shape_cast %29 : vector<32x1xi1> to vector<32x1xi1>
    %117 = vector.broadcast %116 : vector<32x1xi1> to vector<32x256xi1>
    %118 = arith.select %117, %115, %110 : vector<32x256xi1>, vector<32x256xf32>
    %c8_i32 = arith.constant 8 : i32
    %119 = tpu.dynamic_rotate %118 by %c8_i32 dim 1 : vector<32x256xf32>, i32 -> vector<32x256xf32>
    %c248_i32 = arith.constant 248 : i32
    %120 = tpu.dynamic_rotate %118 by %c248_i32 dim 1 : vector<32x256xf32>, i32 -> vector<32x256xf32>
    %121 = vector.shape_cast %65 : vector<1x256xi1> to vector<1x256xi1>
    %122 = vector.broadcast %121 : vector<1x256xi1> to vector<32x256xi1>
    %123 = arith.select %122, %120, %119 : vector<32x256xi1>, vector<32x256xf32>
    %124 = vector.shape_cast %33 : vector<32x1xi1> to vector<32x1xi1>
    %125 = vector.broadcast %124 : vector<32x1xi1> to vector<32x256xi1>
    %126 = arith.select %125, %123, %118 : vector<32x256xi1>, vector<32x256xf32>
    %c0_70 = arith.constant 0 : index
    %c0_71 = arith.constant 0 : index
    %127 = vector.load %arg4[%c0_70, %c0_71] : memref<32x32xf32, #tpu.memory_space<vmem>>, vector<32x32xf32>
    %cst_72 = arith.constant dense<0.000000e+00> : vector<32x256xf32>
    %128 = tpu.matmul %127, %126, %cst_72 {dimension_numbers = #tpu.dot_dimension_numbers<[1], [0], [0], [1], [0, 0, 1, 1], [], []>, precision = #tpu.contract_precision<fp32>} : vector<32x32xf32>, vector<32x256xf32>, vector<32x256xf32> -> vector<32x256xf32>
    %c0_73 = arith.constant 0 : index
    %c0_74 = arith.constant 0 : index
    %129 = vector.load %arg5[%c0_73, %c0_74] : memref<32x1xf32, #tpu.memory_space<vmem>>, vector<32x1xf32>
    %130 = vector.broadcast %129 : vector<32x1xf32> to vector<32x256xf32>
    %131 = arith.addf %128, %130 : vector<32x256xf32>
    %132 = arith.addf %131, %1 : vector<32x256xf32>
    %c1_i32_75 = arith.constant 1 : i32
    %133 = tpu.dynamic_rotate %1 by %c1_i32_75 dim 1 : vector<32x256xf32>, i32 -> vector<32x256xf32>
    %c241_i32_76 = arith.constant 241 : i32
    %134 = tpu.dynamic_rotate %1 by %c241_i32_76 dim 1 : vector<32x256xf32>, i32 -> vector<32x256xf32>
    %135 = vector.shape_cast %53 : vector<1x256xi1> to vector<1x256xi1>
    %136 = vector.broadcast %135 : vector<1x256xi1> to vector<32x256xi1>
    %137 = arith.select %136, %134, %133 : vector<32x256xi1>, vector<32x256xf32>
    %138 = vector.shape_cast %37 : vector<32x1xi1> to vector<32x1xi1>
    %139 = vector.broadcast %138 : vector<32x1xi1> to vector<32x256xi1>
    %140 = arith.select %139, %137, %1 : vector<32x256xi1>, vector<32x256xf32>
    %c2_i32_77 = arith.constant 2 : i32
    %141 = tpu.dynamic_rotate %140 by %c2_i32_77 dim 1 : vector<32x256xf32>, i32 -> vector<32x256xf32>
    %c242_i32_78 = arith.constant 242 : i32
    %142 = tpu.dynamic_rotate %140 by %c242_i32_78 dim 1 : vector<32x256xf32>, i32 -> vector<32x256xf32>
    %143 = vector.shape_cast %57 : vector<1x256xi1> to vector<1x256xi1>
    %144 = vector.broadcast %143 : vector<1x256xi1> to vector<32x256xi1>
    %145 = arith.select %144, %142, %141 : vector<32x256xi1>, vector<32x256xf32>
    %146 = vector.shape_cast %41 : vector<32x1xi1> to vector<32x1xi1>
    %147 = vector.broadcast %146 : vector<32x1xi1> to vector<32x256xi1>
    %148 = arith.select %147, %145, %140 : vector<32x256xi1>, vector<32x256xf32>
    %c4_i32_79 = arith.constant 4 : i32
    %149 = tpu.dynamic_rotate %148 by %c4_i32_79 dim 1 : vector<32x256xf32>, i32 -> vector<32x256xf32>
    %c244_i32_80 = arith.constant 244 : i32
    %150 = tpu.dynamic_rotate %148 by %c244_i32_80 dim 1 : vector<32x256xf32>, i32 -> vector<32x256xf32>
    %151 = vector.shape_cast %61 : vector<1x256xi1> to vector<1x256xi1>
    %152 = vector.broadcast %151 : vector<1x256xi1> to vector<32x256xi1>
    %153 = arith.select %152, %150, %149 : vector<32x256xi1>, vector<32x256xf32>
    %154 = vector.shape_cast %45 : vector<32x1xi1> to vector<32x1xi1>
    %155 = vector.broadcast %154 : vector<32x1xi1> to vector<32x256xi1>
    %156 = arith.select %155, %153, %148 : vector<32x256xi1>, vector<32x256xf32>
    %c8_i32_81 = arith.constant 8 : i32
    %157 = tpu.dynamic_rotate %156 by %c8_i32_81 dim 1 : vector<32x256xf32>, i32 -> vector<32x256xf32>
    %c248_i32_82 = arith.constant 248 : i32
    %158 = tpu.dynamic_rotate %156 by %c248_i32_82 dim 1 : vector<32x256xf32>, i32 -> vector<32x256xf32>
    %159 = vector.shape_cast %65 : vector<1x256xi1> to vector<1x256xi1>
    %160 = vector.broadcast %159 : vector<1x256xi1> to vector<32x256xi1>
    %161 = arith.select %160, %158, %157 : vector<32x256xi1>, vector<32x256xf32>
    %162 = vector.shape_cast %49 : vector<32x1xi1> to vector<32x1xi1>
    %163 = vector.broadcast %162 : vector<32x1xi1> to vector<32x256xi1>
    %164 = arith.select %163, %161, %156 : vector<32x256xi1>, vector<32x256xf32>
    %c0_83 = arith.constant 0 : index
    %c0_84 = arith.constant 0 : index
    %165 = vector.load %arg6[%c0_83, %c0_84] : memref<32x32xf32, #tpu.memory_space<vmem>>, vector<32x32xf32>
    %cst_85 = arith.constant dense<0.000000e+00> : vector<32x256xf32>
    %166 = tpu.matmul %165, %164, %cst_85 {dimension_numbers = #tpu.dot_dimension_numbers<[1], [0], [0], [1], [0, 0, 1, 1], [], []>, precision = #tpu.contract_precision<fp32>} : vector<32x32xf32>, vector<32x256xf32>, vector<32x256xf32> -> vector<32x256xf32>
    %c0_86 = arith.constant 0 : index
    %c0_87 = arith.constant 0 : index
    %167 = vector.load %arg7[%c0_86, %c0_87] : memref<32x1xf32, #tpu.memory_space<vmem>>, vector<32x1xf32>
    %168 = vector.broadcast %167 : vector<32x1xf32> to vector<32x256xf32>
    %169 = arith.addf %166, %168 : vector<32x256xf32>
    %cst_88 = arith.constant 5.000000e-01 : f32
    %170 = vector.broadcast %cst_88 : f32 to vector<32x256xf32>
    %171 = arith.mulf %170, %169 : vector<32x256xf32>
    %cst_89 = arith.constant 0.707106769 : f32
    %172 = vector.broadcast %cst_89 : f32 to vector<32x256xf32>
    %173 = arith.mulf %169, %172 : vector<32x256xf32>
    %174 = math.erf %173 : vector<32x256xf32>
    %cst_90 = arith.constant 1.000000e+00 : f32
    %175 = vector.broadcast %cst_90 : f32 to vector<32x256xf32>
    %176 = arith.addf %175, %174 : vector<32x256xf32>
    %177 = arith.mulf %171, %176 : vector<32x256xf32>
    %c16_i32_91 = arith.constant 16 : i32
    %178 = tpu.dynamic_rotate %177 by %c16_i32_91 dim 1 : vector<32x256xf32>, i32 -> vector<32x256xf32>
    %179 = vector.shape_cast %5 : vector<32x1xi1> to vector<32x1xi1>
    %180 = vector.broadcast %179 : vector<32x1xi1> to vector<32x256xi1>
    %181 = arith.select %180, %178, %177 : vector<32x256xi1>, vector<32x256xf32>
    %c32_i32_92 = arith.constant 32 : i32
    %182 = tpu.dynamic_rotate %181 by %c32_i32_92 dim 1 : vector<32x256xf32>, i32 -> vector<32x256xf32>
    %183 = vector.shape_cast %9 : vector<32x1xi1> to vector<32x1xi1>
    %184 = vector.broadcast %183 : vector<32x1xi1> to vector<32x256xi1>
    %185 = arith.select %184, %182, %181 : vector<32x256xi1>, vector<32x256xf32>
    %c64_i32_93 = arith.constant 64 : i32
    %186 = tpu.dynamic_rotate %185 by %c64_i32_93 dim 1 : vector<32x256xf32>, i32 -> vector<32x256xf32>
    %187 = vector.shape_cast %13 : vector<32x1xi1> to vector<32x1xi1>
    %188 = vector.broadcast %187 : vector<32x1xi1> to vector<32x256xi1>
    %189 = arith.select %188, %186, %185 : vector<32x256xi1>, vector<32x256xf32>
    %c128_i32_94 = arith.constant 128 : i32
    %190 = tpu.dynamic_rotate %189 by %c128_i32_94 dim 1 : vector<32x256xf32>, i32 -> vector<32x256xf32>
    %191 = vector.shape_cast %17 : vector<32x1xi1> to vector<32x1xi1>
    %192 = vector.broadcast %191 : vector<32x1xi1> to vector<32x256xi1>
    %193 = arith.select %192, %190, %189 : vector<32x256xi1>, vector<32x256xf32>
    %c0_95 = arith.constant 0 : index
    %c0_96 = arith.constant 0 : index
    %194 = vector.load %arg8[%c0_95, %c0_96] : memref<32x32xf32, #tpu.memory_space<vmem>>, vector<32x32xf32>
    %cst_97 = arith.constant dense<0.000000e+00> : vector<32x256xf32>
    %195 = tpu.matmul %194, %193, %cst_97 {dimension_numbers = #tpu.dot_dimension_numbers<[1], [0], [0], [1], [0, 0, 1, 1], [], []>, precision = #tpu.contract_precision<fp32>} : vector<32x32xf32>, vector<32x256xf32>, vector<32x256xf32> -> vector<32x256xf32>
    %c0_98 = arith.constant 0 : index
    %c0_99 = arith.constant 0 : index
    %196 = vector.load %arg9[%c0_98, %c0_99] : memref<32x1xf32, #tpu.memory_space<vmem>>, vector<32x1xf32>
    %197 = vector.broadcast %196 : vector<32x1xf32> to vector<32x256xf32>
    %198 = arith.addf %195, %197 : vector<32x256xf32>
    %199 = arith.addf %198, %1 : vector<32x256xf32>
    %cst_100 = arith.constant dense<0.000000e+00> : vector<256xf32>
    %200 = vector.multi_reduction <add>, %132, %cst_100 [0] : vector<32x256xf32> to vector<256xf32>
    %201 = vector.shape_cast %200 : vector<256xf32> to vector<1x256xf32>
    %cst_101 = arith.constant dense<0.000000e+00> : vector<256xf32>
    %202 = vector.multi_reduction <add>, %199, %cst_101 [0] : vector<32x256xf32> to vector<256xf32>
    %203 = vector.shape_cast %202 : vector<256xf32> to vector<1x256xf32>
    %204 = arith.addf %201, %203 : vector<1x256xf32>
    %cst_102 = arith.constant 1.562500e-02 : f32
    %205 = vector.broadcast %cst_102 : f32 to vector<1x256xf32>
    %206 = arith.mulf %204, %205 : vector<1x256xf32>
    %207 = vector.broadcast %206 : vector<1x256xf32> to vector<32x256xf32>
    %208 = arith.subf %132, %207 : vector<32x256xf32>
    %209 = vector.broadcast %206 : vector<1x256xf32> to vector<32x256xf32>
    %210 = arith.subf %199, %209 : vector<32x256xf32>
    %211 = arith.mulf %208, %208 : vector<32x256xf32>
    %cst_103 = arith.constant dense<0.000000e+00> : vector<256xf32>
    %212 = vector.multi_reduction <add>, %211, %cst_103 [0] : vector<32x256xf32> to vector<256xf32>
    %213 = vector.shape_cast %212 : vector<256xf32> to vector<1x256xf32>
    %214 = arith.mulf %210, %210 : vector<32x256xf32>
    %cst_104 = arith.constant dense<0.000000e+00> : vector<256xf32>
    %215 = vector.multi_reduction <add>, %214, %cst_104 [0] : vector<32x256xf32> to vector<256xf32>
    %216 = vector.shape_cast %215 : vector<256xf32> to vector<1x256xf32>
    %217 = arith.addf %213, %216 : vector<1x256xf32>
    %cst_105 = arith.constant 1.562500e-02 : f32
    %218 = vector.broadcast %cst_105 : f32 to vector<1x256xf32>
    %219 = arith.mulf %217, %218 : vector<1x256xf32>
    %cst_106 = arith.constant 9.99999974E-6 : f32
    %220 = vector.broadcast %cst_106 : f32 to vector<1x256xf32>
    %221 = arith.addf %219, %220 : vector<1x256xf32>
    %222 = math.rsqrt %221 : vector<1x256xf32>
    %223 = vector.broadcast %222 : vector<1x256xf32> to vector<32x256xf32>
    %224 = arith.mulf %208, %223 : vector<32x256xf32>
    %c0_107 = arith.constant 0 : index
    %c0_108 = arith.constant 0 : index
    %225 = vector.load %arg10[%c0_107, %c0_108] : memref<32x1xf32, #tpu.memory_space<vmem>>, vector<32x1xf32>
    %226 = vector.broadcast %225 : vector<32x1xf32> to vector<32x256xf32>
    %227 = arith.mulf %224, %226 : vector<32x256xf32>
    %c0_109 = arith.constant 0 : index
    %c0_110 = arith.constant 0 : index
    %228 = vector.load %arg12[%c0_109, %c0_110] : memref<32x1xf32, #tpu.memory_space<vmem>>, vector<32x1xf32>
    %229 = vector.broadcast %228 : vector<32x1xf32> to vector<32x256xf32>
    %230 = arith.addf %227, %229 : vector<32x256xf32>
    %231 = vector.broadcast %222 : vector<1x256xf32> to vector<32x256xf32>
    %232 = arith.mulf %210, %231 : vector<32x256xf32>
    %c0_111 = arith.constant 0 : index
    %c0_112 = arith.constant 0 : index
    %233 = vector.load %arg11[%c0_111, %c0_112] : memref<32x1xf32, #tpu.memory_space<vmem>>, vector<32x1xf32>
    %234 = vector.broadcast %233 : vector<32x1xf32> to vector<32x256xf32>
    %235 = arith.mulf %232, %234 : vector<32x256xf32>
    %c0_113 = arith.constant 0 : index
    %c0_114 = arith.constant 0 : index
    %236 = vector.load %arg13[%c0_113, %c0_114] : memref<32x1xf32, #tpu.memory_space<vmem>>, vector<32x1xf32>
    %237 = vector.broadcast %236 : vector<32x1xf32> to vector<32x256xf32>
    %238 = arith.addf %235, %237 : vector<32x256xf32>
    %c0_115 = arith.constant 0 : index
    %c0_116 = arith.constant 0 : index
    %239 = vector.load %arg14[%c0_115, %c0_116] : memref<32x32xf32, #tpu.memory_space<vmem>>, vector<32x32xf32>
    %cst_117 = arith.constant dense<0.000000e+00> : vector<32x256xf32>
    %240 = tpu.matmul %239, %230, %cst_117 {dimension_numbers = #tpu.dot_dimension_numbers<[1], [0], [0], [1], [0, 0, 1, 1], [], []>, precision = #tpu.contract_precision<fp32>} : vector<32x32xf32>, vector<32x256xf32>, vector<32x256xf32> -> vector<32x256xf32>
    %c0_118 = arith.constant 0 : index
    %c0_119 = arith.constant 0 : index
    %241 = vector.load %arg15[%c0_118, %c0_119] : memref<32x32xf32, #tpu.memory_space<vmem>>, vector<32x32xf32>
    %cst_120 = arith.constant dense<0.000000e+00> : vector<32x256xf32>
    %242 = tpu.matmul %241, %238, %cst_120 {dimension_numbers = #tpu.dot_dimension_numbers<[1], [0], [0], [1], [0, 0, 1, 1], [], []>, precision = #tpu.contract_precision<fp32>} : vector<32x32xf32>, vector<32x256xf32>, vector<32x256xf32> -> vector<32x256xf32>
    %243 = arith.addf %240, %242 : vector<32x256xf32>
    %c0_121 = arith.constant 0 : index
    %c0_122 = arith.constant 0 : index
    %244 = vector.load %arg16[%c0_121, %c0_122] : memref<32x1xf32, #tpu.memory_space<vmem>>, vector<32x1xf32>
    %245 = vector.broadcast %244 : vector<32x1xf32> to vector<32x256xf32>
    %246 = arith.addf %243, %245 : vector<32x256xf32>
    %247 = arith.addf %246, %1 : vector<32x256xf32>
    %c0_123 = arith.constant 0 : index
    %c0_124 = arith.constant 0 : index
    %c0_125 = arith.constant 0 : index
    %248 = vector.load %arg25[%c0_123, %c0_124, %c0_125] : memref<1x32x256xf32, #tpu.memory_space<vmem>>, vector<1x32x256xf32>
    %249 = vector.shape_cast %248 : vector<1x32x256xf32> to vector<32x256xf32>
    %250 = vector.shape_cast %247 : vector<32x256xf32> to vector<1x32x256xf32>
    tpu.vector_store %arg25[%c0_123, %c0_124, %c0_125], %250 {strides = array<i32>} : memref<1x32x256xf32, #tpu.memory_space<vmem>>, vector<1x32x256xf32>,
    %c4 = arith.constant 4 : index
    %c0_126 = arith.constant 0 : index
    %c0_127 = arith.constant 0 : index
    %251 = vector.load %arg17[%c4, %c0_126, %c0_127] : memref<9x32x1xf32, #tpu.memory_space<vmem>>, vector<1x32x1xf32>
    %252 = vector.shape_cast %251 : vector<1x32x1xf32> to vector<32x1xf32>
    %253 = vector.broadcast %252 : vector<32x1xf32> to vector<32x256xf32>
    %254 = arith.mulf %253, %1 : vector<32x256xf32>
    %c17_i32 = arith.constant 17 : i32
    %255 = tpu.dynamic_rotate %1 by %c17_i32 dim 1 : vector<32x256xf32>, i32 -> vector<32x256xf32>
    %c0_128 = arith.constant 0 : index
    %c0_129 = arith.constant 0 : index
    %c0_130 = arith.constant 0 : index
    %256 = vector.load %arg17[%c0_128, %c0_129, %c0_130] : memref<9x32x1xf32, #tpu.memory_space<vmem>>, vector<1x32x1xf32>
    %257 = vector.shape_cast %256 : vector<1x32x1xf32> to vector<32x1xf32>
    %c0_131 = arith.constant 0 : index
    %c0_132 = arith.constant 0 : index
    %c0_133 = arith.constant 0 : index
    %258 = vector.load %arg24[%c0_131, %c0_132, %c0_133] : memref<9x1x256xf32, #tpu.memory_space<vmem>>, vector<1x1x256xf32>
    %259 = vector.shape_cast %258 : vector<1x1x256xf32> to vector<1x256xf32>
    %260 = vector.broadcast %259 : vector<1x256xf32> to vector<32x256xf32>
    %261 = arith.mulf %260, %255 : vector<32x256xf32>
    %262 = vector.broadcast %257 : vector<32x1xf32> to vector<32x256xf32>
    %263 = arith.mulf %262, %261 : vector<32x256xf32>
    %264 = arith.addf %254, %263 : vector<32x256xf32>
    %c16_i32_134 = arith.constant 16 : i32
    %265 = tpu.dynamic_rotate %1 by %c16_i32_134 dim 1 : vector<32x256xf32>, i32 -> vector<32x256xf32>
    %c1_135 = arith.constant 1 : index
    %c0_136 = arith.constant 0 : index
    %c0_137 = arith.constant 0 : index
    %266 = vector.load %arg17[%c1_135, %c0_136, %c0_137] : memref<9x32x1xf32, #tpu.memory_space<vmem>>, vector<1x32x1xf32>
    %267 = vector.shape_cast %266 : vector<1x32x1xf32> to vector<32x1xf32>
    %c1_138 = arith.constant 1 : index
    %c0_139 = arith.constant 0 : index
    %c0_140 = arith.constant 0 : index
    %268 = vector.load %arg24[%c1_138, %c0_139, %c0_140] : memref<9x1x256xf32, #tpu.memory_space<vmem>>, vector<1x1x256xf32>
    %269 = vector.shape_cast %268 : vector<1x1x256xf32> to vector<1x256xf32>
    %270 = vector.broadcast %269 : vector<1x256xf32> to vector<32x256xf32>
    %271 = arith.mulf %270, %265 : vector<32x256xf32>
    %272 = vector.broadcast %267 : vector<32x1xf32> to vector<32x256xf32>
    %273 = arith.mulf %272, %271 : vector<32x256xf32>
    %274 = arith.addf %264, %273 : vector<32x256xf32>
    %c15_i32 = arith.constant 15 : i32
    %275 = tpu.dynamic_rotate %1 by %c15_i32 dim 1 : vector<32x256xf32>, i32 -> vector<32x256xf32>
    %c2_141 = arith.constant 2 : index
    %c0_142 = arith.constant 0 : index
    %c0_143 = arith.constant 0 : index
    %276 = vector.load %arg17[%c2_141, %c0_142, %c0_143] : memref<9x32x1xf32, #tpu.memory_space<vmem>>, vector<1x32x1xf32>
    %277 = vector.shape_cast %276 : vector<1x32x1xf32> to vector<32x1xf32>
    %c2_144 = arith.constant 2 : index
    %c0_145 = arith.constant 0 : index
    %c0_146 = arith.constant 0 : index
    %278 = vector.load %arg24[%c2_144, %c0_145, %c0_146] : memref<9x1x256xf32, #tpu.memory_space<vmem>>, vector<1x1x256xf32>
    %279 = vector.shape_cast %278 : vector<1x1x256xf32> to vector<1x256xf32>
    %280 = vector.broadcast %279 : vector<1x256xf32> to vector<32x256xf32>
    %281 = arith.mulf %280, %275 : vector<32x256xf32>
    %282 = vector.broadcast %277 : vector<32x1xf32> to vector<32x256xf32>
    %283 = arith.mulf %282, %281 : vector<32x256xf32>
    %284 = arith.addf %274, %283 : vector<32x256xf32>
    %c1_i32_147 = arith.constant 1 : i32
    %285 = tpu.dynamic_rotate %1 by %c1_i32_147 dim 1 : vector<32x256xf32>, i32 -> vector<32x256xf32>
    %c3_148 = arith.constant 3 : index
    %c0_149 = arith.constant 0 : index
    %c0_150 = arith.constant 0 : index
    %286 = vector.load %arg17[%c3_148, %c0_149, %c0_150] : memref<9x32x1xf32, #tpu.memory_space<vmem>>, vector<1x32x1xf32>
    %287 = vector.shape_cast %286 : vector<1x32x1xf32> to vector<32x1xf32>
    %c3_151 = arith.constant 3 : index
    %c0_152 = arith.constant 0 : index
    %c0_153 = arith.constant 0 : index
    %288 = vector.load %arg24[%c3_151, %c0_152, %c0_153] : memref<9x1x256xf32, #tpu.memory_space<vmem>>, vector<1x1x256xf32>
    %289 = vector.shape_cast %288 : vector<1x1x256xf32> to vector<1x256xf32>
    %290 = vector.broadcast %289 : vector<1x256xf32> to vector<32x256xf32>
    %291 = arith.mulf %290, %285 : vector<32x256xf32>
    %292 = vector.broadcast %287 : vector<32x1xf32> to vector<32x256xf32>
    %293 = arith.mulf %292, %291 : vector<32x256xf32>
    %294 = arith.addf %284, %293 : vector<32x256xf32>
    %c255_i32 = arith.constant 255 : i32
    %295 = tpu.dynamic_rotate %1 by %c255_i32 dim 1 : vector<32x256xf32>, i32 -> vector<32x256xf32>
    %c5 = arith.constant 5 : index
    %c0_154 = arith.constant 0 : index
    %c0_155 = arith.constant 0 : index
    %296 = vector.load %arg17[%c5, %c0_154, %c0_155] : memref<9x32x1xf32, #tpu.memory_space<vmem>>, vector<1x32x1xf32>
    %297 = vector.shape_cast %296 : vector<1x32x1xf32> to vector<32x1xf32>
    %c5_156 = arith.constant 5 : index
    %c0_157 = arith.constant 0 : index
    %c0_158 = arith.constant 0 : index
    %298 = vector.load %arg24[%c5_156, %c0_157, %c0_158] : memref<9x1x256xf32, #tpu.memory_space<vmem>>, vector<1x1x256xf32>
    %299 = vector.shape_cast %298 : vector<1x1x256xf32> to vector<1x256xf32>
    %300 = vector.broadcast %299 : vector<1x256xf32> to vector<32x256xf32>
    %301 = arith.mulf %300, %295 : vector<32x256xf32>
    %302 = vector.broadcast %297 : vector<32x1xf32> to vector<32x256xf32>
    %303 = arith.mulf %302, %301 : vector<32x256xf32>
    %304 = arith.addf %294, %303 : vector<32x256xf32>
    %c241_i32_159 = arith.constant 241 : i32
    %305 = tpu.dynamic_rotate %1 by %c241_i32_159 dim 1 : vector<32x256xf32>, i32 -> vector<32x256xf32>
    %c6 = arith.constant 6 : index
    %c0_160 = arith.constant 0 : index
    %c0_161 = arith.constant 0 : index
    %306 = vector.load %arg17[%c6, %c0_160, %c0_161] : memref<9x32x1xf32, #tpu.memory_space<vmem>>, vector<1x32x1xf32>
    %307 = vector.shape_cast %306 : vector<1x32x1xf32> to vector<32x1xf32>
    %c6_162 = arith.constant 6 : index
    %c0_163 = arith.constant 0 : index
    %c0_164 = arith.constant 0 : index
    %308 = vector.load %arg24[%c6_162, %c0_163, %c0_164] : memref<9x1x256xf32, #tpu.memory_space<vmem>>, vector<1x1x256xf32>
    %309 = vector.shape_cast %308 : vector<1x1x256xf32> to vector<1x256xf32>
    %310 = vector.broadcast %309 : vector<1x256xf32> to vector<32x256xf32>
    %311 = arith.mulf %310, %305 : vector<32x256xf32>
    %312 = vector.broadcast %307 : vector<32x1xf32> to vector<32x256xf32>
    %313 = arith.mulf %312, %311 : vector<32x256xf32>
    %314 = arith.addf %304, %313 : vector<32x256xf32>
    %c240_i32 = arith.constant 240 : i32
    %315 = tpu.dynamic_rotate %1 by %c240_i32 dim 1 : vector<32x256xf32>, i32 -> vector<32x256xf32>
    %c7 = arith.constant 7 : index
    %c0_165 = arith.constant 0 : index
    %c0_166 = arith.constant 0 : index
    %316 = vector.load %arg17[%c7, %c0_165, %c0_166] : memref<9x32x1xf32, #tpu.memory_space<vmem>>, vector<1x32x1xf32>
    %317 = vector.shape_cast %316 : vector<1x32x1xf32> to vector<32x1xf32>
    %c7_167 = arith.constant 7 : index
    %c0_168 = arith.constant 0 : index
    %c0_169 = arith.constant 0 : index
    %318 = vector.load %arg24[%c7_167, %c0_168, %c0_169] : memref<9x1x256xf32, #tpu.memory_space<vmem>>, vector<1x1x256xf32>
    %319 = vector.shape_cast %318 : vector<1x1x256xf32> to vector<1x256xf32>
    %320 = vector.broadcast %319 : vector<1x256xf32> to vector<32x256xf32>
    %321 = arith.mulf %320, %315 : vector<32x256xf32>
    %322 = vector.broadcast %317 : vector<32x1xf32> to vector<32x256xf32>
    %323 = arith.mulf %322, %321 : vector<32x256xf32>
    %324 = arith.addf %314, %323 : vector<32x256xf32>
    %c239_i32 = arith.constant 239 : i32
    %325 = tpu.dynamic_rotate %1 by %c239_i32 dim 1 : vector<32x256xf32>, i32 -> vector<32x256xf32>
    %c8 = arith.constant 8 : index
    %c0_170 = arith.constant 0 : index
    %c0_171 = arith.constant 0 : index
    %326 = vector.load %arg17[%c8, %c0_170, %c0_171] : memref<9x32x1xf32, #tpu.memory_space<vmem>>, vector<1x32x1xf32>
    %327 = vector.shape_cast %326 : vector<1x32x1xf32> to vector<32x1xf32>
    %c8_172 = arith.constant 8 : index
    %c0_173 = arith.constant 0 : index
    %c0_174 = arith.constant 0 : index
    %328 = vector.load %arg24[%c8_172, %c0_173, %c0_174] : memref<9x1x256xf32, #tpu.memory_space<vmem>>, vector<1x1x256xf32>
    %329 = vector.shape_cast %328 : vector<1x1x256xf32> to vector<1x256xf32>
    %330 = vector.broadcast %329 : vector<1x256xf32> to vector<32x256xf32>
    %331 = arith.mulf %330, %325 : vector<32x256xf32>
    %332 = vector.broadcast %327 : vector<32x1xf32> to vector<32x256xf32>
    %333 = arith.mulf %332, %331 : vector<32x256xf32>
    %334 = arith.addf %324, %333 : vector<32x256xf32>
    %c0_175 = arith.constant 0 : index
    %c0_176 = arith.constant 0 : index
    %335 = vector.load %arg18[%c0_175, %c0_176] : memref<32x32xf32, #tpu.memory_space<vmem>>, vector<32x32xf32>
    %cst_177 = arith.constant dense<0.000000e+00> : vector<32x256xf32>
    %336 = tpu.matmul %335, %334, %cst_177 {dimension_numbers = #tpu.dot_dimension_numbers<[1], [0], [0], [1], [0, 0, 1, 1], [], []>, precision = #tpu.contract_precision<fp32>} : vector<32x32xf32>, vector<32x256xf32>, vector<32x256xf32> -> vector<32x256xf32>
    %c0_178 = arith.constant 0 : index
    %c0_179 = arith.constant 0 : index
    %337 = vector.load %arg19[%c0_178, %c0_179] : memref<32x1xf32, #tpu.memory_space<vmem>>, vector<32x1xf32>
    %338 = vector.broadcast %337 : vector<32x1xf32> to vector<32x256xf32>
    %339 = arith.addf %336, %338 : vector<32x256xf32>
    %cst_180 = arith.constant 0.000000e+00 : f32
    %340 = vector.broadcast %cst_180 : f32 to vector<32x256xf32>
    %341 = arith.maximumf %339, %340 : vector<32x256xf32>
    %c0_181 = arith.constant 0 : index
    %c0_182 = arith.constant 0 : index
    %c0_183 = arith.constant 0 : index
    %342 = vector.load %arg26[%c0_181, %c0_182, %c0_183] : memref<1x32x256xf32, #tpu.memory_space<vmem>>, vector<1x32x256xf32>
    %343 = vector.shape_cast %342 : vector<1x32x256xf32> to vector<32x256xf32>
    %344 = vector.shape_cast %341 : vector<32x256xf32> to vector<1x32x256xf32>
    tpu.vector_store %arg26[%c0_181, %c0_182, %c0_183], %344 {strides = array<i32>} : memref<1x32x256xf32, #tpu.memory_space<vmem>>, vector<1x32x256xf32>,
    return
  }
  func.func @transform_0(%arg0: i32) -> (i32, i32, i32) {
    %c0_i32 = arith.constant 0 : i32
    %c0_i32_0 = arith.constant 0 : i32
    %c0_i32_1 = arith.constant 0 : i32
    return %arg0, %c0_i32, %c0_i32_0 : i32, i32, i32
  }
  func.func @transform_1(%arg0: i32) -> (i32, i32) {
    %c0_i32 = arith.constant 0 : i32
    %c0_i32_0 = arith.constant 0 : i32
    %c0_i32_1 = arith.constant 0 : i32
    return %c0_i32, %c0_i32_0 : i32, i32
  }
  func.func @transform_2(%arg0: i32) -> (i32, i32) {
    %c0_i32 = arith.constant 0 : i32
    %c0_i32_0 = arith.constant 0 : i32
    %c0_i32_1 = arith.constant 0 : i32
    return %c0_i32, %c0_i32_0 : i32, i32
  }
  func.func @transform_3(%arg0: i32) -> (i32, i32) {
    %c0_i32 = arith.constant 0 : i32
    %c0_i32_0 = arith.constant 0 : i32
    %c0_i32_1 = arith.constant 0 : i32
    return %c0_i32, %c0_i32_0 : i32, i32
  }
  func.func @transform_4(%arg0: i32) -> (i32, i32) {
    %c0_i32 = arith.constant 0 : i32
    %c0_i32_0 = arith.constant 0 : i32
    %c0_i32_1 = arith.constant 0 : i32
    return %c0_i32, %c0_i32_0 : i32, i32
  }
  func.func @transform_5(%arg0: i32) -> (i32, i32) {
    %c0_i32 = arith.constant 0 : i32
    %c0_i32_0 = arith.constant 0 : i32
    %c0_i32_1 = arith.constant 0 : i32
    return %c0_i32, %c0_i32_0 : i32, i32
  }
  func.func @transform_6(%arg0: i32) -> (i32, i32) {
    %c0_i32 = arith.constant 0 : i32
    %c0_i32_0 = arith.constant 0 : i32
    %c0_i32_1 = arith.constant 0 : i32
    return %c0_i32, %c0_i32_0 : i32, i32
  }
  func.func @transform_7(%arg0: i32) -> (i32, i32) {
    %c0_i32 = arith.constant 0 : i32
    %c0_i32_0 = arith.constant 0 : i32
    %c0_i32_1 = arith.constant 0 : i32
    return %c0_i32, %c0_i32_0 : i32, i32
  }
  func.func @transform_8(%arg0: i32) -> (i32, i32) {
    %c0_i32 = arith.constant 0 : i32
    %c0_i32_0 = arith.constant 0 : i32
    %c0_i32_1 = arith.constant 0 : i32
    return %c0_i32, %c0_i32_0 : i32, i32
  }
  func.func @transform_9(%arg0: i32) -> (i32, i32) {
    %c0_i32 = arith.constant 0 : i32
    %c0_i32_0 = arith.constant 0 : i32
    %c0_i32_1 = arith.constant 0 : i32
    return %c0_i32, %c0_i32_0 : i32, i32
  }
  func.func @transform_10(%arg0: i32) -> (i32, i32) {
    %c0_i32 = arith.constant 0 : i32
    %c0_i32_0 = arith.constant 0 : i32
    %c0_i32_1 = arith.constant 0 : i32
    return %c0_i32, %c0_i32_0 : i32, i32
  }
  func.func @transform_11(%arg0: i32) -> (i32, i32) {
    %c0_i32 = arith.constant 0 : i32
    %c0_i32_0 = arith.constant 0 : i32
    %c0_i32_1 = arith.constant 0 : i32
    return %c0_i32, %c0_i32_0 : i32, i32
  }
  func.func @transform_12(%arg0: i32) -> (i32, i32) {
    %c0_i32 = arith.constant 0 : i32
    %c0_i32_0 = arith.constant 0 : i32
    %c0_i32_1 = arith.constant 0 : i32
    return %c0_i32, %c0_i32_0 : i32, i32
  }
  func.func @transform_13(%arg0: i32) -> (i32, i32) {
    %c0_i32 = arith.constant 0 : i32
    %c0_i32_0 = arith.constant 0 : i32
    %c0_i32_1 = arith.constant 0 : i32
    return %c0_i32, %c0_i32_0 : i32, i32
  }
  func.func @transform_14(%arg0: i32) -> (i32, i32) {
    %c0_i32 = arith.constant 0 : i32
    %c0_i32_0 = arith.constant 0 : i32
    %c0_i32_1 = arith.constant 0 : i32
    return %c0_i32, %c0_i32_0 : i32, i32
  }
  func.func @transform_15(%arg0: i32) -> (i32, i32) {
    %c0_i32 = arith.constant 0 : i32
    %c0_i32_0 = arith.constant 0 : i32
    %c0_i32_1 = arith.constant 0 : i32
    return %c0_i32, %c0_i32_0 : i32, i32
  }
  func.func @transform_16(%arg0: i32) -> (i32, i32, i32) {
    %c0_i32 = arith.constant 0 : i32
    %c0_i32_0 = arith.constant 0 : i32
    %c0_i32_1 = arith.constant 0 : i32
    %c0_i32_2 = arith.constant 0 : i32
    return %c0_i32, %c0_i32_0, %c0_i32_1 : i32, i32, i32
  }
  func.func @transform_17(%arg0: i32) -> (i32, i32) {
    %c0_i32 = arith.constant 0 : i32
    %c0_i32_0 = arith.constant 0 : i32
    %c0_i32_1 = arith.constant 0 : i32
    return %c0_i32, %c0_i32_0 : i32, i32
  }
  func.func @transform_18(%arg0: i32) -> (i32, i32) {
    %c0_i32 = arith.constant 0 : i32
    %c0_i32_0 = arith.constant 0 : i32
    %c0_i32_1 = arith.constant 0 : i32
    return %c0_i32, %c0_i32_0 : i32, i32
  }
  func.func @transform_19(%arg0: i32) -> (i32, i32, i32) {
    %c0_i32 = arith.constant 0 : i32
    %c0_i32_0 = arith.constant 0 : i32
    %c0_i32_1 = arith.constant 0 : i32
    %c0_i32_2 = arith.constant 0 : i32
    return %c0_i32, %c0_i32_0, %c0_i32_1 : i32, i32, i32
  }
  func.func @transform_20(%arg0: i32) -> (i32, i32, i32) {
    %c0_i32 = arith.constant 0 : i32
    %c0_i32_0 = arith.constant 0 : i32
    %c0_i32_1 = arith.constant 0 : i32
    %c0_i32_2 = arith.constant 0 : i32
    return %c0_i32, %c0_i32_0, %c0_i32_1 : i32, i32, i32
  }
  func.func @transform_21(%arg0: i32) -> (i32, i32, i32) {
    %c0_i32 = arith.constant 0 : i32
    %c0_i32_0 = arith.constant 0 : i32
    %c0_i32_1 = arith.constant 0 : i32
    %c0_i32_2 = arith.constant 0 : i32
    return %c0_i32, %c0_i32_0, %c0_i32_1 : i32, i32, i32
  }
  func.func @transform_22(%arg0: i32) -> (i32, i32, i32) {
    %c0_i32 = arith.constant 0 : i32
    %c0_i32_0 = arith.constant 0 : i32
    %c0_i32_1 = arith.constant 0 : i32
    %c0_i32_2 = arith.constant 0 : i32
    return %c0_i32, %c0_i32_0, %c0_i32_1 : i32, i32, i32
  }
  func.func @transform_23(%arg0: i32) -> (i32, i32, i32) {
    %c0_i32 = arith.constant 0 : i32
    %c0_i32_0 = arith.constant 0 : i32
    %c0_i32_1 = arith.constant 0 : i32
    %c0_i32_2 = arith.constant 0 : i32
    return %c0_i32, %c0_i32_0, %c0_i32_1 : i32, i32, i32
  }
  func.func @transform_24(%arg0: i32) -> (i32, i32, i32) {
    %c0_i32 = arith.constant 0 : i32
    %c0_i32_0 = arith.constant 0 : i32
    %c0_i32_1 = arith.constant 0 : i32
    return %arg0, %c0_i32, %c0_i32_0 : i32, i32, i32
  }
  func.func @transform_25(%arg0: i32) -> (i32, i32, i32) {
    %c0_i32 = arith.constant 0 : i32
    %c0_i32_0 = arith.constant 0 : i32
    %c0_i32_1 = arith.constant 0 : i32
    return %arg0, %c0_i32, %c0_i32_0 : i32, i32, i32
  }
}

</mosaic_0001>

<bundles_post_ra>
// kernel: lo2_block_forward.3
= control target key start
LH: loop header
LB: loop body
LE: loop exit
PB: predicated region body
PF: predicated region fallthrough
CT: control target
= control target key end

     0   :  { %12 = vsyncpa [#allocation3], 0  ;;  %s2315_s0 = inlined_call_operand.vmem [shape: f32[2,32,256], index: 0, kind: input, shape index: {}]   ;;  %s2316_s1 = inlined_call_operand.vmem [shape: f32[2,32,256], index: 1, kind: input, shape index: {}]   ;;  %s2317_s2 = inlined_call_operand.vmem [shape: f32[32,1], index: 2, kind: input, shape index: {}]   ;;  %s2318_s3 = inlined_call_operand.vmem [shape: f32[32,1], index: 3, kind: input, shape index: {}]   ;;  %s2319_s4 = inlined_call_operand.vmem [shape: f32[32,32], index: 4, kind: input, shape index: {}]   ;;  %s2320_s5 = inlined_call_operand.vmem [shape: f32[32,32], index: 5, kind: input, shape index: {}]   ;;  %s2321_s6 = inlined_call_operand.vmem [shape: f32[32,1], index: 6, kind: input, shape index: {}]   ;;  %s2322_s7 = inlined_call_operand.hbm [shape: f32[2,32,256], index: 7, kind: output, shape index: {}]  }
   0x1   :  { %14 = vsyncpa [#allocation3 + $0x1], 0  ;;  %s1821_s24 = smov 0   ;;  %s1823_s25 = smov 0  }
   0x2   :  { %s1825_s26 = smov 0   ;;  %s1827_s27 = smov 0  }
   0x3 LB: > { %s1842_s28 = sadd.s32 4294967295, %s1776_s27   ;;  %s1652_s29 = sadd.s32 4294967294, %s1776_s27   ;;  %s1776_s27 = sphi %s1827_s27, %s2328_s27   ;;  %s1772_s26 = sphi %s1825_s26, %s2327_s26   ;;  %s1768_s25 = sphi %s1823_s25, %s2326_s25   ;;  %s1764_s24 = sphi %s1821_s24, %s2325_s24  }
   0x4   : > { %s1846_s30 = sadd.s32 1, %s1776_s27   ;;  %s184_s8 = sadd.s32 1, %s1772_s26 }
   0x5   : > { %s181_s9 = ssub.s32 %s1776_s27, %s1846_s30  ;;  %p194_p0 = scmp.ne.s32.totalorder %s1772_s26, %s1768_s25 }
   0x6   : > { %p182_p1 = scmp.eq.s32.totalorder %s181_s9, 0  ;;  %p195_p2 = scmp.eq.s32.totalorder %s1842_s28, 1 }
   0x7   : > { %p200_p3 = scmp.ne.s32.totalorder %s1768_s25, %s1764_s24  ;;  %p201_p4 = scmp.eq.s32.totalorder %s1652_s29, 1 }
   0x8   : > { %s1857_s10 = scalar_select %p182_p1, %s1772_s26, %s184_s8  }
   0x9   : > { %p1859_p5 = por %p195_p2, %p194_p0  ;;  %p1863_p6 = por %p201_p4, %p200_p3 }
   0xa   : > { %p1655_p7 = scmp.ge.s32.totalorder %s1776_s27, 1  ;;  %p250_p8 = scmp.lt.s32.totalorder %s1776_s27, 3 }
   0xc   : > { %p251_p9 = pnand %p1655_p7, %p250_p8 }
   0xd   : > { %p287_p10 = scmp.lt.s32.totalorder (!%p251_p9), %s1842_s28, 1  ;;  %s284_s19 = sand.u32 (!%p251_p9), 1, %s1768_s25  }
   0xe   : > { %254 = sbr.rel (%p251_p9) target bundleno = 494 (0x1ee), region = 48  ;;  %s1656_s20 = sshll.u32 (!%p251_p9), %s284_s19, 6 }
   0xf   : > { %s2266_s21 = scalar_lea.vmem (!%p251_p9), [#allocation2], %s1656_s20  ;;  %s1668_s22 = sshll.u32 (!%p251_p9), %s1842_s28, 6 }
  0x10   : > { %s1734_s18 = scalar_lea.hbm (!%p251_p9), %s2322_s7, 128 }
  0x13   : > { %v348_v0 = vld [vmem:[%s2318_s3 + $0x18] sm:$0xff]  ;;  %v1778_v2 = vmov 0   ;;  %v347_v3 = vld [vmem:[%s2318_s3 + $0x10] sm:$0xff]  ;;  %v314_v5 = vld [vmem:[%s2317_s2 + $0x8] sm:$0xff]  ;;  %s1907_s23 = scalar_select %p287_p10, %s1842_s28, 1  ;;  %vm385_vm0 = vcmask 261120  }
  0x14   : > { %v316_v1 = vld [vmem:[%s2317_s2 + $0x18] sm:$0xff]  ;;  %1712 = vset.pattern.permute.xlu1 %v1778_v2  ;;  %1711 = vset.pattern.permute.xlu0 %v1778_v2  ;;  %v315_v4 = vld [vmem:[%s2317_s2 + $0x10] sm:$0xff]  ;;  %v313_v6 = vld [vmem:[%s2317_s2] sm:$0xff]  ;;  %s1563_s28 = scalar_lea.sflag [#allocation3], %s284_s19 }
  0x15   : > { %366 = vperm.xlu1 %1712, %v348_v0   ;;  %334 = vperm.xlu0 %1711, %v316_v1   ;;  %v346_v7 = vld [vmem:[%s2318_s3 + $0x8] sm:$0xff]  ;;  %v345_v8 = vld [vmem:[%s2318_s3] sm:$0xff]  ;;  %v1524_v11 = vld [vmem:[%s2321_s6 + $0x10] sm:$0xff]  ;;  %s1666_s29 = sshll.u32 %s1907_s23, 6  ;;  %s1574_s23 = scalar_lea.hbm %s2322_s7, %s1668_s22 }
  0x16   : > { %1713 = vset.pattern.permute.xlu2 %v1778_v2  ;;  %v1522_v9 = vld [vmem:[%s2321_s6] sm:$0xff]  ;;  %v1523_v10 = vld [vmem:[%s2321_s6 + $0x8] sm:$0xff]  ;;  %v1525_v12 = vld [vmem:[%s2321_s6 + $0x18] sm:$0xff]  ;;  %s1915_s13 = scalar_lea.vmem %s2316_s1, %s1666_s29  ;;  %s2086_s9 = scalar_lea.vmem %s2315_s0, %s1666_s29 }
  0x17   : > { %361 = vperm.xlu2 %1713, %v347_v3   ;;  %v311_v13 = vld [vmem:[%s1915_s13 + $0x30] sm:$0xff]  ;;  %v312_v14 = vld [vmem:[%s1915_s13 + $0x38] sm:$0xff]  ;;  %v381_v15 = vld [vmem:[%s2320_s5] sm:$0xff]  ;;  %s1575_s29 = sshll.u32 %s2266_s21, 4  ;;  %s1576_s29 = int_to_ptr.vmem [resolvable:$true] %s1575_s29 }
  0x18   : > { %v387_v20 = vsel %vm385_vm0, %v381_v15, 0  ;;  %v309_v27 = vld [vmem:[%s1915_s13 + $0x20] sm:$0xff]  ;;  %v310_v28 = vld [vmem:[%s1915_s13 + $0x28] sm:$0xff]  ;;  %v307_v42 = vld [vmem:[%s1915_s13 + $0x10] sm:$0xff] }
  0x19   : > { %v1923_v24 = vand.u32 4294901760, %v387_v20  ;;  %v382_v33 = vld [vmem:[%s2320_s5 + $0x8] sm:$0xff]  ;;  %v305_v36 = vld [vmem:[%s1915_s13] sm:$0xff]  ;;  %v308_v45 = vld [vmem:[%s1915_s13 + $0x18] sm:$0xff] }
  0x1a   : > { %v306_v37 = vld [vmem:[%s1915_s13 + $0x8] sm:$0xff]  ;;  %v390_v43 = vsel %vm385_vm0, %v382_v33, 0  ;;  %v383_v2 = vld [vmem:[%s2320_s5 + $0x10] sm:$0xff]  ;;  %s1577_s13 = sshll.u32 %s1574_s23, 4  ;;  %s1578_s13 = int_to_ptr.hbm [resolvable:$true] %s1577_s13 }
  0x1b   : > { %v1937_v32 = vsub.f32 %v387_v20, %v1923_v24  ;;  %v1963_v55 = vand.u32 4294901760, %v390_v43  ;;  %s1728_s14 = sshra.s32 %s1578_s13, 4  ;;  %s1729_s14 = int_to_ptr.hbm [resolvable:$true] %s1728_s14 }
  0x1c   : > { %s1730_s15 = scalar_lea.hbm %s1729_s14, 64  ;;  %p1735_p0 = scmp.lt.s32.totalorder %s1729_s14, %s2322_s7 }
  0x1d   : > { %329 = vperm.xlu0 %1711, %v315_v4   ;;  %324 = vperm.xlu1 %1712, %v314_v5   ;;  %v1956_v47 = vand.u32 4294901760, %v1937_v32  ;;  %p1731_p11 = scmp.ne.s32.totalorder %s1729_s14, %s1730_s15  ;;  %p1736_p1 = scmp.lt.s32.totalorder %s1734_s18, %s1730_s15 }
  0x1f   : > { %319 = vperm.xlu2 %1713, %v313_v6   ;;  %v421_v61 = vsub.f32 %v1937_v32, %v1956_v47  ;;  %v1981_v6 = vsub.f32 %v390_v43, %v1963_v55  ;;  %p1732_p12 = pnand %p1731_p11, %p1859_p5  ;;  %p1737_p2 = por %p1736_p1, %p1735_p0 }
  0x21   : > { %p1733_p13 = pneg %p1732_p12 }
  0x23   : > { %p1738_p3 = pnand %p1737_p2, %p1733_p13 }
  0x25   : > { %356 = vperm.xlu0 %1711, %v346_v7   ;;  %351 = vperm.xlu1 %1712, %v345_v8  }
  0x27   : > { %1528 = vperm.xlu2 %1713, %v1522_v9  }
  0x2d   : > { %1533 = vperm.xlu0 %1711, %v1523_v10   ;;  %1538 = vperm.xlu1 %1712, %v1524_v11  }
  0x2f   : > { %1543 = vperm.xlu2 %1713, %v1525_v12   ;;  %v1991_v12 = vand.u32 4294901760, %v421_v61 }
  0x71   : > { %v362_v21 = vpop.permute.xlu2 %361 }
  0x79   : > { %v320_v44 = vpop.permute.xlu2 %319 }
  0x7a   : > { %v337_v48 = vmul.f32 %v320_v44, %v305_v36  ;;  %v338_v49 = vmul.f32 %v320_v44, %v306_v37  ;;  %v384_v37 = vld [vmem:[%s2320_s5 + $0x18] sm:$0xff] }
  0x7b   : > { %v396_v43 = vsel %vm385_vm0, %v384_v37, 0 }
  0x87   : > { %v367_v16 = vpop.permute.xlu1 %366  ;;  %v335_v17 = vpop.permute.xlu0 %334 }
  0x88   : > { %v343_v18 = vmul.f32 %v335_v17, %v311_v13  ;;  %v344_v19 = vmul.f32 %v335_v17, %v312_v14  ;;  %v393_v14 = vsel %vm385_vm0, %v383_v2, 0 }
  0x8a   : > { %v375_v22 = vadd.f32 %v367_v16, %v343_v18  ;;  %v376_v23 = vadd.f32 %v367_v16, %v344_v19 }
  0x8c   : > { %v1925_v25 = vand.u32 4294901760, %v375_v22  ;;  %v1927_v26 = vand.u32 4294901760, %v376_v23 }
  0x8e   : > { %411 = vmatpush.msra.mxu0 %v1925_v25  ;;  %562 = vmatpush.msra.mxu3 %v1925_v25  ;;  %v1934_v29 = vsub.f32 %v375_v22, %v1925_v25  ;;  %v1946_v38 = vsub.f32 %v376_v23, %v1927_v26 }
  0x8f   : > { %v330_v30 = vpop.permute.xlu0 %329  ;;  %v325_v31 = vpop.permute.xlu1 %324 }
  0x90   : > { %v341_v34 = vmul.f32 %v330_v30, %v309_v27  ;;  %v342_v35 = vmul.f32 %v330_v30, %v310_v28  ;;  %518 = vmatpush.msra.mxu2 %v1934_v29  ;;  %v465_v39 = vand.u32 4294901760, %v1934_v29  ;;  %v339_v52 = vmul.f32 %v325_v31, %v307_v42 }
  0x91   : > { %v743_v54 = vand.u32 4294901760, %v1946_v38  ;;  %v340_v57 = vmul.f32 %v325_v31, %v308_v45  ;;  %v2014_v30 = vand.u32 4294901760, %v393_v14 }
  0x92   : > { %v373_v40 = vadd.f32 %v362_v21, %v341_v34  ;;  %v374_v41 = vadd.f32 %v362_v21, %v342_v35  ;;  %v466_v46 = vsub.f32 %v1934_v29, %v465_v39  ;;  %v2008_v21 = vand.u32 4294901760, %v1981_v6 }
  0x93   : > { %v744_v4 = vsub.f32 %v1946_v38, %v743_v54  ;;  %v2029_v29 = vsub.f32 %v393_v14, %v2014_v30 }
  0x94   : > { %v1958_v50 = vand.u32 4294901760, %v373_v40  ;;  %v1960_v51 = vand.u32 4294901760, %v374_v41  ;;  %v467_v53 = vand.u32 4294901760, %v466_v46  ;;  %v429_v36 = vsub.f32 %v1981_v6, %v2008_v21 }
  0x95   : > { %v745_v20 = vand.u32 4294901760, %v744_v4  ;;  %v2036_v46 = vand.u32 4294901760, %v2029_v29 }
  0x96   : > { %v1966_v56 = vsub.f32 %v374_v41, %v1960_v51  ;;  %413 = vmatpush.msra.mxu0 %v1958_v50  ;;  %564 = vmatpush.msra.mxu3 %v1958_v50  ;;  %v470_v58 = vsub.f32 %v373_v40, %v1958_v50  ;;  %v430_v44 = vand.u32 4294901760, %v429_v36 }
  0x97   : > { %468 = vmatpush.msra.mxu1 %v467_v53  ;;  %v357_v59 = vpop.permute.xlu0 %356  ;;  %v352_v60 = vpop.permute.xlu1 %351 }
  0x98   : > { %v371_v62 = vadd.f32 %v357_v59, %v339_v52  ;;  %v372_v63 = vadd.f32 %v357_v59, %v340_v57  ;;  %v369_v0 = vadd.f32 %v352_v60, %v337_v48  ;;  %v370_v1 = vadd.f32 %v352_v60, %v338_v49  ;;  %521 = vmatpush.msra.mxu2 %v470_v58 }
  0x99   : > { %v471_v3 = vand.u32 4294901760, %v470_v58  ;;  %v749_v5 = vand.u32 4294901760, %v1966_v56  ;;  %v2038_v48 = vand.u32 4294901760, %v396_v43  ;;  %v437_v49 = vsub.f32 %v2029_v29, %v2036_v46 }
  0x9a   : > { %v1983_v7 = vand.u32 4294901760, %v371_v62  ;;  %v1985_v8 = vand.u32 4294901760, %v372_v63  ;;  %v1987_v9 = vand.u32 4294901760, %v369_v0  ;;  %v1989_v10 = vand.u32 4294901760, %v370_v1 }
  0x9b   : > { %v472_v11 = vsub.f32 %v470_v58, %v471_v3  ;;  %v750_v13 = vsub.f32 %v1966_v56, %v749_v5  ;;  %v2049_v52 = vsub.f32 %v396_v43, %v2038_v48  ;;  %v301_v58 = vld [vmem:[%s2086_s9 + $0x20] sm:$0xff] }
  0x9c   : > { %v476_v15 = vsub.f32 %v371_v62, %v1983_v7  ;;  %v1999_v16 = vsub.f32 %v372_v63, %v1985_v8  ;;  %v482_v17 = vsub.f32 %v369_v0, %v1987_v9  ;;  %v2003_v18 = vsub.f32 %v370_v1, %v1989_v10  ;;  %415 = vmatpush.msra.mxu0 %v1983_v7  ;;  %v299_v0 = vld [vmem:[%s2086_s9 + $0x10] sm:$0xff] }
  0x9d   : > { %566 = vmatpush.msra.mxu3 %v1983_v7  ;;  %v473_v19 = vand.u32 4294901760, %v472_v11  ;;  %v751_v31 = vand.u32 4294901760, %v750_v13  ;;  %v2062_v53 = vand.u32 4294901760, %v2049_v52  ;;  %v980_v60 = vand.u32 4294901760, %v301_v58  ;;  %v304_v13 = vld [vmem:[%s2086_s9 + $0x38] sm:$0xff] }
  0x9e   : > { %417 = vmatpush.msra.mxu0 %v1987_v9  ;;  %524 = vmatpush.msra.mxu2 %v476_v15  ;;  %v477_v22 = vand.u32 4294901760, %v476_v15  ;;  %v755_v23 = vand.u32 4294901760, %v1999_v16  ;;  %v483_v27 = vand.u32 4294901760, %v482_v17  ;;  %v761_v28 = vand.u32 4294901760, %v2003_v18 }
  0x9f   : > { %474 = vmatpush.msra.mxu1 %v473_v19  ;;  %568 = vmatpush.msra.mxu3 %v1987_v9  ;;  %v1038_v61 = vsub.f32 %v301_v58, %v980_v60  ;;  %v982_v2 = vand.u32 4294901760, %v299_v0 }
  0xa0   : > { %423 = vmatmul.f32.vlgmr.msra.gmra.mxu0 %v1991_v12  ;;  %v478_v33 = vsub.f32 %v476_v15, %v477_v22  ;;  %v756_v34 = vsub.f32 %v1999_v16, %v755_v23  ;;  %v484_v35 = vsub.f32 %v482_v17, %v483_v27  ;;  %527 = vmatpush.msra.mxu2 %v482_v17  ;;  %v2114_v15 = vand.u32 4294901760, %v304_v13 }
  0xa1   : > { %746 = vmatpush.msrb.mxu3 %v745_v20  ;;  %609 = vmatpush.msrb.mxu0 %v465_v39  ;;  %v762_v42 = vsub.f32 %v2003_v18, %v761_v28  ;;  %v1039_v62 = vand.u32 4294901760, %v1038_v61  ;;  %v302_v20 = vld [vmem:[%s2086_s9 + $0x28] sm:$0xff] }
  0xa2   : > { %530 = vmatmul.f32.vlgmr.msra.gmra.mxu2 %v1937_v32  ;;  %v479_v40 = vand.u32 4294901760, %v478_v33  ;;  %v757_v41 = vand.u32 4294901760, %v756_v34  ;;  %572 = vmatmul.f32.vlgmr.msra.gmra.mxu3 %v1956_v47  ;;  %v485_v39 = vand.u32 4294901760, %v484_v35  ;;  %v300_v35 = vld [vmem:[%s2086_s9 + $0x18] sm:$0xff] }
  0xa3   : > { %752 = vmatpush.msrb.mxu3 %v751_v31  ;;  %613 = vmatpush.msrb.mxu0 %v471_v3  ;;  %v763_v45 = vand.u32 4294901760, %v762_v42  ;;  %v1040_v63 = vsub.f32 %v1038_v61, %v1039_v62  ;;  %v1044_v3 = vsub.f32 %v299_v0, %v982_v2  ;;  %v1260_v37 = vand.u32 4294901760, %v300_v35 }
  0xa4   : > { %689 = vmatpush.msrb.mxu2 %v1927_v26  ;;  %480 = vmatpush.msra.mxu1 %v479_v40 }
  0xa5   : > { %617 = vmatpush.msrb.mxu0 %v477_v22  ;;  %758 = vmatpush.msrb.mxu3 %v757_v41  ;;  %v1041_v1 = vand.u32 4294901760, %v1040_v63  ;;  %v1045_v4 = vand.u32 4294901760, %v1044_v3  ;;  %v2134_v22 = vand.u32 4294901760, %v302_v20  ;;  %v1322_v40 = vsub.f32 %v300_v35, %v1260_v37 }
  0xa6   : > { %691 = vmatpush.msrb.mxu2 %v1960_v51  ;;  %486 = vmatpush.msra.mxu1 %v485_v39  ;;  %v298_v39 = vld [vmem:[%s2086_s9 + $0x8] sm:$0xff] }
  0xa7   : > { %621 = vmatpush.msrb.mxu0 %v483_v27  ;;  %764 = vmatpush.msrb.mxu3 %v763_v45  ;;  %v1262_v43 = vand.u32 4294901760, %v298_v39 }
  0xa8   : > { %693 = vmatpush.msrb.mxu2 %v1985_v8  ;;  %431 = vmatmul.f32.gmra.mxu0 %v430_v44 }
  0xa9   : > { %796 = vmatpush.msra.mxu0 %v1946_v38  ;;  %488 = vmatmul.f32.vlgmr.msra.gmra.mxu1 %v1923_v24  ;;  %v445_v38 = vsub.f32 %v2049_v52, %v2062_v53 }
  0xaa   : > { %652 = vmatpush.msrb.mxu1 %v1925_v25  ;;  %695 = vmatpush.msrb.mxu2 %v1989_v10  ;;  %v438_v25 = vand.u32 4294901760, %v437_v49 }
  0xab   : > { %930 = vmatpush.msra.mxu3 %v1927_v26  ;;  %799 = vmatpush.msra.mxu0 %v1966_v56 }
  0xac   : > { %887 = vmatpush.msra.mxu2 %v743_v54  ;;  %654 = vmatpush.msrb.mxu1 %v1958_v50  ;;  %v446_v50 = vand.u32 4294901760, %v445_v38 }
  0xad   : > { %535 = vmatmul.f32.gmra.mxu2 %v1981_v6  ;;  %932 = vmatpush.msra.mxu3 %v1960_v51 }
  0xae   : > { %802 = vmatpush.msra.mxu0 %v1999_v16  ;;  %891 = vmatpush.msra.mxu2 %v749_v5  ;;  %v1046_v5 = vsub.f32 %v1044_v3, %v1045_v4  ;;  %v2121_v16 = vsub.f32 %v304_v13, %v2114_v15 }
  0xaf   : > { %578 = vmatmul.f32.gmra.mxu3 %v2008_v21  ;;  %656 = vmatpush.msrb.mxu1 %v1983_v7  ;;  %v297_v7 = vld [vmem:[%s2086_s9] sm:$0xff] }
  0xb0   : > { %934 = vmatpush.msra.mxu3 %v1985_v8  ;;  %805 = vmatpush.msra.mxu0 %v2003_v18  ;;  %v1311_v17 = vand.u32 4294901760, %v2121_v16 }
  0xb1   : > { %895 = vmatpush.msra.mxu2 %v755_v23  ;;  %658 = vmatpush.msrb.mxu1 %v1987_v9  ;;  %v984_v9 = vand.u32 4294901760, %v297_v7  ;;  %v1316_v23 = vsub.f32 %v302_v20, %v2134_v22 }
  0xb2   : > { %936 = vmatpush.msra.mxu3 %v1989_v10  ;;  %439 = vmatmul.f32.gmra.mxu0 %v438_v25  ;;  %v1312_v18 = vsub.f32 %v2121_v16, %v1311_v17 }
  0xb3   : > { %840 = vmatpush.msra.mxu1 %v1927_v26  ;;  %899 = vmatpush.msra.mxu2 %v761_v28  ;;  %v303_v26 = vld [vmem:[%s2086_s9 + $0x30] sm:$0xff]  ;;  %v1317_v28 = vand.u32 4294901760, %v1316_v23 }
  0xb4   : > { %492 = vmatmul.f32.gmra.mxu1 %v1963_v55 }
  0xb5   : > { %842 = vmatpush.msra.mxu1 %v1960_v51  ;;  %540 = vmatmul.f32.gmra.mxu2 %v2029_v29  ;;  %v2092_v51 = vand.u32 4294901760, %v303_v26  ;;  %v1318_v31 = vsub.f32 %v1316_v23, %v1317_v28 }
  0xb7   : > { %844 = vmatpush.msra.mxu1 %v1985_v8  ;;  %584 = vmatmul.f32.gmra.mxu3 %v2036_v46  ;;  %v1032_v54 = vsub.f32 %v303_v26, %v2092_v51  ;;  %v1047_v8 = vand.u32 4294901760, %v1046_v5  ;;  %v1319_v36 = vand.u32 4294901760, %v1318_v31 }
  0xb9   : > { %846 = vmatpush.msra.mxu1 %v1989_v10  ;;  %v1033_v56 = vand.u32 4294901760, %v1032_v54  ;;  %v1050_v10 = vsub.f32 %v297_v7, %v984_v9 }
  0xba   : > { %447 = vmatmul.f32.gmra.mxu0 %v446_v50 }
  0xbb   : > { %v1034_v57 = vsub.f32 %v1032_v54, %v1033_v56  ;;  %v1051_v11 = vand.u32 4294901760, %v1050_v10 }
  0xbc   : > { %496 = vmatmul.f32.gmra.mxu1 %v2014_v30 }
  0xbd   : > { %545 = vmatmul.f32.gmra.mxu2 %v2049_v52  ;;  %v1035_v59 = vand.u32 4294901760, %v1034_v57 }
  0xbf   : > { %590 = vmatmul.f32.gmra.mxu3 %v2062_v53 }
  0xc2   : > { %623 = vmatmul.f32.vlgmr.msrb.gmra.mxu0 %v1923_v24 }
  0xc3   : > { %979 = vmatpush.msrb.mxu0 %v2092_v51 }
  0xc4   : > { %500 = vmatmul.f32.gmra.mxu1 %v2038_v48 }
  0xc5   : > { %701 = vmatmul.f32.vlgmr.msrb.gmra.mxu2 %v1991_v12  ;;  %981 = vmatpush.msrb.mxu0 %v980_v60  ;;  %v1052_v12 = vsub.f32 %v1050_v10, %v1051_v11 }
  0xc6   : > { %1086 = vmatpush.msrb.mxu2 %v1032_v54 }
  0xc7   : > { %766 = vmatmul.f32.vlgmr.msrb.gmra.mxu3 %v1923_v24  ;;  %983 = vmatpush.msrb.mxu0 %v982_v2  ;;  %v1053_v14 = vand.u32 4294901760, %v1052_v12 }
  0xc8   : > { %1130 = vmatpush.msrb.mxu3 %v2092_v51  ;;  %1089 = vmatpush.msrb.mxu2 %v1038_v61 }
  0xc9   : > { %985 = vmatpush.msrb.mxu0 %v984_v9 }
  0xca   : > { %627 = vmatmul.f32.gmra.mxu0 %v1963_v55  ;;  %1132 = vmatpush.msrb.mxu3 %v980_v60 }
  0xcb   : > { %1092 = vmatpush.msrb.mxu2 %v1044_v3 }
  0xcc   : > { %660 = vmatmul.f32.vlgmr.msrb.gmra.mxu1 %v1923_v24  ;;  %1134 = vmatpush.msrb.mxu3 %v982_v2 }
  0xcd   : > { %709 = vmatmul.f32.gmra.mxu2 %v430_v44  ;;  %1036 = vmatpush.msrb.mxu1 %v1035_v59 }
  0xce   : > { %1136 = vmatpush.msrb.mxu3 %v984_v9  ;;  %1095 = vmatpush.msrb.mxu2 %v1050_v10 }
  0xcf   : > { %770 = vmatmul.f32.gmra.mxu3 %v1963_v55  ;;  %1042 = vmatpush.msrb.mxu1 %v1041_v1 }
  0xd1   : > { %1048 = vmatpush.msrb.mxu1 %v1047_v8 }
  0xd2   : > { %631 = vmatmul.f32.gmra.mxu0 %v2014_v30 }
  0xd3   : > { %1054 = vmatpush.msrb.mxu1 %v1053_v14 }
  0xd4   : > { %664 = vmatmul.f32.gmra.mxu1 %v1963_v55 }
  0xd5   : > { %717 = vmatmul.f32.gmra.mxu2 %v438_v25  ;;  %v1328_v25 = vsub.f32 %v298_v39, %v1262_v43 }
  0xd7   : > { %774 = vmatmul.f32.gmra.mxu3 %v2014_v30 }
  0xda   : > { %635 = vmatmul.f32.gmra.mxu0 %v2038_v48 }
  0xdc   : > { %668 = vmatmul.f32.gmra.mxu1 %v2014_v30 }
  0xdd   : > { %725 = vmatmul.f32.gmra.mxu2 %v446_v50  ;;  %v1329_v50 = vand.u32 4294901760, %v1328_v25 }
  0xdf   : > { %778 = vmatmul.f32.gmra.mxu3 %v2038_v48 }
  0xe2   : > { %808 = vmatmul.f32.vlgmr.msra.gmra.mxu0 %v1937_v32  ;;  %v377_v32 = vld [vmem:[%s2319_s4] sm:$0xff] }
  0xe3   : > { %1177 = vmatpush.msra.mxu0 %v1033_v56 }
  0xe4   : > { %672 = vmatmul.f32.gmra.mxu1 %v2038_v48 }
  0xe5   : > { %901 = vmatmul.f32.vlgmr.msra.gmra.mxu2 %v1923_v24  ;;  %1181 = vmatpush.msra.mxu0 %v1039_v62 }
  0xe6   : > { %1257 = vmatpush.msra.mxu2 %v2114_v15 }
  0xe7   : > { %938 = vmatmul.f32.vlgmr.msra.gmra.mxu3 %v1923_v24  ;;  %1185 = vmatpush.msra.mxu0 %v1045_v4  ;;  %v955_v24 = vsel %vm385_vm0, %v377_v32, 0 }
  0xe8   : > { %v2131_v19 = vand.u32 4294901760, %v955_v24  ;;  %1259 = vmatpush.msra.mxu2 %v2134_v22 }
  0xe9   : > { %1189 = vmatpush.msra.mxu0 %v1051_v11 }
  0xea   : > { %813 = vmatmul.f32.gmra.mxu0 %v1981_v6  ;;  %v1313_v6 = vand.u32 4294901760, %v1312_v18  ;;  %1261 = vmatpush.msra.mxu2 %v1260_v37 }
  0xec   : > { %850 = vmatmul.f32.vlgmr.msra.gmra.mxu1 %v1956_v47  ;;  %v378_v47 = vld [vmem:[%s2319_s4 + $0x8] sm:$0xff]  ;;  %1314 = vmatpush.msra.mxu3 %v1313_v6 }
  0xed   : > { %905 = vmatmul.f32.gmra.mxu2 %v1963_v55  ;;  %1220 = vmatpush.msra.mxu1 %v2092_v51  ;;  %v958_v27 = vsel %vm385_vm0, %v378_v47, 0  ;;  %v1330_v51 = vsub.f32 %v1328_v25, %v1329_v50 }
  0xee   : > { %v2152_v34 = vand.u32 4294901760, %v958_v27  ;;  %1320 = vmatpush.msra.mxu3 %v1319_v36  ;;  %1263 = vmatpush.msra.mxu2 %v1262_v43 }
  0xef   : > { %942 = vmatmul.f32.gmra.mxu3 %v1963_v55  ;;  %1222 = vmatpush.msra.mxu1 %v980_v60  ;;  %v2143_v55 = vsub.f32 %v955_v24, %v2131_v19  ;;  %v1331_v56 = vand.u32 4294901760, %v1330_v51 }
  0xf0   : > { %v2162_v41 = vsub.f32 %v958_v27, %v2152_v34 }
  0xf1   : > { %1224 = vmatpush.msra.mxu1 %v982_v2  ;;  %v2150_v33 = vand.u32 4294901760, %v2143_v55 }
  0xf2   : > { %818 = vmatmul.f32.gmra.mxu0 %v2029_v29  ;;  %v1323_v29 = vand.u32 4294901760, %v1322_v40  ;;  %v2170_v49 = vand.u32 4294901760, %v2162_v41 }
  0xf3   : > { %1226 = vmatpush.msra.mxu1 %v984_v9 }
  0xf4   : > { %856 = vmatmul.f32.gmra.mxu1 %v2008_v21  ;;  %v379_v21 = vld [vmem:[%s2319_s4 + $0x10] sm:$0xff]  ;;  %v1324_v44 = vsub.f32 %v1322_v40, %v1323_v29  ;;  %v997_v26 = vsub.f32 %v2162_v41, %v2170_v49 }
  0xf5   : > { %909 = vmatmul.f32.gmra.mxu2 %v2014_v30  ;;  %v961_v42 = vsel %vm385_vm0, %v379_v21, 0 }
  0xf6   : > { %v1325_v38 = vand.u32 4294901760, %v1324_v44  ;;  %v998_v57 = vand.u32 4294901760, %v997_v26 }
  0xf7   : > { %946 = vmatmul.f32.gmra.mxu3 %v2014_v30  ;;  %v989_v30 = vsub.f32 %v2143_v55, %v2150_v33 }
  0xf8   : > { %1326 = vmatpush.msra.mxu3 %v1325_v38 }
  0xf9   : > { %v990_v45 = vand.u32 4294901760, %v989_v30 }
  0xfa   : > { %823 = vmatmul.f32.gmra.mxu0 %v2049_v52  ;;  %v2172_v52 = vand.u32 4294901760, %v961_v42  ;;  %1332 = vmatpush.msra.mxu3 %v1331_v56 }
  0xfc   : > { %862 = vmatmul.f32.gmra.mxu1 %v2036_v46  ;;  %v380_v46 = vld [vmem:[%s2319_s4 + $0x18] sm:$0xff] }
  0xfd   : > { %913 = vmatmul.f32.gmra.mxu2 %v2038_v48  ;;  %v964_v54 = vsel %vm385_vm0, %v380_v46, 0 }
  0xfe   : > { %v2190_v59 = vand.u32 4294901760, %v964_v54 }
  0xff   : > { %950 = vmatmul.f32.gmra.mxu3 %v2038_v48  ;;  %v2180_v48 = vsub.f32 %v961_v42, %v2172_v52 }
 0x100   : > { %v2196_v60 = vsub.f32 %v964_v54, %v2190_v59 }
 0x101   : > { %v2188_v58 = vand.u32 4294901760, %v2180_v48 }
 0x102   : > { %991 = vmatmul.f32.vlgmr.msrb.gmra.mxu0 %v990_v45  ;;  %v2204_v62 = vand.u32 4294901760, %v2196_v60 }
 0x103   : > { %1364 = vmatpush.msrb.mxu0 %v2121_v16 }
 0x104   : > { %868 = vmatmul.f32.gmra.mxu1 %v2062_v53  ;;  %v1005_v53 = vsub.f32 %v2180_v48, %v2188_v58  ;;  %v1013_v63 = vsub.f32 %v2196_v60, %v2204_v62 }
 0x105   : > { %1098 = vmatmul.f32.vlgmr.msrb.gmra.mxu2 %v2143_v55  ;;  %1367 = vmatpush.msrb.mxu0 %v1316_v23 }
 0x106   : > { %1455 = vmatpush.msrb.mxu2 %v1311_v17  ;;  %v1006_v61 = vand.u32 4294901760, %v1005_v53  ;;  %v1014_v0 = vand.u32 4294901760, %v1013_v63 }
 0x107   : > { %1140 = vmatmul.f32.vlgmr.msrb.gmra.mxu3 %v2150_v33  ;;  %1370 = vmatpush.msrb.mxu0 %v1322_v40 }
 0x108   : > { %1459 = vmatpush.msrb.mxu2 %v1317_v28  ;;  %1498 = vmatpush.msrb.mxu3 %v2114_v15 }
 0x109   : > { %1373 = vmatpush.msrb.mxu0 %v1328_v25 }
 0x10a   : > { %1463 = vmatpush.msrb.mxu2 %v1323_v29  ;;  %999 = vmatmul.f32.gmra.mxu0 %v998_v57 }
 0x10b   : > { %1500 = vmatpush.msrb.mxu3 %v2134_v22 }
 0x10c   : > { %1056 = vmatmul.f32.vlgmr.msrb.gmra.mxu1 %v2131_v19  ;;  %1467 = vmatpush.msrb.mxu2 %v1329_v50 }
 0x10d   : > { %1103 = vmatmul.f32.gmra.mxu2 %v2162_v41  ;;  %1408 = vmatpush.msrb.mxu1 %v2114_v15 }
 0x10e   : > { %1502 = vmatpush.msrb.mxu3 %v1260_v37 }
 0x10f   : > { %1146 = vmatmul.f32.gmra.mxu3 %v2170_v49  ;;  %1410 = vmatpush.msrb.mxu1 %v2134_v22 }
 0x110   : > { %1504 = vmatpush.msrb.mxu3 %v1262_v43 }
 0x111   : > { %1412 = vmatpush.msrb.mxu1 %v1260_v37 }
 0x112   : > { %1007 = vmatmul.f32.gmra.mxu0 %v1006_v61 }
 0x113   : > { %1414 = vmatpush.msrb.mxu1 %v1262_v43 }
 0x114   : > { %1060 = vmatmul.f32.gmra.mxu1 %v2152_v34 }
 0x115   : > { %1108 = vmatmul.f32.gmra.mxu2 %v2180_v48 }
 0x117   : > { %1152 = vmatmul.f32.gmra.mxu3 %v2188_v58 }
 0x11a   : > { %1015 = vmatmul.f32.gmra.mxu0 %v1014_v0 }
 0x11c   : > { %1064 = vmatmul.f32.gmra.mxu1 %v2172_v52 }
 0x11d   : > { %1113 = vmatmul.f32.gmra.mxu2 %v2196_v60  ;;  %v424_v1 = vpop.f32.mrf.mxu0 }
 0x11f   : > { %1158 = vmatmul.f32.gmra.mxu3 %v2204_v62 }
 0x122   : > { %1191 = vmatmul.f32.vlgmr.msra.gmra.mxu0 %v2131_v19 }
 0x124   : > { %1068 = vmatmul.f32.gmra.mxu1 %v2190_v59 }
 0x125   : > { %1269 = vmatmul.f32.vlgmr.msra.gmra.mxu2 %v990_v45  ;;  %v531_v2 = vpop.f32.mrf.mxu2  ;;  %v432_v3 = vpop.f32.mrf.mxu0 }
 0x126   : > { %v489_v4 = vpop.f32.mrf.mxu1  ;;  %v573_v7 = vpop.f32.mrf.mxu3 }
 0x127   : > { %1334 = vmatmul.f32.vlgmr.msra.gmra.mxu3 %v2131_v19  ;;  %v490_v5 = vadd.f32 %v489_v4, %v424_v1 }
 0x129   : > { %v532_v8 = vadd.f32 %v531_v2, %v490_v5 }
 0x12a   : > { %1195 = vmatmul.f32.gmra.mxu0 %v2152_v34 }
 0x12b   : > { %v574_v9 = vadd.f32 %v573_v7, %v532_v8 }
 0x12c   : > { %1228 = vmatmul.f32.vlgmr.msra.gmra.mxu1 %v2131_v19 }
 0x12d   : > { %1277 = vmatmul.f32.gmra.mxu2 %v998_v57 }
 0x12f   : > { %1338 = vmatmul.f32.gmra.mxu3 %v2152_v34  ;;  %v440_v10 = vpop.f32.mrf.mxu0 }
 0x130   : > { %v536_v11 = vpop.f32.mrf.mxu2 }
 0x131   : > { %v493_v12 = vpop.f32.mrf.mxu1 }
 0x132   : > { %v494_v13 = vadd.f32 %v493_v12, %v432_v3  ;;  %v579_v14 = vpop.f32.mrf.mxu3  ;;  %1199 = vmatmul.f32.gmra.mxu0 %v2172_v52 }
 0x134   : > { %v537_v15 = vadd.f32 %v536_v11, %v494_v13  ;;  %1232 = vmatmul.f32.gmra.mxu1 %v2152_v34 }
 0x135   : > { %1285 = vmatmul.f32.gmra.mxu2 %v1006_v61 }
 0x136   : > { %v580_v32 = vadd.f32 %v579_v14, %v537_v15 }
 0x137   : > { %1342 = vmatmul.f32.gmra.mxu3 %v2172_v52  ;;  %v448_v16 = vpop.f32.mrf.mxu0 }
 0x138   : > { %v541_v24 = vpop.f32.mrf.mxu2 }
 0x139   : > { %v497_v17 = vpop.f32.mrf.mxu1 }
 0x13a   : > { %v498_v18 = vadd.f32 %v497_v17, %v440_v10  ;;  %v585_v20 = vpop.f32.mrf.mxu3  ;;  %1203 = vmatmul.f32.gmra.mxu0 %v2190_v59 }
 0x13c   : > { %v542_v6 = vadd.f32 %v541_v24, %v498_v18  ;;  %1236 = vmatmul.f32.gmra.mxu1 %v2172_v52 }
 0x13d   : > { %1293 = vmatmul.f32.gmra.mxu2 %v1014_v0 }
 0x13e   : > { %v586_v22 = vadd.f32 %v585_v20, %v542_v6 }
 0x13f   : > { %1346 = vmatmul.f32.gmra.mxu3 %v2190_v59  ;;  %v624_v23 = vpop.f32.mrf.mxu0 }
 0x140   : > { %v546_v47 = vpop.f32.mrf.mxu2  ;;  %v625_v28 = vadd.f32 %v624_v23, %v574_v9 }
 0x141   : > { %v501_v27 = vpop.f32.mrf.mxu1 }
 0x142   : > { %v502_v31 = vadd.f32 %v501_v27, %v448_v16  ;;  %v591_v35 = vpop.f32.mrf.mxu3  ;;  %1376 = vmatmul.f32.vlgmr.msrb.gmra.mxu0 %v2143_v55 }
 0x144   : > { %v547_v36 = vadd.f32 %v546_v47, %v502_v31  ;;  %1240 = vmatmul.f32.gmra.mxu1 %v2190_v59 }
 0x145   : > { %1469 = vmatmul.f32.vlgmr.msrb.gmra.mxu2 %v2131_v19 }
 0x146   : > { %v592_v37 = vadd.f32 %v591_v35, %v547_v36 }
 0x147   : > { %1506 = vmatmul.f32.vlgmr.msrb.gmra.mxu3 %v2131_v19  ;;  %v628_v21 = vpop.f32.mrf.mxu0 }
 0x148   : > { %v702_v40 = vpop.f32.mrf.mxu2  ;;  %v629_v30 = vadd.f32 %v628_v21, %v580_v32 }
 0x149   : > { %v661_v42 = vpop.f32.mrf.mxu1 }
 0x14a   : > { %v2231_v29 = vadd.f32 %v661_v42, %v625_v28  ;;  %v767_v39 = vpop.f32.mrf.mxu3  ;;  %1381 = vmatmul.f32.gmra.mxu0 %v2162_v41 }
 0x14b   : > { %v768_v43 = vadd.f32 %v767_v39, %v702_v40 }
 0x14c   : > { %1418 = vmatmul.f32.vlgmr.msrb.gmra.mxu1 %v2150_v33 }
 0x14d   : > { %1473 = vmatmul.f32.gmra.mxu2 %v2152_v34 }
 0x14f   : > { %1510 = vmatmul.f32.gmra.mxu3 %v2152_v34  ;;  %v632_v55 = vpop.f32.mrf.mxu0 }
 0x150   : > { %v710_v44 = vpop.f32.mrf.mxu2  ;;  %v633_v45 = vadd.f32 %v632_v55, %v586_v22 }
 0x151   : > { %v665_v19 = vpop.f32.mrf.mxu1 }
 0x152   : > { %v2237_v25 = vadd.f32 %v665_v19, %v629_v30  ;;  %v771_v38 = vpop.f32.mrf.mxu3  ;;  %1386 = vmatmul.f32.gmra.mxu0 %v2180_v48 }
 0x153   : > { %v772_v46 = vadd.f32 %v771_v38, %v710_v44 }
 0x154   : > { %1424 = vmatmul.f32.gmra.mxu1 %v2170_v49 }
 0x155   : > { %1477 = vmatmul.f32.gmra.mxu2 %v2172_v52 }
 0x157   : > { %1514 = vmatmul.f32.gmra.mxu3 %v2172_v52  ;;  %v636_v33 = vpop.f32.mrf.mxu0 }
 0x158   : > { %v718_v41 = vpop.f32.mrf.mxu2  ;;  %v637_v50 = vadd.f32 %v636_v33, %v592_v37 }
 0x159   : > { %v669_v34 = vpop.f32.mrf.mxu1 }
 0x15a   : > { %v2243_v26 = vadd.f32 %v669_v34, %v633_v45  ;;  %v775_v51 = vpop.f32.mrf.mxu3  ;;  %1391 = vmatmul.f32.gmra.mxu0 %v2196_v60 }
 0x15b   : > { %v776_v54 = vadd.f32 %v775_v51, %v718_v41 }
 0x15c   : > { %1430 = vmatmul.f32.gmra.mxu1 %v2188_v58 }
 0x15d   : > { %1481 = vmatmul.f32.gmra.mxu2 %v2190_v59 }
 0x15f   : > { %1518 = vmatmul.f32.gmra.mxu3 %v2190_v59  ;;  %v809_v48 = vpop.f32.mrf.mxu0 }
 0x160   : > { %v726_v49 = vpop.f32.mrf.mxu2  ;;  %v810_v52 = vadd.f32 %v809_v48, %v768_v43 }
 0x161   : > { %v673_v56 = vpop.f32.mrf.mxu1 }
 0x162   : > { %v2249_v57 = vadd.f32 %v673_v56, %v637_v50  ;;  %v779_v53 = vpop.f32.mrf.mxu3 }
 0x163   : > { %v780_v61 = vadd.f32 %v779_v53, %v726_v49 }
 0x164   : > { %1436 = vmatmul.f32.gmra.mxu1 %v2204_v62 }
 0x167   : > { %v814_v63 = vpop.f32.mrf.mxu0 }
 0x168   : > { %v902_v0 = vpop.f32.mrf.mxu2  ;;  %v815_v1 = vadd.f32 %v814_v63, %v772_v46 }
 0x169   : > { %v851_v60 = vpop.f32.mrf.mxu1 }
 0x16a   : > { %v852_v2 = vadd.f32 %v851_v60, %v810_v52  ;;  %v939_v58 = vpop.f32.mrf.mxu3 }
 0x16c   : > { %v903_v3 = vadd.f32 %v902_v0, %v852_v2 }
 0x16e   : > { %v2252_v4 = vadd.f32 %v939_v58, %v903_v3 }
 0x16f   : > { %v819_v59 = vpop.f32.mrf.mxu0 }
 0x170   : > { %v906_v5 = vpop.f32.mrf.mxu2  ;;  %v820_v7 = vadd.f32 %v819_v59, %v776_v54 }
 0x171   : > { %v857_v8 = vpop.f32.mrf.mxu1 }
 0x172   : > { %v858_v9 = vadd.f32 %v857_v8, %v815_v1  ;;  %v943_v10 = vpop.f32.mrf.mxu3  ;;  %v1534_v8 = vpop.permute.xlu0 %1533 }
 0x174   : > { %v907_v11 = vadd.f32 %v906_v5, %v858_v9 }
 0x176   : > { %v2254_v12 = vadd.f32 %v943_v10, %v907_v11 }
 0x177   : > { %v824_v13 = vpop.f32.mrf.mxu0 }
 0x178   : > { %v910_v62 = vpop.f32.mrf.mxu2  ;;  %v825_v14 = vadd.f32 %v824_v13, %v780_v61  ;;  %v1529_v61 = vpop.permute.xlu2 %1528 }
 0x179   : > { %v863_v15 = vpop.f32.mrf.mxu1 }
 0x17a   : > { %v864_v32 = vadd.f32 %v863_v15, %v820_v7  ;;  %v947_v16 = vpop.f32.mrf.mxu3 }
 0x17c   : > { %v911_v24 = vadd.f32 %v910_v62, %v864_v32 }
 0x17e   : > { %v2256_v17 = vadd.f32 %v947_v16, %v911_v24 }
 0x17f   : > { %v992_v20 = vpop.f32.mrf.mxu0 }
 0x180   : > { %v914_v18 = vpop.f32.mrf.mxu2  ;;  %v993_v44 = vadd.f32 %v992_v20, %v2231_v29 }
 0x181   : > { %v869_v6 = vpop.f32.mrf.mxu1 }
 0x182   : > { %v870_v22 = vadd.f32 %v869_v6, %v825_v14  ;;  %v951_v47 = vpop.f32.mrf.mxu3 }
 0x184   : > { %v915_v23 = vadd.f32 %v914_v18, %v870_v22  ;;  %v1539_v18 = vpop.permute.xlu1 %1538 }
 0x186   : > { %v2258_v27 = vadd.f32 %v951_v47, %v915_v23 }
 0x187   : > { %v1000_v28 = vpop.f32.mrf.mxu0 }
 0x188   : > { %v1099_v31 = vpop.f32.mrf.mxu2  ;;  %v1001_v50 = vadd.f32 %v1000_v28, %v2237_v25 }
 0x189   : > { %v1057_v35 = vpop.f32.mrf.mxu1 }
 0x18a   : > { %v1141_v36 = vpop.f32.mrf.mxu3  ;;  %v1058_v45 = vadd.f32 %v1057_v35, %v993_v44 }
 0x18c   : > { %v1100_v33 = vadd.f32 %v1099_v31, %v1058_v45 }
 0x18e   : > { %v1142_v34 = vadd.f32 %v1141_v36, %v1100_v33  ;;  %v1544_v36 = vpop.permute.xlu2 %1543 }
 0x18f   : > { %v1008_v37 = vpop.f32.mrf.mxu0 }
 0x190   : > { %v1104_v21 = vpop.f32.mrf.mxu2  ;;  %v1009_v63 = vadd.f32 %v1008_v37, %v2243_v26 }
 0x191   : > { %v1061_v40 = vpop.f32.mrf.mxu1 }
 0x192   : > { %v1147_v30 = vpop.f32.mrf.mxu3  ;;  %v1062_v51 = vadd.f32 %v1061_v40, %v1001_v50 }
 0x194   : > { %v1105_v52 = vadd.f32 %v1104_v21, %v1062_v51 }
 0x196   : > { %v1148_v1 = vadd.f32 %v1147_v30, %v1105_v52 }
 0x197   : > { %v1016_v42 = vpop.f32.mrf.mxu0 }
 0x198   : > { %v1109_v39 = vpop.f32.mrf.mxu2  ;;  %v1017_v9 = vadd.f32 %v1016_v42, %v2249_v57 }
 0x199   : > { %v1065_v43 = vpop.f32.mrf.mxu1 }
 0x19a   : > { %v1153_v55 = vpop.f32.mrf.mxu3  ;;  %v1066_v60 = vadd.f32 %v1065_v43, %v1009_v63 }
 0x19c   : > { %v1110_v59 = vadd.f32 %v1109_v39, %v1066_v60 }
 0x19e   : > { %v1154_v10 = vadd.f32 %v1153_v55, %v1110_v59 }
 0x19f   : > { %v1192_v38 = vpop.f32.mrf.mxu0 }
 0x1a0   : > { %v1114_v19 = vpop.f32.mrf.mxu2  ;;  %v1193_v54 = vadd.f32 %v1192_v38, %v1142_v34 }
 0x1a1   : > { %v1069_v46 = vpop.f32.mrf.mxu1 }
 0x1a2   : > { %v1159_v41 = vpop.f32.mrf.mxu3  ;;  %v1070_v11 = vadd.f32 %v1069_v46, %v1017_v9 }
 0x1a4   : > { %v1115_v32 = vadd.f32 %v1114_v19, %v1070_v11 }
 0x1a6   : > { %v1160_v6 = vadd.f32 %v1159_v41, %v1115_v32 }
 0x1a7   : > { %v1196_v49 = vpop.f32.mrf.mxu0 }
 0x1a8   : > { %v1270_v48 = vpop.f32.mrf.mxu2  ;;  %v1197_v25 = vadd.f32 %v1196_v49, %v1148_v1 }
 0x1a9   : > { %v1229_v56 = vpop.f32.mrf.mxu1  ;;  %v1271_v28 = vadd.f32 %v1270_v48, %v2252_v4 }
 0x1aa   : > { %v1230_v53 = vadd.f32 %v1229_v56, %v1193_v54  ;;  %v1335_v29 = vpop.f32.mrf.mxu3 }
 0x1ab   : > { %v1336_v21 = vadd.f32 %v1335_v29, %v1271_v28 }
 0x1ac   : > { %v1546_v0 = vadd.f32 %v1529_v61, %v1230_v53 }
 0x1ae   : > { %1554 = vst [vmem:[%s2266_s21] sm:$0xff] %v1546_v0 }
 0x1af   : > { %v1200_v2 = vpop.f32.mrf.mxu0 }
 0x1b0   : > { %v1278_v58 = vpop.f32.mrf.mxu2  ;;  %v1201_v13 = vadd.f32 %v1200_v2, %v1154_v10 }
 0x1b1   : > { %v1233_v3 = vpop.f32.mrf.mxu1  ;;  %v1279_v43 = vadd.f32 %v1278_v58, %v2254_v12 }
 0x1b2   : > { %v1234_v5 = vadd.f32 %v1233_v3, %v1197_v25  ;;  %v1339_v7 = vpop.f32.mrf.mxu3 }
 0x1b3   : > { %v1340_v19 = vadd.f32 %v1339_v7, %v1279_v43 }
 0x1b4   : > { %v1548_v26 = vadd.f32 %v1534_v8, %v1234_v5 }
 0x1b6   : > { %1556 = vst [vmem:[%s2266_s21 + $0x10] sm:$0xff] %v1548_v26 }
 0x1b7   : > { %v1204_v62 = vpop.f32.mrf.mxu0 }
 0x1b8   : > { %v1286_v14 = vpop.f32.mrf.mxu2  ;;  %v1205_v22 = vadd.f32 %v1204_v62, %v1160_v6 }
 0x1b9   : > { %v1237_v15 = vpop.f32.mrf.mxu1  ;;  %v1287_v50 = vadd.f32 %v1286_v14, %v2256_v17 }
 0x1ba   : > { %v1238_v16 = vadd.f32 %v1237_v15, %v1201_v13  ;;  %v1343_v24 = vpop.f32.mrf.mxu3 }
 0x1bb   : > { %v1344_v48 = vadd.f32 %v1343_v24, %v1287_v50 }
 0x1bc   : > { %v1550_v20 = vadd.f32 %v1539_v18, %v1238_v16 }
 0x1be   : > { %1558 = vst [vmem:[%s2266_s21 + $0x20] sm:$0xff] %v1550_v20 }
 0x1bf   : > { %v1377_v23 = vpop.f32.mrf.mxu0 }
 0x1c0   : > { %v1294_v47 = vpop.f32.mrf.mxu2  ;;  %v1378_v40 = vadd.f32 %v1377_v23, %v1336_v21 }
 0x1c1   : > { %v1241_v57 = vpop.f32.mrf.mxu1 }
 0x1c2   : > { %v1242_v31 = vadd.f32 %v1241_v57, %v1205_v22  ;;  %v1347_v35 = vpop.f32.mrf.mxu3 }
 0x1c4   : > { %v1552_v37 = vadd.f32 %v1544_v36, %v1242_v31 }
 0x1c6   : > { %1560 = vst [vmem:[%s2266_s21 + $0x30] sm:$0xff] %v1552_v37 }
 0x1c7   : > { %v1382_v42 = vpop.f32.mrf.mxu0 }
 0x1c8   : > { %v1470_v30 = vpop.f32.mrf.mxu2  ;;  %v1383_v46 = vadd.f32 %v1382_v42, %v1340_v19 }
 0x1c9   : > { %v1419_v39 = vpop.f32.mrf.mxu1 }
 0x1ca   : > { %v1420_v55 = vadd.f32 %v1419_v39, %v1378_v40  ;;  %v1507_v44 = vpop.f32.mrf.mxu3 }
 0x1cc   : > { %v1471_v45 = vadd.f32 %v1470_v30, %v1420_v55 }
 0x1ce   : > { %v1508_v38 = vadd.f32 %v1507_v44, %v1471_v45 }
 0x1cf   : > { %v1387_v54 = vpop.f32.mrf.mxu0 }
 0x1d0   : > { %v1547_v4 = vadd.f32 %v1529_v61, %v1508_v38  ;;  %v1474_v33 = vpop.f32.mrf.mxu2  ;;  %v1388_v56 = vadd.f32 %v1387_v54, %v1344_v48  ;;  %v1295_v61 = vadd.f32 %v1294_v47, %v2258_v27 }
 0x1d1   : > { %v1425_v41 = vpop.f32.mrf.mxu1 }
 0x1d2   : > { %1555 = vst [vmem:[%s2266_s21 + $0x8] sm:$0xff] %v1547_v4  ;;  %v1426_v34 = vadd.f32 %v1425_v41, %v1383_v46  ;;  %v1511_v51 = vpop.f32.mrf.mxu3  ;;  %v1348_v60 = vadd.f32 %v1347_v35, %v1295_v61 }
 0x1d4   : > { %v1475_v49 = vadd.f32 %v1474_v33, %v1426_v34 }
 0x1d6   : > { %v1512_v12 = vadd.f32 %v1511_v51, %v1475_v49 }
 0x1d7   : > { %v1392_v1 = vpop.f32.mrf.mxu0 }
 0x1d8   : > { %v1549_v52 = vadd.f32 %v1534_v8, %v1512_v12  ;;  %v1478_v53 = vpop.f32.mrf.mxu2  ;;  %v1393_v2 = vadd.f32 %v1392_v1, %v1348_v60 }
 0x1d9   : > { %v1431_v29 = vpop.f32.mrf.mxu1 }
 0x1da   : > { %1557 = vst [vmem:[%s2266_s21 + $0x18] sm:$0xff] %v1549_v52  ;;  %v1432_v63 = vadd.f32 %v1431_v29, %v1388_v56  ;;  %v1515_v0 = vpop.f32.mrf.mxu3 }
 0x1dc   : > { %v1479_v17 = vadd.f32 %v1478_v53, %v1432_v63 }
 0x1de   : > { %v1516_v25 = vadd.f32 %v1515_v0, %v1479_v17 }
 0x1e0   : > { %v1551_v58 = vadd.f32 %v1539_v18, %v1516_v25  ;;  %v1482_v59 = vpop.f32.mrf.mxu2 }
 0x1e1   : > { %v1437_v3 = vpop.f32.mrf.mxu1 }
 0x1e2   : > { %1559 = vst [vmem:[%s2266_s21 + $0x28] sm:$0xff] %v1551_v58  ;;  %v1438_v27 = vadd.f32 %v1437_v3, %v1393_v2  ;;  %v1519_v5 = vpop.f32.mrf.mxu3 }
 0x1e4   : > { %v1483_v7 = vadd.f32 %v1482_v59, %v1438_v27 }
 0x1e6   : > { %v1520_v8 = vadd.f32 %v1519_v5, %v1483_v7 }
 0x1e8   : > { %v1553_v9 = vadd.f32 %v1544_v36, %v1520_v8 }
 0x1ea   : > { %1561 = vst [vmem:[%s2266_s21 + $0x38] sm:$0xff] %v1553_v9 }
 0x1eb   : > { %1741 = shalt.err (!%p1738_p3)
}
 0x1ec   : > { %s1779_s19 = smov 256   ;;  %s1780_s21 = smov 16  }
 0x1ed   : > { %1669 = dma.vmem_to_hbm [thread:$0]  (%p1859_p5), %s1576_s29, 1024, %s1578_s13, %s1563_s28, %s1779_s19, %s1779_s19, %s1780_s21  }
 0x1ee PF: > { %p1675_p4 = scmp.ge.s32.totalorder %s1776_s27, 2  ;;  %s1592_s8 = sand.u32 1, %s1764_s24  }
 0x1ef   : > { %s1593_s9 = scalar_lea.sflag [#allocation3], %s1592_s8 }
 0x1f0   : > { %p1672_p7 = pnand %p1675_p4, %p1863_p6 }
 0x1f2   : > { %p1673_p8 = pneg %p1672_p7 }
 0x1f4   : > { %1759 = dma.done.wait (%p1673_p8), %s1593_s9, 1024  }
 0x1f5   : > { %1761 = vsyncadd (%p1673_p8), %s1593_s9, 4294966272  ;;  %p17_p9 = scmp.ge.s32.totalorder %s1846_s30, 4   ;;  %s2325_s24 = smov %s1768_s25 }
 0x1f6   : > { %s2326_s25 = smov %s1772_s26  ;;  %s2327_s26 = smov %s1857_s10 }
 0x1f7   : > { %s2328_s27 = smov %s1846_s30  ;;  %19 = sbr.rel (!%p17_p9) target bundleno = 3 (0x3), region = 86 }
 0x1fc   :  { %1599 = vsyncpa [#allocation3], 1 }
 0x1fd   :  { %1601 = vsyncpa [#allocation3 + $0x1], 1 }

// kernel: lo2_block_forward.2
= control target key start
LH: loop header
LB: loop body
LE: loop exit
PB: predicated region body
PF: predicated region fallthrough
CT: control target
= control target key end

     0   :  { %s8133_s29 = smov 0   ;;  %s13352_s0 = inlined_call_operand.vmem [shape: f32[2,32,256], index: 0, kind: input, shape index: {}]   ;;  %s13353_s1 = inlined_call_operand.vmem [shape: f32[32,32], index: 1, kind: input, shape index: {}]   ;;  %s13354_s2 = inlined_call_operand.vmem [shape: f32[32,1], index: 2, kind: input, shape index: {}]   ;;  %s13355_s3 = inlined_call_operand.vmem [shape: f32[32,32], index: 3, kind: input, shape index: {}]   ;;  %s13356_s4 = inlined_call_operand.vmem [shape: f32[32,1], index: 4, kind: input, shape index: {}]   ;;  %s13357_s5 = inlined_call_operand.vmem [shape: f32[32,32], index: 5, kind: input, shape index: {}]   ;;  %s13358_s6 = inlined_call_operand.vmem [shape: f32[32,1], index: 6, kind: input, shape index: {}]   ;;  %s13359_s7 = inlined_call_operand.vmem [shape: f32[32,32], index: 7, kind: input, shape index: {}]   ;;  %s13360_s8 = inlined_call_operand.vmem [shape: f32[32,1], index: 8, kind: input, shape index: {}]   ;;  %s13361_s9 = inlined_call_operand.vmem [shape: f32[32,1], index: 9, kind: input, shape index: {}]   ;;  %s13362_s10 = inlined_call_operand.vmem [shape: f32[32,1], index: 10, kind: input, shape index: {}]   ;;  %s13363_s11 = inlined_call_operand.vmem [shape: f32[32,1], index: 11, kind: input, shape index: {}]   ;;  %s13364_s12 = inlined_call_operand.vmem [shape: f32[32,1], index: 12, kind: input, shape index: {}]   ;;  %s13365_s13 = inlined_call_operand.vmem [shape: f32[32,32], index: 13, kind: input, shape index: {}]   ;;  %s13366_s14 = inlined_call_operand.vmem [shape: f32[32,32], index: 14, kind: input, shape index: {}]   ;;  %s13367_s15 = inlined_call_operand.vmem [shape: f32[32,1], index: 15, kind: input, shape index: {}]   ;;  %s13368_s16 = inlined_call_operand.vmem [shape: f32[9,32,1], index: 16, kind: input, shape index: {}]   ;;  %s13369_s17 = inlined_call_operand.vmem [shape: f32[32,32], index: 17, kind: input, shape index: {}]   ;;  %s13370_s18 = inlined_call_operand.vmem [shape: f32[32,1], index: 18, kind: input, shape index: {}]   ;;  %s13371_s19 = inlined_call_operand.vmem [shape: f32[4,32,1], index: 19, kind: input, shape index: {}]   ;;  %s13372_s20 = inlined_call_operand.vmem [shape: f32[4,32,1], index: 20, kind: input, shape index: {}]   ;;  %s13373_s21 = inlined_call_operand.vmem [shape: f32[4,32,1], index: 21, kind: input, shape index: {}]   ;;  %s13374_s22 = inlined_call_operand.vmem [shape: f32[4,1,256], index: 22, kind: input, shape index: {}]   ;;  %s13375_s23 = inlined_call_operand.vmem [shape: f32[9,1,256], index: 23, kind: input, shape index: {}]   ;;  %s13376_s24 = inlined_call_operand.vmem [shape: f32[2,32,256], index: 24, kind: output, shape index: {0}]   ;;  %s13377_s25 = inlined_call_operand.vmem [shape: f32[2,32,256], index: 25, kind: output, shape index: {1}]  }
   0x1   :  { %13536 = sst [smem:[#allocation78_spill]] %s13352_s0 }
   0x2   :  { %13537 = sst [smem:[#allocation79_spill]] %s13353_s1 }
   0x3   :  { %13538 = sst [smem:[#allocation80_spill]] %s13354_s2 }
   0x4   :  { %13539 = sst [smem:[#allocation81_spill]] %s13355_s3 }
   0x5   :  { %13540 = sst [smem:[#allocation82_spill]] %s13356_s4 }
   0x6   :  { %13541 = sst [smem:[#allocation83_spill]] %s13357_s5 }
   0x7   :  { %13542 = sst [smem:[#allocation84_spill]] %s13358_s6 }
   0x8   :  { %13543 = sst [smem:[#allocation85_spill]] %s13359_s7 }
   0x9   :  { %13544 = sst [smem:[#allocation86_spill]] %s13360_s8 }
   0xa   :  { %13545 = sst [smem:[#allocation87_spill]] %s13361_s9 }
   0xb   :  { %13546 = sst [smem:[#allocation88_spill]] %s13371_s19 }
   0xc   :  { %13547 = sst [smem:[#allocation89_spill]] %s13372_s20 }
   0xd LB: > { %s7774_s2 = sadd.s32 4294967295, %s7984_s29   ;;  %p7778_p0 = scmp.ge.s32.totalorder %s7984_s29, 1  ;;  %s7984_s29 = sphi %s8133_s29, %s36_s29  }
   0xe   : > { %p690_p1 = scmp.lt.s32.totalorder %s7984_s29, 3 }
  0x10   : > { %p691_p2 = pnand %p7778_p0, %p690_p1 }
  0x12   : > { %694 = sbr.rel (%p691_p2) target bundleno = 2785 (0xae1), region = 116 }
  0x17   : > { %s13548_s19 = sld [smem:[#allocation88_spill]]  ;;  %p763_p3 = scmp.lt.s32.totalorder %s7774_s2, 1  ;;  %v13395_v1 = vmov 0   ;;  %v918_v32 = vlaneseq }
  0x18   : > { %7909 = vset.pattern.permute.xlu1 %v13395_v1  ;;  %7910 = vset.pattern.permute.xlu2 %v13395_v1  ;;  %s13549_s1 = sld [smem:[#allocation78_spill]]  ;;  %s13477_s28 = smov 16  }
  0x19   : > { %s13922_s2 = smov (!%p763_p3, %s7774_s2), 1  ;;  %7911 = vset.pattern.permute.xlu0 %v13395_v1  ;;  %v8238_v35 = vand.u32 127, %v918_v32  ;;  %s13389_s26 = smov 32  }
  0x1a   : > { %s8148_s7 = sshll.u32 %s13922_s2, 6  ;;  %s13387_s2 = smov 64  }
  0x1b   : > { %vm920_vm11 = vcmp.lt.s32.totalorder %v8238_v35, 16  ;;  %s13566_s9 = sld [smem:[#allocation80_spill]]  ;;  %s7990_s5 = smov 1  }
  0x1c   : > { %s13567_s20 = sld [smem:[#allocation89_spill]]  ;;  %s7991_s30 = smov 113  }
  0x1d   : > { %v789_v0 = vld [vmem:[%s13548_s19 + $0x18] sm:$0xff]  ;;  %v788_v5 = vld [vmem:[%s13548_s19 + $0x10] sm:$0xff]  ;;  %v787_v9 = vld [vmem:[%s13548_s19 + $0x8] sm:$0xff]  ;;  %s7993_s0 = smov 114   ;;  %s7996_s27 = smov 8  }
  0x1e   : > { %vm793_vm0 = vcmp.ne.f32.partialorder %v789_v0, 0.0  ;;  %s8154_s8 = scalar_lea.vmem %s13549_s1, %s8148_s7  ;;  %vm792_vm1 = vcmp.ne.f32.partialorder %v788_v5, 0.0  ;;  %vm791_vm2 = vcmp.ne.f32.partialorder %v787_v9, 0.0  ;;  %v786_v13 = vld [vmem:[%s13548_s19] sm:$0xff]  ;;  %v7788_v17 = vld [vmem:[%s13548_s19 + $0x38] sm:$0xff]  ;;  %v7787_v19 = vld [vmem:[%s13548_s19 + $0x30] sm:$0xff] }
  0x1f   : > { %v932_v2 = vsel %vm793_vm0, 1, %v13395_v1  ;;  %v8157_v3 = vld [vmem:[%s8154_s8 + $0x30] sm:$0xff]  ;;  %v8160_v4 = vld [vmem:[%s8154_s8 + $0x28] sm:$0xff]  ;;  %v8170_v6 = vld [vmem:[%s8154_s8 + $0x20] sm:$0xff]  ;;  %v931_v8 = vsel %vm792_vm1, 1, %v13395_v1  ;;  %v930_v11 = vsel %vm791_vm2, 1, %v13395_v1 }
  0x20   : > { %943 = vperm.xlu1 %7909, %v932_v2   ;;  %908 = vrot.lane.b32.xlu0 %v8157_v3, %s13477_s28  ;;  %v8175_v7 = vld [vmem:[%s8154_s8 + $0x38] sm:$0xff]  ;;  %v8190_v12 = vld [vmem:[%s8154_s8 + $0x10] sm:$0xff]  ;;  %v8198_v14 = vld [vmem:[%s8154_s8 + $0x8] sm:$0xff]  ;;  %vm790_vm3 = vcmp.ne.f32.partialorder %v786_v13, 0.0  ;;  %vm802_vm4 = vcmp.ne.f32.partialorder %v7788_v17, 0.0  ;;  %vm801_vm5 = vcmp.ne.f32.partialorder %v7787_v19, 0.0 }
  0x21   : > { %914 = vrot.lane.b32.xlu2 %v8160_v4, %s13477_s28  ;;  %v8184_v10 = vld [vmem:[%s8154_s8 + $0x18] sm:$0xff]  ;;  %v929_v15 = vsel %vm790_vm3, 1, %v13395_v1  ;;  %v8204_v16 = vld [vmem:[%s8154_s8] sm:$0xff]  ;;  %v985_v18 = vsel %vm802_vm4, 1, %v13395_v1  ;;  %v984_v20 = vsel %vm801_vm5, 1, %v13395_v1  ;;  %v7786_v21 = vld [vmem:[%s13548_s19 + $0x28] sm:$0xff] }
  0x22   : > { %vm800_vm6 = vcmp.ne.f32.partialorder %v7786_v21, 0.0  ;;  %v7785_v23 = vld [vmem:[%s13548_s19 + $0x20] sm:$0xff]  ;;  %v7792_v25 = vld [vmem:[%s13548_s19 + $0x58] sm:$0xff]  ;;  %v7795_v27 = vld [vmem:[%s13548_s19 + $0x70] sm:$0xff]  ;;  %vm13475_vm3 = vcmp.lt.s32.totalorder %v8238_v35, 32  ;;  %s7997_s4 = smov 120  }
  0x23   : > { %v983_v22 = vsel %vm800_vm6, 1, %v13395_v1  ;;  %vm799_vm7 = vcmp.ne.f32.partialorder %v7785_v23, 0.0  ;;  %vm811_vm8 = vcmp.ne.f32.partialorder %v7792_v25, 0.0  ;;  %vm819_vm9 = vcmp.ne.f32.partialorder %v7795_v27, 0.0  ;;  %v7790_v29 = vld [vmem:[%s13548_s19 + $0x48] sm:$0xff]  ;;  %v7791_v61 = vld [vmem:[%s13548_s19 + $0x50] sm:$0xff] }
  0x24   : > { %v982_v24 = vsel %vm799_vm7, 1, %v13395_v1  ;;  %v1038_v26 = vsel %vm811_vm8, 1, %v13395_v1  ;;  %v1065_v28 = vsel %vm819_vm9, 1, %v13395_v1  ;;  %vm809_vm10 = vcmp.ne.f32.partialorder %v7790_v29, 0.0  ;;  %v7796_v62 = vld [vmem:[%s13548_s19 + $0x78] sm:$0xff]  ;;  %v7794_v2 = vld [vmem:[%s13548_s19 + $0x68] sm:$0xff] }
  0x25   : > { %v1036_v30 = vsel %vm809_vm10, 1, %v13395_v1  ;;  %vm810_vm0 = vcmp.ne.f32.partialorder %v7791_v61, 0.0  ;;  %vm820_vm1 = vcmp.ne.f32.partialorder %v7796_v62, 0.0  ;;  %vm818_vm2 = vcmp.ne.f32.partialorder %v7794_v2, 0.0  ;;  %v1096_v61 = vld [vmem:[%s13566_s9 + $0x8] sm:$0xff]  ;;  %v1095_v62 = vld [vmem:[%s13566_s9] sm:$0xff] }
  0x26   : > { %v1037_v63 = vsel %vm810_vm0, 1, %v13395_v1  ;;  %v1066_v0 = vsel %vm820_vm1, 1, %v13395_v1  ;;  %v1064_v5 = vsel %vm818_vm2, 1, %v13395_v1  ;;  %v822_v2 = vld [vmem:[%s13567_s20 + $0x8] sm:$0xff]  ;;  %s13635_s6 = sld [smem:[#allocation81_spill]] }
  0x27   : > { %vm826_vm2 = vcmp.ne.f32.partialorder %v822_v2, 0.0  ;;  %s13638_s3 = sld [smem:[#allocation84_spill]] }
  0x28   : > { %906 = vrot.lane.b32.xlu1 %v8170_v6, %s13477_s28  ;;  %916 = vrot.lane.b32.xlu0 %v8175_v7, %s13477_s28  ;;  %s13695_s1 = sld [smem:[#allocation86_spill]] }
  0x29   : > { %940 = vperm.xlu2 %7910, %v931_v8  }
  0x30   : > { %912 = vrot.lane.b32.xlu1 %v8184_v10, %s13477_s28  ;;  %904 = vrot.lane.b32.xlu0 %v8190_v12, %s13477_s28 }
  0x31   : > { %937 = vperm.xlu2 %7910, %v930_v11  }
  0x38   : > { %910 = vrot.lane.b32.xlu1 %v8198_v14, %s13477_s28  ;;  %902 = vrot.lane.b32.xlu0 %v8204_v16, %s13477_s28  ;;  %s13688_s28 = smov 64  }
  0x39   : > { %934 = vperm.xlu2 %7910, %v929_v15  }
  0x41   : > { %996 = vperm.xlu2 %7910, %v985_v18  }
  0x49   : > { %993 = vperm.xlu2 %7910, %v984_v20  }
  0x51   : > { %990 = vperm.xlu2 %7910, %v983_v22  }
  0x59   : > { %987 = vperm.xlu2 %7910, %v982_v24  }
  0x61   : > { %1049 = vperm.xlu2 %7910, %v1038_v26  }
  0x69   : > { %1074 = vperm.xlu2 %7910, %v1065_v28  }
  0x71   : > { %1043 = vperm.xlu2 %7910, %v1036_v30  }
  0x7b   : > { %v915_v34 = vpop.permute.xlu2 %914 }
  0x83   : > { %v8260_v42 = vpop.permute.xlu2 %940 }
  0x84   : > { %13553 = vst [vmem:[#allocation5_spill] sm:$0xff] %v8260_v42  ;;  %vm947_vm13 = vcmp.eq.s32.totalorder %v8260_v42, 1 }
  0x8b   : > { %v8281_v49 = vpop.permute.xlu2 %937 }
  0x8c   : > { %13556 = vst [vmem:[#allocation8_spill] sm:$0xff] %v8281_v49  ;;  %vm946_vm14 = vcmp.eq.s32.totalorder %v8281_v49, 1 }
  0x92   : > { %v8236_v31 = vpop.permute.xlu1 %943  ;;  %v909_v33 = vpop.permute.xlu0 %908 }
  0x93   : > { %13550 = vst [vmem:[#allocation2_spill] sm:$0xff] %v8236_v31  ;;  %vm948_vm12 = vcmp.eq.s32.totalorder %v8236_v31, 1  ;;  %v8310_v58 = vpop.permute.xlu2 %934 }
  0x94   : > { %13561 = vst [vmem:[#allocation13_spill] sm:$0xff] %v8310_v58  ;;  %vm13476_vm15 = vcmp.eq.s32.totalorder %v8310_v58, 1 }
  0x9a   : > { %v917_v36 = vpop.permute.xlu0 %916  ;;  %v907_v37 = vpop.permute.xlu1 %906 }
  0x9b   : > { %v8244_v38 = vsel %vm920_vm11, %v909_v33, %v917_v36  ;;  %v8248_v39 = vsel %vm920_vm11, %v917_v36, %v909_v33  ;;  %v8265_v43 = vsel %vm920_vm11, %v907_v37, %v915_v34  ;;  %v8269_v44 = vsel %vm920_vm11, %v915_v34, %v907_v37  ;;  %v8335_v8 = vpop.permute.xlu2 %996  ;;  %v7789_v34 = vld [vmem:[%s13548_s19 + $0x40] sm:$0xff] }
  0x9c   : > { %13551 = vst [vmem:[#allocation3_spill] sm:$0xff] %v8244_v38  ;;  %v956_v40 = vsel %vm948_vm12, %v8244_v38, %v8175_v7  ;;  %v955_v41 = vsel %vm948_vm12, %v8248_v39, %v8157_v3  ;;  %v954_v47 = vsel %vm947_vm13, %v8265_v43, %v8160_v4  ;;  %v953_v48 = vsel %vm947_vm13, %v8269_v44, %v8170_v6 }
  0x9d   : > { %13552 = vst [vmem:[#allocation4_spill] sm:$0xff] %v8248_v39  ;;  %971 = vrot.lane.b32.xlu1 %v956_v40, %s13389_s26  ;;  %963 = vrot.lane.b32.xlu0 %v955_v41, %s13389_s26  ;;  %vm13393_vm4 = vcmp.eq.s32.totalorder %v8335_v8, 1  ;;  %vm808_vm7 = vcmp.ne.f32.partialorder %v7789_v34, 0.0 }
  0x9e   : > { %13554 = vst [vmem:[#allocation6_spill] sm:$0xff] %v8265_v43 }
  0x9f   : > { %13555 = vst [vmem:[#allocation7_spill] sm:$0xff] %v8269_v44 }
  0xa0   : > { %13562 = vst [vmem:[#allocation14_spill] sm:$0xff] %v8335_v8 }
  0xa2   : > { %v913_v45 = vpop.permute.xlu1 %912  ;;  %v905_v46 = vpop.permute.xlu0 %904 }
  0xa3   : > { %v8286_v50 = vsel %vm920_vm11, %v905_v46, %v913_v45  ;;  %v8290_v51 = vsel %vm920_vm11, %v913_v45, %v905_v46  ;;  %v8343_v17 = vpop.permute.xlu2 %993 }
  0xa4   : > { %13557 = vst [vmem:[#allocation9_spill] sm:$0xff] %v8286_v50  ;;  %v952_v52 = vsel %vm946_vm14, %v8286_v50, %v8184_v10  ;;  %v951_v53 = vsel %vm946_vm14, %v8290_v51, %v8190_v12  ;;  %vm13470_vm5 = vcmp.eq.s32.totalorder %v8343_v17, 1 }
  0xa5   : > { %969 = vrot.lane.b32.xlu1 %v954_v47, %s13389_s26  ;;  %961 = vrot.lane.b32.xlu0 %v953_v48, %s13389_s26  ;;  %13558 = vst [vmem:[#allocation10_spill] sm:$0xff] %v8290_v51 }
  0xa6   : > { %13563 = vst [vmem:[#allocation15_spill] sm:$0xff] %v8343_v17 }
  0xaa   : > { %v911_v54 = vpop.permute.xlu1 %910  ;;  %v903_v55 = vpop.permute.xlu0 %902 }
  0xab   : > { %v8304_v56 = vsel %vm920_vm11, %v903_v55, %v911_v54  ;;  %v8308_v57 = vsel %vm920_vm11, %v911_v54, %v903_v55  ;;  %v8374_v26 = vpop.permute.xlu2 %990  ;;  %v1098_v55 = vld [vmem:[%s13566_s9 + $0x18] sm:$0xff] }
  0xac   : > { %13559 = vst [vmem:[#allocation11_spill] sm:$0xff] %v8304_v56  ;;  %v949_v59 = vsel %vm13476_vm15, %v8308_v57, %v8204_v16  ;;  %v950_v60 = vsel %vm13476_vm15, %v8304_v56, %v8198_v14  ;;  %vm13468_vm6 = vcmp.eq.s32.totalorder %v8374_v26, 1 }
  0xad   : > { %967 = vrot.lane.b32.xlu1 %v952_v52, %s13389_s26  ;;  %959 = vrot.lane.b32.xlu0 %v951_v53, %s13389_s26  ;;  %13560 = vst [vmem:[#allocation12_spill] sm:$0xff] %v8308_v57 }
  0xae   : > { %13564 = vst [vmem:[#allocation16_spill] sm:$0xff] %v8374_v26 }
  0xb3   : > { %v8396_v36 = vpop.permute.xlu2 %987 }
  0xb4   : > { %13565 = vst [vmem:[#allocation17_spill] sm:$0xff] %v8396_v36  ;;  %vm13392_vm8 = vcmp.eq.s32.totalorder %v8396_v36, 1 }
  0xb5   : > { %957 = vrot.lane.b32.xlu0 %v949_v59, %s13389_s26  ;;  %965 = vrot.lane.b32.xlu1 %v950_v60, %s13389_s26  ;;  %s13574_s26 = sld [smem:[#allocation79_spill]] }
  0xbd   : > { %1046 = vperm.xlu1 %7909, %v1037_v63   ;;  %1077 = vperm.xlu0 %7911, %v1066_v0   ;;  %v7800_v63 = vld [vmem:[%s13567_s20 + $0x38] sm:$0xff] }
  0xbe   : > { %v824_v0 = vld [vmem:[%s13567_s20 + $0x18] sm:$0xff]  ;;  %vm837_vm0 = vcmp.ne.f32.partialorder %v7800_v63, 0.0 }
  0xbf   : > { %vm828_vm1 = vcmp.ne.f32.partialorder %v824_v0, 0.0  ;;  %v857_v0 = vld [vmem:[%s13373_s21 + $0x8] sm:$0xff] }
  0xc5   : > { %1071 = vperm.xlu0 %7911, %v1064_v5   ;;  %v2197_v5 = vsel %vm837_vm0, 1, %v13395_v1 }
 0x10f   : > { %v972_v9 = vpop.permute.xlu1 %971  ;;  %v964_v11 = vpop.permute.xlu0 %963 }
 0x110   : > { %v977_v13 = vsel %vm13475_vm3, %v964_v11, %v972_v9  ;;  %v981_v15 = vsel %vm13475_vm3, %v972_v9, %v964_v11  ;;  %v2106_v9 = vsel %vm828_vm1, 1, %v13395_v1  ;;  %v2104_v11 = vsel %vm826_vm2, 1, %v13395_v1 }
 0x111   : > { %v8347_v18 = vsel %vm13393_vm4, %v981_v15, %v955_v41  ;;  %v8351_v19 = vsel %vm13393_vm4, %v977_v13, %v956_v40  ;;  %v1035_v41 = vsel %vm808_vm7, 1, %v13395_v1  ;;  %v7797_v13 = vld [vmem:[%s13567_s20 + $0x20] sm:$0xff]  ;;  %vm1119_vm4 = vcmask 261120  }
 0x112   : > { %1016 = vrot.lane.b32.xlu0 %v8347_v18, %s13387_s2  ;;  %1024 = vrot.lane.b32.xlu1 %v8351_v19, %s13387_s2  ;;  %v821_v15 = vld [vmem:[%s13567_s20] sm:$0xff]  ;;  %vm834_vm7 = vcmp.ne.f32.partialorder %v7797_v13, 0.0 }
 0x117   : > { %v970_v20 = vpop.permute.xlu1 %969  ;;  %v962_v21 = vpop.permute.xlu0 %961 }
 0x118   : > { %v976_v22 = vsel %vm13475_vm3, %v962_v21, %v970_v20  ;;  %v980_v23 = vsel %vm13475_vm3, %v970_v20, %v962_v21  ;;  %v7799_v20 = vld [vmem:[%s13567_s20 + $0x30] sm:$0xff]  ;;  %v2194_v21 = vsel %vm834_vm7, 1, %v13395_v1 }
 0x119   : > { %v8364_v24 = vsel %vm13470_vm5, %v980_v23, %v953_v48  ;;  %v8368_v25 = vsel %vm13470_vm5, %v976_v22, %v954_v47 }
 0x11a   : > { %1014 = vrot.lane.b32.xlu1 %v8364_v24, %s13387_s2  ;;  %1022 = vrot.lane.b32.xlu2 %v8368_v25, %s13387_s2 }
 0x11f   : > { %v968_v27 = vpop.permute.xlu1 %967  ;;  %v960_v28 = vpop.permute.xlu0 %959 }
 0x120   : > { %v975_v29 = vsel %vm13475_vm3, %v960_v28, %v968_v27  ;;  %v979_v30 = vsel %vm13475_vm3, %v968_v27, %v960_v28  ;;  %v7802_v27 = vld [vmem:[%s13567_s20 + $0x48] sm:$0xff] }
 0x121   : > { %v8383_v32 = vsel %vm13468_vm6, %v979_v30, %v951_v53  ;;  %v8387_v33 = vsel %vm13468_vm6, %v975_v29, %v952_v52  ;;  %v7793_v52 = vld [vmem:[%s13548_s19 + $0x60] sm:$0xff]  ;;  %v1097_v53 = vld [vmem:[%s13566_s9 + $0x10] sm:$0xff]  ;;  %v7798_v28 = vld [vmem:[%s13567_s20 + $0x28] sm:$0xff]  ;;  %vm844_vm0 = vcmp.ne.f32.partialorder %v7802_v27, 0.0  ;;  %s13639_s9 = sld [smem:[#allocation83_spill]]  ;;  %s13677_s19 = smov 32  }
 0x122   : > { %1012 = vrot.lane.b32.xlu0 %v8383_v32, %s13387_s2  ;;  %1020 = vrot.lane.b32.xlu1 %v8387_v33, %s13387_s2  ;;  %vm817_vm9 = vcmp.ne.f32.partialorder %v7793_v52, 0.0  ;;  %v7804_v29 = vld [vmem:[%s13567_s20 + $0x58] sm:$0xff]  ;;  %vm835_vm1 = vcmp.ne.f32.partialorder %v7798_v28, 0.0  ;;  %v2286_v30 = vsel %vm844_vm0, 1, %v13395_v1  ;;  %v8482_v52 = vpop.permute.xlu2 %1049 }
 0x123   : > { %v1063_v54 = vsel %vm817_vm9, 1, %v13395_v1  ;;  %vm825_vm9 = vcmp.ne.f32.partialorder %v821_v15, 0.0  ;;  %vm846_vm2 = vcmp.ne.f32.partialorder %v7804_v29, 0.0  ;;  %v2195_v34 = vsel %vm835_vm1, 1, %v13395_v1  ;;  %13568 = vst [vmem:[#allocation18_spill] sm:$0xff] %v8482_v52 }
 0x124   : > { %v2103_v22 = vsel %vm825_vm9, 1, %v13395_v1  ;;  %vm861_vm1 = vcmp.ne.f32.partialorder %v857_v0, 0.0 }
 0x125   : > { %v3065_v2 = vsel %vm861_vm1, 1, %v13395_v1 }
 0x127   : > { %v966_v37 = vpop.permute.xlu1 %965  ;;  %v958_v40 = vpop.permute.xlu0 %957 }
 0x128   : > { %v974_v45 = vsel %vm13475_vm3, %v958_v40, %v966_v37  ;;  %v978_v46 = vsel %vm13475_vm3, %v966_v37, %v958_v40  ;;  %v2288_v37 = vsel %vm846_vm2, 1, %v13395_v1  ;;  %v7803_v40 = vld [vmem:[%s13567_s20 + $0x50] sm:$0xff]  ;;  %vm13467_vm2 = vcmp.lt.s32.totalorder %v8238_v35, 64 }
 0x129   : > { %v8406_v47 = vsel %vm13392_vm8, %v978_v46, %v949_v59  ;;  %v8410_v48 = vsel %vm13392_vm8, %v974_v45, %v950_v60  ;;  %v823_v59 = vld [vmem:[%s13567_s20 + $0x10] sm:$0xff]  ;;  %vm845_vm7 = vcmp.ne.f32.partialorder %v7803_v40, 0.0 }
 0x12a   : > { %1040 = vperm.xlu0 %7911, %v1035_v41   ;;  %1010 = vrot.lane.b32.xlu1 %v8406_v47, %s13387_s2  ;;  %vm827_vm10 = vcmp.ne.f32.partialorder %v823_v59, 0.0  ;;  %v7801_v41 = vld [vmem:[%s13567_s20 + $0x40] sm:$0xff]  ;;  %v2287_v45 = vsel %vm845_vm7, 1, %v13395_v1  ;;  %v8499_v59 = vpop.permute.xlu2 %1074  ;;  %vm13391_vm7 = vcmp.eq.s32.totalorder %v8482_v52, 1 }
 0x12b   : > { %1018 = vrot.lane.b32.xlu2 %v8410_v48, %s13387_s2  ;;  %v2105_v60 = vsel %vm827_vm10, 1, %v13395_v1  ;;  %vm836_vm10 = vcmp.ne.f32.partialorder %v7799_v20, 0.0  ;;  %vm843_vm9 = vcmp.ne.f32.partialorder %v7801_v41, 0.0  ;;  %13569 = vst [vmem:[#allocation19_spill] sm:$0xff] %v8499_v59  ;;  %vm13416_vm8 = vcmp.eq.s32.totalorder %v8499_v59, 1  ;;  %s7992_s2 = smov 2  }
 0x12c   : > { %v2196_v23 = vsel %vm836_vm10, 1, %v13395_v1  ;;  %v2285_v46 = vsel %vm843_vm9, 1, %v13395_v1 }
 0x132   : > { %1111 = vperm.xlu0 %7911, %v1097_v53   ;;  %1068 = vperm.xlu1 %7909, %v1063_v54   ;;  %v859_v53 = vld [vmem:[%s13373_s21 + $0x18] sm:$0xff] }
 0x133   : > { %1116 = vperm.xlu2 %7910, %v1098_v55   ;;  %vm863_vm10 = vcmp.ne.f32.partialorder %v859_v53, 0.0  ;;  %v858_v55 = vld [vmem:[%s13373_s21 + $0x10] sm:$0xff] }
 0x134   : > { %v3067_v54 = vsel %vm863_vm10, 1, %v13395_v1  ;;  %vm862_vm0 = vcmp.ne.f32.partialorder %v858_v55, 0.0  ;;  %v7806_v55 = vld [vmem:[%s13567_s20 + $0x68] sm:$0xff] }
 0x13a   : > { %2114 = vperm.xlu0 %7911, %v2105_v60   ;;  %1106 = vperm.xlu1 %7909, %v1096_v61   ;;  %v3066_v60 = vsel %vm862_vm0, 1, %v13395_v1  ;;  %v8504_v61 = vpop.permute.xlu0 %1077 }
 0x13b   : > { %1101 = vperm.xlu2 %7910, %v1095_v62   ;;  %13570 = vst [vmem:[#allocation20_spill] sm:$0xff] %v8504_v61  ;;  %v8510_v62 = vpop.permute.xlu2 %1043  ;;  %vm13411_vm9 = vcmp.eq.s32.totalorder %v8504_v61, 1 }
 0x13c   : > { %13571 = vst [vmem:[#allocation21_spill] sm:$0xff] %v8510_v62 }
 0x142   : > { %2208 = vperm.xlu0 %7911, %v2197_v5   ;;  %2117 = vperm.xlu1 %7909, %v2106_v9   ;;  %v8516_v63 = vpop.permute.xlu0 %1071 }
 0x143   : > { %2111 = vperm.xlu2 %7910, %v2104_v11   ;;  %13572 = vst [vmem:[#allocation22_spill] sm:$0xff] %v8516_v63 }
 0x14a   : > { %2199 = vperm.xlu0 %7911, %v2194_v21   ;;  %2108 = vperm.xlu1 %7909, %v2103_v22   ;;  %v7808_v22 = vld [vmem:[%s13567_s20 + $0x78] sm:$0xff] }
 0x14b   : > { %2205 = vperm.xlu2 %7910, %v2196_v23   ;;  %v856_v23 = vld [vmem:[%s13373_s21] sm:$0xff]  ;;  %vm855_vm10 = vcmp.ne.f32.partialorder %v7808_v22, 0.0 }
 0x14c   : > { %vm860_vm0 = vcmp.ne.f32.partialorder %v856_v23, 0.0  ;;  %v2379_v41 = vsel %vm855_vm10, 1, %v13395_v1  ;;  %vm13412_vm10 = vcmp.eq.s32.totalorder %v8516_v63, 1 }
 0x152   : > { %2293 = vperm.xlu0 %7911, %v2286_v30   ;;  %2202 = vperm.xlu1 %7909, %v2195_v34  }
 0x153   : > { %2299 = vperm.xlu2 %7910, %v2288_v37  }
 0x15a   : > { %3014 = vrot.lane.b32.xlu0 %v8157_v3, %s7990_s5  ;;  %2296 = vperm.xlu1 %7909, %v2287_v45   ;;  %v3064_v45 = vsel %vm860_vm0, 1, %v13395_v1 }
 0x15b   : > { %2290 = vperm.xlu2 %7910, %v2285_v46  }
 0x162   : > { %3046 = vrot.lane.b32.xlu0 %v8175_v7, %s7991_s30  ;;  %3022 = vrot.lane.b32.xlu1 %v8175_v7, %s7990_s5 }
 0x163   : > { %3038 = vrot.lane.b32.xlu2 %v8157_v3, %s7991_s30 }
 0x16a   : > { %3020 = vrot.lane.b32.xlu0 %v8160_v4, %s7990_s5  ;;  %3078 = vperm.xlu1 %7909, %v3067_v54   ;;  %v7805_v54 = vld [vmem:[%s13567_s20 + $0x60] sm:$0xff] }
 0x16b   : > { %3012 = vrot.lane.b32.xlu2 %v8170_v6, %s7990_s5  ;;  %vm852_vm0 = vcmp.ne.f32.partialorder %v7805_v54, 0.0 }
 0x172   : > { %3075 = vperm.xlu0 %7911, %v3066_v60   ;;  %3036 = vrot.lane.b32.xlu1 %v8170_v6, %s7991_s30  ;;  %v8523_v6 = vpop.permute.xlu1 %1046 }
 0x173   : > { %3044 = vrot.lane.b32.xlu2 %v8160_v4, %s7991_s30  ;;  %13573 = vst [vmem:[#allocation23_spill] sm:$0xff] %v8523_v6  ;;  %vm13394_vm1 = vcmp.eq.s32.totalorder %v8523_v6, 1 }
 0x174   : > { %v1023_v4 = vpop.permute.xlu2 %1022 }
 0x17a   : > { %3034 = vrot.lane.b32.xlu0 %v8190_v12, %s7991_s30  ;;  %3010 = vrot.lane.b32.xlu1 %v8190_v12, %s7990_s5 }
 0x17b   : > { %3018 = vrot.lane.b32.xlu2 %v8184_v10, %s7990_s5 }
 0x182   : > { %3008 = vrot.lane.b32.xlu0 %v8204_v16, %s7990_s5  ;;  %3042 = vrot.lane.b32.xlu1 %v8184_v10, %s7991_s30 }
 0x183   : > { %3072 = vperm.xlu2 %7910, %v3065_v2  }
 0x184   : > { %v1025_v12 = vpop.permute.xlu1 %1024  ;;  %v1017_v5 = vpop.permute.xlu0 %1016 }
 0x185   : > { %v8532_v9 = vpop.permute.xlu2 %1018  ;;  %v1030_v11 = vsel %vm13467_vm2, %v1017_v5, %v1025_v12  ;;  %v1034_v13 = vsel %vm13467_vm2, %v1025_v12, %v1017_v5 }
 0x186   : > { %v1061_v10 = vsel %vm13391_vm7, %v1034_v13, %v8347_v18  ;;  %v1062_v15 = vsel %vm13391_vm7, %v1030_v11, %v8351_v19  ;;  %v7807_v19 = vld [vmem:[%s13567_s20 + $0x70] sm:$0xff]  ;;  %s13706_s20 = sld [smem:[#allocation87_spill]] }
 0x187   : > { %v1089_v20 = vsel %vm13411_vm9, %v1062_v15, %v1061_v10  ;;  %vm854_vm7 = vcmp.ne.f32.partialorder %v7807_v19, 0.0 }
 0x188   : > { %v8547_v21 = vand.u32 4294901760, %v1089_v20 }
 0x18a   : > { %3040 = vrot.lane.b32.xlu0 %v8198_v14, %s7991_s30  ;;  %3016 = vrot.lane.b32.xlu1 %v8198_v14, %s7990_s5  ;;  %v8560_v18 = vsub.f32 %v1089_v20, %v8547_v21  ;;  %v1090_v20 = vsel %vm13411_vm9, %v1061_v10, %v1062_v15  ;;  %v2376_v10 = vsel %vm852_vm0, 1, %v13395_v1  ;;  %vm2081_vm9 = vcmp.lt.s32.totalorder %v8238_v35, 113 }
 0x18b   : > { %3032 = vrot.lane.b32.xlu2 %v8204_v16, %s7991_s30  ;;  %1145 = vmatpush.msra.mxu0 %v8547_v21 }
 0x18c   : > { %1296 = vmatpush.msra.mxu3 %v8547_v21  ;;  %v1015_v27 = vpop.permute.xlu1 %1014  ;;  %1252 = vmatpush.msra.mxu2 %v8560_v18  ;;  %v1199_v14 = vand.u32 4294901760, %v8560_v18 }
 0x18d   : > { %v1029_v28 = vsel %vm13467_vm2, %v1015_v27, %v1023_v4  ;;  %v1033_v29 = vsel %vm13467_vm2, %v1023_v4, %v1015_v27  ;;  %v8588_v40 = vpop.permute.xlu2 %1116 }
 0x18e   : > { %v1059_v16 = vsel %vm13394_vm1, %v1033_v29, %v8364_v24  ;;  %v1060_v30 = vsel %vm13394_vm1, %v1029_v28, %v8368_v25  ;;  %v1200_v34 = vsub.f32 %v8560_v18, %v1199_v14  ;;  %v1091_v24 = vld [vmem:[%s13574_s26] sm:$0xff]  ;;  %v2378_v25 = vsel %vm854_vm7, 1, %v13395_v1 }
 0x18f   : > { %v1087_v37 = vsel %vm13416_vm8, %v1060_v30, %v1059_v16  ;;  %v1121_v0 = vsel %vm1119_vm4, %v1091_v24, 0  ;;  %vm13413_vm7 = vcmp.eq.s32.totalorder %v8510_v62, 1  ;;  %vm853_vm1 = vcmp.ne.f32.partialorder %v7806_v55, 0.0 }
 0x190   : > { %v8596_v46 = vand.u32 4294901760, %v1087_v37  ;;  %v1201_v53 = vand.u32 4294901760, %v1200_v34  ;;  %v8618_v13 = vand.u32 4294901760, %v1121_v0  ;;  %v1088_v27 = vsel %vm13416_vm8, %v1059_v16, %v1060_v30  ;;  %v1092_v30 = vld [vmem:[%s13574_s26 + $0x8] sm:$0xff] }
 0x191   : > { %v2377_v15 = vsel %vm853_vm1, 1, %v13395_v1  ;;  %v8639_v34 = vand.u32 4294901760, %v1090_v20 }
 0x192   : > { %2390 = vperm.xlu0 %7911, %v2379_v41   ;;  %3069 = vperm.xlu1 %7909, %v3064_v45   ;;  %v8605_v60 = vsub.f32 %v1087_v37, %v8596_v46  ;;  %v8644_v37 = vsub.f32 %v1121_v0, %v8618_v13  ;;  %v8646_v41 = vand.u32 4294901760, %v1088_v27 }
 0x193   : > { %2387 = vperm.xlu2 %7910, %v2378_v25   ;;  %1147 = vmatpush.msra.mxu0 %v8596_v46  ;;  %v8663_v54 = vsub.f32 %v1090_v20, %v8639_v34 }
 0x194   : > { %1202 = vmatpush.msra.mxu1 %v1201_v53  ;;  %1298 = vmatpush.msra.mxu3 %v8596_v46  ;;  %v1021_v4 = vpop.permute.xlu1 %1020  ;;  %v1013_v2 = vpop.permute.xlu0 %1012  ;;  %v13399_v12 = vand.u32 4294901760, %v8605_v60  ;;  %v8666_v55 = vand.u32 4294901760, %v8644_v37  ;;  %v8669_v0 = vsub.f32 %v1088_v27, %v8646_v41 }
 0x195   : > { %1255 = vmatpush.msra.mxu2 %v8605_v60  ;;  %v1028_v5 = vsel %vm13467_vm2, %v1013_v2, %v1021_v4  ;;  %v1032_v11 = vsel %vm13467_vm2, %v1021_v4, %v1013_v2  ;;  %v1124_v4 = vsel %vm1119_vm4, %v1092_v30, 0 }
 0x196   : > { %v1057_v22 = vsel %vm13413_vm7, %v1032_v11, %v8383_v32  ;;  %v1058_v23 = vsel %vm13413_vm7, %v1028_v5, %v8387_v33  ;;  %v1206_v19 = vsub.f32 %v8605_v60, %v13399_v12  ;;  %v8641_v33 = vpop.permute.xlu2 %1101  ;;  %v1155_v20 = vsub.f32 %v8644_v37, %v8666_v55 }
 0x197   : > { %v1085_v28 = vsel %vm13412_vm10, %v1058_v23, %v1057_v22  ;;  %v1086_v45 = vsel %vm13412_vm10, %v1057_v22, %v1058_v23  ;;  %v13397_v22 = vand.u32 4294901760, %v8663_v54  ;;  %v8678_v23 = vand.u32 4294901760, %v1124_v4 }
 0x198   : > { %v8637_v29 = vand.u32 4294901760, %v1085_v28  ;;  %v1207_v32 = vand.u32 4294901760, %v1206_v19  ;;  %v8675_v5 = vand.u32 4294901760, %v1086_v45  ;;  %v13400_v19 = vand.u32 4294901760, %v8669_v0 }
 0x199   : > { %v8703_v1 = vsub.f32 %v1124_v4, %v8678_v23 }
 0x19a   : > { %2381 = vperm.xlu0 %7911, %v2376_v10   ;;  %2384 = vperm.xlu1 %7909, %v2377_v15   ;;  %v8649_v16 = vsub.f32 %v1085_v28, %v8637_v29  ;;  %v8691_v10 = vsub.f32 %v1086_v45, %v8675_v5 }
 0x19b   : > { %1149 = vmatpush.msra.mxu0 %v8637_v29  ;;  %1208 = vmatpush.msra.mxu1 %v1207_v32 }
 0x19c   : > { %1300 = vmatpush.msra.mxu3 %v8637_v29  ;;  %v1011_v24 = vpop.permute.xlu1 %1010  ;;  %1258 = vmatpush.msra.mxu2 %v8649_v16  ;;  %v8659_v25 = vpop.permute.xlu0 %1040  ;;  %v13398_v53 = vand.u32 4294901760, %v8649_v16  ;;  %v13578_v43 = vand.u32 4294901760, %v8649_v16 }
 0x19d   : > { %13575 = vst [vmem:[#allocation24_spill] sm:$0xff] %v8659_v25  ;;  %v1027_v27 = vsel %vm13467_vm2, %v1011_v24, %v8532_v9  ;;  %v1031_v28 = vsel %vm13467_vm2, %v8532_v9, %v1011_v24  ;;  %vm13410_vm1 = vcmp.eq.s32.totalorder %v8659_v25, 1  ;;  %v1093_v9 = vld [vmem:[%s13574_s26 + $0x10] sm:$0xff] }
 0x19e   : > { %v1212_v2 = vsub.f32 %v8649_v16, %v13398_v53  ;;  %v8693_v15 = vpop.permute.xlu2 %2111  ;;  %v1055_v45 = vsel %vm13410_vm1, %v1031_v28, %v8406_v47  ;;  %v1056_v24 = vsel %vm13410_vm1, %v1027_v27, %v8410_v48  ;;  %v1484_v53 = vsub.f32 %v8669_v0, %v13400_v19 }
 0x19f   : > { %v13403_v47 = vand.u32 4294901760, %v8691_v10  ;;  %v1127_v48 = vsel %vm1119_vm4, %v1093_v9, 0  ;;  %v8731_v27 = vand.u32 4294901760, %v8703_v1  ;;  %v13580_v16 = vand.u32 4294901760, %v8669_v0 }
 0x1a0   : > { %v1213_v11 = vand.u32 4294901760, %v1212_v2  ;;  %v1478_v2 = vsub.f32 %v8663_v54, %v13397_v22  ;;  %v1485_v19 = vand.u32 4294901760, %v1484_v53  ;;  %v8743_v9 = vand.u32 4294901760, %v1127_v48 }
 0x1a1   : > { %v1163_v53 = vsub.f32 %v8703_v1, %v8731_v27  ;;  %vm2056_vm1 = vcmp.lt.s32.totalorder %v8238_v35, 1 }
 0x1a2   : > { %1214 = vmatpush.msra.mxu1 %v1213_v11  ;;  %v8715_v11 = vand.u32 4294901760, %v1155_v20  ;;  %v1479_v20 = vand.u32 4294901760, %v1478_v2  ;;  %v1490_v2 = vsub.f32 %v8691_v10, %v13403_v47  ;;  %v8766_v51 = vsub.f32 %v1127_v48, %v8743_v9 }
 0x1a4   : > { %v8695_v32 = vpop.permute.xlu1 %1068  ;;  %v8697_v30 = vpop.permute.xlu0 %1111  ;;  %v8776_v48 = vand.u32 4294901760, %v8766_v51 }
 0x1a5   : > { %13576 = vst [vmem:[#allocation25_spill] sm:$0xff] %v8695_v32  ;;  %vm13409_vm0 = vcmp.eq.s32.totalorder %v8695_v32, 1 }
 0x1a6   : > { %v1083_v4 = vsel %vm13409_vm0, %v1056_v24, %v1055_v45  ;;  %v1084_v22 = vsel %vm13409_vm0, %v1055_v45, %v1056_v24  ;;  %v8758_v18 = vpop.permute.xlu2 %2205 }
 0x1a7   : > { %v8725_v28 = vand.u32 4294901760, %v1083_v4  ;;  %v8727_v12 = vand.u32 4294901760, %v1084_v22 }
 0x1a9   : > { %1151 = vmatpush.msra.mxu0 %v8725_v28  ;;  %1302 = vmatpush.msra.mxu3 %v8725_v28  ;;  %v1216_v45 = vsub.f32 %v1083_v4, %v8725_v28  ;;  %v8737_v24 = vsub.f32 %v1084_v22, %v8727_v12 }
 0x1aa   : > { %1157 = vmatmul.f32.vlgmr.msra.gmra.mxu0 %v8715_v11  ;;  %1306 = vmatmul.f32.vlgmr.msra.gmra.mxu3 %v8666_v55 }
 0x1ab   : > { %1480 = vmatpush.msrb.mxu3 %v1479_v20  ;;  %1343 = vmatpush.msrb.mxu0 %v1199_v14  ;;  %v1217_v56 = vand.u32 4294901760, %v1216_v45  ;;  %v1495_v4 = vand.u32 4294901760, %v8737_v24  ;;  %v1094_v20 = vld [vmem:[%s13574_s26 + $0x18] sm:$0xff]  ;;  %v13577_v14 = vand.u32 4294901760, %v8605_v60 }
 0x1ac   : > { %1261 = vmatpush.msra.mxu2 %v1216_v45  ;;  %v8748_v57 = vpop.permute.xlu1 %1106  ;;  %v8751_v22 = vpop.permute.xlu0 %2114  ;;  %v1130_v60 = vsel %vm1119_vm4, %v1094_v20, 0 }
 0x1ad   : > { %1264 = vmatmul.f32.vlgmr.msra.gmra.mxu2 %v8644_v37  ;;  %1486 = vmatpush.msrb.mxu3 %v1485_v19  ;;  %v1218_v47 = vsub.f32 %v1216_v45, %v1217_v56  ;;  %v1496_v50 = vsub.f32 %v8737_v24, %v1495_v4  ;;  %v1491_v19 = vand.u32 4294901760, %v1490_v2  ;;  %v8778_v45 = vand.u32 4294901760, %v1130_v60 }
 0x1ae   : > { %1347 = vmatpush.msrb.mxu0 %v13577_v14  ;;  %1423 = vmatpush.msrb.mxu2 %v8639_v34  ;;  %v8772_v14 = vand.u32 4294901760, %v1163_v53  ;;  %v13582_v53 = vmov 0  }
 0x1af   : > { %v1219_v44 = vand.u32 4294901760, %v1218_v47  ;;  %v1497_v38 = vand.u32 4294901760, %v1496_v50  ;;  %1492 = vmatpush.msrb.mxu3 %v1491_v19 }
 0x1b0   : > { %1351 = vmatpush.msrb.mxu0 %v13578_v43  ;;  %1425 = vmatpush.msrb.mxu2 %v8646_v41 }
 0x1b1   : > { %1220 = vmatpush.msra.mxu1 %v1219_v44  ;;  %1498 = vmatpush.msrb.mxu3 %v1497_v38  ;;  %v13579_v38 = vand.u32 4294901760, %v8663_v54  ;;  %v1171_v44 = vsub.f32 %v8766_v51, %v8776_v48 }
 0x1b2   : > { %1355 = vmatpush.msrb.mxu0 %v1217_v56  ;;  %1427 = vmatpush.msrb.mxu2 %v8675_v5  ;;  %v8796_v56 = vsub.f32 %v1130_v60, %v8778_v45 }
 0x1b3   : > { %1222 = vmatmul.f32.vlgmr.msra.gmra.mxu1 %v8618_v13  ;;  %1165 = vmatmul.f32.gmra.mxu0 %v8772_v14 }
 0x1b4   : > { %1530 = vmatpush.msra.mxu0 %v8663_v54  ;;  %1386 = vmatpush.msrb.mxu1 %v8547_v21  ;;  %v8784_v43 = vpop.permute.xlu1 %2117  ;;  %v8786_v50 = vpop.permute.xlu0 %2208  ;;  %v8809_v54 = vand.u32 4294901760, %v1171_v44  ;;  %v8812_v47 = vand.u32 4294901760, %v8796_v56 }
 0x1b5   : > { %1429 = vmatpush.msrb.mxu2 %v8727_v12  ;;  %1664 = vmatpush.msra.mxu3 %v8639_v34  ;;  %v8798_v21 = vpop.permute.xlu2 %2299 }
 0x1b6   : > { %1533 = vmatpush.msra.mxu0 %v8669_v0  ;;  %1269 = vmatmul.f32.gmra.mxu2 %v8703_v1 }
 0x1b7   : > { %1621 = vmatpush.msra.mxu2 %v13579_v38  ;;  %1388 = vmatpush.msrb.mxu1 %v8596_v46  ;;  %v13581_v46 = vand.u32 4294901760, %v8691_v10 }
 0x1b8   : > { %1666 = vmatpush.msra.mxu3 %v8646_v41  ;;  %1536 = vmatpush.msra.mxu0 %v8691_v10 }
 0x1b9   : > { %1625 = vmatpush.msra.mxu2 %v13580_v16  ;;  %1312 = vmatmul.f32.gmra.mxu3 %v8731_v27 }
 0x1ba   : > { %1390 = vmatpush.msrb.mxu1 %v8637_v29  ;;  %1668 = vmatpush.msra.mxu3 %v8675_v5  ;;  %v1179_v29 = vsub.f32 %v8796_v56, %v8812_v47 }
 0x1bb   : > { %1539 = vmatpush.msra.mxu0 %v8737_v24  ;;  %1629 = vmatpush.msra.mxu2 %v13581_v46 }
 0x1bc   : > { %1392 = vmatpush.msrb.mxu1 %v8725_v28  ;;  %1670 = vmatpush.msra.mxu3 %v8727_v12  ;;  %v8819_v0 = vpop.permute.xlu1 %2108  ;;  %v8821_v2 = vpop.permute.xlu0 %2199  ;;  %v8834_v28 = vand.u32 4294901760, %v1179_v29 }
 0x1bd   : > { %1633 = vmatpush.msra.mxu2 %v1495_v4  ;;  %1173 = vmatmul.f32.gmra.mxu0 %v8809_v54  ;;  %v8830_v10 = vpop.permute.xlu2 %2290 }
 0x1be   : > { %1574 = vmatpush.msra.mxu1 %v8639_v34  ;;  %1274 = vmatmul.f32.gmra.mxu2 %v8766_v51 }
 0x1bf   : > { %1226 = vmatmul.f32.gmra.mxu1 %v8678_v23 }
 0x1c0   : > { %1576 = vmatpush.msra.mxu1 %v8646_v41  ;;  %v891_v41 = vld [vmem:[%s13374_s22] sm:$0x3] }
 0x1c1   : > { %1318 = vmatmul.f32.gmra.mxu3 %v8776_v48  ;;  %vm892_vm0 = vcmp.ne.f32.partialorder %v891_v41, 0.0 }
 0x1c2   : > { %1578 = vmatpush.msra.mxu1 %v8675_v5  ;;  %v2090_v20 = vsel %vm892_vm0, 1, %v13582_v53 }
 0x1c3   : > { %v2092_v19 = vperm.slane %v2090_v20, 1  ;;  %v2091_v60 = vperm.slane %v2090_v20, 0 }
 0x1c4   : > { %1580 = vmatpush.msra.mxu1 %v8727_v12  ;;  %v8837_v34 = vpop.permute.xlu1 %2202  ;;  %v8839_v24 = vpop.permute.xlu0 %2293 }
 0x1c5   : > { %1181 = vmatmul.f32.gmra.mxu0 %v8834_v28  ;;  %v3039_v5 = vpop.permute.xlu2 %3038  ;;  %vm8860_vm10 = vcmp.eq.s32.totalorder %v2092_v19, 1  ;;  %vm8864_vm0 = vcmp.eq.s32.totalorder %v2091_v60, 1 }
 0x1c6   : > { %1279 = vmatmul.f32.gmra.mxu2 %v8796_v56 }
 0x1c7   : > { %1230 = vmatmul.f32.gmra.mxu1 %v8743_v9 }
 0x1c9   : > { %1324 = vmatmul.f32.gmra.mxu3 %v8812_v47 }
 0x1cc   : > { %v8848_v4 = vpop.permute.xlu1 %2296  ;;  %v3015_v12 = vpop.permute.xlu0 %3014 }
 0x1cd   : > { %1357 = vmatmul.f32.vlgmr.msrb.gmra.mxu0 %v8618_v13  ;;  %v3013_v16 = vpop.permute.xlu2 %3012 }
 0x1ce   : > { %1435 = vmatmul.f32.vlgmr.msrb.gmra.mxu2 %v8715_v11 }
 0x1cf   : > { %1234 = vmatmul.f32.gmra.mxu1 %v8778_v45 }
 0x1d1   : > { %1500 = vmatmul.f32.vlgmr.msrb.gmra.mxu3 %v8618_v13 }
 0x1d4   : > { %v3023_v38 = vpop.permute.xlu1 %3022  ;;  %v3047_v44 = vpop.permute.xlu0 %3046 }
 0x1d5   : > { %1361 = vmatmul.f32.gmra.mxu0 %v8678_v23  ;;  %v8870_v29 = vsel %vm2056_vm1, %v3015_v12, %v3023_v38  ;;  %v8874_v41 = vsel %vm2056_vm1, %v3023_v38, %v3015_v12  ;;  %v8878_v20 = vsel %vm2081_vm9, %v3039_v5, %v3047_v44 }
 0x1d6   : > { %1443 = vmatmul.f32.gmra.mxu2 %v8772_v14  ;;  %13587 = vst [vmem:[#allocation26_spill] sm:$0xff] %v8870_v29  ;;  %v8882_v14 = vsel %vm2081_vm9, %v3047_v44, %v3039_v5  ;;  %v3062_v12 = vsel %vm8864_vm0, %v8878_v20, %v8874_v41 }
 0x1d7   : > { %1394 = vmatmul.f32.vlgmr.msrb.gmra.mxu1 %v8618_v13  ;;  %13588 = vst [vmem:[#allocation27_spill] sm:$0xff] %v8874_v41  ;;  %v3063_v19 = vsel %vm8860_vm10, %v8882_v14, %v8870_v29  ;;  %v3045_v29 = vpop.permute.xlu2 %3044 }
 0x1d8   : > { %13589 = vst [vmem:[#allocation28_spill] sm:$0xff] %v8878_v20 }
 0x1d9   : > { %13590 = vst [vmem:[#allocation29_spill] sm:$0xff] %v8882_v14  ;;  %1504 = vmatmul.f32.gmra.mxu3 %v8678_v23  ;;  %v7812_v14 = vld [vmem:[%s13373_s21 + $0x38] sm:$0xff] }
 0x1dc   : > { %v3079_v60 = vpop.permute.xlu1 %3078  ;;  %v3021_v38 = vpop.permute.xlu0 %3020 }
 0x1dd   : > { %vm3083_vm7 = vcmp.eq.s32.totalorder %v3079_v60, 1  ;;  %1365 = vmatmul.f32.gmra.mxu0 %v8743_v9  ;;  %v7948_v60 = vld [vmem:[%s8154_s8 + $0x20] sm:$0xff]  ;;  %v8938_v39 = vsel %vm2056_vm1, %v3013_v16, %v3021_v38 }
 0x1de   : > { %v8896_v5 = vsel %vm3083_vm7, %v3063_v19, %v8175_v7  ;;  %v8899_v44 = vsel %vm3083_vm7, %v3062_v12, %v8157_v3  ;;  %1451 = vmatmul.f32.gmra.mxu2 %v8809_v54  ;;  %vm872_vm7 = vcmp.ne.f32.partialorder %v7812_v14, 0.0  ;;  %v8914_v3 = vsel %vm2056_vm1, %v3021_v38, %v3013_v16  ;;  %13593 = vst [vmem:[#allocation32_spill] sm:$0xff] %v8938_v39  ;;  %v7949_v16 = vld [vmem:[%s8154_s8 + $0x28] sm:$0xff] }
 0x1df   : > { %1398 = vmatmul.f32.gmra.mxu1 %v8678_v23  ;;  %3106 = vrot.lane.b32.xlu2 %v8896_v5, %s7992_s2  ;;  %13591 = vst [vmem:[#allocation30_spill] sm:$0xff] %v8914_v3  ;;  %v3151_v19 = vsel %vm872_vm7, 1, %v13582_v53  ;;  %v3019_v41 = vpop.permute.xlu2 %3018 }
 0x1e0   : > { %3122 = vrot.lane.b32.xlu0 %v8899_v44, %s7993_s0  ;;  %3098 = vrot.lane.b32.xlu1 %v8899_v44, %s7992_s2 }
 0x1e1   : > { %1508 = vmatmul.f32.gmra.mxu3 %v8743_v9 }
 0x1e4   : > { %v3037_v7 = vpop.permute.xlu1 %3036  ;;  %v3076_v54 = vpop.permute.xlu0 %3075 }
 0x1e5   : > { %v8919_v12 = vsel %vm2081_vm9, %v3037_v7, %v3045_v29  ;;  %vm3082_vm8 = vcmp.eq.s32.totalorder %v3076_v54, 1  ;;  %1369 = vmatmul.f32.gmra.mxu0 %v8778_v45 }
 0x1e6   : > { %13592 = vst [vmem:[#allocation31_spill] sm:$0xff] %v8919_v12  ;;  %v3060_v14 = vsel %vm8864_vm0, %v8919_v12, %v8914_v3  ;;  %1459 = vmatmul.f32.gmra.mxu2 %v8834_v28  ;;  %v8942_v28 = vsel %vm2081_vm9, %v3045_v29, %v3037_v7  ;;  %v7811_v29 = vld [vmem:[%s13373_s21 + $0x30] sm:$0xff] }
 0x1e7   : > { %1402 = vmatmul.f32.gmra.mxu1 %v8743_v9  ;;  %3162 = vperm.xlu2 %7910, %v3151_v19   ;;  %v8930_v20 = vsel %vm3082_vm8, %v3060_v14, %v7948_v60  ;;  %13594 = vst [vmem:[#allocation33_spill] sm:$0xff] %v8942_v28  ;;  %v3061_v60 = vsel %vm8860_vm10, %v8942_v28, %v8938_v39  ;;  %vm871_vm7 = vcmp.ne.f32.partialorder %v7811_v29, 0.0 }
 0x1e8   : > { %3130 = vrot.lane.b32.xlu1 %v8896_v5, %s7993_s0  ;;  %3096 = vrot.lane.b32.xlu0 %v8930_v20, %s7992_s2  ;;  %v8954_v38 = vsel %vm3082_vm8, %v3061_v60, %v7949_v16  ;;  %v3150_v12 = vsel %vm871_vm7, 1, %v13582_v53 }
 0x1e9   : > { %1512 = vmatmul.f32.gmra.mxu3 %v8778_v45 }
 0x1ec   : > { %v3011_v19 = vpop.permute.xlu1 %3010  ;;  %v3035_v14 = vpop.permute.xlu0 %3034 }
 0x1ed   : > { %1542 = vmatmul.f32.vlgmr.msra.gmra.mxu0 %v8644_v37  ;;  %v3073_v37 = vpop.permute.xlu2 %3072  ;;  %v8968_v7 = vsel %vm2056_vm1, %v3011_v19, %v3019_v41  ;;  %v8972_v54 = vsel %vm2056_vm1, %v3019_v41, %v3011_v19 }
 0x1ee   : > { %1635 = vmatmul.f32.vlgmr.msra.gmra.mxu2 %v8618_v13  ;;  %13595 = vst [vmem:[#allocation34_spill] sm:$0xff] %v8968_v7  ;;  %vm3081_vm8 = vcmp.eq.s32.totalorder %v3073_v37, 1  ;;  %v7951_v37 = vld [vmem:[%s8154_s8 + $0x10] sm:$0xff] }
 0x1ef   : > { %1406 = vmatmul.f32.gmra.mxu1 %v8778_v45  ;;  %3120 = vrot.lane.b32.xlu2 %v8930_v20, %s7993_s0  ;;  %13596 = vst [vmem:[#allocation35_spill] sm:$0xff] %v8972_v54 }
 0x1f0   : > { %3104 = vrot.lane.b32.xlu1 %v8954_v38, %s7992_s2  ;;  %3128 = vrot.lane.b32.xlu0 %v8954_v38, %s7993_s0 }
 0x1f1   : > { %1672 = vmatmul.f32.vlgmr.msra.gmra.mxu3 %v8618_v13 }
 0x1f4   : > { %v3043_v60 = vpop.permute.xlu1 %3042  ;;  %v3009_v29 = vpop.permute.xlu0 %3008 }
 0x1f5   : > { %v8976_v16 = vsel %vm2081_vm9, %v3035_v14, %v3043_v60  ;;  %v8980_v13 = vsel %vm2081_vm9, %v3043_v60, %v3035_v14  ;;  %1547 = vmatmul.f32.gmra.mxu0 %v8703_v1  ;;  %v7950_v14 = vld [vmem:[%s8154_s8 + $0x18] sm:$0xff]  ;;  %v7810_v1 = vld [vmem:[%s13373_s21 + $0x28] sm:$0xff] }
 0x1f6   : > { %13597 = vst [vmem:[#allocation36_spill] sm:$0xff] %v8976_v16  ;;  %v3059_v41 = vsel %vm8860_vm10, %v8980_v13, %v8968_v7  ;;  %v3058_v19 = vsel %vm8864_vm0, %v8976_v16, %v8972_v54  ;;  %1639 = vmatmul.f32.gmra.mxu2 %v8678_v23  ;;  %vm870_vm7 = vcmp.ne.f32.partialorder %v7810_v1, 0.0 }
 0x1f7   : > { %13598 = vst [vmem:[#allocation37_spill] sm:$0xff] %v8980_v13  ;;  %1584 = vmatmul.f32.vlgmr.msra.gmra.mxu1 %v8666_v55  ;;  %v8995_v60 = vsel %vm3081_vm8, %v3059_v41, %v7950_v14  ;;  %v8998_v28 = vsel %vm3081_vm8, %v3058_v19, %v7951_v37  ;;  %v3149_v41 = vsel %vm870_vm7, 1, %v13582_v53  ;;  %v3033_v19 = vpop.permute.xlu2 %3032 }
 0x1f8   : > { %13599 = vst [vmem:[#allocation38_spill] sm:$0xff] %v8995_v60  ;;  %3159 = vperm.xlu1 %7909, %v3150_v12   ;;  %3102 = vrot.lane.b32.xlu0 %v8995_v60, %s7992_s2 }
 0x1f9   : > { %13600 = vst [vmem:[#allocation39_spill] sm:$0xff] %v8998_v28  ;;  %1676 = vmatmul.f32.gmra.mxu3 %v8678_v23  ;;  %3094 = vrot.lane.b32.xlu2 %v8998_v28, %s7992_s2 }
 0x1fc   : > { %v3017_v55 = vpop.permute.xlu1 %3016  ;;  %v3041_v14 = vpop.permute.xlu0 %3040 }
 0x1fd   : > { %1552 = vmatmul.f32.gmra.mxu0 %v8766_v51  ;;  %v9013_v12 = vsel %vm2056_vm1, %v3009_v29, %v3017_v55  ;;  %v9018_v23 = vsel %vm2056_vm1, %v3017_v55, %v3009_v29  ;;  %v9022_v37 = vsel %vm2081_vm9, %v3033_v19, %v3041_v14  ;;  %v9026_v51 = vsel %vm2081_vm9, %v3041_v14, %v3033_v19 }
 0x1fe   : > { %13601 = vst [vmem:[#allocation40_spill] sm:$0xff] %v9013_v12  ;;  %1643 = vmatmul.f32.gmra.mxu2 %v8743_v9  ;;  %v3057_v29 = vsel %vm8860_vm10, %v9026_v51, %v9013_v12 }
 0x1ff   : > { %1590 = vmatmul.f32.gmra.mxu1 %v8731_v27  ;;  %13602 = vst [vmem:[#allocation41_spill] sm:$0xff] %v9018_v23  ;;  %v3056_v27 = vsel %vm8864_vm0, %v9022_v37, %v9018_v23 }
 0x200   : > { %13603 = vst [vmem:[#allocation42_spill] sm:$0xff] %v9022_v37  ;;  %3118 = vrot.lane.b32.xlu1 %v8998_v28, %s7993_s0  ;;  %3156 = vperm.xlu0 %7911, %v3149_v41   ;;  %v7953_v41 = vld [vmem:[%s8154_s8 + $0x8] sm:$0xff] }
 0x201   : > { %13604 = vst [vmem:[#allocation43_spill] sm:$0xff] %v9026_v51  ;;  %1680 = vmatmul.f32.gmra.mxu3 %v8743_v9  ;;  %3126 = vrot.lane.b32.xlu2 %v8995_v60, %s7993_s0  ;;  %v7952_v9 = vld [vmem:[%s8154_s8] sm:$0xff] }
 0x204   : > { %v3070_v1 = vpop.permute.xlu1 %3069 }
 0x205   : > { %vm3080_vm8 = vcmp.eq.s32.totalorder %v3070_v1, 1  ;;  %1557 = vmatmul.f32.gmra.mxu0 %v8796_v56  ;;  %v7809_v56 = vld [vmem:[%s13373_s21 + $0x20] sm:$0xff] }
 0x206   : > { %v9044_v55 = vsel %vm3080_vm8, %v3056_v27, %v7952_v9  ;;  %v9047_v19 = vsel %vm3080_vm8, %v3057_v29, %v7953_v41  ;;  %1647 = vmatmul.f32.gmra.mxu2 %v8778_v45  ;;  %vm869_vm7 = vcmp.ne.f32.partialorder %v7809_v56, 0.0 }
 0x207   : > { %1596 = vmatmul.f32.gmra.mxu1 %v8776_v48  ;;  %13605 = vst [vmem:[#allocation44_spill] sm:$0xff] %v9044_v55  ;;  %v3148_v48 = vsel %vm869_vm7, 1, %v13582_v53 }
 0x208   : > { %13606 = vst [vmem:[#allocation45_spill] sm:$0xff] %v9047_v19  ;;  %3092 = vrot.lane.b32.xlu1 %v9044_v55, %s7992_s2  ;;  %3116 = vrot.lane.b32.xlu0 %v9044_v55, %s7993_s0 }
 0x209   : > { %1684 = vmatmul.f32.gmra.mxu3 %v8778_v45  ;;  %3100 = vrot.lane.b32.xlu2 %v9047_v19, %s7992_s2 }
 0x20f   : > { %1602 = vmatmul.f32.gmra.mxu1 %v8812_v47 }
 0x210   : > { %3124 = vrot.lane.b32.xlu1 %v9047_v19, %s7993_s0 }
 0x211   : > { %3153 = vperm.xlu2 %7910, %v3148_v48  }
 0x227   : > { %v1158_v14 = vpop.f32.mrf.mxu0 }
 0x228   : > { %v1159_v47 = vadd.f32 %v1158_v14, %v8641_v33 }
 0x22d   : > { %v1307_v9 = vpop.f32.mrf.mxu3 }
 0x230   : > { %v1265_v27 = vpop.f32.mrf.mxu2  ;;  %v1166_v29 = vpop.f32.mrf.mxu0 }
 0x231   : > { %v1223_v1 = vpop.f32.mrf.mxu1  ;;  %v1167_v32 = vadd.f32 %v1166_v29, %v8748_v57 }
 0x232   : > { %v1224_v12 = vadd.f32 %v1223_v1, %v1159_v47 }
 0x234   : > { %v1266_v48 = vadd.f32 %v1265_v27, %v1224_v12 }
 0x236   : > { %v1308_v25 = vadd.f32 %v1307_v9, %v1266_v48 }
 0x239   : > { %v1270_v41 = vpop.f32.mrf.mxu2 }
 0x23a   : > { %v1174_v51 = vpop.f32.mrf.mxu0 }
 0x23b   : > { %v1175_v14 = vadd.f32 %v1174_v51, %v8697_v30 }
 0x23c   : > { %v1227_v45 = vpop.f32.mrf.mxu1  ;;  %v1313_v37 = vpop.f32.mrf.mxu3 }
 0x23d   : > { %v1228_v61 = vadd.f32 %v1227_v45, %v1167_v32 }
 0x23f   : > { %v1271_v6 = vadd.f32 %v1270_v41, %v1228_v61 }
 0x241   : > { %v1275_v16 = vpop.f32.mrf.mxu2  ;;  %v1314_v47 = vadd.f32 %v1313_v37, %v1271_v6 }
 0x242   : > { %v1182_v13 = vpop.f32.mrf.mxu0 }
 0x243   : > { %v1183_v37 = vadd.f32 %v1182_v13, %v8588_v40 }
 0x244   : > { %v1231_v56 = vpop.f32.mrf.mxu1  ;;  %v1319_v23 = vpop.f32.mrf.mxu3 }
 0x245   : > { %v1232_v12 = vadd.f32 %v1231_v56, %v1175_v14 }
 0x249   : > { %v1280_v7 = vpop.f32.mrf.mxu2 }
 0x24a   : > { %v1358_v39 = vpop.f32.mrf.mxu0 }
 0x24b   : > { %v1359_v52 = vadd.f32 %v1358_v39, %v1308_v25 }
 0x24c   : > { %v1235_v54 = vpop.f32.mrf.mxu1  ;;  %v1325_v3 = vpop.f32.mrf.mxu3 }
 0x24d   : > { %v1236_v48 = vadd.f32 %v1235_v54, %v1183_v37 }
 0x24f   : > { %v1281_v17 = vadd.f32 %v1280_v7, %v1236_v48 }
 0x251   : > { %v1436_v63 = vpop.f32.mrf.mxu2 }
 0x252   : > { %v1362_v62 = vpop.f32.mrf.mxu0 }
 0x253   : > { %v1363_v29 = vadd.f32 %v1362_v62, %v1314_v47 }
 0x254   : > { %v1395_v59 = vpop.f32.mrf.mxu1  ;;  %v1501_v8 = vpop.f32.mrf.mxu3 }
 0x255   : > { %v9066_v36 = vadd.f32 %v1395_v59, %v1359_v52  ;;  %v1276_v52 = vadd.f32 %v1275_v16, %v1232_v12 }
 0x257   : > { %v9070_v1 = vmul.f32 0.70710677, %v9066_v36  ;;  %v1320_v56 = vadd.f32 %v1319_v23, %v1276_v52 }
 0x259   : > { %v1704_v27 = vmul.f32 %v9070_v1, %v9070_v1  ;;  %v9076_v39 = vpop.f32.mrf.mxu2 }
 0x25a   : > { %v1366_v25 = vpop.f32.mrf.mxu0 }
 0x25b   : > { %v9074_v32 = vmin.f32 %v1704_v27, 16.0  ;;  %v1367_v27 = vadd.f32 %v1366_v25, %v1320_v56 }
 0x25c   : > { %v1399_v61 = vpop.f32.mrf.mxu1  ;;  %v9081_v51 = vpop.f32.mrf.mxu3 }
 0x25d   : > { %v1706_v59 = vmul.f32 2.1237322e-06, %v9074_v32  ;;  %v9079_v9 = vadd.f32 %v1399_v61, %v1363_v29  ;;  %v1717_v6 = vmul.f32 3.8918573e-05, %v9074_v32 }
 0x25f   : > { %v1707_v41 = vadd.f32 0.00028619796, %v1706_v59  ;;  %v9086_v62 = vmul.f32 0.70710677, %v9079_v9  ;;  %v1718_v45 = vadd.f32 0.001143296, %v1717_v6 }
 0x261   : > { %v1708_v14 = vmul.f32 %v1707_v41, %v9074_v32  ;;  %v1784_v16 = vmul.f32 %v9086_v62, %v9086_v62  ;;  %v1719_v47 = vmul.f32 %v1718_v45, %v9074_v32  ;;  %v1452_v61 = vpop.f32.mrf.mxu2  ;;  %v1326_v45 = vadd.f32 %v1325_v3, %v1281_v17 }
 0x262   : > { %v1370_v13 = vpop.f32.mrf.mxu0 }
 0x263   : > { %v1709_v12 = vadd.f32 0.0036580483, %v1708_v14  ;;  %v9092_v29 = vmin.f32 %v1784_v16, 16.0  ;;  %v1720_v26 = vadd.f32 0.014752088, %v1719_v47  ;;  %v1371_v16 = vadd.f32 %v1370_v13, %v1326_v45 }
 0x264   : > { %v1403_v59 = vpop.f32.mrf.mxu1  ;;  %v9096_v23 = vpop.f32.mrf.mxu3 }
 0x265   : > { %v9094_v58 = vadd.f32 %v1403_v59, %v1367_v27  ;;  %v1721_v54 = vmul.f32 %v1720_v26, %v9074_v32  ;;  %v1710_v52 = vmul.f32 %v1709_v12, %v9074_v32  ;;  %v1786_v6 = vmul.f32 2.1237322e-06, %v9092_v29 }
 0x266   : > { %v1797_v41 = vmul.f32 3.8918573e-05, %v9092_v29 }
 0x267   : > { %v9102_v37 = vmul.f32 0.70710677, %v9094_v58  ;;  %v1722_v25 = vadd.f32 0.112945676, %v1721_v54  ;;  %v1711_v48 = vadd.f32 0.05243302, %v1710_v52  ;;  %v1437_v54 = vadd.f32 %v1436_v63, %v8641_v33 }
 0x268   : > { %v1787_v14 = vadd.f32 0.00028619796, %v1786_v6  ;;  %v1798_v31 = vadd.f32 0.001143296, %v1797_v41 }
 0x269   : > { %v1864_v7 = vmul.f32 %v9102_v37, %v9102_v37  ;;  %v1723_v56 = vmul.f32 %v1722_v25, %v9074_v32  ;;  %v1460_v26 = vpop.f32.mrf.mxu2  ;;  %v1712_v25 = vmul.f32 %v1711_v48, %v9074_v32  ;;  %v1502_v41 = vadd.f32 %v1501_v8, %v1437_v54 }
 0x26a   : > { %v1543_v27 = vpop.f32.mrf.mxu0  ;;  %v1788_v52 = vmul.f32 %v1787_v14, %v9092_v29  ;;  %v1799_v45 = vmul.f32 %v1798_v31, %v9092_v29 }
 0x26b   : > { %v9108_v47 = vmin.f32 %v1864_v7, 16.0  ;;  %v1724_v59 = vadd.f32 0.4994258, %v1723_v56 }
 0x26c   : > { %v1407_v12 = vpop.f32.mrf.mxu1  ;;  %v9113_v17 = vpop.f32.mrf.mxu3  ;;  %v1789_v14 = vadd.f32 0.0036580483, %v1788_v52  ;;  %v1800_v60 = vadd.f32 0.014752088, %v1799_v45 }
 0x26d   : > { %v9111_v49 = vadd.f32 %v1407_v12, %v1371_v16  ;;  %v1866_v3 = vmul.f32 2.1237322e-06, %v9108_v47  ;;  %v1725_v6 = vmul.f32 %v1724_v59, %v9074_v32  ;;  %v1877_v63 = vmul.f32 3.8918573e-05, %v9108_v47 }
 0x26e   : > { %v1544_v16 = vadd.f32 %v1543_v27, %v1502_v41  ;;  %v1713_v12 = vadd.f32 0.18741608, %v1712_v25  ;;  %v1445_v59 = vadd.f32 %v9076_v39, %v8748_v57  ;;  %v1790_v25 = vmul.f32 %v1789_v14, %v9092_v29 }
 0x26f   : > { %v9119_v13 = vmul.f32 0.70710677, %v9111_v49  ;;  %v1867_v33 = vadd.f32 0.00028619796, %v1866_v3  ;;  %v9126_v56 = vadd.f32 1.0, %v1725_v6  ;;  %v1801_v52 = vmul.f32 %v1800_v60, %v9092_v29 }
 0x270   : > { %v1878_v54 = vadd.f32 0.001143296, %v1877_v63  ;;  %v1714_v27 = vmul.f32 %v1713_v12, %v9074_v32  ;;  %v1506_v45 = vadd.f32 %v9081_v51, %v1445_v59  ;;  %v1453_v39 = vadd.f32 %v1452_v61, %v8697_v30 }
 0x271   : > { %v1944_v7 = vmul.f32 %v9119_v13, %v9119_v13  ;;  %v1636_v48 = vpop.f32.mrf.mxu2  ;;  %7912 = vrcp.f32 %v9126_v56  ;;  %v1868_v3 = vmul.f32 %v1867_v33, %v9108_v47  ;;  %v1802_v63 = vadd.f32 0.112945676, %v1801_v52 }
 0x272   : > { %v1548_v42 = vpop.f32.mrf.mxu0  ;;  %v1879_v57 = vmul.f32 %v1878_v54, %v9108_v47  ;;  %v1715_v32 = vadd.f32 1.1283791, %v1714_v27  ;;  %v1791_v12 = vadd.f32 0.05243302, %v1790_v25  ;;  %v1510_v30 = vadd.f32 %v9096_v23, %v1453_v39 }
 0x273   : > { %v9132_v55 = vmin.f32 %v1944_v7, 16.0  ;;  %v1549_v7 = vadd.f32 %v1548_v42, %v1506_v45  ;;  %v1803_v52 = vmul.f32 %v1802_v63, %v9092_v29  ;;  %v1461_v42 = vadd.f32 %v1460_v26, %v8588_v40 }
 0x274   : > { %v1585_v19 = vpop.f32.mrf.mxu1  ;;  %v1673_v8 = vpop.f32.mrf.mxu3  ;;  %v1880_v59 = vadd.f32 0.014752088, %v1879_v57  ;;  %v1716_v25 = vmul.f32 %v1715_v32, %v9070_v1  ;;  %v1792_v45 = vmul.f32 %v1791_v12, %v9092_v29  ;;  %v1736_v57 = vand.u32 2147483647, %v9126_v56 }
 0x275   : > { %v1586_v31 = vadd.f32 %v1585_v19, %v1544_v16  ;;  %v1869_v19 = vadd.f32 0.0036580483, %v1868_v3  ;;  %v1946_v41 = vmul.f32 2.1237322e-06, %v9132_v55  ;;  %v1738_v39 = vand.u32 2147483648, %v9126_v56 }
 0x276   : > { %vm1732_vm7 = vweird.f32 %v9126_v56  ;;  %vm1737_vm2 = vcmp.eq.f32.partialorder %v1736_v57, 8.507059e+37 }
 0x277   : > { %v1637_v6 = vadd.f32 %v1636_v48, %v1586_v31  ;;  %v7913_v33 = vpop.eup %7912  ;;  %v1870_v54 = vmul.f32 %v1869_v19, %v9108_v47  ;;  %v1947_v61 = vadd.f32 0.00028619796, %v1946_v41  ;;  %v1804_v19 = vadd.f32 0.4994258, %v1803_v52 }
 0x278   : > { %v1728_v51 = vmul.f32 %v7913_v33, %v9126_v56  ;;  %v1881_v41 = vmul.f32 %v1880_v59, %v9108_v47  ;;  %vm1733_vm8 = vweird.f32 %v7913_v33 }
 0x279   : > { %v9141_v16 = vadd.f32 %v1673_v8, %v1637_v6  ;;  %v1640_v48 = vpop.f32.mrf.mxu2  ;;  %v1871_v40 = vadd.f32 0.05243302, %v1870_v54  ;;  %v1948_v26 = vmul.f32 %v1947_v61, %v9132_v55  ;;  %v1805_v63 = vmul.f32 %v1804_v19, %v9092_v29  ;;  %vm1734_vm6 = vmor %vm1732_vm7, %vm1733_vm8 }
 0x27a   : > { %v1553_v3 = vpop.f32.mrf.mxu0  ;;  %v1729_v27 = vsub.f32 1.0, %v1728_v51  ;;  %v1739_v61 = vor.u32 1.1754944e-38, %v1738_v39  ;;  %v1882_v52 = vadd.f32 0.112945676, %v1881_v41  ;;  %v1514_v39 = vadd.f32 %v9113_v17, %v1461_v42 }
 0x27b   : > { %v9149_v8 = vmul.f32 0.70710677, %v9141_v16  ;;  %v9166_v51 = vadd.f32 1.0, %v1805_v63 }
 0x27c   : > { %v1591_v14 = vpop.f32.mrf.mxu1  ;;  %v1677_v60 = vpop.f32.mrf.mxu3  ;;  %v1730_v23 = vmul.f32 %v7913_v33, %v1729_v27 }
 0x27d   : > { %v1592_v31 = vadd.f32 %v1591_v14, %v1549_v7  ;;  %v1744_v1 = vmul.f32 %v9149_v8, %v9149_v8  ;;  %7914 = vrcp.f32 %v9166_v51 }
 0x27e   : > { %v1731_v14 = vadd.f32 %v7913_v33, %v1730_v23 }
 0x27f   : > { %v1641_v6 = vadd.f32 %v1640_v48, %v1592_v31  ;;  %v1554_v48 = vadd.f32 %v1553_v3, %v1510_v30  ;;  %v1793_v31 = vadd.f32 0.18741608, %v1792_v45  ;;  %v1872_v30 = vmul.f32 %v1871_v40, %v9108_v47 }
 0x280   : > { %v1735_v27 = vsel %vm1734_vm6, %v7913_v33, %v1731_v14  ;;  %v1949_v45 = vadd.f32 0.0036580483, %v1948_v26  ;;  %v9173_v56 = vmin.f32 %v1744_v1, 16.0 }
 0x281   : > { %v9154_v7 = vadd.f32 %v1677_v60, %v1641_v6  ;;  %v1644_v12 = vpop.f32.mrf.mxu2  ;;  %v1957_v6 = vmul.f32 3.8918573e-05, %v9132_v55  ;;  %v1740_v19 = vsel %vm1737_vm2, %v1739_v61, %v1735_v27  ;;  %v1873_v14 = vadd.f32 0.18741608, %v1872_v30 }
 0x282   : > { %v1558_v23 = vpop.f32.mrf.mxu0  ;;  %v1741_v63 = vmul.f32 %v1740_v19, %v1716_v25  ;;  %v1950_v26 = vmul.f32 %v1949_v45, %v9132_v55  ;;  %v1746_v1 = vmul.f32 2.1237322e-06, %v9173_v56  ;;  %v1688_v25 = vmul.f32 0.5, %v9066_v36 }
 0x283   : > { %v9163_v32 = vmul.f32 0.70710677, %v9154_v7  ;;  %v1958_v40 = vadd.f32 0.001143296, %v1957_v6  ;;  %v1874_v36 = vmul.f32 %v1873_v14, %v9108_v47  ;;  %vm1812_vm2 = vweird.f32 %v9166_v51 }
 0x284   : > { %v1597_v60 = vpop.f32.mrf.mxu1  ;;  %v1681_v54 = vpop.f32.mrf.mxu3  ;;  %v7824_v33 = vclamps-f32 %v1741_v63, 1.0 }
 0x285   : > { %v1598_v59 = vadd.f32 %v1597_v60, %v1554_v48  ;;  %v1824_v3 = vmul.f32 %v9163_v32, %v9163_v32  ;;  %v1883_v48 = vmul.f32 %v1882_v52, %v9108_v47  ;;  %v1794_v60 = vmul.f32 %v1793_v31, %v9092_v29 }
 0x286   : > { %v2024_v42 = vadd.f32 1.0, %v7824_v33  ;;  %v1959_v6 = vmul.f32 %v1958_v40, %v9132_v55  ;;  %v1818_v40 = vand.u32 2147483648, %v9166_v51 }
 0x287   : > { %v1645_v57 = vadd.f32 %v1644_v12, %v1598_v59  ;;  %v9180_v28 = vmin.f32 %v1824_v3, 16.0  ;;  %v1559_v12 = vadd.f32 %v1558_v23, %v1514_v39  ;;  %v7915_v59 = vpop.eup %7914  ;;  %v1884_v52 = vadd.f32 0.4994258, %v1883_v48 }
 0x288   : > { %v1808_v31 = vmul.f32 %v7915_v59, %v9166_v51  ;;  %v1795_v30 = vadd.f32 1.1283791, %v1794_v60  ;;  %v9191_v27 = vmul.f32 %v2024_v42, %v1688_v25  ;;  %v1747_v39 = vadd.f32 0.00028619796, %v1746_v1 }
 0x289   : > { %v9176_v41 = vadd.f32 %v1681_v54, %v1645_v57  ;;  %v1648_v61 = vpop.f32.mrf.mxu2  ;;  %v1826_v3 = vmul.f32 2.1237322e-06, %v9180_v28  ;;  %v1885_v45 = vmul.f32 %v1884_v52, %v9108_v47  ;;  %v1951_v57 = vadd.f32 0.05243302, %v1950_v26 }
 0x28a   : > { %v1809_v63 = vsub.f32 1.0, %v1808_v31  ;;  %2065 = vrot.lane.b32.xlu2 %v9191_v27, %s7991_s30  ;;  %2040 = vrot.lane.b32.xlu0 %v9191_v27, %s7990_s5  ;;  %vm1813_vm6 = vweird.f32 %v7915_v59  ;;  %v1816_v47 = vand.u32 2147483647, %v9166_v51  ;;  %v1960_v14 = vadd.f32 0.014752088, %v1959_v6 }
 0x28b   : > { %v9186_v17 = vmul.f32 0.70710677, %v9176_v41  ;;  %v9202_v60 = vadd.f32 1.0, %v1885_v45  ;;  %v1827_v26 = vadd.f32 0.00028619796, %v1826_v3  ;;  %vm1814_vm8 = vmor %vm1812_vm2, %vm1813_vm6  ;;  %v1952_v31 = vmul.f32 %v1951_v57, %v9132_v55 }
 0x28c   : > { %v1603_v54 = vpop.f32.mrf.mxu1  ;;  %v1685_v23 = vpop.f32.mrf.mxu3  ;;  %v1810_v33 = vmul.f32 %v7915_v59, %v1809_v63  ;;  %v1757_v42 = vmul.f32 3.8918573e-05, %v9173_v56  ;;  %vm1817_vm7 = vcmp.eq.f32.partialorder %v1816_v47, 8.507059e+37  ;;  %v1961_v3 = vmul.f32 %v1960_v14, %v9132_v55 }
 0x28d   : > { %v1604_v29 = vadd.f32 %v1603_v54, %v1559_v12  ;;  %v1904_v48 = vmul.f32 %v9186_v17, %v9186_v17  ;;  %7916 = vrcp.f32 %v9202_v60  ;;  %v1796_v12 = vmul.f32 %v1795_v30, %v9086_v62 }
 0x28e   : > { %v1811_v25 = vadd.f32 %v7915_v59, %v1810_v33  ;;  %v1875_v54 = vadd.f32 1.1283791, %v1874_v36  ;;  %v1828_v62 = vmul.f32 %v1827_v26, %v9180_v28  ;;  %v1690_v45 = vmul.f32 0.5, %v9079_v9 }
 0x28f   : > { %v1649_v19 = vadd.f32 %v1648_v61, %v1604_v29  ;;  %v1748_v61 = vmul.f32 %v1747_v39, %v9173_v56  ;;  %v9212_v52 = vmin.f32 %v1904_v48, 16.0  ;;  %v1819_v29 = vor.u32 1.1754944e-38, %v1818_v40 }
 0x290   : > { %v1815_v6 = vsel %vm1814_vm8, %v7915_v59, %v1811_v25  ;;  %v1837_v59 = vmul.f32 3.8918573e-05, %v9180_v28  ;;  %v1876_v57 = vmul.f32 %v1875_v54, %v9102_v37  ;;  %v1953_v40 = vadd.f32 0.18741608, %v1952_v31 }
 0x291   : > { %v9205_v1 = vadd.f32 %v1685_v23, %v1649_v19  ;;  %v1820_v51 = vsel %vm1817_vm7, %v1819_v29, %v1815_v6  ;;  %v1962_v19 = vadd.f32 0.112945676, %v1961_v3  ;;  %v1758_v23 = vadd.f32 0.001143296, %v1757_v42 }
 0x292   : > { %v1821_v36 = vmul.f32 %v1820_v51, %v1796_v12  ;;  %v1749_v39 = vadd.f32 0.0036580483, %v1748_v61  ;;  %v1906_v48 = vmul.f32 2.1237322e-06, %v9212_v52  ;;  %v1829_v14 = vadd.f32 0.0036580483, %v1828_v62 }
 0x293   : > { %v9218_v30 = vmul.f32 0.70710677, %v9205_v1  ;;  %v7917_v63 = vpop.eup %7916  ;;  %v1963_v9 = vmul.f32 %v1962_v19, %v9132_v55  ;;  %v1759_v12 = vmul.f32 %v1758_v23, %v9173_v56  ;;  %v1896_v61 = vand.u32 2147483647, %v9202_v60 }
 0x294   : > { %v7826_v33 = vclamps-f32 %v1821_v36, 1.0  ;;  %v1888_v47 = vmul.f32 %v7917_v63, %v9202_v60  ;;  %v1838_v29 = vadd.f32 0.001143296, %v1837_v59  ;;  %v1750_v6 = vmul.f32 %v1749_v39, %v9173_v56 }
 0x295   : > { %v1984_v26 = vmul.f32 %v9218_v30, %v9218_v30  ;;  %v1907_v37 = vadd.f32 0.00028619796, %v1906_v48  ;;  %v1898_v54 = vand.u32 2147483648, %v9202_v60  ;;  %v1964_v31 = vadd.f32 0.4994258, %v1963_v9 }
 0x296   : > { %v2026_v25 = vadd.f32 1.0, %v7826_v33  ;;  %v1889_v42 = vsub.f32 1.0, %v1888_v47  ;;  %vm1893_vm6 = vweird.f32 %v7917_v63  ;;  %v1760_v51 = vadd.f32 0.014752088, %v1759_v12 }
 0x297   : > { %v1830_v36 = vmul.f32 %v1829_v14, %v9180_v28  ;;  %v9235_v19 = vmin.f32 %v1984_v26, 16.0  ;;  %v1965_v23 = vmul.f32 %v1964_v31, %v9132_v55  ;;  %v1839_v33 = vmul.f32 %v1838_v29, %v9180_v28 }
 0x298   : > { %v9232_v3 = vmul.f32 %v2026_v25, %v1690_v45  ;;  %v1890_v62 = vmul.f32 %v7917_v63, %v1889_v42  ;;  %vm1892_vm2 = vweird.f32 %v9202_v60  ;;  %v1761_v45 = vmul.f32 %v1760_v51, %v9173_v56 }
 0x299   : > { %v1917_v48 = vmul.f32 3.8918573e-05, %v9212_v52  ;;  %v1908_v59 = vmul.f32 %v1907_v37, %v9212_v52  ;;  %vm1894_vm8 = vmor %vm1892_vm2, %vm1893_vm6  ;;  %vm1897_vm7 = vcmp.eq.f32.partialorder %v1896_v61, 8.507059e+37  ;;  %v1899_v47 = vor.u32 1.1754944e-38, %v1898_v54 }
 0x29a   : > { %2067 = vrot.lane.b32.xlu0 %v9232_v3, %s7991_s30  ;;  %2042 = vrot.lane.b32.xlu1 %v9232_v3, %s7990_s5  ;;  %v1891_v39 = vadd.f32 %v7917_v63, %v1890_v62  ;;  %v9247_v14 = vadd.f32 1.0, %v1965_v23  ;;  %v1762_v9 = vadd.f32 0.112945676, %v1761_v45  ;;  %v1840_v12 = vadd.f32 0.014752088, %v1839_v33 }
 0x29b   : > { %v1918_v25 = vadd.f32 0.001143296, %v1917_v48  ;;  %v1986_v42 = vmul.f32 2.1237322e-06, %v9235_v19  ;;  %v1751_v60 = vadd.f32 0.05243302, %v1750_v6 }
 0x29c   : > { %v1895_v26 = vsel %vm1894_vm8, %v7917_v63, %v1891_v39  ;;  %7918 = vrcp.f32 %v9247_v14  ;;  %v1997_v62 = vmul.f32 3.8918573e-05, %v9235_v19  ;;  %v1692_v37 = vmul.f32 0.5, %v9094_v58 }
 0x29d   : > { %v1900_v29 = vsel %vm1897_vm7, %v1899_v47, %v1895_v26  ;;  %v1909_v51 = vadd.f32 0.0036580483, %v1908_v59  ;;  %v1763_v61 = vmul.f32 %v1762_v9, %v9173_v56  ;;  %v1841_v54 = vmul.f32 %v1840_v12, %v9180_v28 }
 0x29e   : > { %v1901_v31 = vmul.f32 %v1900_v29, %v1876_v57  ;;  %v1954_v63 = vmul.f32 %v1953_v40, %v9132_v55  ;;  %v1831_v23 = vadd.f32 0.05243302, %v1830_v36  ;;  %v1919_v39 = vmul.f32 %v1918_v25, %v9212_v52 }
 0x29f   : > { %v1987_v45 = vadd.f32 0.00028619796, %v1986_v42  ;;  %v1764_v48 = vadd.f32 0.4994258, %v1763_v61  ;;  %v1842_v47 = vadd.f32 0.112945676, %v1841_v54  ;;  %v1752_v57 = vmul.f32 %v1751_v60, %v9173_v56 }
 0x2a0   : > { %v7828_v33 = vclamps-f32 %v1901_v31, 1.0  ;;  %v1920_v26 = vadd.f32 0.014752088, %v1919_v39  ;;  %v1998_v29 = vadd.f32 0.001143296, %v1997_v62  ;;  %v1910_v59 = vmul.f32 %v1909_v51, %v9212_v52 }
 0x2a1   : > { %v1765_v9 = vmul.f32 %v1764_v48, %v9173_v56  ;;  %v1843_v12 = vmul.f32 %v1842_v47, %v9180_v28  ;;  %v1955_v55 = vadd.f32 1.1283791, %v1954_v63  ;;  %v1988_v42 = vmul.f32 %v1987_v45, %v9235_v19 }
 0x2a2   : > { %v2028_v6 = vadd.f32 1.0, %v7828_v33  ;;  %v7919_v58 = vpop.eup %7918  ;;  %v1921_v25 = vmul.f32 %v1920_v26, %v9212_v52  ;;  %v1999_v62 = vmul.f32 %v1998_v29, %v9235_v19  ;;  %v1753_v61 = vadd.f32 0.18741608, %v1752_v57 }
 0x2a3   : > { %v1968_v36 = vmul.f32 %v7919_v58, %v9247_v14  ;;  %v9266_v60 = vadd.f32 1.0, %v1765_v9  ;;  %v1844_v31 = vadd.f32 0.4994258, %v1843_v12  ;;  %v1832_v51 = vmul.f32 %v1831_v23, %v9180_v28 }
 0x2a4   : > { %v9261_v40 = vmul.f32 %v2028_v6, %v1692_v37  ;;  %v1922_v54 = vadd.f32 0.112945676, %v1921_v25  ;;  %v1911_v63 = vadd.f32 0.05243302, %v1910_v59  ;;  %v1976_v33 = vand.u32 2147483647, %v9247_v14 }
 0x2a5   : > { %v1969_v37 = vsub.f32 1.0, %v1968_v36  ;;  %v1978_v39 = vand.u32 2147483648, %v9247_v14  ;;  %7920 = vrcp.f32 %v9266_v60  ;;  %vm1973_vm6 = vweird.f32 %v7919_v58 }
 0x2a6   : > { %2044 = vrot.lane.b32.xlu2 %v9261_v40, %s7990_s5  ;;  %2069 = vrot.lane.b32.xlu1 %v9261_v40, %s7991_s30  ;;  %v1845_v48 = vmul.f32 %v1844_v31, %v9180_v28  ;;  %v1923_v23 = vmul.f32 %v1922_v54, %v9212_v52  ;;  %v1956_v47 = vmul.f32 %v1955_v55, %v9119_v13  ;;  %v1989_v57 = vadd.f32 0.0036580483, %v1988_v42 }
 0x2a7   : > { %v1970_v45 = vmul.f32 %v7919_v58, %v1969_v37  ;;  %v2000_v6 = vadd.f32 0.014752088, %v1999_v62  ;;  %vm1972_vm2 = vweird.f32 %v9247_v14  ;;  %v1754_v9 = vmul.f32 %v1753_v61, %v9173_v56 }
 0x2a8   : > { %v9281_v29 = vadd.f32 1.0, %v1845_v48  ;;  %v1924_v59 = vadd.f32 0.4994258, %v1923_v23  ;;  %v1833_v12 = vadd.f32 0.18741608, %v1832_v51  ;;  %vm1974_vm8 = vmor %vm1972_vm2, %vm1973_vm6  ;;  %v1979_v36 = vor.u32 1.1754944e-38, %v1978_v39 }
 0x2a9   : > { %v1971_v26 = vadd.f32 %v7919_v58, %v1970_v45  ;;  %v2001_v25 = vmul.f32 %v2000_v6, %v9235_v19  ;;  %v1912_v31 = vmul.f32 %v1911_v63, %v9212_v52  ;;  %vm1977_vm7 = vcmp.eq.f32.partialorder %v1976_v33, 8.507059e+37 }
 0x2aa   : > { %7922 = vrcp.f32 %v9281_v29  ;;  %v1990_v55 = vmul.f32 %v1989_v57, %v9235_v19  ;;  %v1925_v42 = vmul.f32 %v1924_v59, %v9212_v52  ;;  %v1755_v61 = vadd.f32 1.1283791, %v1754_v9 }
 0x2ab   : > { %v1975_v37 = vsel %vm1974_vm8, %v7919_v58, %v1971_v26  ;;  %v7921_v13 = vpop.eup %7920  ;;  %v2002_v62 = vadd.f32 0.112945676, %v2001_v25  ;;  %v1834_v51 = vmul.f32 %v1833_v12, %v9180_v28  ;;  %v1694_v63 = vmul.f32 0.5, %v9111_v49 }
 0x2ac   : > { %v1980_v14 = vsel %vm1977_vm7, %v1979_v36, %v1975_v37  ;;  %v1768_v56 = vmul.f32 %v7921_v13, %v9266_v60  ;;  %v9291_v39 = vadd.f32 1.0, %v1925_v42  ;;  %v1913_v33 = vadd.f32 0.18741608, %v1912_v31 }
 0x2ad   : > { %v1981_v54 = vmul.f32 %v1980_v14, %v1956_v47  ;;  %v2003_v58 = vmul.f32 %v2002_v62, %v9235_v19  ;;  %v1991_v23 = vadd.f32 0.05243302, %v1990_v55  ;;  %v1776_v57 = vand.u32 2147483647, %v9266_v60 }
 0x2ae   : > { %v1769_v48 = vsub.f32 1.0, %v1768_v56  ;;  %v1778_v6 = vand.u32 2147483648, %v9266_v60  ;;  %7924 = vrcp.f32 %v9291_v39  ;;  %vm1773_vm6 = vweird.f32 %v7921_v13 }
 0x2af   : > { %v7830_v45 = vclamps-f32 %v1981_v54, 1.0  ;;  %v2004_v28 = vadd.f32 0.4994258, %v2003_v58  ;;  %v1756_v9 = vmul.f32 %v1755_v61, %v9149_v8  ;;  %v1835_v12 = vadd.f32 1.1283791, %v1834_v51 }
 0x2b0   : > { %v7923_v47 = vpop.eup %7922  ;;  %v1770_v59 = vmul.f32 %v7921_v13, %v1769_v48  ;;  %vm1772_vm2 = vweird.f32 %v9266_v60  ;;  %v1914_v37 = vmul.f32 %v1913_v33, %v9212_v52  ;;  %v1992_v55 = vmul.f32 %v1991_v23, %v9235_v19 }
 0x2b1   : > { %v2030_v26 = vadd.f32 1.0, %v7830_v45  ;;  %v1848_v49 = vmul.f32 %v7923_v47, %v9281_v29  ;;  %v2005_v31 = vmul.f32 %v2004_v28, %v9235_v19  ;;  %vm1774_vm8 = vmor %vm1772_vm2, %vm1773_vm6  ;;  %v1779_v14 = vor.u32 1.1754944e-38, %v1778_v6 }
 0x2b2   : > { %v1771_v25 = vadd.f32 %v7921_v13, %v1770_v59  ;;  %vm1777_vm7 = vcmp.eq.f32.partialorder %v1776_v57, 8.507059e+37  ;;  %v1858_v62 = vand.u32 2147483648, %v9281_v29  ;;  %vm1853_vm5 = vweird.f32 %v7923_v47 }
 0x2b3   : > { %v9300_v36 = vmul.f32 %v2030_v26, %v1694_v63  ;;  %v1849_v42 = vsub.f32 1.0, %v1848_v49  ;;  %v9311_v60 = vadd.f32 1.0, %v2005_v31  ;;  %v1856_v61 = vand.u32 2147483647, %v9281_v29 }
 0x2b4   : > { %v1775_v8 = vsel %vm1774_vm8, %v7921_v13, %v1771_v25  ;;  %v7925_v54 = vpop.eup %7924  ;;  %v1689_v51 = vmul.f32 0.5, %v9141_v16  ;;  %v1836_v13 = vmul.f32 %v1835_v12, %v9163_v32  ;;  %v1915_v33 = vadd.f32 1.1283791, %v1914_v37 }
 0x2b5   : > { %2071 = vrot.lane.b32.xlu2 %v9300_v36, %s7991_s30  ;;  %2046 = vrot.lane.b32.xlu0 %v9300_v36, %s7990_s5  ;;  %v1780_v56 = vsel %vm1777_vm7, %v1779_v14, %v1775_v8  ;;  %v1850_v52 = vmul.f32 %v7923_v47, %v1849_v42  ;;  %v1928_v63 = vmul.f32 %v7925_v54, %v9291_v39  ;;  %7926 = vrcp.f32 %v9311_v60 }
 0x2b6   : > { %v1781_v58 = vmul.f32 %v1780_v56, %v1756_v9  ;;  %vm1852_vm6 = vweird.f32 %v9281_v29  ;;  %v1993_v48 = vadd.f32 0.18741608, %v1992_v55  ;;  %v1859_v57 = vor.u32 1.1754944e-38, %v1858_v62 }
 0x2b7   : > { %v1851_v45 = vadd.f32 %v7923_v47, %v1850_v52  ;;  %vm1854_vm2 = vmor %vm1852_vm6, %vm1853_vm5  ;;  %v1929_v6 = vsub.f32 1.0, %v1928_v63  ;;  %vm1857_vm8 = vcmp.eq.f32.partialorder %v1856_v61, 8.507059e+37  ;;  %v1936_v16 = vand.u32 2147483647, %v9291_v39 }
 0x2b8   : > { %v7825_v23 = vclamps-f32 %v1781_v58, 1.0  ;;  %v1938_v59 = vand.u32 2147483648, %v9291_v39  ;;  %vm1933_vm7 = vweird.f32 %v7925_v54  ;;  %v1994_v25 = vmul.f32 %v1993_v48, %v9235_v19 }
 0x2b9   : > { %v1855_v26 = vsel %vm1854_vm2, %v7923_v47, %v1851_v45  ;;  %v1930_v49 = vmul.f32 %v7925_v54, %v1929_v6  ;;  %vm1932_vm5 = vweird.f32 %v9291_v39  ;;  %v1916_v14 = vmul.f32 %v1915_v33, %v9186_v17 }
 0x2ba   : > { %v2025_v28 = vadd.f32 1.0, %v7825_v23  ;;  %v1860_v9 = vsel %vm1857_vm8, %v1859_v57, %v1855_v26  ;;  %vm1934_vm6 = vmor %vm1932_vm5, %vm1933_vm7  ;;  %v1939_v47 = vor.u32 1.1754944e-38, %v1938_v59  ;;  %vm1937_vm2 = vcmp.eq.f32.partialorder %v1936_v16, 8.507059e+37  ;;  %v9349_v26 = vpop.permute.xlu0 %2390 }
 0x2bb   : > { %v1861_v32 = vmul.f32 %v1860_v9, %v1836_v13  ;;  %v7927_v12 = vpop.eup %7926  ;;  %v1931_v31 = vadd.f32 %v7925_v54, %v1930_v49  ;;  %v1691_v19 = vmul.f32 0.5, %v9154_v7  ;;  %v1995_v56 = vadd.f32 1.1283791, %v1994_v25  ;;  %13608 = vst [vmem:[#allocation47_spill] sm:$0xff] %v9349_v26  ;;  %v9362_v9 = vpop.permute.xlu1 %2384 }
 0x2bc   : > { %v9322_v29 = vmul.f32 %v2025_v28, %v1689_v51  ;;  %v2008_v55 = vmul.f32 %v7927_v12, %v9311_v60  ;;  %v2018_v61 = vand.u32 2147483648, %v9311_v60  ;;  %vm2013_vm8 = vweird.f32 %v7927_v12  ;;  %13609 = vst [vmem:[#allocation48_spill] sm:$0xff] %v9362_v9 }
 0x2bd   : > { %v7827_v37 = vclamps-f32 %v1861_v32, 1.0  ;;  %v1935_v42 = vsel %vm1934_vm6, %v7925_v54, %v1931_v31  ;;  %v2016_v58 = vand.u32 2147483647, %v9311_v60  ;;  %vm2012_vm7 = vweird.f32 %v9311_v60  ;;  %v9347_v60 = vpop.permute.xlu2 %2387 }
 0x2be   : > { %2073 = vrot.lane.b32.xlu0 %v9322_v29, %s7991_s30  ;;  %2048 = vrot.lane.b32.xlu1 %v9322_v29, %s7990_s5  ;;  %v1940_v62 = vsel %vm1937_vm2, %v1939_v47, %v1935_v42  ;;  %v2009_v39 = vsub.f32 1.0, %v2008_v55  ;;  %v1693_v7 = vmul.f32 0.5, %v9176_v41  ;;  %vm2014_vm5 = vmor %vm2012_vm7, %vm2013_vm8  ;;  %v2019_v33 = vor.u32 1.1754944e-38, %v2018_v61  ;;  %13607 = vst [vmem:[#allocation46_spill] sm:$0xff] %v9347_v60 }
 0x2bf   : > { %v2027_v8 = vadd.f32 1.0, %v7827_v37  ;;  %v1941_v52 = vmul.f32 %v1940_v62, %v1916_v14  ;;  %v1996_v45 = vmul.f32 %v1995_v56, %v9218_v30  ;;  %vm2017_vm6 = vcmp.eq.f32.partialorder %v2016_v58, 8.507059e+37 }
 0x2c0   : > { %v2010_v17 = vmul.f32 %v7927_v12, %v2009_v39  ;;  %v1695_v16 = vmul.f32 0.5, %v9205_v1  ;;  %vm2119_vm2 = vcmp.eq.s32.totalorder %v8819_v0, 1  ;;  %vm2120_vm8 = vcmp.eq.s32.totalorder %v8693_v15, 1 }
 0x2c1   : > { %v9333_v51 = vmul.f32 %v2027_v8, %v1691_v19  ;;  %v7829_v63 = vclamps-f32 %v1941_v52, 1.0  ;;  %vm2121_vm7 = vcmp.eq.s32.totalorder %v8751_v22, 1 }
 0x2c2   : > { %v2011_v54 = vadd.f32 %v7927_v12, %v2010_v17  ;;  %v9364_v49 = vpop.permute.xlu0 %2381 }
 0x2c3   : > { %2050 = vrot.lane.b32.xlu2 %v9333_v51, %s7990_s5  ;;  %v2029_v13 = vadd.f32 1.0, %v7829_v63  ;;  %13610 = vst [vmem:[#allocation49_spill] sm:$0xff] %v9364_v49  ;;  %v9366_v32 = vpop.permute.xlu1 %3098 }
 0x2c4   : > { %v2015_v48 = vsel %vm2014_vm5, %v7927_v12, %v2011_v54  ;;  %vm2122_vm5 = vcmp.eq.s32.totalorder %v8784_v43, 1  ;;  %v7821_v43 = vld [vmem:[%s13374_s22 + $0x2] sm:$0x3] }
 0x2c5   : > { %v9343_v23 = vmul.f32 %v2029_v13, %v1693_v7  ;;  %v2020_v57 = vsel %vm2017_vm6, %v2019_v33, %v2015_v48  ;;  %v9360_v28 = vpop.permute.xlu2 %3106 }
 0x2c6   : > { %2075 = vrot.lane.b32.xlu1 %v9333_v51, %s7991_s30  ;;  %v2021_v6 = vmul.f32 %v2020_v57, %v1996_v45 }
 0x2c7   : > { %2052 = vrot.lane.b32.xlu0 %v9343_v23, %s7990_s5 }
 0x2c8   : > { %v7831_v41 = vclamps-f32 %v2021_v6, 1.0 }
 0x2ca   : > { %v2031_v30 = vadd.f32 1.0, %v7831_v41  ;;  %v9370_v12 = vpop.permute.xlu0 %3122 }
 0x2cb   : > { %2077 = vrot.lane.b32.xlu2 %v9343_v23, %s7991_s30  ;;  %v9372_v25 = vpop.permute.xlu1 %3130 }
 0x2cc   : > { %v9354_v59 = vmul.f32 %v2031_v30, %v1695_v16 }
 0x2cd   : > { %v9368_v1 = vpop.permute.xlu2 %3162 }
 0x2ce   : > { %2054 = vrot.lane.b32.xlu1 %v9354_v59, %s7990_s5  ;;  %s13671_s5 = smov 16  }
 0x2cf   : > { %2079 = vrot.lane.b32.xlu0 %v9354_v59, %s7991_s30  ;;  %s13339_s30 = scalar_lea.vmem %s13377_s25, %s8148_s7 }
 0x2d2   : > { %v9376_v37 = vpop.permute.xlu0 %3096 }
 0x2d3   : > { %v9378_v47 = vpop.permute.xlu1 %3104 }
 0x2d5   : > { %v9374_v31 = vpop.permute.xlu2 %3120 }
 0x2da   : > { %v9382_v14 = vpop.permute.xlu0 %3128 }
 0x2db   : > { %v9384_v42 = vpop.permute.xlu1 %3159 }
 0x2dd   : > { %v9380_v55 = vpop.permute.xlu2 %3094 }
 0x2e2   : > { %v9388_v8 = vpop.permute.xlu0 %3102 }
 0x2e3   : > { %v9390_v62 = vpop.permute.xlu1 %3118 }
 0x2e5   : > { %v9386_v19 = vpop.permute.xlu2 %3126 }
 0x2ea   : > { %v9394_v56 = vpop.permute.xlu0 %3156 }
 0x2eb   : > { %v9396_v52 = vpop.permute.xlu1 %3092 }
 0x2ec   : > { %13612 = vst [vmem:[#allocation51_spill] sm:$0xff] %v9396_v52 }
 0x2ed   : > { %v9392_v39 = vpop.permute.xlu2 %3100 }
 0x2ee   : > { %13611 = vst [vmem:[#allocation50_spill] sm:$0xff] %v9392_v39 }
 0x2f2   : > { %v9400_v17 = vpop.permute.xlu0 %3116 }
 0x2f3   : > { %v9402_v63 = vpop.permute.xlu1 %3124 }
 0x2f5   : > { %v9398_v61 = vpop.permute.xlu2 %3153 }
 0x2f6   : > { %13613 = vst [vmem:[#allocation52_spill] sm:$0xff] %v9398_v61 }
 0x2fc   : > { %v2041_v54 = vpop.permute.xlu0 %2040 }
 0x2fd   : > { %v2066_v58 = vpop.permute.xlu2 %2065 }
 0x305   : > { %v2045_v7 = vpop.permute.xlu2 %2044 }
 0x30c   : > { %v2043_v13 = vpop.permute.xlu1 %2042  ;;  %v2068_v33 = vpop.permute.xlu0 %2067 }
 0x30f   : > { %v2072_v45 = vpop.permute.xlu2 %2071 }
 0x318   : > { %v2070_v48 = vpop.permute.xlu1 %2069 }
 0x31d   : > { %v2051_v6 = vpop.permute.xlu2 %2050 }
 0x327   : > { %v2047_v57 = vpop.permute.xlu0 %2046 }
 0x330   : > { %v2049_v41 = vpop.permute.xlu1 %2048  ;;  %v2074_v16 = vpop.permute.xlu0 %2073 }
 0x331   : > { %v2057_v30 = vsel %vm2056_vm1, %v2041_v54, %v2049_v41  ;;  %v2061_v49 = vsel %vm2056_vm1, %v2049_v41, %v2041_v54  ;;  %v2082_v26 = vsel %vm2081_vm9, %v2066_v58, %v2074_v16  ;;  %v2086_v9 = vsel %vm2081_vm9, %v2074_v16, %v2066_v58 }
 0x332   : > { %v2096_v60 = vsel %vm8860_vm10, %v2086_v9, %v2057_v30  ;;  %v2095_v61 = vsel %vm8864_vm0, %v2082_v26, %v2061_v49  ;;  %v2058_v9 = vsel %vm2056_vm1, %v2043_v13, %v2051_v6  ;;  %v2078_v26 = vpop.permute.xlu2 %2077 }
 0x333   : > { %v9418_v39 = vsel %vm2119_vm2, %v2096_v60, %v9322_v29  ;;  %v9421_v52 = vsel %vm2119_vm2, %v2095_v61, %v9191_v27  ;;  %v2062_v29 = vsel %vm2056_vm1, %v2051_v6, %v2043_v13  ;;  %v2084_v15 = vsel %vm2081_vm9, %v2070_v48, %v2078_v26 }
 0x334   : > { %2139 = vrot.lane.b32.xlu0 %v9418_v39, %s7992_s2  ;;  %2156 = vrot.lane.b32.xlu1 %v9421_v52, %s7993_s0  ;;  %v2088_v41 = vsel %vm2081_vm9, %v2078_v26, %v2070_v48  ;;  %vm2210_vm2 = vcmp.eq.s32.totalorder %v8821_v2, 1 }
 0x335   : > { %2131 = vrot.lane.b32.xlu2 %v9421_v52, %s7992_s2 }
 0x338   : > { %v2076_v0 = vpop.permute.xlu1 %2075 }
 0x339   : > { %v2083_v27 = vsel %vm2081_vm9, %v2068_v33, %v2076_v0  ;;  %v2087_v60 = vsel %vm2081_vm9, %v2076_v0, %v2068_v33  ;;  %v2053_v58 = vpop.permute.xlu0 %2052 }
 0x33a   : > { %v2097_v49 = vsel %vm8864_vm0, %v2083_v27, %v2062_v29  ;;  %v2098_v61 = vsel %vm8860_vm10, %v2087_v60, %v2058_v9  ;;  %v2063_v6 = vsel %vm2056_vm1, %v2053_v58, %v2045_v7  ;;  %v2059_v33 = vsel %vm2056_vm1, %v2045_v7, %v2053_v58 }
 0x33b   : > { %v9443_v54 = vsel %vm2120_vm8, %v2097_v49, %v9232_v3  ;;  %v9446_v13 = vsel %vm2120_vm8, %v2098_v61, %v9333_v51  ;;  %v2099_v3 = vsel %vm8864_vm0, %v2084_v15, %v2063_v6  ;;  %v2100_v22 = vsel %vm8860_vm10, %v2088_v41, %v2059_v33 }
 0x33c   : > { %2133 = vrot.lane.b32.xlu0 %v9443_v54, %s7992_s2  ;;  %2141 = vrot.lane.b32.xlu1 %v9446_v13, %s7992_s2  ;;  %v9462_v51 = vsel %vm2121_vm7, %v2099_v3, %v9261_v40  ;;  %v9477_v30 = vsel %vm2121_vm7, %v2100_v22, %v9343_v23  ;;  %vm2211_vm8 = vcmp.eq.s32.totalorder %v8837_v34, 1  ;;  %vm2212_vm7 = vcmp.eq.s32.totalorder %v8758_v18, 1 }
 0x33d   : > { %2164 = vrot.lane.b32.xlu2 %v9418_v39, %s7993_s0 }
 0x340   : > { %v2055_v40 = vpop.permute.xlu1 %2054 }
 0x341   : > { %v2080_v16 = vpop.permute.xlu0 %2079  ;;  %v2060_v7 = vsel %vm2056_vm1, %v2047_v57, %v2055_v40  ;;  %v2064_v48 = vsel %vm2056_vm1, %v2055_v40, %v2047_v57  ;;  %vm2172_vm1 = vcmp.lt.s32.totalorder %v8238_v35, 114 }
 0x342   : > { %v2085_v0 = vsel %vm2081_vm9, %v2072_v45, %v2080_v16  ;;  %v2089_v9 = vsel %vm2081_vm9, %v2080_v16, %v2072_v45  ;;  %vm895_vm9 = vcmp.ne.f32.partialorder %v7821_v43, 0.0  ;;  %v3136_v49 = vsel %vm2172_vm1, %v9402_v63, %v9400_v17 }
 0x343   : > { %v2102_v23 = vsel %vm8860_vm10, %v2089_v9, %v2060_v7  ;;  %v2101_v29 = vsel %vm8864_vm0, %v2085_v0, %v2064_v48  ;;  %vm2147_vm10 = vcmp.lt.s32.totalorder %v8238_v35, 2 }
 0x344   : > { %2166 = vrot.lane.b32.xlu0 %v9446_v13, %s7993_s0  ;;  %2135 = vrot.lane.b32.xlu1 %v9462_v51, %s7992_s2  ;;  %v9499_v27 = vsel %vm2122_vm5, %v2102_v23, %v9354_v59  ;;  %v9502_v57 = vsel %vm2122_vm5, %v2101_v29, %v9300_v36  ;;  %v2181_v36 = vsel %vm895_vm9, 1, %v13582_v53  ;;  %vm2213_vm5 = vcmp.eq.s32.totalorder %v8786_v50, 1 }
 0x345   : > { %2158 = vrot.lane.b32.xlu2 %v9443_v54, %s7993_s0  ;;  %v2182_v59 = vperm.slane %v2181_v36, 0  ;;  %v2183_v45 = vperm.slane %v2181_v36, 1  ;;  %vm3167_vm9 = vcmp.eq.s32.totalorder %v9368_v1, 1 }
 0x347   : > { %vm9518_vm0 = vcmp.eq.s32.totalorder %v2182_v59, 1  ;;  %vm9522_vm6 = vcmp.eq.s32.totalorder %v2183_v45, 1 }
 0x34c   : > { %2160 = vrot.lane.b32.xlu0 %v9462_v51, %s7993_s0  ;;  %2168 = vrot.lane.b32.xlu1 %v9477_v30, %s7993_s0 }
 0x34d   : > { %2143 = vrot.lane.b32.xlu2 %v9477_v30, %s7992_s2 }
 0x354   : > { %2145 = vrot.lane.b32.xlu0 %v9499_v27, %s7992_s2  ;;  %2162 = vrot.lane.b32.xlu1 %v9502_v57, %s7993_s0 }
 0x355   : > { %2137 = vrot.lane.b32.xlu2 %v9502_v57, %s7992_s2  ;;  %s7994_s2 = smov 116  }
 0x35d   : > { %2170 = vrot.lane.b32.xlu2 %v9499_v27, %s7993_s0  ;;  %s7995_s0 = smov 4  }
 0x38f   : > { %v2132_v11 = vpop.permute.xlu2 %2131 }
 0x397   : > { %v2165_v46 = vpop.permute.xlu2 %2164 }
 0x39f   : > { %v2159_v58 = vpop.permute.xlu2 %2158 }
 0x3a6   : > { %v2157_v60 = vpop.permute.xlu1 %2156  ;;  %v2140_v26 = vpop.permute.xlu0 %2139 }
 0x3a7   : > { %v2173_v6 = vsel %vm2172_vm1, %v2157_v60, %v2165_v46  ;;  %v2177_v15 = vsel %vm2172_vm1, %v2165_v46, %v2157_v60  ;;  %v2148_v3 = vsel %vm2147_vm10, %v2132_v11, %v2140_v26  ;;  %v2152_v33 = vsel %vm2147_vm10, %v2140_v26, %v2132_v11  ;;  %v2144_v48 = vpop.permute.xlu2 %2143 }
 0x3a8   : > { %v2186_v41 = vsel %vm9518_vm0, %v2173_v6, %v2152_v33  ;;  %v2187_v22 = vsel %vm9522_vm6, %v2177_v15, %v2148_v3 }
 0x3a9   : > { %v9540_v40 = vsel %vm2210_vm2, %v2186_v41, %v9421_v52  ;;  %v9543_v16 = vsel %vm2210_vm2, %v2187_v22, %v9418_v39 }
 0x3aa   : > { %2247 = vrot.lane.b32.xlu0 %v9540_v40, %s7994_s2  ;;  %2222 = vrot.lane.b32.xlu1 %v9540_v40, %s7995_s0 }
 0x3ab   : > { %2230 = vrot.lane.b32.xlu2 %v9543_v16, %s7995_s0 }
 0x3ae   : > { %v2142_v2 = vpop.permute.xlu1 %2141  ;;  %v2134_v7 = vpop.permute.xlu0 %2133 }
 0x3af   : > { %v2149_v0 = vsel %vm2147_vm10, %v2134_v7, %v2142_v2  ;;  %v2153_v9 = vsel %vm2147_vm10, %v2142_v2, %v2134_v7  ;;  %v2138_v59 = vpop.permute.xlu2 %2137 }
 0x3b2   : > { %2255 = vrot.lane.b32.xlu1 %v9543_v16, %s7994_s2 }
 0x3b6   : > { %v2136_v52 = vpop.permute.xlu1 %2135  ;;  %v2167_v39 = vpop.permute.xlu0 %2166 }
 0x3b7   : > { %v2174_v23 = vsel %vm2172_vm1, %v2159_v58, %v2167_v39  ;;  %v2178_v29 = vsel %vm2172_vm1, %v2167_v39, %v2159_v58  ;;  %v2150_v60 = vsel %vm2147_vm10, %v2136_v52, %v2144_v48  ;;  %v2171_v18 = vpop.permute.xlu2 %2170 }
 0x3b8   : > { %v2189_v11 = vsel %vm9522_vm6, %v2178_v29, %v2149_v0  ;;  %v2188_v43 = vsel %vm9518_vm0, %v2174_v23, %v2153_v9  ;;  %v7822_v9 = vld [vmem:[%s13374_s22 + $0x4] sm:$0x3] }
 0x3b9   : > { %v9567_v46 = vsel %vm2211_vm8, %v2189_v11, %v9446_v13  ;;  %v9570_v36 = vsel %vm2211_vm8, %v2188_v43, %v9443_v54  ;;  %v2154_v13 = vsel %vm2147_vm10, %v2144_v48, %v2136_v52  ;;  %v3135_v52 = vsel %vm2172_vm1, %v9370_v12, %v9372_v25 }
 0x3ba   : > { %2232 = vrot.lane.b32.xlu0 %v9567_v46, %s7995_s0  ;;  %2249 = vrot.lane.b32.xlu1 %v9570_v36, %s7994_s2  ;;  %vm898_vm2 = vcmp.ne.f32.partialorder %v7822_v9, 0.0  ;;  %vm2238_vm8 = vcmp.lt.s32.totalorder %v8238_v35, 4 }
 0x3bb   : > { %2224 = vrot.lane.b32.xlu2 %v9570_v36, %s7995_s0  ;;  %v2272_v11 = vsel %vm898_vm2, 1, %v13582_v53  ;;  %vm2301_vm2 = vcmp.eq.s32.totalorder %v8830_v10, 1 }
 0x3bc   : > { %v2274_v43 = vperm.slane %v2272_v11, 1 }
 0x3be   : > { %v2169_v34 = vpop.permute.xlu1 %2168  ;;  %v2161_v45 = vpop.permute.xlu0 %2160 }
 0x3bf   : > { %v2175_v54 = vsel %vm2172_vm1, %v2161_v45, %v2169_v34  ;;  %v2179_v26 = vsel %vm2172_vm1, %v2169_v34, %v2161_v45 }
 0x3c0   : > { %v2191_v58 = vsel %vm9522_vm6, %v2179_v26, %v2150_v60  ;;  %v2190_v6 = vsel %vm9518_vm0, %v2175_v54, %v2154_v13 }
 0x3c1   : > { %v9592_v15 = vsel %vm2212_vm7, %v2191_v58, %v9477_v30  ;;  %v9595_v3 = vsel %vm2212_vm7, %v2190_v6, %v9462_v51  ;;  %vm2263_vm7 = vcmp.lt.s32.totalorder %v8238_v35, 116 }
 0x3c2   : > { %2234 = vrot.lane.b32.xlu1 %v9592_v15, %s7995_s0  ;;  %2226 = vrot.lane.b32.xlu0 %v9595_v3, %s7995_s0 }
 0x3c3   : > { %2257 = vrot.lane.b32.xlu2 %v9567_v46, %s7994_s2 }
 0x3c6   : > { %v2163_v33 = vpop.permute.xlu1 %2162  ;;  %v2146_v41 = vpop.permute.xlu0 %2145 }
 0x3c7   : > { %v2176_v22 = vsel %vm2172_vm1, %v2163_v33, %v2171_v18  ;;  %v2155_v30 = vsel %vm2147_vm10, %v2146_v41, %v2138_v59  ;;  %v2180_v7 = vsel %vm2172_vm1, %v2171_v18, %v2163_v33  ;;  %v2151_v48 = vsel %vm2147_vm10, %v2138_v59, %v2146_v41 }
 0x3c8   : > { %v2192_v51 = vsel %vm9518_vm0, %v2176_v22, %v2155_v30  ;;  %v2193_v50 = vsel %vm9522_vm6, %v2180_v7, %v2151_v48  ;;  %v2273_v59 = vperm.slane %v2272_v11, 0 }
 0x3c9   : > { %v9611_v2 = vsel %vm2213_vm5, %v2192_v51, %v9502_v57  ;;  %v9626_v57 = vsel %vm2213_vm5, %v2193_v50, %v9499_v27  ;;  %v3115_v27 = vsel %vm2147_vm10, %v9360_v28, %v9366_v32  ;;  %vm9658_vm5 = vcmp.eq.s32.totalorder %v2274_v43, 1 }
 0x3ca   : > { %2259 = vrot.lane.b32.xlu0 %v9592_v15, %s7994_s2  ;;  %2228 = vrot.lane.b32.xlu1 %v9611_v2, %s7995_s0  ;;  %v3146_v39 = vsel %vm9518_vm0, %v3135_v52, %v3115_v27  ;;  %vm9662_vm3 = vcmp.eq.s32.totalorder %v2273_v59, 1 }
 0x3cb   : > { %2251 = vrot.lane.b32.xlu2 %v9595_v3, %s7994_s2  ;;  %v9648_v0 = vsel %vm3167_vm9, %v3146_v39, %v8899_v44 }
 0x3d2   : > { %2253 = vrot.lane.b32.xlu0 %v9611_v2, %s7994_s2  ;;  %2261 = vrot.lane.b32.xlu1 %v9626_v57, %s7994_s2 }
 0x3d3   : > { %2236 = vrot.lane.b32.xlu2 %v9626_v57, %s7995_s0 }
 0x3da   : > { %3182 = vrot.lane.b32.xlu0 %v9648_v0, %s7995_s0 }
 0x405   : > { %v2231_v23 = vpop.permute.xlu2 %2230 }
 0x415   : > { %v2225_v34 = vpop.permute.xlu2 %2224 }
 0x41c   : > { %v2223_v29 = vpop.permute.xlu1 %2222  ;;  %v2248_v60 = vpop.permute.xlu0 %2247 }
 0x41d   : > { %v2239_v54 = vsel %vm2238_vm8, %v2223_v29, %v2231_v23  ;;  %v2243_v26 = vsel %vm2238_vm8, %v2231_v23, %v2223_v29  ;;  %v2258_v10 = vpop.permute.xlu2 %2257 }
 0x424   : > { %v2256_v13 = vpop.permute.xlu1 %2255 }
 0x425   : > { %v2264_v58 = vsel %vm2263_vm7, %v2248_v60, %v2256_v13  ;;  %v2268_v6 = vsel %vm2263_vm7, %v2256_v13, %v2248_v60  ;;  %v2252_v23 = vpop.permute.xlu2 %2251 }
 0x426   : > { %v2278_v18 = vsel %vm9658_vm5, %v2268_v6, %v2239_v54  ;;  %v2277_v33 = vsel %vm9662_vm3, %v2264_v58, %v2243_v26 }
 0x427   : > { %v9680_v41 = vsel %vm2301_vm2, %v2278_v18, %v9543_v16  ;;  %v9683_v22 = vsel %vm2301_vm2, %v2277_v33, %v9540_v40  ;;  %vm2302_vm2 = vcmp.eq.s32.totalorder %v8839_v24, 1 }
 0x428   : > { %2321 = vrot.lane.b32.xlu0 %v9680_v41, %s7996_s27  ;;  %2338 = vrot.lane.b32.xlu1 %v9683_v22, %s7997_s4 }
 0x429   : > { %2313 = vrot.lane.b32.xlu2 %v9683_v22, %s7996_s27 }
 0x42c   : > { %v2250_v30 = vpop.permute.xlu1 %2249  ;;  %v2233_v51 = vpop.permute.xlu0 %2232 }
 0x42d   : > { %v2265_v16 = vsel %vm2263_vm7, %v2250_v30, %v2258_v10  ;;  %v2269_v40 = vsel %vm2263_vm7, %v2258_v10, %v2250_v30  ;;  %v2240_v7 = vsel %vm2238_vm8, %v2225_v34, %v2233_v51  ;;  %v2244_v48 = vsel %vm2238_vm8, %v2233_v51, %v2225_v34 }
 0x42e   : > { %v2279_v50 = vsel %vm9662_vm3, %v2265_v16, %v2244_v48  ;;  %v2280_v52 = vsel %vm9658_vm5, %v2269_v40, %v2240_v7  ;;  %v3134_v40 = vsel %vm2172_vm1, %v9374_v31, %v9382_v14 }
 0x42f   : > { %v9705_v27 = vsel %vm2302_vm2, %v2279_v50, %v9570_v36  ;;  %v9708_v39 = vsel %vm2302_vm2, %v2280_v52, %v9567_v46  ;;  %vm2303_vm2 = vcmp.eq.s32.totalorder %v8848_v4, 1  ;;  %v2237_v4 = vpop.permute.xlu2 %2236 }
 0x430   : > { %2315 = vrot.lane.b32.xlu0 %v9705_v27, %s7996_s27  ;;  %2323 = vrot.lane.b32.xlu1 %v9708_v39, %s7996_s27 }
 0x431   : > { %2346 = vrot.lane.b32.xlu2 %v9680_v41, %s7997_s4 }
 0x434   : > { %v2235_v24 = vpop.permute.xlu1 %2234  ;;  %v2227_v9 = vpop.permute.xlu0 %2226 }
 0x435   : > { %v2241_v29 = vsel %vm2238_vm8, %v2227_v9, %v2235_v24  ;;  %v2245_v11 = vsel %vm2238_vm8, %v2235_v24, %v2227_v9  ;;  %v3137_v24 = vsel %vm2172_vm1, %v9386_v19, %v9390_v62  ;;  %v13623_v9 = vld [vmem:[#allocation51_spill] sm:$0xff] }
 0x438   : > { %2348 = vrot.lane.b32.xlu0 %v9708_v39, %s7997_s4 }
 0x439   : > { %2340 = vrot.lane.b32.xlu2 %v9705_v27, %s7997_s4 }
 0x43c   : > { %v2229_v46 = vpop.permute.xlu1 %2228  ;;  %v2260_v36 = vpop.permute.xlu0 %2259 }
 0x43d   : > { %v2266_v43 = vsel %vm2263_vm7, %v2252_v23, %v2260_v36  ;;  %v2270_v59 = vsel %vm2263_vm7, %v2260_v36, %v2252_v23  ;;  %v2242_v6 = vsel %vm2238_vm8, %v2229_v46, %v2237_v4  ;;  %v13624_v23 = vld [vmem:[#allocation50_spill] sm:$0xff]  ;;  %v3109_v36 = vsel %vm2147_vm10, %v9380_v55, %v9388_v8 }
 0x43e   : > { %v2282_v34 = vsel %vm9658_vm5, %v2270_v59, %v2241_v29  ;;  %v2281_v60 = vsel %vm9662_vm3, %v2266_v43, %v2245_v11  ;;  %v3143_v11 = vsel %vm9522_vm6, %v3137_v24, %v3109_v36  ;;  %v13625_v43 = vld [vmem:[#allocation52_spill] sm:$0xff] }
 0x43f   : > { %v9734_v13 = vsel %vm2303_vm2, %v2282_v34, %v9592_v15  ;;  %v9737_v54 = vsel %vm2303_vm2, %v2281_v60, %v9595_v3  ;;  %v2246_v15 = vsel %vm2238_vm8, %v2237_v4, %v2229_v46  ;;  %vm2304_vm2 = vcmp.eq.s32.totalorder %v8798_v21, 1  ;;  %v13626_v59 = vld [vmem:[#allocation44_spill] sm:$0xff]  ;;  %v13628_v4 = vld [vmem:[#allocation45_spill] sm:$0xff] }
 0x440   : > { %2342 = vrot.lane.b32.xlu0 %v9737_v54, %s7997_s4  ;;  %2317 = vrot.lane.b32.xlu1 %v9737_v54, %s7996_s27  ;;  %v3139_v21 = vsel %vm2172_vm1, %v9372_v25, %v9370_v12  ;;  %v7815_v12 = vld [vmem:[%s13373_s21 + $0x50] sm:$0xff]  ;;  %v7816_v25 = vld [vmem:[%s13373_s21 + $0x58] sm:$0xff]  ;;  %v3112_v46 = vsel %vm2147_vm10, %v13624_v23, %v13623_v9  ;;  %v3108_v34 = vsel %vm2147_vm10, %v13623_v9, %v13624_v23 }
 0x441   : > { %2325 = vrot.lane.b32.xlu2 %v9734_v13, %s7996_s27  ;;  %vm881_vm15 = vcmp.ne.f32.partialorder %v7816_v25, 0.0 }
 0x442   : > { %v3235_v48 = vsel %vm881_vm15, 1, %v13582_v53  ;;  %vm3165_vm15 = vcmp.eq.s32.totalorder %v9394_v56, 1  ;;  %v3141_v56 = vsel %vm9522_vm6, %v3136_v49, %v3108_v34 }
 0x444   : > { %v2262_v26 = vpop.permute.xlu1 %2261  ;;  %v2254_v58 = vpop.permute.xlu0 %2253 }
 0x445   : > { %v2267_v3 = vsel %vm2263_vm7, %v2254_v58, %v2262_v26  ;;  %v2271_v18 = vsel %vm2263_vm7, %v2262_v26, %v2254_v58 }
 0x446   : > { %v2284_v33 = vsel %vm9658_vm5, %v2271_v18, %v2242_v6  ;;  %v2283_v10 = vsel %vm9662_vm3, %v2267_v3, %v2246_v15 }
 0x447   : > { %v9759_v30 = vsel %vm2304_vm2, %v2284_v33, %v9626_v57  ;;  %v9762_v51 = vsel %vm2304_vm2, %v2283_v10, %v9611_v2  ;;  %v3111_v2 = vsel %vm2147_vm10, %v9366_v32, %v9360_v28  ;;  %v3110_v28 = vsel %vm2147_vm10, %v9376_v37, %v9378_v47 }
 0x448   : > { %2350 = vrot.lane.b32.xlu1 %v9734_v13, %s7997_s4  ;;  %2327 = vrot.lane.b32.xlu0 %v9759_v30, %s7996_s27  ;;  %v3147_v57 = vsel %vm9522_vm6, %v3139_v21, %v3111_v2  ;;  %vm880_vm2 = vcmp.ne.f32.partialorder %v7815_v12, 0.0 }
 0x449   : > { %2319 = vrot.lane.b32.xlu2 %v9762_v51, %s7996_s27  ;;  %v9783_v16 = vsel %vm3167_vm9, %v3147_v57, %v8896_v5  ;;  %v3138_v5 = vsel %vm2172_vm1, %v9382_v14, %v9374_v31  ;;  %vm3166_vm9 = vcmp.eq.s32.totalorder %v9384_v42, 1  ;;  %v3234_v7 = vsel %vm880_vm2, 1, %v13582_v53  ;;  %v7823_v57 = vld [vmem:[%s13374_s22 + $0x6] sm:$0x3] }
 0x44a   : > { %v3145_v32 = vsel %vm9522_vm6, %v3138_v5, %v3110_v28  ;;  %v3113_v31 = vsel %vm2147_vm10, %v9388_v8, %v9380_v55  ;;  %v3132_v42 = vsel %vm2172_vm1, %v9400_v17, %v9402_v63  ;;  %v7814_v8 = vld [vmem:[%s13373_s21 + $0x48] sm:$0xff]  ;;  %v7813_v17 = vld [vmem:[%s13373_s21 + $0x40] sm:$0xff]  ;;  %vm2354_vm6 = vcmp.lt.s32.totalorder %v8238_v35, 120 }
 0x44b   : > { %v9805_v1 = vsel %vm3166_vm9, %v3145_v32, %v8954_v38  ;;  %v3114_v38 = vsel %vm2147_vm10, %v9378_v47, %v9376_v37  ;;  %v3133_v37 = vsel %vm2172_vm1, %v9390_v62, %v9386_v19  ;;  %v3140_v29 = vsel %vm9518_vm0, %v3132_v42, %v3112_v46  ;;  %v13627_v62 = vld [vmem:[#allocation38_spill] sm:$0xff] }
 0x44c   : > { %v3144_v50 = vsel %vm9518_vm0, %v3134_v40, %v3114_v38  ;;  %v3142_v47 = vsel %vm9518_vm0, %v3133_v37, %v3113_v31  ;;  %v9891_v55 = vsel %vm3165_vm15, %v3143_v11, %v13627_v62  ;;  %vm879_vm0 = vcmp.ne.f32.partialorder %v7814_v8, 0.0  ;;  %v9924_v6 = vpop.permute.xlu0 %3182  ;;  %v13629_v40 = vld [vmem:[#allocation46_spill] sm:$0xff] }
 0x44d   : > { %v9834_v52 = vsel %vm3166_vm9, %v3144_v50, %v8930_v20  ;;  %v13622_v20 = vld [vmem:[#allocation39_spill] sm:$0xff]  ;;  %vm3164_vm9 = vcmp.eq.s32.totalorder %v13625_v43, 1  ;;  %v3233_v60 = vsel %vm879_vm0, 1, %v13582_v53  ;;  %vm878_vm10 = vcmp.ne.f32.partialorder %v7813_v17, 0.0  ;;  %v2404_v17 = vld [vmem:[%s13635_s6] sm:$0xff] }
 0x44e   : > { %v9852_v14 = vsel %vm3165_vm15, %v3142_v47, %v13622_v20  ;;  %v9882_v19 = vsel %vm3164_vm9, %v3140_v29, %v13626_v59  ;;  %v9910_v26 = vsel %vm3164_vm9, %v3141_v56, %v13628_v4  ;;  %v3232_v63 = vsel %vm878_vm10, 1, %v13582_v53  ;;  %v13634_v56 = vld [vmem:[#allocation48_spill] sm:$0xff] }
 0x44f   : > { %vm901_vm1 = vcmp.ne.f32.partialorder %v7823_v57, 0.0  ;;  %vm2329_vm2 = vcmp.lt.s32.totalorder %v8238_v35, 8  ;;  %vm2394_vm15 = vcmp.eq.s32.totalorder %v13629_v40, 1  ;;  %vm2393_vm10 = vcmp.eq.s32.totalorder %v13634_v56, 1 }
 0x450   : > { %3214 = vrot.lane.b32.xlu0 %v9783_v16, %s7994_s2  ;;  %2344 = vrot.lane.b32.xlu1 %v9762_v51, %s7997_s4  ;;  %v2363_v5 = vsel %vm901_vm1, 1, %v13582_v53 }
 0x451   : > { %2352 = vrot.lane.b32.xlu2 %v9759_v30, %s7997_s4  ;;  %v2364_v12 = vperm.slane %v2363_v5, 0  ;;  %v2365_v25 = vperm.slane %v2363_v5, 1 }
 0x453   : > { %vm9933_vm9 = vcmp.eq.s32.totalorder %v2364_v12, 1  ;;  %vm9937_vm0 = vcmp.eq.s32.totalorder %v2365_v25, 1 }
 0x458   : > { %3188 = vrot.lane.b32.xlu0 %v9805_v1, %s7995_s0  ;;  %3190 = vrot.lane.b32.xlu1 %v9783_v16, %s7995_s0 }
 0x459   : > { %3206 = vrot.lane.b32.xlu2 %v9648_v0, %s7994_s2 }
 0x460   : > { %3243 = vperm.xlu0 %7911, %v3234_v7   ;;  %3246 = vperm.xlu1 %7909, %v3235_v48  }
 0x461   : > { %3180 = vrot.lane.b32.xlu2 %v9834_v52, %s7995_s0 }
 0x468   : > { %3202 = vrot.lane.b32.xlu0 %v9852_v14, %s7994_s2  ;;  %3204 = vrot.lane.b32.xlu1 %v9834_v52, %s7994_s2 }
 0x469   : > { %3212 = vrot.lane.b32.xlu2 %v9805_v1, %s7994_s2 }
 0x470   : > { %3176 = vrot.lane.b32.xlu0 %v9882_v19, %s7995_s0  ;;  %3178 = vrot.lane.b32.xlu1 %v9852_v14, %s7995_s0 }
 0x471   : > { %3186 = vrot.lane.b32.xlu2 %v9891_v55, %s7995_s0 }
 0x478   : > { %3208 = vrot.lane.b32.xlu0 %v9910_v26, %s7994_s2  ;;  %3210 = vrot.lane.b32.xlu1 %v9891_v55, %s7994_s2 }
 0x479   : > { %3240 = vperm.xlu2 %7910, %v3233_v60  }
 0x480   : > { %3184 = vrot.lane.b32.xlu1 %v9910_v26, %s7995_s0  ;;  %s8000_s0 = smov 127  }
 0x481   : > { %3200 = vrot.lane.b32.xlu2 %v9882_v19, %s7994_s2 }
 0x483   : > { %v2314_v61 = vpop.permute.xlu2 %2313 }
 0x488   : > { %3237 = vperm.xlu1 %7909, %v3232_v63  }
 0x48b   : > { %v2347_v58 = vpop.permute.xlu2 %2346 }
 0x493   : > { %v2341_v3 = vpop.permute.xlu2 %2340 }
 0x49a   : > { %v2322_v15 = vpop.permute.xlu0 %2321  ;;  %v2339_v18 = vpop.permute.xlu1 %2338 }
 0x49b   : > { %v2326_v10 = vpop.permute.xlu2 %2325  ;;  %v2355_v50 = vsel %vm2354_vm6, %v2339_v18, %v2347_v58  ;;  %v2359_v37 = vsel %vm2354_vm6, %v2347_v58, %v2339_v18  ;;  %v2330_v42 = vsel %vm2329_vm2, %v2314_v61, %v2322_v15  ;;  %v2334_v24 = vsel %vm2329_vm2, %v2322_v15, %v2314_v61 }
 0x49c   : > { %v2368_v63 = vsel %vm9933_vm9, %v2355_v50, %v2334_v24  ;;  %v2369_v61 = vsel %vm9937_vm0, %v2359_v37, %v2330_v42 }
 0x4a2   : > { %v2316_v33 = vpop.permute.xlu0 %2315  ;;  %v2324_v21 = vpop.permute.xlu1 %2323 }
 0x4a3   : > { %v2320_v28 = vpop.permute.xlu2 %2319  ;;  %v2331_v9 = vsel %vm2329_vm2, %v2316_v33, %v2324_v21  ;;  %v2335_v23 = vsel %vm2329_vm2, %v2324_v21, %v2316_v33  ;;  %v2433_v33 = vsel %vm1119_vm4, %v2404_v17, 0 }
 0x4a4   : > { %v10017_v40 = vand.u32 4294901760, %v2433_v33 }
 0x4aa   : > { %v2349_v2 = vpop.permute.xlu0 %2348 }
 0x4ab   : > { %v2353_v31 = vpop.permute.xlu2 %2352  ;;  %v2356_v47 = vsel %vm2354_vm6, %v2341_v3, %v2349_v2  ;;  %v2360_v20 = vsel %vm2354_vm6, %v2349_v2, %v2341_v3  ;;  %v13636_v3 = vld [vmem:[#allocation47_spill] sm:$0xff] }
 0x4ac   : > { %v2370_v59 = vsel %vm9933_vm9, %v2356_v47, %v2335_v23  ;;  %v2371_v62 = vsel %vm9937_vm0, %v2360_v20, %v2331_v9  ;;  %vm2395_vm1 = vcmp.eq.s32.totalorder %v13636_v3, 1 }
 0x4ad   : > { %v2398_v58 = vsel %vm2393_vm10, %v2370_v59, %v9705_v27 }
 0x4ae   : > { %v10000_v27 = vand.u32 4294901760, %v2398_v58 }
 0x4b0   : > { %v2522_v24 = vsub.f32 %v2398_v58, %v10000_v27 }
 0x4b2   : > { %v2318_v32 = vpop.permute.xlu1 %2317  ;;  %v2343_v38 = vpop.permute.xlu0 %2342 }
 0x4b3   : > { %v2332_v36 = vsel %vm2329_vm2, %v2318_v32, %v2326_v10  ;;  %v2336_v29 = vsel %vm2329_vm2, %v2326_v10, %v2318_v32 }
 0x4ba   : > { %v2351_v46 = vpop.permute.xlu1 %2350  ;;  %v2328_v4 = vpop.permute.xlu0 %2327 }
 0x4bb   : > { %v2357_v11 = vsel %vm2354_vm6, %v2343_v38, %v2351_v46  ;;  %v2361_v43 = vsel %vm2354_vm6, %v2351_v46, %v2343_v38  ;;  %v2333_v5 = vsel %vm2329_vm2, %v2320_v28, %v2328_v4  ;;  %v2337_v32 = vsel %vm2329_vm2, %v2328_v4, %v2320_v28 }
 0x4bc   : > { %v2372_v8 = vsel %vm9933_vm9, %v2357_v11, %v2336_v29  ;;  %v2373_v49 = vsel %vm9937_vm0, %v2361_v43, %v2332_v36  ;;  %v10047_v36 = vsub.f32 %v2433_v33, %v10017_v40 }
 0x4bd   : > { %v2400_v34 = vsel %vm2394_vm15, %v2372_v8, %v9737_v54  ;;  %v2401_v60 = vsel %vm2394_vm15, %v2373_v49, %v9734_v13  ;;  %v2399_v54 = vsel %vm2393_vm10, %v2371_v62, %v9708_v39  ;;  %v13637_v13 = vld [vmem:[#allocation49_spill] sm:$0xff]  ;;  %v10002_v39 = vpop.permute.xlu2 %3206  ;;  %v2523_v8 = vand.u32 4294901760, %v2522_v24 }
 0x4be   : > { %v9989_v15 = vand.u32 4294901760, %v2400_v34  ;;  %vm2392_vm15 = vcmp.eq.s32.totalorder %v13637_v13, 1  ;;  %v9993_v18 = vand.u32 4294901760, %v2401_v60  ;;  %v9998_v2 = vand.u32 4294901760, %v2399_v54 }
 0x4bf   : > { %v2396_v10 = vsel %vm2392_vm15, %v2368_v63, %v9683_v22  ;;  %v2397_v21 = vsel %vm2392_vm15, %v2369_v61, %v9680_v41  ;;  %v10063_v17 = vand.u32 4294901760, %v10047_v36  ;;  %v2524_v13 = vsub.f32 %v2522_v24, %v2523_v8 }
 0x4c0   : > { %v2516_v38 = vsub.f32 %v2400_v34, %v9989_v15  ;;  %v10025_v37 = vand.u32 4294901760, %v2396_v10  ;;  %v10030_v47 = vand.u32 4294901760, %v2397_v21  ;;  %v10038_v9 = vsub.f32 %v2399_v54, %v9998_v2 }
 0x4c2   : > { %v2345_v57 = vpop.permute.xlu1 %2344  ;;  %v2517_v46 = vand.u32 4294901760, %v2516_v38  ;;  %v2528_v29 = vsub.f32 %v2396_v10, %v10025_v37  ;;  %v10054_v49 = vsub.f32 %v2397_v21, %v10030_v47  ;;  %v2801_v34 = vand.u32 4294901760, %v10038_v9 }
 0x4c3   : > { %v2358_v12 = vsel %vm2354_vm6, %v2345_v57, %v2353_v31  ;;  %v2362_v22 = vsel %vm2354_vm6, %v2353_v31, %v2345_v57  ;;  %v10028_v31 = vsub.f32 %v2401_v60, %v9993_v18 }
 0x4c4   : > { %v2374_v41 = vsel %vm9933_vm9, %v2358_v12, %v2337_v32  ;;  %v2375_v25 = vsel %vm9937_vm0, %v2362_v22, %v2333_v5  ;;  %v2518_v4 = vsub.f32 %v2516_v38, %v2517_v46  ;;  %v2529_v58 = vand.u32 4294901760, %v2528_v29 }
 0x4c5   : > { %v2402_v28 = vsel %vm2395_vm1, %v2374_v41, %v9762_v51  ;;  %v2403_v50 = vsel %vm2395_vm1, %v2375_v25, %v9759_v30  ;;  %v3215_v30 = vpop.permute.xlu0 %3214  ;;  %v2795_v11 = vand.u32 4294901760, %v10028_v31  ;;  %v10065_v63 = vpop.permute.xlu2 %3180  ;;  %v2807_v33 = vand.u32 4294901760, %v10054_v49 }
 0x4c6   : > { %v10032_v20 = vand.u32 4294901760, %v2403_v50  ;;  %v10034_v42 = vand.u32 4294901760, %v2402_v28  ;;  %v2802_v10 = vsub.f32 %v10038_v9, %v2801_v34  ;;  %v2519_v5 = vand.u32 4294901760, %v2518_v4 }
 0x4c7   : > { %v2796_v61 = vsub.f32 %v10028_v31, %v2795_v11  ;;  %v2467_v32 = vsub.f32 %v10047_v36, %v10063_v17  ;;  %v2530_v22 = vsub.f32 %v2528_v29, %v2529_v58  ;;  %v3219_v41 = vsel %vm2263_vm7, %v10002_v39, %v3215_v30 }
 0x4c8   : > { %v10041_v51 = vsub.f32 %v2403_v50, %v10032_v20  ;;  %2457 = vmatpush.msrb.mxu0 %v10034_v42  ;;  %2608 = vmatpush.msrb.mxu3 %v10034_v42  ;;  %v2510_v23 = vsub.f32 %v2402_v28, %v10034_v42  ;;  %v3223_v25 = vsel %vm2263_vm7, %v3215_v30, %v10002_v39  ;;  %v2525_v28 = vand.u32 4294901760, %v2524_v13 }
 0x4c9   : > { %v2797_v12 = vand.u32 4294901760, %v2796_v61  ;;  %v2808_v50 = vsub.f32 %v10054_v49, %v2807_v33 }
 0x4ca   : > { %v3191_v43 = vpop.permute.xlu1 %3190  ;;  %2459 = vmatpush.msrb.mxu0 %v9989_v15  ;;  %2564 = vmatpush.msrb.mxu2 %v2510_v23  ;;  %v2511_v59 = vand.u32 4294901760, %v2510_v23  ;;  %v2789_v62 = vand.u32 4294901760, %v10041_v51 }
 0x4cb   : > { %2610 = vmatpush.msrb.mxu3 %v9989_v15  ;;  %v3195_v21 = vsel %vm2238_vm8, %v9924_v6, %v3191_v43  ;;  %v3199_v57 = vsel %vm2238_vm8, %v3191_v43, %v9924_v6  ;;  %v2531_v43 = vand.u32 4294901760, %v2530_v22 }
 0x4cc   : > { %2461 = vmatpush.msrb.mxu0 %v10000_v27  ;;  %2567 = vmatpush.msrb.mxu2 %v2516_v38  ;;  %v2512_v56 = vsub.f32 %v2510_v23, %v2511_v59  ;;  %v2790_v60 = vsub.f32 %v10041_v51, %v2789_v62  ;;  %v3231_v23 = vsel %vm9658_vm5, %v3223_v25, %v3195_v21 }
 0x4cd   : > { %2612 = vmatpush.msrb.mxu3 %v10000_v27  ;;  %v10091_v38 = vpop.permute.xlu0 %3188  ;;  %v3230_v39 = vsel %vm9662_vm3, %v3219_v41, %v3199_v57 }
 0x4ce   : > { %2463 = vmatpush.msrb.mxu0 %v10025_v37  ;;  %2570 = vmatpush.msrb.mxu2 %v2522_v24  ;;  %v2513_v54 = vand.u32 4294901760, %v2512_v56  ;;  %v2791_v3 = vand.u32 4294901760, %v2790_v60  ;;  %v2803_v24 = vand.u32 4294901760, %v2802_v10  ;;  %v7818_v10 = vld [vmem:[%s13373_s21 + $0x68] sm:$0xff] }
 0x4cf   : > { %2614 = vmatpush.msrb.mxu3 %v10025_v37 }
 0x4d0   : > { %2655 = vmatpush.msra.mxu0 %v2511_v59  ;;  %2514 = vmatpush.msrb.mxu1 %v2513_v54  ;;  %v3213_v59 = vpop.permute.xlu2 %3212 }
 0x4d1   : > { %2573 = vmatpush.msrb.mxu2 %v2528_v29  ;;  %2792 = vmatpush.msra.mxu3 %v2791_v3  ;;  %v10108_v29 = vand.u32 4294901760, %v2467_v32 }
 0x4d2   : > { %2659 = vmatpush.msra.mxu0 %v2517_v46  ;;  %v3247_v6 = vpop.permute.xlu1 %3246  ;;  %2520 = vmatpush.msrb.mxu1 %v2519_v5 }
 0x4d3   : > { %2735 = vmatpush.msra.mxu2 %v10032_v20  ;;  %vm3251_vm10 = vcmp.eq.s32.totalorder %v3247_v6, 1  ;;  %2798 = vmatpush.msra.mxu3 %v2797_v12 }
 0x4d4   : > { %2663 = vmatpush.msra.mxu0 %v2523_v8  ;;  %2526 = vmatpush.msrb.mxu1 %v2525_v28  ;;  %v10103_v30 = vsel %vm3251_vm10, %v3231_v23, %v9783_v16  ;;  %v10106_v46 = vsel %vm3251_vm10, %v3230_v39, %v9648_v0  ;;  %v2809_v16 = vand.u32 4294901760, %v2808_v50  ;;  %v7820_v0 = vld [vmem:[%s13373_s21 + $0x78] sm:$0xff] }
 0x4d5   : > { %2737 = vmatpush.msra.mxu2 %v9993_v18  ;;  %2804 = vmatpush.msra.mxu3 %v2803_v24  ;;  %v3244_v56 = vpop.permute.xlu0 %3243  ;;  %vm890_vm1 = vcmp.ne.f32.partialorder %v7820_v0, 0.0 }
 0x4d6   : > { %2667 = vmatpush.msra.mxu0 %v2529_v58  ;;  %3274 = vrot.lane.b32.xlu0 %v10103_v30, %s7996_s27  ;;  %v3319_v4 = vsel %vm890_vm1, 1, %v13582_v53  ;;  %vm3250_vm15 = vcmp.eq.s32.totalorder %v3244_v56, 1 }
 0x4d7   : > { %2739 = vmatpush.msra.mxu2 %v9998_v2  ;;  %3290 = vrot.lane.b32.xlu1 %v10106_v46, %s7997_s4 }
 0x4d8   : > { %3266 = vrot.lane.b32.xlu2 %v10106_v46, %s7996_s27  ;;  %2469 = vmatmul.f32.vlgmr.msrb.gmra.mxu0 %v10108_v29 }
 0x4d9   : > { %2532 = vmatpush.msrb.mxu1 %v2531_v43  ;;  %2810 = vmatpush.msra.mxu3 %v2809_v16 }
 0x4da   : > { %2842 = vmatpush.msrb.mxu0 %v10041_v51  ;;  %2618 = vmatmul.f32.vlgmr.msrb.gmra.mxu3 %v10063_v17  ;;  %v3205_v8 = vpop.permute.xlu1 %3204 }
 0x4db   : > { %2698 = vmatpush.msra.mxu1 %v10034_v42  ;;  %2741 = vmatpush.msra.mxu2 %v10030_v47  ;;  %v3218_v60 = vsel %vm2263_vm7, %v3205_v8, %v3213_v59  ;;  %v3198_v42 = vsel %vm2238_vm8, %v10091_v38, %v10065_v63 }
 0x4dc   : > { %2976 = vmatpush.msrb.mxu3 %v10032_v20  ;;  %2576 = vmatmul.f32.vlgmr.msrb.gmra.mxu2 %v10047_v36  ;;  %v3228_v51 = vsel %vm9662_vm3, %v3218_v60, %v3198_v42  ;;  %v7817_v42 = vld [vmem:[%s13373_s21 + $0x60] sm:$0xff] }
 0x4dd   : > { %2845 = vmatpush.msrb.mxu0 %v10028_v31  ;;  %2933 = vmatpush.msrb.mxu2 %v2789_v62 }
 0x4de   : > { %2700 = vmatpush.msra.mxu1 %v9989_v15  ;;  %2978 = vmatpush.msrb.mxu3 %v9993_v18  ;;  %v3187_v15 = vpop.permute.xlu2 %3186 }
 0x4df   : > { %2848 = vmatpush.msrb.mxu0 %v10038_v9  ;;  %2937 = vmatpush.msrb.mxu2 %v2795_v11  ;;  %v3222_v11 = vsel %vm2263_vm7, %v3213_v59, %v3205_v8 }
 0x4e0   : > { %2702 = vmatpush.msra.mxu1 %v10000_v27  ;;  %2980 = vmatpush.msrb.mxu3 %v9998_v2  ;;  %v10153_v27 = vsel %vm3250_vm15, %v3228_v51, %v9834_v52  ;;  %v3194_v52 = vsel %vm2238_vm8, %v10065_v63, %v10091_v38  ;;  %v3350_v51 = vld [vmem:[%s13638_s3 + $0x10] sm:$0xff] }
 0x4e1   : > { %2851 = vmatpush.msrb.mxu0 %v10054_v49  ;;  %2941 = vmatpush.msrb.mxu2 %v2801_v34  ;;  %v3229_v9 = vsel %vm9658_vm5, %v3222_v11, %v3194_v52  ;;  %v7819_v49 = vld [vmem:[%s13373_s21 + $0x70] sm:$0xff] }
 0x4e2   : > { %2704 = vmatpush.msra.mxu1 %v10025_v37  ;;  %2982 = vmatpush.msrb.mxu3 %v10030_v47  ;;  %v3179_v31 = vpop.permute.xlu1 %3178  ;;  %v3203_v37 = vpop.permute.xlu0 %3202  ;;  %vm889_vm10 = vcmp.ne.f32.partialorder %v7819_v49, 0.0 }
 0x4e3   : > { %3330 = vperm.xlu0 %7911, %v3319_v4   ;;  %3298 = vrot.lane.b32.xlu2 %v10103_v30, %s7997_s4  ;;  %v3197_v34 = vsel %vm2238_vm8, %v3187_v15, %v3179_v31  ;;  %v3193_v63 = vsel %vm2238_vm8, %v3179_v31, %v3187_v15  ;;  %v3318_v3 = vsel %vm889_vm10, 1, %v13582_v53  ;;  %v3348_v15 = vld [vmem:[%s13638_s3] sm:$0xff] }
 0x4e4   : > { %2534 = vmatmul.f32.vlgmr.msrb.gmra.mxu1 %v10017_v40  ;;  %2945 = vmatpush.msrb.mxu2 %v2807_v33 }
 0x4e5   : > { %2886 = vmatpush.msrb.mxu1 %v10032_v20  ;;  %3264 = vrot.lane.b32.xlu1 %v10153_v27, %s7996_s27  ;;  %v10176_v20 = vsel %vm3250_vm15, %v3229_v9, %v9805_v1  ;;  %vm888_vm15 = vcmp.ne.f32.partialorder %v7818_v10, 0.0 }
 0x4e6   : > { %v3317_v25 = vsel %vm888_vm15, 1, %v13582_v53 }
 0x4e7   : > { %2888 = vmatpush.msrb.mxu1 %v9993_v18  ;;  %v3241_v18 = vpop.permute.xlu2 %3240 }
 0x4e8   : > { %vm3249_vm1 = vcmp.eq.s32.totalorder %v3241_v18, 1 }
 0x4e9   : > { %2890 = vmatpush.msrb.mxu1 %v9998_v2 }
 0x4ea   : > { %v3211_v62 = vpop.permute.xlu1 %3210  ;;  %v3177_v54 = vpop.permute.xlu0 %3176 }
 0x4eb   : > { %2892 = vmatpush.msrb.mxu1 %v10030_v47  ;;  %3288 = vrot.lane.b32.xlu0 %v10153_v27, %s7997_s4  ;;  %v3217_v2 = vsel %vm2263_vm7, %v3203_v37, %v3211_v62  ;;  %v3221_v1 = vsel %vm2263_vm7, %v3211_v62, %v3203_v37 }
 0x4ec   : > { %3272 = vrot.lane.b32.xlu2 %v10176_v20, %s7996_s27  ;;  %v3226_v47 = vsel %vm9662_vm3, %v3217_v2, %v3197_v34  ;;  %v3227_v61 = vsel %vm9658_vm5, %v3221_v1, %v3193_v63 }
 0x4ed   : > { %3296 = vrot.lane.b32.xlu1 %v10176_v20, %s7997_s4  ;;  %v10200_v58 = vsel %vm3249_vm1, %v3226_v47, %v9852_v14  ;;  %v10204_v13 = vsel %vm3249_vm1, %v3227_v61, %v9891_v55  ;;  %v2405_v14 = vld [vmem:[%s13635_s6 + $0x8] sm:$0xff]  ;;  %v2406_v55 = vld [vmem:[%s13635_s6 + $0x10] sm:$0xff] }
 0x4ee   : > { %v2436_v21 = vsel %vm1119_vm4, %v2405_v14, 0  ;;  %v2439_v57 = vsel %vm1119_vm4, %v2406_v55, 0 }
 0x4ef   : > { %v10221_v5 = vand.u32 4294901760, %v2436_v21  ;;  %v10223_v32 = vand.u32 4294901760, %v2439_v57  ;;  %v3201_v50 = vpop.permute.xlu2 %3200 }
 0x4f1   : > { %v10226_v12 = vsub.f32 %v2436_v21, %v10221_v5  ;;  %v10229_v22 = vsub.f32 %v2439_v57, %v10223_v32  ;;  %2538 = vmatmul.f32.gmra.mxu1 %v10221_v5 }
 0x4f2   : > { %v3185_v33 = vpop.permute.xlu1 %3184  ;;  %v3209_v41 = vpop.permute.xlu0 %3208 }
 0x4f3   : > { %3262 = vrot.lane.b32.xlu0 %v10200_v58, %s7996_s27  ;;  %v3192_v6 = vsel %vm2238_vm8, %v3177_v54, %v3185_v33  ;;  %v10240_v28 = vand.u32 4294901760, %v10226_v12  ;;  %2581 = vmatmul.f32.gmra.mxu2 %v10226_v12  ;;  %v3196_v24 = vsel %vm2238_vm8, %v3185_v33, %v3177_v54  ;;  %v3220_v23 = vsel %vm2263_vm7, %v3209_v41, %v3201_v50 }
 0x4f4   : > { %3327 = vperm.xlu2 %7910, %v3318_v3   ;;  %v10251_v43 = vand.u32 4294901760, %v10229_v22  ;;  %v3216_v59 = vsel %vm2263_vm7, %v3201_v50, %v3209_v41  ;;  %v3225_v16 = vsel %vm9658_vm5, %v3220_v23, %v3192_v6 }
 0x4f5   : > { %3270 = vrot.lane.b32.xlu1 %v10204_v13, %s7996_s27  ;;  %v2475_v39 = vsub.f32 %v10226_v12, %v10240_v28  ;;  %2624 = vmatmul.f32.gmra.mxu3 %v10240_v28  ;;  %v3224_v0 = vsel %vm9662_vm3, %v3216_v59, %v3196_v24  ;;  %vm887_vm3 = vcmp.ne.f32.partialorder %v7817_v42, 0.0 }
 0x4f6   : > { %v2483_v4 = vsub.f32 %v10229_v22, %v10251_v43  ;;  %v3316_v45 = vsel %vm887_vm3, 1, %v13582_v53  ;;  %v2407_v53 = vld [vmem:[%s13635_s6 + $0x18] sm:$0xff]  ;;  %s13712_s6 = sld [smem:[#allocation85_spill]] }
 0x4f7   : > { %v2476_v56 = vand.u32 4294901760, %v2475_v39  ;;  %v2442_v31 = vsel %vm1119_vm4, %v2407_v53, 0 }
 0x4f8   : > { %v2484_v44 = vand.u32 4294901760, %v2483_v4  ;;  %v2488_v11 = vand.u32 4294901760, %v2442_v31 }
 0x4f9   : > { %2477 = vmatmul.f32.gmra.mxu0 %v2476_v56  ;;  %2542 = vmatmul.f32.gmra.mxu1 %v10223_v32 }
 0x4fa   : > { %v3238_v38 = vpop.permute.xlu1 %3237  ;;  %v2489_v52 = vsub.f32 %v2442_v31, %v2488_v11 }
 0x4fb   : > { %3294 = vrot.lane.b32.xlu0 %v10204_v13, %s7997_s4  ;;  %vm3248_vm10 = vcmp.eq.s32.totalorder %v3238_v38, 1  ;;  %2586 = vmatmul.f32.gmra.mxu2 %v10229_v22 }
 0x4fc   : > { %3286 = vrot.lane.b32.xlu2 %v10200_v58, %s7997_s4  ;;  %v10260_v8 = vsel %vm3248_vm10, %v3225_v16, %v9910_v26  ;;  %v10263_v60 = vsel %vm3248_vm10, %v3224_v0, %v9882_v19  ;;  %v3351_v19 = vld [vmem:[%s13638_s3 + $0x18] sm:$0xff]  ;;  %v3349_v26 = vld [vmem:[%s13638_s3 + $0x8] sm:$0xff]  ;;  %v2490_v37 = vand.u32 4294901760, %v2489_v52  ;;  %s7999_s3 = smov 15  }
 0x4fd   : > { %3324 = vperm.xlu1 %7909, %v3317_v25   ;;  %2630 = vmatmul.f32.gmra.mxu3 %v10251_v43 }
 0x4fe   : > { %v2491_v9 = vsub.f32 %v2489_v52, %v2490_v37 }
 0x500   : > { %v2492_v62 = vand.u32 4294901760, %v2491_v9 }
 0x501   : > { %2485 = vmatmul.f32.gmra.mxu0 %v2484_v44  ;;  %2546 = vmatmul.f32.gmra.mxu1 %v2488_v11 }
 0x503   : > { %3268 = vrot.lane.b32.xlu0 %v10260_v8, %s7996_s27  ;;  %2591 = vmatmul.f32.gmra.mxu2 %v2489_v52 }
 0x504   : > { %3260 = vrot.lane.b32.xlu2 %v10263_v60, %s7996_s27  ;;  %s13694_s27 = sld [smem:[#allocation82_spill]] }
 0x505   : > { %3284 = vrot.lane.b32.xlu1 %v10263_v60, %s7997_s4  ;;  %2636 = vmatmul.f32.gmra.mxu3 %v2490_v37 }
 0x509   : > { %2493 = vmatmul.f32.gmra.mxu0 %v2492_v62  ;;  %2706 = vmatmul.f32.vlgmr.msra.gmra.mxu1 %v10017_v40 }
 0x50b   : > { %3321 = vperm.xlu0 %7911, %v3316_v45   ;;  %2747 = vmatmul.f32.vlgmr.msra.gmra.mxu2 %v10108_v29 }
 0x50c   : > { %3292 = vrot.lane.b32.xlu2 %v10260_v8, %s7997_s4  ;;  %s7998_s4 = smov 17  }
 0x50d   : > { %3369 = vperm.xlu1 %7909, %v3351_v19   ;;  %2812 = vmatmul.f32.vlgmr.msra.gmra.mxu3 %v10017_v40 }
 0x511   : > { %2669 = vmatmul.f32.vlgmr.msra.gmra.mxu0 %v10017_v40  ;;  %2710 = vmatmul.f32.gmra.mxu1 %v10221_v5 }
 0x513   : > { %3359 = vperm.xlu0 %7911, %v3349_v26   ;;  %2755 = vmatmul.f32.gmra.mxu2 %v2476_v56 }
 0x514   : > { %3364 = vperm.xlu2 %7910, %v3350_v51  }
 0x515   : > { %3354 = vperm.xlu1 %7909, %v3348_v15   ;;  %2816 = vmatmul.f32.gmra.mxu3 %v10221_v5 }
 0x519   : > { %2673 = vmatmul.f32.gmra.mxu0 %v10221_v5  ;;  %2714 = vmatmul.f32.gmra.mxu1 %v10223_v32 }
 0x51b   : > { %2763 = vmatmul.f32.gmra.mxu2 %v2484_v44 }
 0x51d   : > { %2820 = vmatmul.f32.gmra.mxu3 %v10223_v32 }
 0x521   : > { %2677 = vmatmul.f32.gmra.mxu0 %v10223_v32  ;;  %2718 = vmatmul.f32.gmra.mxu1 %v2488_v11 }
 0x523   : > { %2771 = vmatmul.f32.gmra.mxu2 %v2492_v62 }
 0x525   : > { %2824 = vmatmul.f32.gmra.mxu3 %v2488_v11 }
 0x529   : > { %2681 = vmatmul.f32.gmra.mxu0 %v2488_v11  ;;  %2896 = vmatmul.f32.vlgmr.msrb.gmra.mxu1 %v10063_v17 }
 0x52b   : > { %2947 = vmatmul.f32.vlgmr.msrb.gmra.mxu2 %v10017_v40 }
 0x52d   : > { %2984 = vmatmul.f32.vlgmr.msrb.gmra.mxu3 %v10017_v40 }
 0x531   : > { %2854 = vmatmul.f32.vlgmr.msrb.gmra.mxu0 %v10047_v36  ;;  %2902 = vmatmul.f32.gmra.mxu1 %v10240_v28 }
 0x532   : > { %v3267_v29 = vpop.permute.xlu2 %3266 }
 0x533   : > { %2951 = vmatmul.f32.gmra.mxu2 %v10221_v5 }
 0x535   : > { %2988 = vmatmul.f32.gmra.mxu3 %v10221_v5 }
 0x539   : > { %2859 = vmatmul.f32.gmra.mxu0 %v10226_v12  ;;  %2908 = vmatmul.f32.gmra.mxu1 %v10251_v43 }
 0x53b   : > { %2955 = vmatmul.f32.gmra.mxu2 %v10223_v32 }
 0x53d   : > { %v3299_v49 = vpop.permute.xlu2 %3298  ;;  %2992 = vmatmul.f32.gmra.mxu3 %v10223_v32 }
 0x541   : > { %2864 = vmatmul.f32.gmra.mxu0 %v10229_v22  ;;  %2914 = vmatmul.f32.gmra.mxu1 %v2490_v37 }
 0x543   : > { %2959 = vmatmul.f32.gmra.mxu2 %v2488_v11 }
 0x545   : > { %2996 = vmatmul.f32.gmra.mxu3 %v2488_v11 }
 0x546   : > { %v3273_v17 = vpop.permute.xlu2 %3272 }
 0x548   : > { %v3275_v18 = vpop.permute.xlu0 %3274 }
 0x549   : > { %v3291_v34 = vpop.permute.xlu1 %3290  ;;  %v3283_v36 = vsel %vm2329_vm2, %v3275_v18, %v3267_v29  ;;  %2869 = vmatmul.f32.gmra.mxu0 %v2489_v52  ;;  %v3279_v50 = vsel %vm2329_vm2, %v3267_v29, %v3275_v18  ;;  %v3345_v29 = vld [vmem:[%s13639_s9 + $0x8] sm:$0xff] }
 0x54a   : > { %v3303_v40 = vsel %vm2354_vm6, %v3291_v34, %v3299_v49  ;;  %v3307_v28 = vsel %vm2354_vm6, %v3299_v49, %v3291_v34 }
 0x54b   : > { %v3314_v1 = vsel %vm9933_vm9, %v3303_v40, %v3283_v36  ;;  %v3315_v59 = vsel %vm9937_vm0, %v3307_v28, %v3279_v50  ;;  %v3376_v40 = vsel %vm1119_vm4, %v3345_v29, 0 }
 0x54e   : > { %v3328_v3 = vpop.permute.xlu2 %3327 }
 0x54f   : > { %vm3334_vm7 = vcmp.eq.s32.totalorder %v3328_v3, 1 }
 0x555   : > { %v3331_v2 = vpop.permute.xlu0 %3330 }
 0x556   : > { %vm3335_vm8 = vcmp.eq.s32.totalorder %v3331_v2, 1  ;;  %v3287_v41 = vpop.permute.xlu2 %3286 }
 0x557   : > { %v3342_v47 = vsel %vm3335_vm8, %v3314_v1, %v10106_v46  ;;  %v3265_v61 = vpop.permute.xlu1 %3264  ;;  %v3343_v56 = vsel %vm3335_vm8, %v3315_v59, %v10103_v30 }
 0x558   : > { %v10328_v63 = vand.u32 4294901760, %v3342_v47  ;;  %v3282_v21 = vsel %vm2329_vm2, %v3273_v17, %v3265_v61  ;;  %v3278_v39 = vsel %vm2329_vm2, %v3265_v61, %v3273_v17  ;;  %v10394_v11 = vand.u32 4294901760, %v3343_v56 }
 0x559   : > { %v10429_v61 = vand.u32 4294901760, %v3376_v40 }
 0x55a   : > { %v10331_v54 = vsub.f32 %v3342_v47, %v10328_v63  ;;  %3397 = vmatpush.msra.mxu0 %v10328_v63  ;;  %3548 = vmatpush.msra.mxu3 %v10328_v63  ;;  %v10409_v49 = vsub.f32 %v3343_v56, %v10394_v11 }
 0x55c   : > { %v3451_v33 = vand.u32 4294901760, %v10331_v54  ;;  %3504 = vmatpush.msra.mxu2 %v10331_v54  ;;  %v3729_v1 = vand.u32 4294901760, %v10409_v49 }
 0x55d   : > { %v3289_v10 = vpop.permute.xlu0 %3288 }
 0x55e   : > { %v3452_v46 = vsub.f32 %v10331_v54, %v3451_v33  ;;  %v3261_v53 = vpop.permute.xlu2 %3260 }
 0x55f   : > { %v3297_v14 = vpop.permute.xlu1 %3296 }
 0x560   : > { %v3453_v55 = vand.u32 4294901760, %v3452_v46  ;;  %v3302_v57 = vsel %vm2354_vm6, %v3289_v10, %v3297_v14  ;;  %v3306_v24 = vsel %vm2354_vm6, %v3297_v14, %v3289_v10 }
 0x561   : > { %v3312_v5 = vsel %vm9933_vm9, %v3302_v57, %v3282_v21  ;;  %v3313_v16 = vsel %vm9937_vm0, %v3306_v24, %v3278_v39 }
 0x562   : > { %3454 = vmatpush.msra.mxu1 %v3453_v55  ;;  %v3340_v32 = vsel %vm3334_vm7, %v3312_v5, %v10153_v27  ;;  %v3344_v27 = vld [vmem:[%s13639_s9] sm:$0xff]  ;;  %v3341_v26 = vsel %vm3334_vm7, %v3313_v16, %v10176_v20 }
 0x563   : > { %v10348_v12 = vand.u32 4294901760, %v3340_v32  ;;  %v3373_v43 = vsel %vm1119_vm4, %v3344_v27, 0  ;;  %v10396_v52 = vand.u32 4294901760, %v3341_v26  ;;  %v3346_v27 = vld [vmem:[%s13639_s9 + $0x10] sm:$0xff] }
 0x564   : > { %v10384_v19 = vand.u32 4294901760, %v3373_v43  ;;  %v3379_v48 = vsel %vm1119_vm4, %v3346_v27, 0 }
 0x565   : > { %v3263_v22 = vpop.permute.xlu0 %3262  ;;  %3399 = vmatpush.msra.mxu0 %v10348_v12  ;;  %3550 = vmatpush.msra.mxu3 %v10348_v12  ;;  %v10353_v25 = vsub.f32 %v3340_v32, %v10348_v12  ;;  %v10422_v17 = vsub.f32 %v3341_v26, %v10396_v52 }
 0x566   : > { %v10400_v20 = vsub.f32 %v3373_v43, %v10384_v19  ;;  %v3293_v3 = vpop.permute.xlu2 %3292 }
 0x567   : > { %v3271_v38 = vpop.permute.xlu1 %3270  ;;  %3507 = vmatpush.msra.mxu2 %v10353_v25  ;;  %v3457_v6 = vand.u32 4294901760, %v10353_v25  ;;  %v3735_v55 = vand.u32 4294901760, %v10422_v17 }
 0x568   : > { %v3281_v4 = vsel %vm2329_vm2, %v3271_v38, %v3263_v22  ;;  %v3277_v51 = vsel %vm2329_vm2, %v3263_v22, %v3271_v38  ;;  %v10449_v38 = vsub.f32 %v3376_v40, %v10429_v61 }
 0x569   : > { %v3458_v23 = vsub.f32 %v10353_v25, %v3457_v6  ;;  %v3736_v24 = vsub.f32 %v10422_v17, %v3735_v55  ;;  %v10505_v25 = vpop.f32.mrf.mxu0 }
 0x56a   : > { %v10472_v56 = vand.u32 4294901760, %v10449_v38  ;;  %13640 = vst [vmem:[#allocation39_spill] sm:$0xff] %v10505_v25 }
 0x56b   : > { %v3459_v0 = vand.u32 4294901760, %v3458_v23 }
 0x56d   : > { %v3295_v42 = vpop.permute.xlu0 %3294  ;;  %3460 = vmatpush.msra.mxu1 %v3459_v0 }
 0x56e   : > { %v3301_v44 = vsel %vm2354_vm6, %v3287_v41, %v3295_v42  ;;  %v3305_v45 = vsel %vm2354_vm6, %v3295_v42, %v3287_v41  ;;  %v3730_v41 = vsub.f32 %v10409_v49, %v3729_v1 }
 0x56f   : > { %v3310_v30 = vsel %vm9933_vm9, %v3301_v44, %v3281_v4  ;;  %v3325_v15 = vpop.permute.xlu1 %3324  ;;  %v3311_v31 = vsel %vm9937_vm0, %v3305_v45, %v3277_v51  ;;  %v10484_v44 = vand.u32 4294901760, %v3379_v48  ;;  %v3415_v51 = vsub.f32 %v10449_v38, %v10472_v56 }
 0x570   : > { %vm3333_vm5 = vcmp.eq.s32.totalorder %v3325_v15, 1  ;;  %v3731_v0 = vand.u32 4294901760, %v3730_v41 }
 0x571   : > { %v3338_v37 = vsel %vm3333_vm5, %v3310_v30, %v10200_v58  ;;  %v3339_v9 = vsel %vm3333_vm5, %v3311_v31, %v10204_v13  ;;  %v10419_v13 = vand.u32 4294901760, %v10400_v20  ;;  %v3347_v30 = vld [vmem:[%s13639_s9 + $0x18] sm:$0xff]  ;;  %v10501_v15 = vsub.f32 %v3379_v48, %v10484_v44 }
 0x572   : > { %v10403_v62 = vand.u32 4294901760, %v3338_v37  ;;  %v10416_v34 = vand.u32 4294901760, %v3339_v9 }
 0x573   : > { %v3407_v14 = vsub.f32 %v10400_v20, %v10419_v13  ;;  %v10511_v29 = vand.u32 4294901760, %v10501_v15 }
 0x574   : > { %3401 = vmatpush.msra.mxu0 %v10403_v62  ;;  %3552 = vmatpush.msra.mxu3 %v10403_v62  ;;  %v10414_v58 = vsub.f32 %v3338_v37, %v10403_v62  ;;  %v10432_v10 = vsub.f32 %v3339_v9, %v10416_v34  ;;  %v3382_v9 = vsel %vm1119_vm4, %v3347_v30, 0 }
 0x575   : > { %v3269_v18 = vpop.permute.xlu0 %3268  ;;  %v10463_v43 = vand.u32 4294901760, %v3407_v14 }
 0x576   : > { %3510 = vmatpush.msra.mxu2 %v10414_v58  ;;  %v3463_v36 = vand.u32 4294901760, %v10414_v58  ;;  %v3276_v46 = vsel %vm2329_vm2, %v3261_v53, %v3269_v18  ;;  %v3280_v5 = vsel %vm2329_vm2, %v3269_v18, %v3261_v53  ;;  %v3741_v59 = vand.u32 4294901760, %v10432_v10 }
 0x577   : > { %v3285_v2 = vpop.permute.xlu1 %3284  ;;  %v3423_v18 = vsub.f32 %v10501_v15, %v10511_v29 }
 0x578   : > { %v3464_v47 = vsub.f32 %v10414_v58, %v3463_v36  ;;  %v3300_v21 = vsel %vm2354_vm6, %v3285_v2, %v3293_v3  ;;  %v3304_v57 = vsel %vm2354_vm6, %v3293_v3, %v3285_v2  ;;  %v3742_v4 = vsub.f32 %v10432_v10, %v3741_v59 }
 0x579   : > { %v3308_v28 = vsel %vm9933_vm9, %v3300_v21, %v3280_v5  ;;  %v3309_v50 = vsel %vm9937_vm0, %v3304_v57, %v3276_v46  ;;  %v10513_v58 = vand.u32 4294901760, %v3382_v9 }
 0x57a   : > { %v3465_v32 = vand.u32 4294901760, %v3464_v47  ;;  %v3743_v53 = vand.u32 4294901760, %v3742_v4 }
 0x57b   : > { %v10527_v40 = vsub.f32 %v3382_v9, %v10513_v58 }
 0x57c   : > { %3466 = vmatpush.msra.mxu1 %v3465_v32 }
 0x57d   : > { %v3322_v22 = vpop.permute.xlu0 %3321  ;;  %v10545_v2 = vand.u32 4294901760, %v10527_v40 }
 0x57e   : > { %vm3332_vm6 = vcmp.eq.s32.totalorder %v3322_v22, 1 }
 0x57f   : > { %v3336_v23 = vsel %vm3332_vm6, %v3308_v28, %v10263_v60  ;;  %v3337_v39 = vsel %vm3332_vm6, %v3309_v50, %v10260_v8  ;;  %v3737_v8 = vand.u32 4294901760, %v3736_v24 }
 0x580   : > { %v10466_v16 = vand.u32 4294901760, %v3336_v23  ;;  %v10468_v7 = vand.u32 4294901760, %v3337_v39 }
 0x582   : > { %v3468_v42 = vsub.f32 %v3336_v23, %v10466_v16  ;;  %v10476_v60 = vsub.f32 %v3337_v39, %v10468_v7  ;;  %3403 = vmatpush.msra.mxu0 %v10466_v16  ;;  %3554 = vmatpush.msra.mxu3 %v10466_v16 }
 0x583   : > { %3409 = vmatmul.f32.vlgmr.msra.gmra.mxu0 %v10463_v43  ;;  %3558 = vmatmul.f32.vlgmr.msra.gmra.mxu3 %v10419_v13 }
 0x584   : > { %3732 = vmatpush.msrb.mxu3 %v3731_v0  ;;  %3595 = vmatpush.msrb.mxu0 %v3451_v33  ;;  %v3469_v45 = vand.u32 4294901760, %v3468_v42  ;;  %v3747_v26 = vand.u32 4294901760, %v10476_v60 }
 0x585   : > { %3513 = vmatpush.msra.mxu2 %v3468_v42 }
 0x586   : > { %3516 = vmatmul.f32.vlgmr.msra.gmra.mxu2 %v10400_v20  ;;  %3738 = vmatpush.msrb.mxu3 %v3737_v8  ;;  %v3470_v54 = vsub.f32 %v3468_v42, %v3469_v45  ;;  %v3748_v33 = vsub.f32 %v10476_v60, %v3747_v26 }
 0x587   : > { %3599 = vmatpush.msrb.mxu0 %v3457_v6  ;;  %3675 = vmatpush.msrb.mxu2 %v10394_v11  ;;  %v10507_v6 = vand.u32 4294901760, %v3415_v51 }
 0x588   : > { %v3471_v31 = vand.u32 4294901760, %v3470_v54  ;;  %v3749_v37 = vand.u32 4294901760, %v3748_v33  ;;  %3744 = vmatpush.msrb.mxu3 %v3743_v53 }
 0x589   : > { %3603 = vmatpush.msrb.mxu0 %v3463_v36  ;;  %3677 = vmatpush.msrb.mxu2 %v10396_v52  ;;  %v10540_v36 = vpop.f32.mrf.mxu1 }
 0x58a   : > { %3472 = vmatpush.msra.mxu1 %v3471_v31  ;;  %3750 = vmatpush.msrb.mxu3 %v3749_v37  ;;  %13643 = vst [vmem:[#allocation52_spill] sm:$0xff] %v10540_v36 }
 0x58b   : > { %3607 = vmatpush.msrb.mxu0 %v3469_v45  ;;  %3679 = vmatpush.msrb.mxu2 %v10416_v34 }
 0x58c   : > { %3474 = vmatmul.f32.vlgmr.msra.gmra.mxu1 %v10384_v19  ;;  %3417 = vmatmul.f32.gmra.mxu0 %v10507_v6 }
 0x58d   : > { %3782 = vmatpush.msra.mxu0 %v10409_v49  ;;  %3638 = vmatpush.msrb.mxu1 %v10328_v63  ;;  %v10533_v63 = vpop.f32.mrf.mxu2  ;;  %v10538_v49 = vpop.f32.mrf.mxu0 }
 0x58e   : > { %3681 = vmatpush.msrb.mxu2 %v10468_v7  ;;  %3916 = vmatpush.msra.mxu3 %v10394_v11  ;;  %13641 = vst [vmem:[#allocation51_spill] sm:$0xff] %v10533_v63 }
 0x58f   : > { %3785 = vmatpush.msra.mxu0 %v10422_v17  ;;  %3521 = vmatmul.f32.gmra.mxu2 %v10449_v38  ;;  %13642 = vst [vmem:[#allocation50_spill] sm:$0xff] %v10538_v49 }
 0x590   : > { %3873 = vmatpush.msra.mxu2 %v3729_v1  ;;  %3640 = vmatpush.msrb.mxu1 %v10348_v12  ;;  %v3424_v12 = vand.u32 4294901760, %v3423_v18  ;;  %v10547_v1 = vpop.f32.mrf.mxu3 }
 0x591   : > { %3918 = vmatpush.msra.mxu3 %v10396_v52  ;;  %3788 = vmatpush.msra.mxu0 %v10432_v10  ;;  %13644 = vst [vmem:[#allocation44_spill] sm:$0xff] %v10547_v1  ;;  %v10567_v3 = vpop.f32.mrf.mxu1 }
 0x592   : > { %3877 = vmatpush.msra.mxu2 %v3735_v55  ;;  %3564 = vmatmul.f32.gmra.mxu3 %v10472_v56  ;;  %13647 = vst [vmem:[#allocation46_spill] sm:$0xff] %v10567_v3 }
 0x593   : > { %3642 = vmatpush.msrb.mxu1 %v10403_v62  ;;  %3920 = vmatpush.msra.mxu3 %v10416_v34  ;;  %v3431_v62 = vsub.f32 %v10527_v40, %v10545_v2 }
 0x594   : > { %3791 = vmatpush.msra.mxu0 %v10476_v60  ;;  %3881 = vmatpush.msra.mxu2 %v3741_v59 }
 0x595   : > { %3644 = vmatpush.msrb.mxu1 %v10466_v16  ;;  %3922 = vmatpush.msra.mxu3 %v10468_v7  ;;  %v3432_v17 = vand.u32 4294901760, %v3431_v62  ;;  %v10562_v47 = vpop.f32.mrf.mxu2 }
 0x596   : > { %3885 = vmatpush.msra.mxu2 %v3747_v26  ;;  %3425 = vmatmul.f32.gmra.mxu0 %v3424_v12  ;;  %13645 = vst [vmem:[#allocation38_spill] sm:$0xff] %v10562_v47 }
 0x597   : > { %3826 = vmatpush.msra.mxu1 %v10394_v11  ;;  %3526 = vmatmul.f32.gmra.mxu2 %v10501_v15  ;;  %v10565_v11 = vpop.f32.mrf.mxu0 }
 0x598   : > { %3478 = vmatmul.f32.gmra.mxu1 %v10429_v61  ;;  %13646 = vst [vmem:[#allocation45_spill] sm:$0xff] %v10565_v11  ;;  %v10569_v10 = vpop.f32.mrf.mxu3 }
 0x599   : > { %3828 = vmatpush.msra.mxu1 %v10396_v52  ;;  %13648 = vst [vmem:[#allocation48_spill] sm:$0xff] %v10569_v10  ;;  %v10578_v46 = vpop.f32.mrf.mxu1 }
 0x59a   : > { %3570 = vmatmul.f32.gmra.mxu3 %v10511_v29  ;;  %13651 = vst [vmem:[#allocation53_spill] sm:$0xff] %v10578_v46 }
 0x59b   : > { %3830 = vmatpush.msra.mxu1 %v10416_v34 }
 0x59d   : > { %3832 = vmatpush.msra.mxu1 %v10468_v7  ;;  %v10574_v52 = vpop.f32.mrf.mxu2 }
 0x59e   : > { %3433 = vmatmul.f32.gmra.mxu0 %v3432_v17  ;;  %13649 = vst [vmem:[#allocation47_spill] sm:$0xff] %v10574_v52 }
 0x59f   : > { %3531 = vmatmul.f32.gmra.mxu2 %v10527_v40  ;;  %v10576_v34 = vpop.f32.mrf.mxu0 }
 0x5a0   : > { %3482 = vmatmul.f32.gmra.mxu1 %v10484_v44  ;;  %13650 = vst [vmem:[#allocation49_spill] sm:$0xff] %v10576_v34  ;;  %v10582_v14 = vpop.f32.mrf.mxu3 }
 0x5a1   : > { %13652 = vst [vmem:[#allocation54_spill] sm:$0xff] %v10582_v14  ;;  %v10591_v21 = vpop.f32.mrf.mxu1 }
 0x5a2   : > { %3576 = vmatmul.f32.gmra.mxu3 %v10545_v2  ;;  %13654 = vst [vmem:[#allocation56_spill] sm:$0xff] %v10591_v21  ;;  %v10693_v21 = vpop.permute.xlu2 %3364 }
 0x5a5   : > { %v10588_v55 = vpop.f32.mrf.mxu2 }
 0x5a6   : > { %3609 = vmatmul.f32.vlgmr.msrb.gmra.mxu0 %v10384_v19  ;;  %13653 = vst [vmem:[#allocation55_spill] sm:$0xff] %v10588_v55 }
 0x5a7   : > { %3687 = vmatmul.f32.vlgmr.msrb.gmra.mxu2 %v10463_v43  ;;  %v10593_v57 = vpop.f32.mrf.mxu0 }
 0x5a8   : > { %3486 = vmatmul.f32.gmra.mxu1 %v10513_v58  ;;  %13655 = vst [vmem:[#allocation57_spill] sm:$0xff] %v10593_v57  ;;  %v10595_v5 = vpop.f32.mrf.mxu3 }
 0x5a9   : > { %13656 = vst [vmem:[#allocation58_spill] sm:$0xff] %v10595_v5  ;;  %v10605_v41 = vpop.f32.mrf.mxu1 }
 0x5aa   : > { %3752 = vmatmul.f32.vlgmr.msrb.gmra.mxu3 %v10384_v19  ;;  %13658 = vst [vmem:[#allocation60_spill] sm:$0xff] %v10605_v41 }
 0x5ad   : > { %v10600_v32 = vpop.f32.mrf.mxu2 }
 0x5ae   : > { %3613 = vmatmul.f32.gmra.mxu0 %v10429_v61 }
 0x5af   : > { %3695 = vmatmul.f32.gmra.mxu2 %v10507_v6  ;;  %v10603_v22 = vpop.f32.mrf.mxu0 }
 0x5b0   : > { %3646 = vmatmul.f32.vlgmr.msrb.gmra.mxu1 %v10384_v19  ;;  %13657 = vst [vmem:[#allocation59_spill] sm:$0xff] %v10603_v22  ;;  %v10607_v27 = vpop.f32.mrf.mxu3 }
 0x5b1   : > { %v10616_v24 = vpop.f32.mrf.mxu1 }
 0x5b2   : > { %3756 = vmatmul.f32.gmra.mxu3 %v10429_v61  ;;  %13660 = vst [vmem:[#allocation62_spill] sm:$0xff] %v10616_v24  ;;  %v10685_v24 = vpop.permute.xlu0 %3359 }
 0x5b5   : > { %v10612_v28 = vpop.f32.mrf.mxu2 }
 0x5b6   : > { %3617 = vmatmul.f32.gmra.mxu0 %v10484_v44 }
 0x5b7   : > { %3703 = vmatmul.f32.gmra.mxu2 %v3424_v12  ;;  %v10614_v50 = vpop.f32.mrf.mxu0 }
 0x5b8   : > { %3650 = vmatmul.f32.gmra.mxu1 %v10429_v61  ;;  %13659 = vst [vmem:[#allocation61_spill] sm:$0xff] %v10614_v50  ;;  %v10618_v23 = vpop.f32.mrf.mxu3 }
 0x5b9   : > { %v10628_v59 = vpop.f32.mrf.mxu1 }
 0x5ba   : > { %3760 = vmatmul.f32.gmra.mxu3 %v10484_v44  ;;  %13662 = vst [vmem:[#allocation64_spill] sm:$0xff] %v10628_v59 }
 0x5bd   : > { %v10624_v39 = vpop.f32.mrf.mxu2 }
 0x5be   : > { %3621 = vmatmul.f32.gmra.mxu0 %v10513_v58 }
 0x5bf   : > { %3711 = vmatmul.f32.gmra.mxu2 %v3432_v17  ;;  %v10626_v43 = vpop.f32.mrf.mxu0 }
 0x5c0   : > { %3654 = vmatmul.f32.gmra.mxu1 %v10484_v44  ;;  %13661 = vst [vmem:[#allocation63_spill] sm:$0xff] %v10626_v43  ;;  %v10632_v16 = vpop.f32.mrf.mxu3 }
 0x5c1   : > { %13663 = vst [vmem:[#allocation65_spill] sm:$0xff] %v10632_v16 }
 0x5c2   : > { %3764 = vmatmul.f32.gmra.mxu3 %v10513_v58 }
 0x5c6   : > { %3794 = vmatmul.f32.vlgmr.msra.gmra.mxu0 %v10400_v20  ;;  %v10641_v20 = vpop.f32.mrf.mxu1 }
 0x5c7   : > { %3887 = vmatmul.f32.vlgmr.msra.gmra.mxu2 %v10384_v19  ;;  %13664 = vst [vmem:[#allocation66_spill] sm:$0xff] %v10641_v20  ;;  %v10643_v7 = vpop.f32.mrf.mxu0 }
 0x5c8   : > { %3658 = vmatmul.f32.gmra.mxu1 %v10513_v58 }
 0x5ca   : > { %3924 = vmatmul.f32.vlgmr.msra.gmra.mxu3 %v10384_v19  ;;  %v10638_v19 = vpop.f32.mrf.mxu2 }
 0x5ce   : > { %3799 = vmatmul.f32.gmra.mxu0 %v10449_v38  ;;  %v10645_v38 = vpop.f32.mrf.mxu3  ;;  %v10656_v48 = vpop.f32.mrf.mxu1 }
 0x5cf   : > { %3891 = vmatmul.f32.gmra.mxu2 %v10429_v61 }
 0x5d0   : > { %3836 = vmatmul.f32.vlgmr.msra.gmra.mxu1 %v10419_v13 }
 0x5d2   : > { %3928 = vmatmul.f32.gmra.mxu3 %v10429_v61  ;;  %v10651_v13 = vpop.f32.mrf.mxu2  ;;  %v10654_v61 = vpop.f32.mrf.mxu0 }
 0x5d6   : > { %3804 = vmatmul.f32.gmra.mxu0 %v10501_v15  ;;  %v10658_v0 = vpop.f32.mrf.mxu3  ;;  %v10665_v60 = vpop.f32.mrf.mxu1 }
 0x5d7   : > { %3895 = vmatmul.f32.gmra.mxu2 %v10484_v44 }
 0x5d8   : > { %3842 = vmatmul.f32.gmra.mxu1 %v10472_v56 }
 0x5da   : > { %3932 = vmatmul.f32.gmra.mxu3 %v10484_v44  ;;  %v10661_v56 = vpop.f32.mrf.mxu2  ;;  %v10663_v42 = vpop.f32.mrf.mxu0 }
 0x5db   : > { %13665 = vst [vmem:[#allocation67_spill] sm:$0xff] %v10663_v42 }
 0x5de   : > { %3809 = vmatmul.f32.gmra.mxu0 %v10527_v40  ;;  %v10667_v8 = vpop.f32.mrf.mxu3  ;;  %v10673_v45 = vpop.f32.mrf.mxu1 }
 0x5df   : > { %3899 = vmatmul.f32.gmra.mxu2 %v10513_v58  ;;  %13667 = vst [vmem:[#allocation69_spill] sm:$0xff] %v10673_v45 }
 0x5e0   : > { %3848 = vmatmul.f32.gmra.mxu1 %v10511_v29 }
 0x5e2   : > { %3936 = vmatmul.f32.gmra.mxu3 %v10513_v58  ;;  %v10669_v4 = vpop.f32.mrf.mxu2  ;;  %v10671_v44 = vpop.f32.mrf.mxu0 }
 0x5e3   : > { %13666 = vst [vmem:[#allocation68_spill] sm:$0xff] %v10669_v4 }
 0x5e6   : > { %v10675_v26 = vpop.f32.mrf.mxu3  ;;  %v10679_v30 = vpop.f32.mrf.mxu1 }
 0x5e7   : > { %13668 = vst [vmem:[#allocation70_spill] sm:$0xff] %v10675_v26 }
 0x5e8   : > { %3854 = vmatmul.f32.gmra.mxu1 %v10545_v2  ;;  %v10683_v2 = vpop.permute.xlu1 %3369 }
 0x5ea   : > { %v10677_v51 = vpop.f32.mrf.mxu2 }
 0x5eb   : > { %13669 = vst [vmem:[#allocation71_spill] sm:$0xff] %v10677_v51 }
 0x5ee   : > { %v10681_v33 = vpop.f32.mrf.mxu3 }
 0x5ef   : > { %13670 = vst [vmem:[#allocation72_spill] sm:$0xff] %v10681_v33 }
 0x5f0   : > { %v10687_v41 = vpop.permute.xlu1 %3354 }
 0x600   : > { %v3410_v54 = vpop.f32.mrf.mxu0 }
 0x601   : > { %v3411_v5 = vadd.f32 %v3410_v54, %v10687_v41 }
 0x606   : > { %v3559_v37 = vpop.f32.mrf.mxu3 }
 0x609   : > { %v3517_v53 = vpop.f32.mrf.mxu2  ;;  %v3418_v15 = vpop.f32.mrf.mxu0 }
 0x60a   : > { %v3475_v31 = vpop.f32.mrf.mxu1  ;;  %v3419_v50 = vadd.f32 %v3418_v15, %v10685_v24 }
 0x60b   : > { %v3476_v57 = vadd.f32 %v3475_v31, %v3411_v5 }
 0x60d   : > { %v3518_v47 = vadd.f32 %v3517_v53, %v3476_v57 }
 0x60f   : > { %v3560_v3 = vadd.f32 %v3559_v37, %v3518_v47 }
 0x612   : > { %v3522_v9 = vpop.f32.mrf.mxu2 }
 0x613   : > { %v3426_v6 = vpop.f32.mrf.mxu0 }
 0x614   : > { %v3427_v63 = vadd.f32 %v3426_v6, %v10693_v21 }
 0x615   : > { %v3479_v29 = vpop.f32.mrf.mxu1  ;;  %v3565_v58 = vpop.f32.mrf.mxu3 }
 0x616   : > { %v3480_v22 = vadd.f32 %v3479_v29, %v3419_v50 }
 0x618   : > { %v3523_v1 = vadd.f32 %v3522_v9, %v3480_v22 }
 0x61a   : > { %v3527_v18 = vpop.f32.mrf.mxu2  ;;  %v3566_v46 = vadd.f32 %v3565_v58, %v3523_v1 }
 0x61b   : > { %v3434_v40 = vpop.f32.mrf.mxu0 }
 0x61c   : > { %v3435_v57 = vadd.f32 %v3434_v40, %v10683_v2 }
 0x61d   : > { %v3483_v12 = vpop.f32.mrf.mxu1  ;;  %v3571_v62 = vpop.f32.mrf.mxu3 }
 0x61e   : > { %v3484_v34 = vadd.f32 %v3483_v12, %v3427_v63 }
 0x620   : > { %v3528_v31 = vadd.f32 %v3527_v18, %v3484_v34 }
 0x622   : > { %v3532_v17 = vpop.f32.mrf.mxu2  ;;  %v3572_v63 = vadd.f32 %v3571_v62, %v3528_v31 }
 0x623   : > { %v3610_v59 = vpop.f32.mrf.mxu0 }
 0x624   : > { %v3611_v54 = vadd.f32 %v3610_v59, %v3560_v3 }
 0x625   : > { %v3487_v20 = vpop.f32.mrf.mxu1  ;;  %v3577_v43 = vpop.f32.mrf.mxu3 }
 0x626   : > { %v3488_v1 = vadd.f32 %v3487_v20, %v3435_v57 }
 0x62a   : > { %v3688_v14 = vpop.f32.mrf.mxu2 }
 0x62b   : > { %v3614_v55 = vpop.f32.mrf.mxu0 }
 0x62c   : > { %v3615_v36 = vadd.f32 %v3614_v55, %v3566_v46  ;;  %v3533_v55 = vadd.f32 %v3532_v17, %v3488_v1 }
 0x62d   : > { %v3647_v10 = vpop.f32.mrf.mxu1  ;;  %v10691_v52 = vpop.f32.mrf.mxu3 }
 0x62e   : > { %v10702_v9 = vadd.f32 %v3647_v10, %v3611_v54  ;;  %v3578_v54 = vadd.f32 %v3577_v43, %v3533_v55 }
 0x630   : > { %v10709_v47 = vmul.f32 0.70710677, %v10702_v9 }
 0x632   : > { %v10696_v15 = vpop.f32.mrf.mxu2  ;;  %v3956_v6 = vmul.f32 %v10709_v47, %v10709_v47 }
 0x633   : > { %v3618_v50 = vpop.f32.mrf.mxu0 }
 0x634   : > { %v3619_v34 = vadd.f32 %v3618_v50, %v3572_v63  ;;  %v10728_v50 = vmin.f32 %v3956_v6, 16.0 }
 0x635   : > { %v3651_v5 = vpop.f32.mrf.mxu1  ;;  %v10700_v22 = vpop.f32.mrf.mxu3 }
 0x636   : > { %v10698_v29 = vadd.f32 %v3651_v5, %v3615_v36  ;;  %v3969_v43 = vmul.f32 3.8918573e-05, %v10728_v50 }
 0x638   : > { %v10706_v53 = vmul.f32 0.70710677, %v10698_v29 }
 0x63a   : > { %v4036_v3 = vmul.f32 %v10706_v53, %v10706_v53  ;;  %v10713_v36 = vpop.f32.mrf.mxu2 }
 0x63b   : > { %v3622_v59 = vpop.f32.mrf.mxu0 }
 0x63c   : > { %v10715_v46 = vmin.f32 %v4036_v3, 16.0  ;;  %v3623_v57 = vadd.f32 %v3622_v59, %v3578_v54  ;;  %v3689_v54 = vadd.f32 %v3688_v14, %v10687_v41 }
 0x63d   : > { %v3655_v10 = vpop.f32.mrf.mxu1  ;;  %v10723_v18 = vpop.f32.mrf.mxu3 }
 0x63e   : > { %v10717_v37 = vadd.f32 %v3655_v10, %v3619_v34  ;;  %v4038_v20 = vmul.f32 2.1237322e-06, %v10715_v46  ;;  %v4049_v58 = vmul.f32 3.8918573e-05, %v10715_v46  ;;  %v3754_v25 = vadd.f32 %v10691_v52, %v3689_v54 }
 0x640   : > { %v4039_v40 = vadd.f32 0.00028619796, %v4038_v20  ;;  %v4050_v12 = vadd.f32 0.001143296, %v4049_v58  ;;  %v10726_v62 = vmul.f32 0.70710677, %v10717_v37 }
 0x642   : > { %v4040_v17 = vmul.f32 %v4039_v40, %v10715_v46  ;;  %v4051_v5 = vmul.f32 %v4050_v12, %v10715_v46  ;;  %v4116_v31 = vmul.f32 %v10726_v62, %v10726_v62  ;;  %v10738_v20 = vpop.f32.mrf.mxu2 }
 0x643   : > { %v3795_v12 = vpop.f32.mrf.mxu0 }
 0x644   : > { %v4041_v63 = vadd.f32 0.0036580483, %v4040_v17  ;;  %v4052_v1 = vadd.f32 0.014752088, %v4051_v5  ;;  %v10734_v3 = vmin.f32 %v4116_v31, 16.0 }
 0x645   : > { %v3659_v34 = vpop.f32.mrf.mxu1  ;;  %v10749_v31 = vpop.f32.mrf.mxu3 }
 0x646   : > { %v10736_v10 = vadd.f32 %v3659_v34, %v3623_v57  ;;  %v4042_v55 = vmul.f32 %v4041_v63, %v10715_v46  ;;  %v4053_v6 = vmul.f32 %v4052_v1, %v10715_v46  ;;  %v4118_v58 = vmul.f32 2.1237322e-06, %v10734_v3 }
 0x647   : > { %v4129_v40 = vmul.f32 3.8918573e-05, %v10734_v3  ;;  %v3970_v57 = vadd.f32 0.001143296, %v3969_v43 }
 0x648   : > { %v10746_v59 = vmul.f32 0.70710677, %v10736_v10  ;;  %v4054_v17 = vadd.f32 0.112945676, %v4053_v6  ;;  %v4119_v5 = vadd.f32 0.00028619796, %v4118_v58 }
 0x649   : > { %v4043_v34 = vadd.f32 0.05243302, %v4042_v55  ;;  %v4130_v11 = vadd.f32 0.001143296, %v4129_v40  ;;  %v3971_v43 = vmul.f32 %v3970_v57, %v10728_v50  ;;  %v3796_v40 = vadd.f32 %v3795_v12, %v3754_v25 }
 0x64a   : > { %v4055_v63 = vmul.f32 %v4054_v17, %v10715_v46  ;;  %v4120_v1 = vmul.f32 %v4119_v5, %v10734_v3  ;;  %v4196_v49 = vmul.f32 %v10746_v59, %v10746_v59  ;;  %v3888_v6 = vpop.f32.mrf.mxu2  ;;  %v3697_v17 = vadd.f32 %v10696_v15, %v10685_v24 }
 0x64b   : > { %v4131_v14 = vmul.f32 %v4130_v11, %v10734_v3  ;;  %v4044_v55 = vmul.f32 %v4043_v34, %v10715_v46  ;;  %v3800_v45 = vpop.f32.mrf.mxu0  ;;  %v3972_v25 = vadd.f32 0.014752088, %v3971_v43 }
 0x64c   : > { %v4056_v26 = vadd.f32 0.4994258, %v4055_v63  ;;  %v4121_v4 = vadd.f32 0.0036580483, %v4120_v1  ;;  %v10757_v41 = vmin.f32 %v4196_v49, 16.0  ;;  %v3758_v24 = vadd.f32 %v10700_v22, %v3697_v17 }
 0x64d   : > { %v3837_v33 = vpop.f32.mrf.mxu1  ;;  %v4132_v5 = vadd.f32 0.014752088, %v4131_v14  ;;  %v4045_v12 = vadd.f32 0.18741608, %v4044_v55 }
 0x64e   : > { %v4057_v58 = vmul.f32 %v4056_v26, %v10715_v46  ;;  %v4198_v52 = vmul.f32 2.1237322e-06, %v10757_v41  ;;  %v4209_v54 = vmul.f32 3.8918573e-05, %v10757_v41  ;;  %v3838_v49 = vadd.f32 %v3837_v33, %v3796_v40  ;;  %v3925_v26 = vpop.f32.mrf.mxu3 }
 0x64f   : > { %v4122_v11 = vmul.f32 %v4121_v4, %v10734_v3  ;;  %v4133_v57 = vmul.f32 %v4132_v5, %v10734_v3  ;;  %v4046_v43 = vmul.f32 %v4045_v12, %v10715_v46 }
 0x650   : > { %v10766_v63 = vadd.f32 1.0, %v4057_v58  ;;  %v4199_v1 = vadd.f32 0.00028619796, %v4198_v52  ;;  %v4210_v34 = vadd.f32 0.001143296, %v4209_v54  ;;  %v3889_v33 = vadd.f32 %v3888_v6, %v3838_v49 }
 0x651   : > { %v4134_v15 = vadd.f32 0.112945676, %v4133_v57  ;;  %v4123_v4 = vadd.f32 0.05243302, %v4122_v11  ;;  %v3801_v52 = vadd.f32 %v3800_v45, %v3758_v24  ;;  %v3973_v54 = vmul.f32 %v3972_v25, %v10728_v50 }
 0x652   : > { %7928 = vrcp.f32 %v10766_v63  ;;  %v4200_v14 = vmul.f32 %v4199_v1, %v10757_v41  ;;  %v4211_v58 = vmul.f32 %v4210_v34, %v10757_v41  ;;  %v10777_v16 = vadd.f32 %v3925_v26, %v3889_v33  ;;  %v3892_v17 = vpop.f32.mrf.mxu2 }
 0x653   : > { %v4135_v5 = vmul.f32 %v4134_v15, %v10734_v3  ;;  %v3958_v6 = vmul.f32 2.1237322e-06, %v10728_v50  ;;  %v4124_v45 = vmul.f32 %v4123_v4, %v10734_v3  ;;  %v3705_v11 = vadd.f32 %v10713_v36, %v10693_v21 }
 0x654   : > { %v4212_v55 = vadd.f32 0.014752088, %v4211_v58  ;;  %v4201_v42 = vadd.f32 0.0036580483, %v4200_v14  ;;  %v3974_v46 = vadd.f32 0.112945676, %v3973_v54  ;;  %v3805_v14 = vpop.f32.mrf.mxu0  ;;  %vm4064_vm9 = vweird.f32 %v10766_v63 }
 0x655   : > { %v3843_v40 = vpop.f32.mrf.mxu1  ;;  %v4136_v51 = vadd.f32 0.4994258, %v4135_v5  ;;  %v4047_v34 = vadd.f32 1.1283791, %v4046_v43  ;;  %v10788_v15 = vmul.f32 0.70710677, %v10777_v16  ;;  %v3762_v43 = vadd.f32 %v10723_v18, %v3705_v11 }
 0x656   : > { %v3844_v22 = vadd.f32 %v3843_v40, %v3801_v52  ;;  %v4213_v1 = vmul.f32 %v4212_v55, %v10757_v41  ;;  %v4202_v24 = vmul.f32 %v4201_v42, %v10757_v41  ;;  %v3929_v33 = vpop.f32.mrf.mxu3  ;;  %v4068_v40 = vand.u32 2147483647, %v10766_v63 }
 0x657   : > { %v4137_v25 = vmul.f32 %v4136_v51, %v10734_v3  ;;  %v4070_v4 = vand.u32 2147483648, %v10766_v63  ;;  %v4125_v51 = vadd.f32 0.18741608, %v4124_v45  ;;  %v3996_v42 = vmul.f32 %v10788_v15, %v10788_v15 }
 0x658   : > { %v7929_v57 = vpop.eup %7928  ;;  %v4214_v26 = vadd.f32 0.112945676, %v4213_v1  ;;  %v3893_v58 = vadd.f32 %v3892_v17, %v3844_v22  ;;  %v3975_v54 = vmul.f32 %v3974_v46, %v10728_v50  ;;  %v4203_v17 = vadd.f32 0.05243302, %v4202_v24 }
 0x659   : > { %v4060_v49 = vmul.f32 %v7929_v57, %v10766_v63  ;;  %v10792_v5 = vadd.f32 1.0, %v4137_v25  ;;  %vm4065_vm2 = vweird.f32 %v7929_v57  ;;  %v4071_v45 = vor.u32 1.1754944e-38, %v4070_v4 }
 0x65a   : > { %v4215_v21 = vmul.f32 %v4214_v26, %v10757_v41  ;;  %v10800_v55 = vadd.f32 %v3929_v33, %v3893_v58  ;;  %vm4066_vm0 = vmor %vm4064_vm9, %vm4065_vm2  ;;  %v3713_v25 = vadd.f32 %v10738_v20, %v10683_v2  ;;  %v10806_v26 = vmin.f32 %v3996_v42, 16.0 }
 0x65b   : > { %v4061_v12 = vsub.f32 1.0, %v4060_v49  ;;  %7930 = vrcp.f32 %v10792_v5  ;;  %v4048_v49 = vmul.f32 %v4047_v34, %v10706_v53  ;;  %vm4069_vm1 = vcmp.eq.f32.partialorder %v4068_v40, 8.507059e+37 }
 0x65c   : > { %v4216_v1 = vadd.f32 0.4994258, %v4215_v21  ;;  %v4126_v18 = vmul.f32 %v4125_v51, %v10734_v3  ;;  %v4009_v63 = vmul.f32 3.8918573e-05, %v10806_v26  ;;  %v3806_v24 = vadd.f32 %v3805_v14, %v3762_v43  ;;  %v3810_v42 = vpop.f32.mrf.mxu0 }
 0x65d   : > { %v4062_v36 = vmul.f32 %v7929_v57, %v4061_v12  ;;  %v3849_v52 = vpop.f32.mrf.mxu1  ;;  %v3896_v12 = vpop.f32.mrf.mxu2  ;;  %v10812_v53 = vmul.f32 0.70710677, %v10800_v55  ;;  %v4204_v33 = vmul.f32 %v4203_v17, %v10757_v41  ;;  %v3942_v21 = vmul.f32 0.5, %v10698_v29 }
 0x65e   : > { %v4217_v11 = vmul.f32 %v4216_v1, %v10757_v41  ;;  %v4010_v40 = vadd.f32 0.001143296, %v4009_v63  ;;  %v3850_v4 = vadd.f32 %v3849_v52, %v3806_v24  ;;  %v10823_v14 = vmul.f32 0.5, %v10717_v37  ;;  %v3933_v43 = vpop.f32.mrf.mxu3 }
 0x65f   : > { %v4063_v22 = vadd.f32 %v7929_v57, %v4062_v36  ;;  %v4076_v3 = vmul.f32 %v10812_v53, %v10812_v53  ;;  %v4127_v17 = vadd.f32 1.1283791, %v4126_v18  ;;  %v4150_v52 = vand.u32 2147483648, %v10792_v5 }
 0x660   : > { %v10815_v2 = vadd.f32 1.0, %v4217_v11  ;;  %v4148_v18 = vand.u32 2147483647, %v10792_v5  ;;  %vm4144_vm10 = vweird.f32 %v10792_v5 }
 0x661   : > { %v4067_v46 = vsel %vm4066_vm0, %v7929_v57, %v4063_v22  ;;  %v7931_v20 = vpop.eup %7930  ;;  %v10817_v57 = vadd.f32 0.00028619796, %v3958_v6  ;;  %v3976_v22 = vadd.f32 0.4994258, %v3975_v54  ;;  %v3766_v6 = vadd.f32 %v10749_v31, %v3713_v25 }
 0x662   : > { %v4072_v58 = vsel %vm4069_vm1, %v4071_v45, %v4067_v46  ;;  %v4140_v51 = vmul.f32 %v7931_v20, %v10792_v5  ;;  %7932 = vrcp.f32 %v10815_v2  ;;  %v4205_v45 = vadd.f32 0.18741608, %v4204_v33 }
 0x663   : > { %v4073_v34 = vmul.f32 %v4072_v58, %v4048_v49  ;;  %v4011_v46 = vmul.f32 %v4010_v40, %v10806_v26  ;;  %v10830_v37 = vmin.f32 %v4076_v3, 16.0  ;;  %v3811_v11 = vadd.f32 %v3810_v42, %v3766_v6 }
 0x664   : > { %v4141_v49 = vsub.f32 1.0, %v4140_v51  ;;  %v3897_v58 = vadd.f32 %v3896_v12, %v3850_v4  ;;  %vm4145_vm15 = vweird.f32 %v7931_v20  ;;  %v4151_v33 = vor.u32 1.1754944e-38, %v4150_v52 }
 0x665   : > { %v7834_v36 = vclamps-f32 %v4073_v34, 1.0  ;;  %v3855_v29 = vpop.f32.mrf.mxu1  ;;  %v4078_v31 = vmul.f32 2.1237322e-06, %v10830_v37  ;;  %v4089_v25 = vmul.f32 3.8918573e-05, %v10830_v37  ;;  %v4206_v40 = vmul.f32 %v4205_v45, %v10757_v41  ;;  %v3900_v12 = vpop.f32.mrf.mxu2  ;;  %vm4146_vm3 = vmor %vm4144_vm10, %vm4145_vm15 }
 0x666   : > { %v4142_v54 = vmul.f32 %v7931_v20, %v4141_v49  ;;  %v3856_v24 = vadd.f32 %v3855_v29, %v3811_v11  ;;  %v10839_v3 = vadd.f32 %v3933_v43, %v3897_v58  ;;  %v4128_v51 = vmul.f32 %v4127_v17, %v10726_v62 }
 0x667   : > { %v4278_v1 = vadd.f32 1.0, %v7834_v36  ;;  %v4079_v36 = vadd.f32 0.00028619796, %v4078_v31  ;;  %v4090_v5 = vadd.f32 0.001143296, %v4089_v25  ;;  %vm4149_vm8 = vcmp.eq.f32.partialorder %v4148_v18, 8.507059e+37 }
 0x668   : > { %v4143_v34 = vadd.f32 %v7931_v20, %v4142_v54  ;;  %v7933_v4 = vpop.eup %7932  ;;  %v3901_v49 = vadd.f32 %v3900_v12, %v3856_v24  ;;  %v4207_v45 = vadd.f32 1.1283791, %v4206_v40  ;;  %v10848_v11 = vmul.f32 0.70710677, %v10839_v3 }
 0x669   : > { %v10832_v63 = vmul.f32 %v4278_v1, %v3942_v21  ;;  %v4012_v21 = vadd.f32 0.014752088, %v4011_v46  ;;  %v4220_v6 = vmul.f32 %v7933_v4, %v10815_v2  ;;  %v4080_v41 = vmul.f32 %v4079_v36, %v10830_v37  ;;  %v3937_v46 = vpop.f32.mrf.mxu3 }
 0x66a   : > { %v4147_v42 = vsel %vm4146_vm3, %v7931_v20, %v4143_v34  ;;  %v4091_v43 = vmul.f32 %v4090_v5, %v10830_v37  ;;  %v4228_v58 = vand.u32 2147483647, %v10815_v2  ;;  %v4230_v62 = vand.u32 2147483648, %v10815_v2 }
 0x66b   : > { %4294 = vrot.lane.b32.xlu0 %v10832_v63, %s13671_s5  ;;  %v4152_v1 = vsel %vm4149_vm8, %v4151_v33, %v4147_v42  ;;  %v4221_v29 = vsub.f32 1.0, %v4220_v6  ;;  %v4013_v20 = vmul.f32 %v4012_v21, %v10806_v26  ;;  %vm4225_vm7 = vweird.f32 %v7933_v4 }
 0x66c   : > { %v4153_v52 = vmul.f32 %v4152_v1, %v4128_v51  ;;  %v4092_v17 = vadd.f32 0.014752088, %v4091_v43  ;;  %v4156_v31 = vmul.f32 %v10848_v11, %v10848_v11  ;;  %v3977_v25 = vmul.f32 %v3976_v22, %v10728_v50 }
 0x66d   : > { %v4222_v18 = vmul.f32 %v7933_v4, %v4221_v29  ;;  %v4081_v24 = vadd.f32 0.0036580483, %v4080_v41  ;;  %v10857_v33 = vadd.f32 %v3937_v46, %v3901_v49  ;;  %vm4224_vm5 = vweird.f32 %v10815_v2 }
 0x66e   : > { %v7836_v54 = vclamps-f32 %v4153_v52, 1.0  ;;  %v4093_v34 = vmul.f32 %v4092_v17, %v10830_v37  ;;  %v10860_v36 = vmin.f32 %v4156_v31, 16.0  ;;  %v4208_v21 = vmul.f32 %v4207_v45, %v10746_v59  ;;  %vm4226_vm6 = vmor %vm4224_vm5, %vm4225_vm7 }
 0x66f   : > { %v4223_v12 = vadd.f32 %v7933_v4, %v4222_v18  ;;  %vm4229_vm2 = vcmp.eq.f32.partialorder %v4228_v58, 8.507059e+37  ;;  %v4231_v5 = vor.u32 1.1754944e-38, %v4230_v62  ;;  %v4014_v6 = vadd.f32 0.112945676, %v4013_v20 }
 0x670   : > { %v4280_v40 = vadd.f32 1.0, %v7836_v54  ;;  %v4094_v51 = vadd.f32 0.112945676, %v4093_v34  ;;  %v4158_v1 = vmul.f32 2.1237322e-06, %v10860_v36  ;;  %v4082_v43 = vmul.f32 %v4081_v24, %v10830_v37 }
 0x671   : > { %v4227_v22 = vsel %vm4226_vm6, %v7933_v4, %v4223_v12  ;;  %v10870_v49 = vmul.f32 0.70710677, %v10857_v33  ;;  %v3960_v59 = vmul.f32 %v10817_v57, %v10728_v50  ;;  %v4169_v45 = vmul.f32 3.8918573e-05, %v10860_v36 }
 0x672   : > { %v10864_v42 = vmul.f32 %v4280_v40, %v10823_v14  ;;  %v4232_v41 = vsel %vm4229_vm2, %v4231_v5, %v4227_v22  ;;  %v4095_v2 = vmul.f32 %v4094_v51, %v10830_v37  ;;  %v4159_v14 = vadd.f32 0.00028619796, %v4158_v1 }
 0x673   : > { %v4233_v52 = vmul.f32 %v4232_v41, %v4208_v21  ;;  %v10877_v4 = vadd.f32 1.0, %v3977_v25  ;;  %v4015_v46 = vmul.f32 %v4014_v6, %v10806_v26  ;;  %v4083_v62 = vadd.f32 0.05243302, %v4082_v43 }
 0x674   : > { %4296 = vrot.lane.b32.xlu1 %v10864_v42, %s13671_s5  ;;  %v4096_v58 = vadd.f32 0.4994258, %v4095_v2  ;;  %v4170_v20 = vadd.f32 0.001143296, %v4169_v45  ;;  %v4236_v17 = vmul.f32 %v10870_v49, %v10870_v49  ;;  %v3961_v54 = vadd.f32 0.0036580483, %v3960_v59 }
 0x675   : > { %v7838_v29 = vclamps-f32 %v4233_v52, 1.0  ;;  %v3946_v57 = vmul.f32 0.5, %v10736_v10  ;;  %v3998_v24 = vmul.f32 2.1237322e-06, %v10806_v26  ;;  %v4160_v25 = vmul.f32 %v4159_v14, %v10860_v36 }
 0x676   : > { %v4097_v31 = vmul.f32 %v4096_v58, %v10830_v37  ;;  %v4171_v34 = vmul.f32 %v4170_v20, %v10860_v36  ;;  %v10887_v40 = vmin.f32 %v4236_v17, 16.0  ;;  %7934 = vrcp.f32 %v10877_v4 }
 0x677   : > { %v4282_v18 = vadd.f32 1.0, %v7838_v29  ;;  %v4016_v21 = vadd.f32 0.4994258, %v4015_v46  ;;  %v4084_v51 = vmul.f32 %v4083_v62, %v10830_v37  ;;  %v3962_v1 = vmul.f32 %v3961_v54, %v10728_v50 }
 0x678   : > { %v4098_v5 = vadd.f32 1.0, %v4097_v31  ;;  %v4172_v10 = vadd.f32 0.014752088, %v4171_v34  ;;  %v4238_v22 = vmul.f32 2.1237322e-06, %v10887_v40  ;;  %vm3984_vm3 = vweird.f32 %v10877_v4 }
 0x679   : > { %v10890_v12 = vmul.f32 %v4282_v18, %v3946_v57  ;;  %v4249_v6 = vmul.f32 3.8918573e-05, %v10887_v40  ;;  %v3999_v41 = vadd.f32 0.00028619796, %v3998_v24  ;;  %v4161_v43 = vadd.f32 0.0036580483, %v4160_v25 }
 0x67a   : > { %7936 = vrcp.f32 %v4098_v5  ;;  %v4017_v2 = vmul.f32 %v4016_v21, %v10806_v26  ;;  %v4173_v59 = vmul.f32 %v4172_v10, %v10860_v36  ;;  %v4239_v52 = vadd.f32 0.00028619796, %v4238_v22 }
 0x67b   : > { %4298 = vrot.lane.b32.xlu2 %v10890_v12, %s13671_s5  ;;  %v4250_v45 = vadd.f32 0.001143296, %v4249_v6  ;;  %v4085_v14 = vadd.f32 0.18741608, %v4084_v51  ;;  %v3963_v20 = vadd.f32 0.05243302, %v3962_v1  ;;  %v4000_v17 = vmul.f32 %v3999_v41, %v10806_v26 }
 0x67c   : > { %v10900_v29 = vpop.eup %7934  ;;  %v4174_v46 = vadd.f32 0.112945676, %v4173_v59  ;;  %v4240_v58 = vmul.f32 %v4239_v52, %v10887_v40  ;;  %v4162_v54 = vmul.f32 %v4161_v43, %v10860_v36  ;;  %v10906_v18 = vadd.f32 1.0, %v4017_v2 }
 0x67d   : > { %v4251_v62 = vmul.f32 %v4250_v45, %v10887_v40  ;;  %v4086_v25 = vmul.f32 %v4085_v14, %v10830_v37  ;;  %v3980_v21 = vmul.f32 %v10900_v29, %v10877_v4  ;;  %v3964_v6 = vmul.f32 %v3963_v20, %v10728_v50 }
 0x67e   : > { %v4175_v31 = vmul.f32 %v4174_v46, %v10860_v36  ;;  %v4241_v10 = vadd.f32 0.0036580483, %v4240_v58  ;;  %v4001_v1 = vadd.f32 0.0036580483, %v4000_v17  ;;  %v4163_v43 = vadd.f32 0.05243302, %v4162_v54 }
 0x67f   : > { %v4252_v24 = vadd.f32 0.014752088, %v4251_v62  ;;  %7938 = vrcp.f32 %v10906_v18  ;;  %v4110_v2 = vand.u32 2147483648, %v4098_v5  ;;  %v4087_v37 = vadd.f32 1.1283791, %v4086_v25 }
 0x680   : > { %v7937_v57 = vpop.eup %7936  ;;  %v4176_v51 = vadd.f32 0.4994258, %v4175_v31  ;;  %v4108_v14 = vand.u32 2147483647, %v4098_v5  ;;  %v3981_v46 = vsub.f32 1.0, %v3980_v21  ;;  %v4242_v58 = vmul.f32 %v4241_v10, %v10887_v40 }
 0x681   : > { %v4100_v34 = vmul.f32 %v7937_v57, %v4098_v5  ;;  %v4253_v22 = vmul.f32 %v4252_v24, %v10887_v40  ;;  %vm4105_vm9 = vweird.f32 %v7937_v57  ;;  %vm4104_vm0 = vweird.f32 %v4098_v5 }
 0x682   : > { %v4177_v59 = vmul.f32 %v4176_v51, %v10860_v36  ;;  %v4164_v54 = vmul.f32 %v4163_v43, %v10860_v36  ;;  %v3965_v31 = vadd.f32 0.18741608, %v3964_v6  ;;  %v4002_v24 = vmul.f32 %v4001_v1, %v10806_v26  ;;  %vm4106_vm1 = vmor %vm4104_vm0, %vm4105_vm9 }
 0x683   : > { %v4101_v41 = vsub.f32 1.0, %v4100_v34  ;;  %v4254_v52 = vadd.f32 0.112945676, %v4253_v22  ;;  %v4111_v34 = vor.u32 1.1754944e-38, %v4110_v2  ;;  %v4088_v25 = vmul.f32 %v4087_v37, %v10812_v53 }
 0x684   : > { %v10916_v62 = vadd.f32 1.0, %v4177_v59  ;;  %vm4109_vm15 = vcmp.eq.f32.partialorder %v4108_v14, 8.507059e+37  ;;  %v3982_v10 = vmul.f32 %v10900_v29, %v3981_v46  ;;  %v4243_v5 = vadd.f32 0.05243302, %v4242_v58 }
 0x685   : > { %v4102_v45 = vmul.f32 %v7937_v57, %v4101_v41  ;;  %v4255_v20 = vmul.f32 %v4254_v52, %v10887_v40  ;;  %v10924_v22 = vpop.eup %7938  ;;  %v4165_v43 = vadd.f32 0.18741608, %v4164_v54  ;;  %v4003_v1 = vadd.f32 0.05243302, %v4002_v24 }
 0x686   : > { %7940 = vrcp.f32 %v10916_v62  ;;  %v3966_v2 = vmul.f32 %v3965_v31, %v10728_v50  ;;  %v4020_v52 = vmul.f32 %v10924_v22, %v10906_v18  ;;  %vm3985_vm10 = vweird.f32 %v10900_v29 }
 0x687   : > { %v4103_v17 = vadd.f32 %v7937_v57, %v4102_v45  ;;  %v4256_v51 = vadd.f32 0.4994258, %v4255_v20  ;;  %v3983_v45 = vadd.f32 %v10900_v29, %v3982_v10  ;;  %v3990_v14 = vand.u32 2147483648, %v10877_v4  ;;  %vm10944_vm8 = vmor %vm3984_vm3, %vm3985_vm10 }
 0x688   : > { %v4244_v46 = vmul.f32 %v4243_v5, %v10887_v40  ;;  %v3943_v58 = vmul.f32 0.5, %v10800_v55  ;;  %v4166_v50 = vmul.f32 %v4165_v43, %v10860_v36  ;;  %v3988_v54 = vand.u32 2147483647, %v10877_v4 }
 0x689   : > { %v4107_v21 = vsel %vm4106_vm1, %v7937_v57, %v4103_v17  ;;  %v4257_v6 = vmul.f32 %v4256_v51, %v10887_v40  ;;  %v4004_v31 = vmul.f32 %v4003_v1, %v10806_v26  ;;  %v3967_v24 = vadd.f32 1.1283791, %v3966_v2 }
 0x68a   : > { %v4112_v41 = vsel %vm4109_vm15, %v4111_v34, %v4107_v21  ;;  %v3987_v36 = vsel %vm10944_vm8, %v10900_v29, %v3983_v45  ;;  %v3991_v51 = vor.u32 1.1754944e-38, %v3990_v14  ;;  %v4190_v4 = vand.u32 2147483648, %v10916_v62 }
 0x68b   : > { %v4113_v59 = vmul.f32 %v4112_v41, %v4088_v25  ;;  %v10931_v57 = vadd.f32 1.0, %v4257_v6  ;;  %v4021_v25 = vsub.f32 1.0, %v4020_v52  ;;  %v4245_v10 = vadd.f32 0.18741608, %v4244_v46 }
 0x68c   : > { %v7941_v37 = vpop.eup %7940  ;;  %v4167_v41 = vadd.f32 1.1283791, %v4166_v50  ;;  %vm3989_vm5 = vcmp.eq.f32.partialorder %v3988_v54, 8.507059e+37  ;;  %v4005_v43 = vadd.f32 0.18741608, %v4004_v31  ;;  %vm4184_vm6 = vweird.f32 %v10916_v62 }
 0x68d   : > { %v7835_v53 = vclamps-f32 %v4113_v59, 1.0  ;;  %v4180_v17 = vmul.f32 %v7941_v37, %v10916_v62  ;;  %7942 = vrcp.f32 %v10931_v57  ;;  %vm4185_vm7 = vweird.f32 %v7941_v37 }
 0x68e   : > { %v4188_v59 = vand.u32 2147483647, %v10916_v62  ;;  %v3992_v6 = vsel %vm3989_vm5, %v3991_v51, %v3987_v36  ;;  %v4022_v1 = vmul.f32 %v10924_v22, %v4021_v25  ;;  %v3968_v52 = vmul.f32 %v3967_v24, %v10709_v47  ;;  %vm4186_vm2 = vmor %vm4184_vm6, %vm4185_vm7 }
 0x68f   : > { %v4279_v20 = vadd.f32 1.0, %v7835_v53  ;;  %v4181_v21 = vsub.f32 1.0, %v4180_v17  ;;  %v4191_v53 = vor.u32 1.1754944e-38, %v4190_v4  ;;  %v4246_v45 = vmul.f32 %v4245_v10, %v10887_v40 }
 0x690   : > { %v4168_v14 = vmul.f32 %v4167_v41, %v10848_v11  ;;  %vm4189_vm9 = vcmp.eq.f32.partialorder %v4188_v59, 8.507059e+37  ;;  %v4006_v50 = vmul.f32 %v4005_v43, %v10806_v26  ;;  %vm4024_vm0 = vweird.f32 %v10906_v18 }
 0x691   : > { %v10948_v55 = vmul.f32 %v4279_v20, %v3943_v58  ;;  %v4182_v5 = vmul.f32 %v7941_v37, %v4181_v21  ;;  %v3993_v20 = vmul.f32 %v3992_v6, %v3968_v52  ;;  %v4023_v62 = vadd.f32 %v10924_v22, %v4022_v1 }
 0x692   : > { %vm4025_vm1 = vweird.f32 %v10924_v22  ;;  %v4028_v40 = vand.u32 2147483647, %v10906_v18  ;;  %v4030_v11 = vand.u32 2147483648, %v10906_v18  ;;  %v4270_v31 = vand.u32 2147483648, %v10931_v57 }
 0x693   : > { %4302 = vrot.lane.b32.xlu1 %v10948_v55, %s13671_s5  ;;  %v4183_v2 = vadd.f32 %v7941_v37, %v4182_v5  ;;  %v7943_v29 = vpop.eup %7942  ;;  %v4268_v26 = vand.u32 2147483647, %v10931_v57  ;;  %v4007_v25 = vadd.f32 1.1283791, %v4006_v50  ;;  %vm10973_vm10 = vmor %vm4024_vm0, %vm4025_vm1  ;;  %v3945_v36 = vmul.f32 0.5, %v10839_v3 }
 0x694   : > { %v4260_v58 = vmul.f32 %v7943_v29, %v10931_v57  ;;  %vm4265_vm15 = vweird.f32 %v7943_v29  ;;  %v4027_v51 = vsel %vm10973_vm10, %v10924_v22, %v4023_v62  ;;  %vm4264_vm3 = vweird.f32 %v10931_v57 }
 0x695   : > { %v4187_v46 = vsel %vm4186_vm2, %v7941_v37, %v4183_v2  ;;  %v4247_v37 = vadd.f32 1.1283791, %v4246_v45  ;;  %v7832_v41 = vclamps-f32 %v3993_v20, 1.0  ;;  %vm4029_vm8 = vcmp.eq.f32.partialorder %v4028_v40, 8.507059e+37  ;;  %vm4266_vm7 = vmor %vm4264_vm3, %vm4265_vm15 }
 0x696   : > { %v4192_v17 = vsel %vm4189_vm9, %v4191_v53, %v4187_v46  ;;  %v4261_v54 = vsub.f32 1.0, %v4260_v58  ;;  %v4031_v5 = vor.u32 1.1754944e-38, %v4030_v11  ;;  %v4271_v59 = vor.u32 1.1754944e-38, %v4270_v31 }
 0x697   : > { %v4193_v47 = vmul.f32 %v4192_v17, %v4168_v14  ;;  %v4248_v43 = vmul.f32 %v4247_v37, %v10870_v49  ;;  %vm4269_vm5 = vcmp.eq.f32.partialorder %v4268_v26, 8.507059e+37  ;;  %v4008_v2 = vmul.f32 %v4007_v25, %v10788_v15 }
 0x698   : > { %v4262_v34 = vmul.f32 %v7943_v29, %v4261_v54  ;;  %v4032_v1 = vsel %vm4029_vm8, %v4031_v5, %v4027_v51  ;;  %v4276_v22 = vadd.f32 1.0, %v7832_v41  ;;  %v3940_v45 = vmul.f32 0.5, %v10702_v9  ;;  %v2411_v54 = vld [vmem:[%s13694_s27 + $0x18] sm:$0xff]  ;;  %v4402_v51 = vld [vmem:[%s13695_s1 + $0x10] sm:$0xff] }
 0x699   : > { %v7837_v24 = vclamps-f32 %v4193_v47, 1.0  ;;  %v4033_v53 = vmul.f32 %v4032_v1, %v4008_v2  ;;  %v3947_v14 = vmul.f32 0.5, %v10857_v33  ;;  %v3941_v15 = vmul.f32 0.5, %v10777_v16  ;;  %v13685_v2 = vld [vmem:[#allocation15_spill] sm:$0xff] }
 0x69a   : > { %v4263_v10 = vadd.f32 %v7943_v29, %v4262_v34  ;;  %v4284_v58 = vmul.f32 %v4276_v22, %v3940_v45 }
 0x69b   : > { %v4281_v4 = vadd.f32 1.0, %v7837_v24  ;;  %v7833_v20 = vclamps-f32 %v4033_v53, 1.0 }
 0x69c   : > { %v4267_v6 = vsel %vm4266_vm7, %v7943_v29, %v4263_v10 }
 0x69d   : > { %v4289_v18 = vmul.f32 %v4281_v4, %v3945_v36  ;;  %v4272_v3 = vsel %vm4269_vm5, %v4271_v59, %v4267_v6  ;;  %v4277_v29 = vadd.f32 1.0, %v7833_v20  ;;  %v13680_v59 = vld [vmem:[#allocation13_spill] sm:$0xff] }
 0x69e   : > { %v4273_v52 = vmul.f32 %v4272_v3, %v4248_v43 }
 0x69f   : > { %4304 = vrot.lane.b32.xlu2 %v4289_v18, %s13671_s5  ;;  %v4285_v50 = vmul.f32 %v4277_v29, %v3941_v15  ;;  %v4401_v29 = vld [vmem:[%s13695_s1 + $0x8] sm:$0xff] }
 0x6a0   : > { %v7839_v57 = vclamps-f32 %v4273_v52, 1.0 }
 0x6a2   : > { %v4283_v46 = vadd.f32 1.0, %v7839_v57 }
 0x6a4   : > { %v4291_v49 = vmul.f32 %v4283_v46, %v3947_v14  ;;  %v13691_v46 = vld [vmem:[#allocation16_spill] sm:$0xff] }
 0x6a5   : > { %vm13692_vm1 = vcmp.eq.s32.totalorder %v13691_v46, 1  ;;  %v5176_v46 = vld [vmem:[%s13363_s11 + $0x10] sm:$0xff] }
 0x6a6   : > { %4306 = vrot.lane.b32.xlu0 %v4291_v49, %s13671_s5  ;;  %vm13693_vm15 = vmmov %vm13692_vm1 }
 0x6a7   : > { %4292 = vrot.lane.b32.xlu2 %v4284_v58, %s13671_s5 }
 0x6ae   : > { %4300 = vrot.lane.b32.xlu0 %v4285_v50, %s13671_s5  ;;  %s13288_s5 = scalar_lea.vmem %s13376_s24, %s8148_s7 }
 0x6d5   : > { %v4299_v17 = vpop.permute.xlu2 %4298 }
 0x6dd   : > { %v4295_v16 = vpop.permute.xlu0 %4294 }
 0x6e6   : > { %v4297_v62 = vpop.permute.xlu1 %4296 }
 0x6f9   : > { %v4305_v47 = vpop.permute.xlu2 %4304 }
 0x6fa   : > { %v4310_v9 = vsel %vm920_vm11, %v4297_v62, %v4305_v47  ;;  %v4314_v33 = vsel %vm920_vm11, %v4305_v47, %v4297_v62  ;;  %v13698_v47 = vld [vmem:[#allocation14_spill] sm:$0xff] }
 0x6fb   : > { %v4321_v40 = vsel %vm947_vm13, %v4310_v9, %v4289_v18  ;;  %v4320_v11 = vsel %vm947_vm13, %v4314_v33, %v10864_v42  ;;  %vm13681_vm13 = vcmp.eq.s32.totalorder %v13680_v59, 1  ;;  %vm13699_vm8 = vcmp.eq.s32.totalorder %v13698_v47, 1  ;;  %v5175_v59 = vld [vmem:[%s13363_s11 + $0x8] sm:$0xff] }
 0x6fc   : > { %4336 = vrot.lane.b32.xlu1 %v4321_v40, %s13677_s19  ;;  %4328 = vrot.lane.b32.xlu0 %v4320_v11, %s13677_s19  ;;  %vm13700_vm7 = vmmov %vm13699_vm8 }
 0x705   : > { %v4303_v37 = vpop.permute.xlu1 %4302 }
 0x706   : > { %v4309_v31 = vsel %vm920_vm11, %v4295_v16, %v4303_v37  ;;  %v4313_v24 = vsel %vm920_vm11, %v4303_v37, %v4295_v16 }
 0x707   : > { %v4318_v26 = vsel %vm946_vm14, %v4313_v24, %v10832_v63  ;;  %v4319_v42 = vsel %vm946_vm14, %v4309_v31, %v10948_v55  ;;  %v4293_v55 = vpop.permute.xlu2 %4292  ;;  %vm13682_vm14 = vmmov %vm13681_vm13  ;;  %v13703_v31 = vld [vmem:[#allocation17_spill] sm:$0xff] }
 0x708   : > { %4326 = vrot.lane.b32.xlu2 %v4318_v26, %s13677_s19  ;;  %4334 = vrot.lane.b32.xlu0 %v4319_v42, %s13677_s19 }
 0x718   : > { %v4307_v25 = vpop.permute.xlu0 %4306 }
 0x719   : > { %v4311_v21 = vsel %vm920_vm11, %v4299_v17, %v4307_v25  ;;  %v4315_v36 = vsel %vm920_vm11, %v4307_v25, %v4299_v17  ;;  %v4400_v25 = vld [vmem:[%s13695_s1] sm:$0xff] }
 0x71a   : > { %v4322_v4 = vsel %vm948_vm12, %v4315_v36, %v10890_v12  ;;  %v4323_v63 = vsel %vm948_vm12, %v4311_v21, %v4291_v49  ;;  %vm13683_vm12 = vcmp.lt.s32.totalorder %v8238_v35, 32  ;;  %v2408_v49 = vld [vmem:[%s13694_s27] sm:$0xff]  ;;  %v5215_v21 = vld [vmem:[%s13362_s10 + $0x8] sm:$0xff]  ;;  %v2410_v36 = vld [vmem:[%s13694_s27 + $0x10] sm:$0xff] }
 0x71b   : > { %4330 = vrot.lane.b32.xlu1 %v4322_v4, %s13677_s19  ;;  %4338 = vrot.lane.b32.xlu2 %v4323_v63, %s13677_s19  ;;  %vm13684_vm6 = vmmov %vm13683_vm12 }
 0x71c   : > { %vm13689_vm9 = vmmov %vm13684_vm6 }
 0x71d   : > { %vm13690_vm0 = vmmov %vm13684_vm6 }
 0x71e   : > { %vm13696_vm10 = vmmov %vm13690_vm0 }
 0x71f   : > { %vm13697_vm3 = vmmov %vm13690_vm0 }
 0x720   : > { %v4301_v10 = vpop.permute.xlu0 %4300  ;;  %vm13701_vm5 = vmmov %vm13690_vm0 }
 0x721   : > { %v4308_v41 = vsel %vm920_vm11, %v4293_v55, %v4301_v10  ;;  %v4312_v5 = vsel %vm920_vm11, %v4301_v10, %v4293_v55  ;;  %vm13686_vm11 = vcmp.eq.s32.totalorder %v13685_v2, 1  ;;  %v5142_v55 = vld [vmem:[%s13706_s20] sm:$0xff]  ;;  %v5144_v10 = vld [vmem:[%s13706_s20 + $0x10] sm:$0xff] }
 0x722   : > { %v4316_v18 = vsel %vm13681_vm13, %v4312_v5, %v4284_v58  ;;  %v4317_v12 = vsel %vm13682_vm14, %v4308_v41, %v4285_v50  ;;  %vm13687_vm2 = vmmov %vm13686_vm11  ;;  %vm13704_vm14 = vcmp.eq.s32.totalorder %v13703_v31, 1  ;;  %v5216_v41 = vld [vmem:[%s13362_s10 + $0x10] sm:$0xff]  ;;  %v5249_v5 = vld [vmem:[%s13364_s12 + $0x18] sm:$0xff] }
 0x723   : > { %4324 = vrot.lane.b32.xlu1 %v4316_v18, %s13677_s19  ;;  %4332 = vrot.lane.b32.xlu2 %v4317_v12, %s13677_s19  ;;  %vm13702_vm13 = vmmov %vm13690_vm0  ;;  %v6530_v31 = vld [vmem:[%s13368_s16 + $0x10] sm:$0xff]  ;;  %s8002_s19 = smov 111  }
 0x762   : > { %v4327_v53 = vpop.permute.xlu2 %4326 }
 0x76e   : > { %v4337_v43 = vpop.permute.xlu1 %4336  ;;  %v4329_v6 = vpop.permute.xlu0 %4328 }
 0x76f   : > { %v4342_v1 = vsel %vm13683_vm12, %v4329_v6, %v4337_v43  ;;  %v4346_v3 = vsel %vm13684_vm6, %v4337_v43, %v4329_v6  ;;  %vm13705_vm12 = vmmov %vm13704_vm14  ;;  %v6422_v43 = vld [vmem:[%s13367_s15] sm:$0xff]  ;;  %vm13710_vm6 = vcmp.lt.s32.totalorder %v8238_v35, 64 }
 0x770   : > { %v11041_v52 = vsel %vm13686_vm11, %v4346_v3, %v4320_v11  ;;  %v11045_v22 = vsel %vm13687_vm2, %v4342_v1, %v4321_v40  ;;  %v5246_v6 = vld [vmem:[%s13364_s12] sm:$0xff]  ;;  %v5143_v1 = vld [vmem:[%s13706_s20 + $0x8] sm:$0xff]  ;;  %v6425_v3 = vld [vmem:[%s13367_s15 + $0x18] sm:$0xff] }
 0x771   : > { %4360 = vrot.lane.b32.xlu2 %v11041_v52, %s13688_s28  ;;  %4368 = vrot.lane.b32.xlu0 %v11045_v22, %s13688_s28  ;;  %vm13711_vm11 = vmmov %vm13710_vm6 }
 0x775   : > { %v4339_v15 = vpop.permute.xlu2 %4338 }
 0x77a   : > { %v4335_v57 = vpop.permute.xlu0 %4334 }
 0x77b   : > { %v4341_v45 = vsel %vm13689_vm9, %v4327_v53, %v4335_v57  ;;  %v4345_v14 = vsel %vm13690_vm0, %v4335_v57, %v4327_v53  ;;  %v5145_v53 = vld [vmem:[%s13706_s20 + $0x18] sm:$0xff]  ;;  %v5174_v57 = vld [vmem:[%s13363_s11] sm:$0xff] }
 0x77c   : > { %v11057_v58 = vsel %vm13692_vm1, %v4345_v14, %v4318_v26  ;;  %v11061_v20 = vsel %vm13693_vm15, %v4341_v45, %v4319_v42  ;;  %v5217_v26 = vld [vmem:[%s13362_s10 + $0x18] sm:$0xff]  ;;  %v2409_v42 = vld [vmem:[%s13694_s27 + $0x8] sm:$0xff]  ;;  %v7842_v45 = vld [vmem:[%s13368_s16 + $0x90] sm:$0xff] }
 0x77d   : > { %4358 = vrot.lane.b32.xlu1 %v11057_v58, %s13688_s28  ;;  %4366 = vrot.lane.b32.xlu2 %v11061_v20, %s13688_s28  ;;  %v4333_v40 = vpop.permute.xlu2 %4332  ;;  %vm13718_vm1 = vmmov %vm13710_vm6 }
 0x77e   : > { %vm13719_vm15 = vmmov %vm13718_vm1 }
 0x785   : > { %2414 = vperm.xlu2 %7910, %v2408_v49   ;;  %v5177_v49 = vld [vmem:[%s13363_s11 + $0x18] sm:$0xff] }
 0x78d   : > { %4411 = vperm.xlu2 %7910, %v4401_v29   ;;  %v4331_v50 = vpop.permute.xlu1 %4330  ;;  %v11181_v29 = vld [vmem:[%s8154_s8 + $0x10] sm:$0xff] }
 0x78e   : > { %v4343_v17 = vsel %vm13696_vm10, %v4331_v50, %v4339_v15  ;;  %v4347_v62 = vsel %vm13697_vm3, %v4339_v15, %v4331_v50  ;;  %v6423_v50 = vld [vmem:[%s13367_s15 + $0x8] sm:$0xff] }
 0x78f   : > { %v11079_v9 = vsel %vm13699_vm8, %v4347_v62, %v4322_v4  ;;  %v11083_v33 = vsel %vm13700_vm7, %v4343_v17, %v4323_v63  ;;  %v5247_v4 = vld [vmem:[%s13364_s12 + $0x8] sm:$0xff]  ;;  %v4403_v63 = vld [vmem:[%s13695_s1 + $0x18] sm:$0xff]  ;;  %v6424_v17 = vld [vmem:[%s13367_s15 + $0x10] sm:$0xff] }
 0x790   : > { %4362 = vrot.lane.b32.xlu0 %v11079_v9, %s13688_s28  ;;  %4370 = vrot.lane.b32.xlu1 %v11083_v33, %s13688_s28  ;;  %v11194_v62 = vld [vmem:[%s8154_s8 + $0x8] sm:$0xff] }
 0x795   : > { %2429 = vperm.xlu2 %7910, %v2411_v54   ;;  %v4325_v11 = vpop.permute.xlu1 %4324  ;;  %v7840_v54 = vld [vmem:[%s13368_s16 + $0x80] sm:$0xff] }
 0x796   : > { %v4340_v16 = vsel %vm13701_vm5, %v4325_v11, %v4333_v40  ;;  %v4344_v37 = vsel %vm13702_vm13, %v4333_v40, %v4325_v11  ;;  %v7841_v40 = vld [vmem:[%s13368_s16 + $0x88] sm:$0xff]  ;;  %v11207_v11 = vld [vmem:[%s8154_s8 + $0x38] sm:$0xff]  ;;  %vm13727_vm5 = vmmov %vm13718_vm1 }
 0x797   : > { %v11098_v24 = vsel %vm13704_vm14, %v4344_v37, %v4316_v18  ;;  %v11102_v34 = vsel %vm13705_vm12, %v4340_v16, %v4317_v12  ;;  %v5248_v18 = vld [vmem:[%s13364_s12 + $0x10] sm:$0xff]  ;;  %v5214_v12 = vld [vmem:[%s13362_s10] sm:$0xff]  ;;  %v7843_v37 = vld [vmem:[%s13368_s16 + $0x98] sm:$0xff] }
 0x798   : > { %4356 = vrot.lane.b32.xlu0 %v11098_v24, %s13688_s28  ;;  %4364 = vrot.lane.b32.xlu1 %v11102_v34, %s13688_s28  ;;  %vm13728_vm13 = vmmov %vm13718_vm1 }
 0x79d   : > { %5235 = vperm.xlu2 %7910, %v5217_v26   ;;  %v11220_v26 = vld [vmem:[%s8154_s8] sm:$0xff] }
 0x7a0   : > { %2419 = vperm.xlu0 %7911, %v2409_v42   ;;  %4406 = vperm.xlu1 %7909, %v4400_v25  }
 0x7a5   : > { %5225 = vperm.xlu2 %7910, %v5215_v21  }
 0x7a8   : > { %2424 = vperm.xlu0 %7911, %v2410_v36   ;;  %4416 = vperm.xlu1 %7909, %v4402_v51   ;;  %v4396_v51 = vld [vmem:[%s13712_s6] sm:$0xff] }
 0x7ad   : > { %5257 = vperm.xlu2 %7910, %v5247_v4   ;;  %v13713_v4 = vld [vmem:[#allocation23_spill] sm:$0xff] }
 0x7ae   : > { %vm13714_vm2 = vcmp.eq.s32.totalorder %v13713_v4, 1 }
 0x7af   : > { %vm13715_vm9 = vmmov %vm13714_vm2 }
 0x7b0   : > { %4421 = vperm.xlu0 %7911, %v4403_v63   ;;  %5148 = vperm.xlu1 %7909, %v5142_v55  }
 0x7b5   : > { %5158 = vperm.xlu2 %7910, %v5144_v10   ;;  %v11240_v10 = vld [vmem:[%s8154_s8 + $0x20] sm:$0xff] }
 0x7b8   : > { %5230 = vperm.xlu0 %7911, %v5216_v41   ;;  %5267 = vperm.xlu1 %7909, %v5249_v5   ;;  %v11245_v41 = vld [vmem:[%s8154_s8 + $0x30] sm:$0xff] }
 0x7bd   : > { %5185 = vperm.xlu2 %7910, %v5175_v59  }
 0x7c0   : > { %5262 = vperm.xlu0 %7911, %v5248_v18   ;;  %5220 = vperm.xlu1 %7909, %v5214_v12  }
 0x7c5   : > { %6428 = vperm.xlu2 %7910, %v6422_v43  }
 0x7c8   : > { %5252 = vperm.xlu0 %7911, %v5246_v6   ;;  %5153 = vperm.xlu1 %7909, %v5143_v1  }
 0x7cb   : > { %v4361_v2 = vpop.permute.xlu2 %4360 }
 0x7cd   : > { %6443 = vperm.xlu2 %7910, %v6425_v3   ;;  %v13721_v3 = vld [vmem:[#allocation21_spill] sm:$0xff] }
 0x7ce   : > { %vm13722_vm10 = vcmp.eq.s32.totalorder %v13721_v3, 1 }
 0x7cf   : > { %vm13723_vm3 = vmmov %vm13722_vm10 }
 0x7d0   : > { %5163 = vperm.xlu0 %7911, %v5145_v53   ;;  %5180 = vperm.xlu1 %7909, %v5174_v57  }
 0x7d5   : > { %6487 = vperm.xlu2 %7910, %v7842_v45   ;;  %v11273_v45 = vld [vmem:[%s8154_s8 + $0x18] sm:$0xff] }
 0x7d7   : > { %v4367_v14 = vpop.permute.xlu2 %4366 }
 0x7d8   : > { %5190 = vperm.xlu0 %7911, %v5176_v46   ;;  %5195 = vperm.xlu1 %7909, %v5177_v49  }
 0x7dd   : > { %6505 = vrot.lane.b32.xlu2 %v11181_v29, %s7998_s4 }
 0x7df   : > { %v11185_v15 = vpop.permute.xlu2 %2414 }
 0x7e0   : > { %6433 = vperm.xlu0 %7911, %v6423_v50   ;;  %6438 = vperm.xlu1 %7909, %v6424_v17  }
 0x7e3   : > { %v4369_v42 = vpop.permute.xlu0 %4368 }
 0x7e4   : > { %v4374_v21 = vsel %vm13710_vm6, %v4361_v2, %v4369_v42  ;;  %v4378_v36 = vsel %vm13711_vm11, %v4369_v42, %v4361_v2 }
 0x7e5   : > { %6511 = vrot.lane.b32.xlu2 %v11194_v62, %s7998_s4  ;;  %v4384_v63 = vsel %vm13714_vm2, %v4378_v36, %v11041_v52  ;;  %v4385_v55 = vsel %vm13715_vm9, %v4374_v21, %v11045_v22  ;;  %v4425_v52 = vsel %vm1119_vm4, %v4396_v51, 0  ;;  %v13716_v22 = vld [vmem:[#allocation19_spill] sm:$0xff]  ;;  %v13730_v21 = vld [vmem:[#allocation18_spill] sm:$0xff]  ;;  %vm13737_vm9 = vmmov %vm13718_vm1 }
 0x7e6   : > { %vm13717_vm0 = vcmp.eq.s32.totalorder %v13716_v22, 1  ;;  %v11260_v6 = vand.u32 4294901760, %v4425_v52  ;;  %vm13731_vm12 = vcmp.eq.s32.totalorder %v13730_v21, 1 }
 0x7e7   : > { %v11198_v47 = vpop.permute.xlu2 %4411  ;;  %v4392_v59 = vsel %vm13717_vm0, %v4385_v55, %v4384_v63  ;;  %vm13724_vm8 = vmmov %vm13717_vm0 }
 0x7e8   : > { %13707 = vst [vmem:[#allocation5_spill] sm:$0xff] %v11198_v47  ;;  %6477 = vperm.xlu0 %7911, %v7840_v54   ;;  %6482 = vperm.xlu1 %7909, %v7841_v40   ;;  %v11262_v1 = vand.u32 4294901760, %v4392_v59  ;;  %v4393_v57 = vsel %vm13724_vm8, %v4384_v63, %v4385_v55  ;;  %v11283_v46 = vsub.f32 %v4425_v52, %v11260_v6  ;;  %vm13732_vm6 = vmmov %vm13731_vm12  ;;  %v4397_v63 = vld [vmem:[%s13712_s6 + $0x8] sm:$0xff]  ;;  %vm6519_vm8 = vcmp.lt.s32.totalorder %v8238_v35, 17 }
 0x7e9   : > { %v11292_v54 = vand.u32 4294901760, %v4393_v57  ;;  %vm13738_vm0 = vmmov %vm13718_vm1 }
 0x7ea   : > { %v11290_v17 = vsub.f32 %v4392_v59, %v11262_v1  ;;  %v11326_v22 = vand.u32 4294901760, %v11283_v46 }
 0x7eb   : > { %v11334_v3 = vsub.f32 %v4393_v57, %v11292_v54 }
 0x7ed   : > { %6517 = vrot.lane.b32.xlu2 %v11207_v11, %s7998_s4 }
 0x7ef   : > { %v11211_v16 = vpop.permute.xlu2 %2429  ;;  %v4359_v5 = vpop.permute.xlu1 %4358 }
 0x7f0   : > { %13708 = vst [vmem:[#allocation8_spill] sm:$0xff] %v11211_v16  ;;  %6492 = vperm.xlu0 %7911, %v7843_v37   ;;  %6503 = vrot.lane.b32.xlu1 %v11220_v26, %s7998_s4  ;;  %v4373_v18 = vsel %vm13718_vm1, %v4359_v5, %v4367_v14  ;;  %v4377_v12 = vsel %vm13719_vm15, %v4367_v14, %v4359_v5  ;;  %v11278_v14 = vld [vmem:[%s8154_s8 + $0x28] sm:$0xff] }
 0x7f1   : > { %v4382_v2 = vsel %vm13722_vm10, %v4377_v12, %v11057_v58  ;;  %v4383_v53 = vsel %vm13723_vm3, %v4373_v18, %v11061_v20  ;;  %v13725_v58 = vld [vmem:[#allocation22_spill] sm:$0xff]  ;;  %v13483_v12 = vand.u32 4294901760, %v11290_v17 }
 0x7f2   : > { %vm13726_vm7 = vcmp.eq.s32.totalorder %v13725_v58, 1 }
 0x7f3   : > { %v4390_v49 = vsel %vm13726_vm7, %v4383_v53, %v4382_v2  ;;  %vm13729_vm14 = vmmov %vm13726_vm7  ;;  %vm6654_vm7 = vcmp.lt.s32.totalorder %v8238_v35, 15 }
 0x7f4   : > { %v4391_v42 = vsel %vm13729_vm14, %v4382_v2, %v4383_v53  ;;  %v11313_v55 = vand.u32 4294901760, %v4390_v49  ;;  %v4428_v53 = vsel %vm1119_vm4, %v4397_v63, 0  ;;  %vm7009_vm14 = vcmp.lt.s32.totalorder %v8238_v35, 111 }
 0x7f5   : > { %6558 = vperm.xlu2 %7910, %v6530_v31   ;;  %v2749_v31 = vadd.f32 %v10600_v32, %v11185_v15  ;;  %v13734_v32 = vld [vmem:[#allocation20_spill] sm:$0xff]  ;;  %v11336_v2 = vand.u32 4294901760, %v4391_v42 }
 0x7f6   : > { %vm13735_vm11 = vcmp.eq.s32.totalorder %v13734_v32, 1  ;;  %v11349_v57 = vsub.f32 %v4390_v49, %v11313_v55  ;;  %v11361_v49 = vand.u32 4294901760, %v4428_v53 }
 0x7f7   : > { %v11224_v25 = vpop.permute.xlu2 %5235  ;;  %vm13736_vm2 = vmmov %vm13735_vm11 }
 0x7f8   : > { %13709 = vst [vmem:[#allocation2_spill] sm:$0xff] %v11224_v25  ;;  %6507 = vrot.lane.b32.xlu0 %v11240_v10, %s7998_s4  ;;  %6509 = vrot.lane.b32.xlu1 %v11245_v41, %s7998_s4 }
 0x7fd   : > { %6652 = vrot.lane.b32.xlu2 %v11207_v11, %s7999_s3 }
 0x7ff   : > { %v11258_v43 = vpop.permute.xlu2 %5225 }
 0x800   : > { %13720 = vst [vmem:[#allocation13_spill] sm:$0xff] %v11258_v43  ;;  %6513 = vrot.lane.b32.xlu0 %v11273_v45, %s7998_s4  ;;  %6515 = vrot.lane.b32.xlu1 %v11278_v14, %s7998_s4 }
 0x802   : > { %v4371_v20 = vpop.permute.xlu1 %4370  ;;  %v4363_v50 = vpop.permute.xlu0 %4362 }
 0x803   : > { %v4375_v40 = vsel %vm13727_vm5, %v4363_v50, %v4371_v20  ;;  %v4379_v37 = vsel %vm13728_vm13, %v4371_v20, %v4363_v50  ;;  %v2814_v50 = vadd.f32 %v10607_v27, %v2749_v31  ;;  %v4510_v31 = vsub.f32 %v11290_v17, %v13483_v12 }
 0x804   : > { %v4386_v36 = vsel %vm13731_vm12, %v4379_v37, %v11079_v9  ;;  %v4387_v51 = vsel %vm13732_vm6, %v4375_v40, %v11083_v33  ;;  %v6528_v9 = vld [vmem:[%s13368_s16] sm:$0xff]  ;;  %v6529_v33 = vld [vmem:[%s13368_s16 + $0x8] sm:$0xff]  ;;  %v4459_v40 = vsub.f32 %v11283_v46, %v11326_v22  ;;  %vm6791_vm5 = vcmp.lt.s32.totalorder %v8238_v35, 127 }
 0x805   : > { %6650 = vrot.lane.b32.xlu2 %v11278_v14, %s7999_s3  ;;  %v4394_v5 = vsel %vm13735_vm11, %v4387_v51, %v4386_v36  ;;  %v4395_v52 = vsel %vm13736_vm2, %v4386_v36, %v4387_v51  ;;  %v11364_v51 = vsub.f32 %v4391_v42, %v11336_v2  ;;  %vm6928_vm13 = vcmp.lt.s32.totalorder %v8238_v35, 112 }
 0x806   : > { %v11328_v59 = vand.u32 4294901760, %v4394_v5  ;;  %v11330_v18 = vand.u32 4294901760, %v4395_v52 }
 0x807   : > { %v11308_v4 = vpop.permute.xlu2 %5257 }
 0x808   : > { %13733 = vst [vmem:[#allocation15_spill] sm:$0xff] %v11308_v4  ;;  %v11340_v58 = vsub.f32 %v4394_v5, %v11328_v59  ;;  %v11343_v20 = vsub.f32 %v4395_v52, %v11330_v18  ;;  %6548 = vperm.xlu0 %7911, %v6528_v9   ;;  %6553 = vperm.xlu1 %7909, %v6529_v33   ;;  %v13739_v52 = vld [vmem:[#allocation24_spill] sm:$0xff] }
 0x809   : > { %4449 = vmatpush.msrb.mxu0 %v11328_v59  ;;  %4600 = vmatpush.msrb.mxu3 %v11328_v59  ;;  %vm13740_vm1 = vcmp.eq.s32.totalorder %v13739_v52, 1 }
 0x80a   : > { %v4365_v37 = vpop.permute.xlu1 %4364  ;;  %4556 = vmatpush.msrb.mxu2 %v11340_v58  ;;  %v4357_v21 = vpop.permute.xlu0 %4356  ;;  %v4503_v36 = vand.u32 4294901760, %v11340_v58  ;;  %v13485_v27 = vand.u32 4294901760, %v11343_v20  ;;  %vm13741_vm15 = vmmov %vm13740_vm1 }
 0x80b   : > { %4451 = vmatpush.msrb.mxu0 %v11262_v1  ;;  %4602 = vmatpush.msrb.mxu3 %v11262_v1  ;;  %v4372_v63 = vsel %vm13737_vm9, %v4357_v21, %v4365_v37  ;;  %v4376_v32 = vsel %vm13738_vm0, %v4365_v37, %v4357_v21  ;;  %v13743_v37 = vld [vmem:[#allocation25_spill] sm:$0xff] }
 0x80c   : > { %v4380_v9 = vsel %vm13740_vm1, %v4376_v32, %v11098_v24  ;;  %v4381_v42 = vsel %vm13741_vm15, %v4372_v63, %v11102_v34  ;;  %4559 = vmatpush.msrb.mxu2 %v11290_v17  ;;  %v4504_v33 = vsub.f32 %v11340_v58, %v4503_v36  ;;  %v4782_v12 = vsub.f32 %v11343_v20, %v13485_v27  ;;  %v6531_v34 = vld [vmem:[%s13368_s16 + $0x18] sm:$0xff] }
 0x80d   : > { %6640 = vrot.lane.b32.xlu2 %v11181_v29, %s7999_s3  ;;  %vm13744_vm10 = vcmp.eq.s32.totalorder %v13743_v37, 1  ;;  %4453 = vmatpush.msrb.mxu0 %v11313_v55  ;;  %v11395_v58 = vand.u32 4294901760, %v4459_v40  ;;  %v4515_v63 = vand.u32 4294901760, %v11349_v57  ;;  %v4398_v40 = vld [vmem:[%s13712_s6 + $0x10] sm:$0xff] }
 0x80e   : > { %v4388_v21 = vsel %vm13744_vm10, %v4381_v42, %v4380_v9  ;;  %vm13745_vm3 = vmmov %vm13744_vm10  ;;  %4604 = vmatpush.msrb.mxu3 %v11313_v55  ;;  %4562 = vmatpush.msrb.mxu2 %v11349_v57  ;;  %v4505_v37 = vand.u32 4294901760, %v4504_v33  ;;  %v4783_v27 = vand.u32 4294901760, %v4782_v12  ;;  %v2773_v12 = vadd.f32 %v10638_v19, %v11211_v16 }
 0x80f   : > { %v11384_v4 = vpop.permute.xlu2 %5158  ;;  %v4389_v24 = vsel %vm13745_vm3, %v4380_v9, %v4381_v42  ;;  %v11398_v32 = vand.u32 4294901760, %v4388_v21  ;;  %v11404_v9 = vsub.f32 %v4428_v53, %v11361_v49  ;;  %v2856_v42 = vadd.f32 %v10643_v7, %v2814_v50 }
 0x810   : > { %13742 = vst [vmem:[#allocation16_spill] sm:$0xff] %v11384_v4  ;;  %v11400_v52 = vand.u32 4294901760, %v4389_v24  ;;  %6563 = vperm.xlu0 %7911, %v6531_v34   ;;  %6644 = vrot.lane.b32.xlu1 %v11245_v41, %s7999_s3  ;;  %v13746_v53 = vand.u32 4294901760, %v11334_v3  ;;  %v4511_v50 = vand.u32 4294901760, %v4510_v31  ;;  %v4431_v19 = vsel %vm1119_vm4, %v4398_v40, 0 }
 0x811   : > { %v4520_v33 = vsub.f32 %v4388_v21, %v11398_v32  ;;  %4455 = vmatpush.msrb.mxu0 %v11398_v32  ;;  %4506 = vmatpush.msrb.mxu1 %v4505_v37  ;;  %v11432_v43 = vand.u32 4294901760, %v11404_v9  ;;  %v2898_v31 = vadd.f32 %v10656_v48, %v2856_v42  ;;  %v13748_v37 = vand.u32 4294901760, %v11364_v51 }
 0x812   : > { %v11412_v4 = vsub.f32 %v4389_v24, %v11400_v52  ;;  %v4788_v7 = vsub.f32 %v11334_v3, %v13746_v53  ;;  %v4516_v24 = vsub.f32 %v11349_v57, %v4515_v63  ;;  %4606 = vmatpush.msrb.mxu3 %v11398_v32  ;;  %4461 = vmatmul.f32.vlgmr.msrb.gmra.mxu0 %v11395_v58  ;;  %v11426_v34 = vpop.permute.xlu1 %4406  ;;  %v11428_v21 = vpop.permute.xlu0 %2419 }
 0x813   : > { %13747 = vst [vmem:[#allocation14_spill] sm:$0xff] %v11426_v34  ;;  %v4521_v5 = vand.u32 4294901760, %v4520_v33  ;;  %4647 = vmatpush.msra.mxu0 %v4503_v36  ;;  %v2757_v57 = vadd.f32 %v10612_v28, %v11428_v21  ;;  %v4794_v25 = vsub.f32 %v11364_v51, %v13748_v37  ;;  %4512 = vmatpush.msrb.mxu1 %v4511_v50  ;;  %v13751_v28 = vand.u32 4294901760, %v11290_v17 }
 0x814   : > { %4784 = vmatpush.msra.mxu3 %v4783_v27  ;;  %4565 = vmatpush.msrb.mxu2 %v4520_v33  ;;  %v4789_v34 = vand.u32 4294901760, %v4788_v7  ;;  %v13749_v47 = vand.u32 4294901760, %v11412_v4  ;;  %v4517_v36 = vand.u32 4294901760, %v4516_v24  ;;  %v11450_v27 = vand.u32 4294901760, %v4431_v19 }
 0x815   : > { %v4522_v53 = vsub.f32 %v4520_v33, %v4521_v5  ;;  %v2818_v48 = vadd.f32 %v10618_v23, %v2757_v57  ;;  %4568 = vmatmul.f32.vlgmr.msrb.gmra.mxu2 %v11283_v46  ;;  %4651 = vmatpush.msra.mxu0 %v13751_v28  ;;  %v2826_v42 = vadd.f32 %v10645_v38, %v2773_v12  ;;  %v4795_v7 = vand.u32 4294901760, %v4794_v25  ;;  %v4399_v38 = vld [vmem:[%s13712_s6 + $0x18] sm:$0xff] }
 0x816   : > { %v4800_v16 = vsub.f32 %v11412_v4, %v13749_v47  ;;  %4727 = vmatpush.msra.mxu2 %v11330_v18  ;;  %4790 = vmatpush.msra.mxu3 %v4789_v34  ;;  %v7847_v47 = vld [vmem:[%s13368_s16 + $0x38] sm:$0xff]  ;;  %v4467_v23 = vsub.f32 %v11404_v9, %v11432_v43  ;;  %v2949_v33 = vadd.f32 %v10651_v13, %v2898_v31 }
 0x817   : > { %v11444_v40 = vpop.permute.xlu2 %5185  ;;  %v2861_v17 = vadd.f32 %v10654_v61, %v2818_v48  ;;  %4518 = vmatpush.msrb.mxu1 %v4517_v36  ;;  %4610 = vmatmul.f32.vlgmr.msrb.gmra.mxu3 %v11326_v22  ;;  %v4523_v12 = vand.u32 4294901760, %v4522_v53  ;;  %v11468_v13 = vsub.f32 %v4431_v19, %v11450_v27  ;;  %v2871_v61 = vadd.f32 %v10671_v44, %v2826_v42  ;;  %v13757_v48 = vld [vmem:[#allocation67_spill] sm:$0xff] }
 0x818   : > { %13750 = vst [vmem:[#allocation17_spill] sm:$0xff] %v11444_v40  ;;  %4655 = vmatpush.msra.mxu0 %v4515_v63  ;;  %4729 = vmatpush.msra.mxu2 %v11292_v54  ;;  %v4801_v50 = vand.u32 4294901760, %v4800_v16  ;;  %v11472_v25 = vand.u32 4294901760, %v4467_v23  ;;  %v4434_v16 = vsel %vm1119_vm4, %v4399_v38, 0  ;;  %v13762_v38 = vld [vmem:[#allocation68_spill] sm:$0xff] }
 0x819   : > { %v2904_v24 = vadd.f32 %v10665_v60, %v2861_v17  ;;  %4796 = vmatpush.msra.mxu3 %v4795_v7  ;;  %6619 = vperm.xlu0 %7911, %v7847_v47   ;;  %v2986_v60 = vadd.f32 %v10658_v0, %v2949_v33  ;;  %v11493_v0 = vand.u32 4294901760, %v11468_v13  ;;  %v2916_v31 = vadd.f32 %v10679_v30, %v2871_v61  ;;  %v13758_v47 = vld [vmem:[#allocation71_spill] sm:$0xff]  ;;  %v13759_v33 = vld [vmem:[#allocation69_spill] sm:$0xff] }
 0x81a   : > { %4659 = vmatpush.msra.mxu0 %v4521_v5  ;;  %4731 = vmatpush.msra.mxu2 %v11336_v2  ;;  %v11474_v34 = vpop.permute.xlu1 %4416  ;;  %v11476_v63 = vpop.permute.xlu0 %2424  ;;  %v13756_v30 = vand.u32 4294901760, %v11343_v20 }
 0x81b   : > { %v2953_v53 = vadd.f32 %v10661_v56, %v2904_v24  ;;  %6642 = vrot.lane.b32.xlu1 %v11240_v10, %s7999_s3  ;;  %6789 = vrot.lane.b32.xlu2 %v11207_v11, %s8000_s0  ;;  %v2765_v44 = vadd.f32 %v10624_v39, %v11476_v63  ;;  %v11495_v56 = vand.u32 4294901760, %v4434_v16  ;;  %v13753_v39 = vld [vmem:[#allocation65_spill] sm:$0xff]  ;;  %v11502_v37 = vadd.f32 %v11194_v62, %v2986_v60 }
 0x81c   : > { %4524 = vmatpush.msrb.mxu1 %v4523_v12  ;;  %4802 = vmatpush.msra.mxu3 %v4801_v50  ;;  %v4475_v36 = vsub.f32 %v11468_v13, %v11493_v0  ;;  %v2961_v23 = vadd.f32 %v13758_v47, %v2916_v31  ;;  %v7846_v50 = vld [vmem:[%s13368_s16 + $0x30] sm:$0xff]  ;;  %v7852_v24 = vld [vmem:[%s13368_s16 + $0x58] sm:$0xff] }
 0x81d   : > { %v2990_v19 = vadd.f32 %v10667_v8, %v2953_v53  ;;  %4834 = vmatpush.msrb.mxu0 %v11343_v20  ;;  %4526 = vmatmul.f32.vlgmr.msrb.gmra.mxu1 %v11260_v6  ;;  %v2822_v57 = vadd.f32 %v13753_v39, %v2765_v44  ;;  %13754 = vst [vmem:[#allocation19_spill] sm:$0xff] %v11502_v37  ;;  %v13765_v53 = vld [vmem:[#allocation72_spill] sm:$0xff]  ;;  %v13768_v39 = vand.u32 4294901760, %v11412_v4 }
 0x81e   : > { %4469 = vmatmul.f32.gmra.mxu0 %v11472_v25  ;;  %4690 = vmatpush.msra.mxu1 %v11328_v59  ;;  %v11520_v42 = vsub.f32 %v4434_v16, %v11495_v56  ;;  %v11550_v16 = vand.u32 4294901760, %v4475_v36  ;;  %v2998_v44 = vadd.f32 %v13765_v53, %v2961_v23  ;;  %v7851_v47 = vld [vmem:[%s13368_s16 + $0x50] sm:$0xff]  ;;  %v7850_v23 = vld [vmem:[%s13368_s16 + $0x48] sm:$0xff] }
 0x81f   : > { %v11487_v5 = vpop.permute.xlu2 %6428  ;;  %v11505_v8 = vadd.f32 %v11273_v45, %v2990_v19  ;;  %4733 = vmatpush.msra.mxu2 %v11400_v52  ;;  %4968 = vmatpush.msrb.mxu3 %v11330_v18  ;;  %v2866_v28 = vadd.f32 %v13757_v48, %v2822_v57  ;;  %v13766_v19 = vld [vmem:[#allocation70_spill] sm:$0xff]  ;;  %v7861_v53 = vld [vmem:[%s13368_s16 + $0xb0] sm:$0xff] }
 0x820   : > { %13752 = vst [vmem:[#allocation23_spill] sm:$0xff] %v11487_v5  ;;  %4837 = vmatpush.msrb.mxu0 %v11334_v3  ;;  %4573 = vmatmul.f32.gmra.mxu2 %v11404_v9  ;;  %v11553_v60 = vand.u32 4294901760, %v11520_v42 }
 0x821   : > { %13755 = vst [vmem:[#allocation21_spill] sm:$0xff] %v11505_v8  ;;  %4925 = vmatpush.msrb.mxu2 %v13756_v30  ;;  %v5009_v59 = vadd.f32 %v11505_v8, %v11502_v37  ;;  %4692 = vmatpush.msra.mxu1 %v11262_v1  ;;  %v2910_v20 = vadd.f32 %v13759_v33, %v2866_v28  ;;  %v13761_v1 = vand.u32 4294901760, %v11334_v3  ;;  %v13764_v3 = vand.u32 4294901760, %v11364_v51  ;;  %v13811_v8 = vld [vmem:[#allocation55_spill] sm:$0xff] }
 0x822   : > { %4970 = vmatpush.msrb.mxu3 %v11292_v54  ;;  %4840 = vmatpush.msrb.mxu0 %v11364_v51  ;;  %v11526_v17 = vpop.permute.xlu1 %5148  ;;  %v11528_v7 = vpop.permute.xlu0 %4421  ;;  %v4483_v57 = vsub.f32 %v11520_v42, %v11553_v60 }
 0x823   : > { %13760 = vst [vmem:[#allocation22_spill] sm:$0xff] %v11526_v17  ;;  %4929 = vmatpush.msrb.mxu2 %v13761_v1  ;;  %4616 = vmatmul.f32.gmra.mxu3 %v11432_v43  ;;  %v2957_v12 = vadd.f32 %v13762_v38, %v2910_v20 }
 0x824   : > { %4694 = vmatpush.msra.mxu1 %v11313_v55  ;;  %4972 = vmatpush.msrb.mxu3 %v11336_v2  ;;  %v7857_v55 = vld [vmem:[%s13368_s16 + $0x78] sm:$0xff] }
 0x825   : > { %4843 = vmatpush.msrb.mxu0 %v11412_v4  ;;  %4933 = vmatpush.msrb.mxu2 %v13764_v3  ;;  %v2994_v31 = vadd.f32 %v13766_v19, %v2957_v12  ;;  %v7844_v12 = vld [vmem:[%s13368_s16 + $0x20] sm:$0xff]  ;;  %v7856_v3 = vld [vmem:[%s13368_s16 + $0x70] sm:$0xff] }
 0x826   : > { %4696 = vmatpush.msra.mxu1 %v11398_v32  ;;  %4974 = vmatpush.msrb.mxu3 %v11400_v52  ;;  %v11569_v32 = vadd.f32 %v11207_v11, %v2998_v44 }
 0x827   : > { %v11542_v61 = vpop.permute.xlu2 %6443  ;;  %6614 = vperm.xlu0 %7911, %v7846_v50   ;;  %6700 = vperm.xlu1 %7909, %v7852_v24   ;;  %v11560_v51 = vadd.f32 %v11278_v14, %v2994_v31 }
 0x828   : > { %13763 = vst [vmem:[#allocation18_spill] sm:$0xff] %v11542_v61  ;;  %6756 = vperm.xlu2 %7910, %v7857_v55   ;;  %4878 = vmatpush.msrb.mxu1 %v11330_v18  ;;  %v7862_v55 = vld [vmem:[%s13368_s16 + $0xb8] sm:$0xff] }
 0x829   : > { %13767 = vst [vmem:[#allocation20_spill] sm:$0xff] %v11560_v51  ;;  %4937 = vmatpush.msrb.mxu2 %v13768_v39  ;;  %4477 = vmatmul.f32.gmra.mxu0 %v11550_v16  ;;  %v5010_v30 = vadd.f32 %v5009_v59, %v11560_v51  ;;  %v4484_v59 = vand.u32 4294901760, %v4483_v57 }
 0x82a   : > { %13769 = vst [vmem:[#allocation24_spill] sm:$0xff] %v11569_v32  ;;  %4530 = vmatmul.f32.gmra.mxu1 %v11361_v49  ;;  %4578 = vmatmul.f32.gmra.mxu2 %v11468_v13  ;;  %v11574_v48 = vpop.permute.xlu1 %5267  ;;  %v11576_v18 = vpop.permute.xlu0 %5230 }
 0x82b   : > { %13770 = vst [vmem:[#allocation25_spill] sm:$0xff] %v11574_v48  ;;  %4880 = vmatpush.msrb.mxu1 %v11292_v54  ;;  %4622 = vmatmul.f32.gmra.mxu3 %v11493_v0  ;;  %v11581_v4 = vadd.f32 %v5010_v30, %v11569_v32  ;;  %v7849_v30 = vld [vmem:[%s13368_s16 + $0x40] sm:$0xff]  ;;  %v13807_v48 = vld [vmem:[#allocation48_spill] sm:$0xff] }
 0x82c   : > { %13771 = vst [vmem:[#allocation65_spill] sm:$0xff] %v11576_v18 }
 0x82d   : > { %13772 = vst [vmem:[#allocation67_spill] sm:$0xff] %v11581_v4  ;;  %4882 = vmatpush.msrb.mxu1 %v11336_v2 }
 0x82f   : > { %v11583_v28 = vpop.permute.xlu2 %6487  ;;  %4884 = vmatpush.msrb.mxu1 %v11400_v52  ;;  %6648 = vrot.lane.b32.xlu0 %v11273_v45, %s7999_s3  ;;  %v7845_v52 = vld [vmem:[%s13368_s16 + $0x28] sm:$0xff] }
 0x830   : > { %6781 = vrot.lane.b32.xlu1 %v11245_v41, %s8000_s0  ;;  %6779 = vrot.lane.b32.xlu2 %v11240_v10, %s8000_s0 }
 0x831   : > { %4485 = vmatmul.f32.gmra.mxu0 %v4484_v59 }
 0x832   : > { %4534 = vmatmul.f32.gmra.mxu1 %v11450_v27  ;;  %4583 = vmatmul.f32.gmra.mxu2 %v11520_v42  ;;  %v11595_v54 = vpop.permute.xlu1 %5220  ;;  %v11597_v2 = vpop.permute.xlu0 %5262 }
 0x833   : > { %13773 = vst [vmem:[#allocation71_spill] sm:$0xff] %v11595_v54  ;;  %4628 = vmatmul.f32.gmra.mxu3 %v11553_v60 }
 0x834   : > { %13774 = vst [vmem:[#allocation69_spill] sm:$0xff] %v11597_v2  ;;  %v13806_v2 = vld [vmem:[#allocation44_spill] sm:$0xff] }
 0x837   : > { %v11603_v36 = vpop.permute.xlu2 %6505  ;;  %6609 = vperm.xlu0 %7911, %v7845_v52  }
 0x838   : > { %6695 = vperm.xlu1 %7909, %v7851_v47   ;;  %6690 = vperm.xlu2 %7910, %v7850_v23   ;;  %v7860_v23 = vld [vmem:[%s13368_s16 + $0xa8] sm:$0xff] }
 0x839   : > { %4661 = vmatmul.f32.vlgmr.msra.gmra.mxu0 %v11260_v6 }
 0x83a   : > { %4538 = vmatmul.f32.gmra.mxu1 %v11495_v56  ;;  %4739 = vmatmul.f32.vlgmr.msra.gmra.mxu2 %v11395_v58  ;;  %v11614_v33 = vpop.permute.xlu1 %5153  ;;  %v11616_v20 = vpop.permute.xlu0 %5252 }
 0x83b   : > { %13775 = vst [vmem:[#allocation68_spill] sm:$0xff] %v11614_v33  ;;  %4804 = vmatmul.f32.vlgmr.msra.gmra.mxu3 %v11260_v6 }
 0x83c   : > { %13776 = vst [vmem:[#allocation72_spill] sm:$0xff] %v11616_v20 }
 0x83f   : > { %v6512_v1 = vpop.permute.xlu2 %6511  ;;  %6638 = vrot.lane.b32.xlu0 %v11220_v26, %s7999_s3 }
 0x840   : > { %6646 = vrot.lane.b32.xlu1 %v11194_v62, %s7999_s3  ;;  %6777 = vrot.lane.b32.xlu2 %v11181_v29, %s8000_s0  ;;  %s8001_s3 = smov 112  }
 0x841   : > { %4665 = vmatmul.f32.gmra.mxu0 %v11361_v49 }
 0x842   : > { %4698 = vmatmul.f32.vlgmr.msra.gmra.mxu1 %v11260_v6  ;;  %4747 = vmatmul.f32.gmra.mxu2 %v11472_v25  ;;  %v11628_v58 = vpop.permute.xlu1 %5180  ;;  %v11630_v38 = vpop.permute.xlu0 %5163 }
 0x843   : > { %13777 = vst [vmem:[#allocation70_spill] sm:$0xff] %v11628_v58  ;;  %4808 = vmatmul.f32.gmra.mxu3 %v11361_v49 }
 0x844   : > { %13778 = vst [vmem:[#allocation73_spill] sm:$0xff] %v11630_v38 }
 0x847   : > { %v11636_v50 = vpop.permute.xlu2 %6517  ;;  %6787 = vrot.lane.b32.xlu0 %v11278_v14, %s8000_s0 }
 0x848   : > { %6604 = vperm.xlu1 %7909, %v7844_v12   ;;  %6926 = vrot.lane.b32.xlu2 %v11207_v11, %s8001_s3 }
 0x849   : > { %4669 = vmatmul.f32.gmra.mxu0 %v11450_v27 }
 0x84a   : > { %4702 = vmatmul.f32.gmra.mxu1 %v11361_v49  ;;  %4755 = vmatmul.f32.gmra.mxu2 %v11550_v16  ;;  %v11645_v25 = vpop.permute.xlu1 %5195  ;;  %v11647_v24 = vpop.permute.xlu0 %5190 }
 0x84b   : > { %13779 = vst [vmem:[#allocation74_spill] sm:$0xff] %v11645_v25  ;;  %4812 = vmatmul.f32.gmra.mxu3 %v11450_v27  ;;  %v13791_v25 = vld [vmem:[#allocation39_spill] sm:$0xff] }
 0x84c   : > { %13780 = vst [vmem:[#allocation75_spill] sm:$0xff] %v11647_v24 }
 0x84f   : > { %6751 = vperm.xlu0 %7911, %v7856_v3   ;;  %v11659_v16 = vpop.permute.xlu2 %6558 }
 0x850   : > { %6837 = vperm.xlu1 %7909, %v7862_v55   ;;  %6832 = vperm.xlu2 %7910, %v7861_v53  }
 0x851   : > { %4673 = vmatmul.f32.gmra.mxu0 %v11495_v56 }
 0x852   : > { %4706 = vmatmul.f32.gmra.mxu1 %v11450_v27  ;;  %4763 = vmatmul.f32.gmra.mxu2 %v4484_v59  ;;  %v11663_v44 = vpop.permute.xlu1 %6438  ;;  %v11665_v19 = vpop.permute.xlu0 %6433 }
 0x853   : > { %13781 = vst [vmem:[#allocation76_spill] sm:$0xff] %v11663_v44  ;;  %4816 = vmatmul.f32.gmra.mxu3 %v11495_v56 }
 0x854   : > { %13782 = vst [vmem:[#allocation77_spill] sm:$0xff] %v11665_v19 }
 0x857   : > { %6785 = vrot.lane.b32.xlu0 %v11273_v45, %s8000_s0  ;;  %v11675_v31 = vpop.permute.xlu2 %6652 }
 0x858   : > { %6918 = vrot.lane.b32.xlu1 %v11245_v41, %s8001_s3  ;;  %6783 = vrot.lane.b32.xlu2 %v11194_v62, %s8000_s0 }
 0x859   : > { %4846 = vmatmul.f32.vlgmr.msrb.gmra.mxu0 %v11283_v46  ;;  %v7855_v46 = vld [vmem:[%s13368_s16 + $0x68] sm:$0xff] }
 0x85a   : > { %4710 = vmatmul.f32.gmra.mxu1 %v11495_v56  ;;  %4939 = vmatmul.f32.vlgmr.msrb.gmra.mxu2 %v11260_v6  ;;  %v11679_v39 = vpop.permute.xlu1 %6482  ;;  %v11681_v57 = vpop.permute.xlu0 %6477 }
 0x85b   : > { %4976 = vmatmul.f32.vlgmr.msrb.gmra.mxu3 %v11260_v6 }
 0x85f   : > { %6685 = vperm.xlu0 %7911, %v7849_v30  }
 0x860   : > { %6746 = vperm.xlu1 %7909, %v7855_v46   ;;  %6999 = vrot.lane.b32.xlu2 %v11245_v41, %s8002_s19 }
 0x861   : > { %4851 = vmatmul.f32.gmra.mxu0 %v11404_v9  ;;  %v7867_v9 = vld [vmem:[%s13368_s16 + $0xd8] sm:$0xff] }
 0x862   : > { %4888 = vmatmul.f32.vlgmr.msrb.gmra.mxu1 %v11326_v22  ;;  %4943 = vmatmul.f32.gmra.mxu2 %v11361_v49  ;;  %v6504_v6 = vpop.permute.xlu1 %6503  ;;  %v11696_v59 = vpop.permute.xlu0 %6492 }
 0x863   : > { %4980 = vmatmul.f32.gmra.mxu3 %v11361_v49  ;;  %v6520_v52 = vsel %vm6519_vm8, %v6504_v6, %v6512_v1  ;;  %v6524_v47 = vsel %vm6519_vm8, %v6512_v1, %v6504_v6  ;;  %v11706_v22 = vpop.permute.xlu2 %6650 }
 0x867   : > { %6893 = vperm.xlu0 %7911, %v7867_v9  }
 0x868   : > { %6775 = vrot.lane.b32.xlu1 %v11220_v26, %s8000_s0  ;;  %6827 = vperm.xlu2 %7910, %v7860_v23  }
 0x869   : > { %4856 = vmatmul.f32.gmra.mxu0 %v11468_v13  ;;  %v6532_v13 = vld [vmem:[%s13375_s23] sm:$0x3] }
 0x86a   : > { %4894 = vmatmul.f32.gmra.mxu1 %v11432_v43  ;;  %4947 = vmatmul.f32.gmra.mxu2 %v11450_v27  ;;  %v6510_v49 = vpop.permute.xlu1 %6509  ;;  %v6508_v1 = vpop.permute.xlu0 %6507  ;;  %v6534_v43 = vperm.slane %v6532_v13, 0  ;;  %v6535_v53 = vperm.slane %v6532_v13, 1 }
 0x86b   : > { %4984 = vmatmul.f32.gmra.mxu3 %v11450_v27  ;;  %v6523_v12 = vsel %vm6519_vm8, %v6510_v49, %v11636_v50  ;;  %v6527_v3 = vsel %vm6519_vm8, %v11636_v50, %v6510_v49  ;;  %v11726_v55 = vpop.permute.xlu2 %6640 }
 0x86c   : > { %v6538_v13 = vmul.f32 %v6534_v43, %v6524_v47  ;;  %v6495_v47 = vmul.f32 %v11220_v26, %v11681_v57 }
 0x86f   : > { %6916 = vrot.lane.b32.xlu0 %v11240_v10, %s8001_s3 }
 0x870   : > { %6924 = vrot.lane.b32.xlu1 %v11278_v14, %s8001_s3  ;;  %6914 = vrot.lane.b32.xlu2 %v11181_v29, %s8001_s3 }
 0x871   : > { %4861 = vmatmul.f32.gmra.mxu0 %v11520_v42 }
 0x872   : > { %4900 = vmatmul.f32.gmra.mxu1 %v11493_v0  ;;  %4951 = vmatmul.f32.gmra.mxu2 %v11495_v56  ;;  %v6516_v27 = vpop.permute.xlu1 %6515  ;;  %v6514_v50 = vpop.permute.xlu0 %6513 }
 0x873   : > { %4988 = vmatmul.f32.gmra.mxu3 %v11495_v56  ;;  %v6522_v30 = vsel %vm6519_vm8, %v6508_v1, %v6516_v27  ;;  %v6526_v46 = vsel %vm6519_vm8, %v6516_v27, %v6508_v1  ;;  %v6521_v6 = vsel %vm6519_vm8, %v11603_v36, %v6514_v50  ;;  %v6525_v0 = vsel %vm6519_vm8, %v6514_v50, %v11603_v36  ;;  %v7854_v56 = vld [vmem:[%s13368_s16 + $0x60] sm:$0xff] }
 0x874   : > { %v6542_v42 = vmul.f32 %v6534_v43, %v6526_v46  ;;  %v6543_v9 = vmul.f32 %v6535_v53, %v6522_v30  ;;  %v6539_v1 = vmul.f32 %v6535_v53, %v6520_v52  ;;  %v6540_v27 = vmul.f32 %v6534_v43, %v6525_v0 }
 0x875   : > { %v6541_v61 = vmul.f32 %v6535_v53, %v6521_v6  ;;  %v11757_v36 = vpop.permute.xlu2 %6789  ;;  %v6499_v50 = vmul.f32 %v11240_v10, %v11583_v28  ;;  %v6500_v30 = vmul.f32 %v11278_v14, %v11583_v28  ;;  %v6498_v52 = vmul.f32 %v11273_v45, %v11679_v39  ;;  %v7866_v28 = vld [vmem:[%s13368_s16 + $0xd0] sm:$0xff] }
 0x876   : > { %v6570_v23 = vmul.f32 %v11659_v16, %v6542_v42  ;;  %v6571_v49 = vmul.f32 %v11659_v16, %v6543_v9  ;;  %v6497_v16 = vmul.f32 %v11181_v29, %v11679_v39  ;;  %v6496_v46 = vmul.f32 %v11194_v62, %v11681_v57  ;;  %v7872_v57 = vld [vmem:[%s13368_s16 + $0xf8] sm:$0xff] }
 0x877   : > { %7007 = vrot.lane.b32.xlu0 %v11207_v11, %s8002_s19 }
 0x878   : > { %6741 = vperm.xlu1 %7909, %v7854_v56   ;;  %7005 = vrot.lane.b32.xlu2 %v11278_v14, %s8002_s19  ;;  %v11775_v44 = vadd.f32 %v6570_v23, %v6499_v50  ;;  %v11777_v39 = vadd.f32 %v6571_v49, %v6500_v30  ;;  %v6544_v23 = vmul.f32 %v6534_v43, %v6527_v3  ;;  %v7848_v3 = vld [vmem:[%s13375_s23 + $0x2] sm:$0x3] }
 0x879   : > { %v6545_v49 = vmul.f32 %v6535_v53, %v6523_v12  ;;  %v6501_v12 = vmul.f32 %v11245_v41, %v11696_v59  ;;  %v6502_v43 = vmul.f32 %v11207_v11, %v11696_v59  ;;  %v13783_v11 = vld [vmem:[#allocation4_spill] sm:$0xff]  ;;  %v13784_v59 = vld [vmem:[#allocation3_spill] sm:$0xff] }
 0x87a   : > { %4906 = vmatmul.f32.gmra.mxu1 %v11553_v60  ;;  %v6554_v6 = vpop.permute.xlu1 %6553  ;;  %v6549_v0 = vpop.permute.xlu0 %6548  ;;  %v7871_v60 = vld [vmem:[%s13368_s16 + $0xf0] sm:$0xff] }
 0x87b   : > { %v6568_v42 = vmul.f32 %v6554_v6, %v6540_v27  ;;  %v6569_v9 = vmul.f32 %v6554_v6, %v6541_v61  ;;  %v6566_v56 = vmul.f32 %v6549_v0, %v6538_v13  ;;  %v6567_v14 = vmul.f32 %v6549_v0, %v6539_v1 }
 0x87d   : > { %v11785_v27 = vadd.f32 %v6568_v42, %v6497_v16  ;;  %v11787_v61 = vadd.f32 %v6569_v9, %v6498_v52  ;;  %v11789_v13 = vadd.f32 %v6566_v56, %v6495_v47  ;;  %v11791_v1 = vadd.f32 %v6567_v14, %v6496_v46 }
 0x87e   : > { %v11807_v42 = vperm.slane %v7848_v3, 0  ;;  %v11809_v9 = vperm.slane %v7848_v3, 1 }
 0x87f   : > { %6888 = vperm.xlu0 %7911, %v7866_v28   ;;  %v7859_v28 = vld [vmem:[%s13368_s16 + $0xa0] sm:$0xff] }
 0x880   : > { %6974 = vperm.xlu1 %7909, %v7872_v57   ;;  %6969 = vperm.xlu2 %7910, %v7871_v60   ;;  %v6601_v56 = vmul.f32 %v11809_v9, %v13784_v59 }
 0x882   : > { %v6757_v50 = vpop.permute.xlu2 %6756  ;;  %v6645_v30 = vpop.permute.xlu1 %6644 }
 0x883   : > { %v6658_v16 = vsel %vm6654_vm7, %v6645_v30, %v11675_v31  ;;  %v6662_v52 = vsel %vm6654_vm7, %v11675_v31, %v6645_v30  ;;  %v6564_v47 = vpop.permute.xlu0 %6563  ;;  %v6600_v31 = vmul.f32 %v11807_v42, %v13783_v11 }
 0x884   : > { %v6572_v53 = vmul.f32 %v6564_v47, %v6544_v23  ;;  %v6573_v46 = vmul.f32 %v6564_v47, %v6545_v49 }
 0x886   : > { %v6580_v6 = vadd.f32 %v6572_v53, %v6501_v12  ;;  %v6581_v0 = vadd.f32 %v6573_v46, %v6502_v43  ;;  %v7853_v12 = vld [vmem:[%s13375_s23 + $0x4] sm:$0x3]  ;;  %v7858_v43 = vld [vmem:[%s13375_s23 + $0x6] sm:$0x3] }
 0x887   : > { %6922 = vrot.lane.b32.xlu0 %v11273_v45, %s8001_s3  ;;  %v11848_v53 = vperm.slane %v7853_v12, 0  ;;  %v11850_v46 = vperm.slane %v7853_v12, 1 }
 0x888   : > { %6997 = vrot.lane.b32.xlu1 %v11240_v10, %s8002_s19  ;;  %6920 = vrot.lane.b32.xlu2 %v11194_v62, %s8001_s3  ;;  %v7865_v10 = vld [vmem:[%s13368_s16 + $0xc8] sm:$0xff]  ;;  %v7864_v62 = vld [vmem:[%s13368_s16 + $0xc0] sm:$0xff] }
 0x889   : > { %v6681_v59 = vmul.f32 %v11848_v53, %v6662_v52 }
 0x88a   : > { %v11817_v41 = vpop.permute.xlu2 %6779 }
 0x88b   : > { %v6620_v14 = vpop.permute.xlu0 %6619 }
 0x88c   : > { %v6628_v57 = vmul.f32 %v6620_v14, %v6600_v31  ;;  %v6629_v60 = vmul.f32 %v6620_v14, %v6601_v56  ;;  %v11859_v31 = vperm.slane %v7858_v43, 1  ;;  %v6682_v56 = vmul.f32 %v11850_v46, %v6658_v16  ;;  %v13785_v14 = vld [vmem:[#allocation7_spill] sm:$0xff] }
 0x88d   : > { %v6643_v23 = vpop.permute.xlu1 %6642 }
 0x88e   : > { %v11835_v49 = vsel %vm6654_vm7, %v6643_v23, %v11706_v22  ;;  %v11840_v30 = vsel %vm6654_vm7, %v11706_v22, %v6643_v23  ;;  %v6636_v47 = vadd.f32 %v6628_v57, %v6580_v6  ;;  %v6637_v3 = vadd.f32 %v6629_v60, %v6581_v0  ;;  %v7877_v6 = vld [vmem:[%s13368_s16 + $0x118] sm:$0xff]  ;;  %v13786_v57 = vld [vmem:[#allocation6_spill] sm:$0xff] }
 0x88f   : > { %6822 = vperm.xlu0 %7911, %v7859_v28   ;;  %v11852_v22 = vpop.f32.mrf.mxu0  ;;  %v11857_v0 = vperm.slane %v7858_v43, 0  ;;  %v6598_v28 = vmul.f32 %v11807_v42, %v13785_v14  ;;  %v6599_v60 = vmul.f32 %v11809_v9, %v13786_v57  ;;  %v13788_v23 = vld [vmem:[#allocation26_spill] sm:$0xff] }
 0x890   : > { %6883 = vperm.xlu1 %7909, %v7865_v10   ;;  %6878 = vperm.xlu2 %7910, %v7864_v62   ;;  %v13787_v10 = vld [vmem:[#allocation27_spill] sm:$0xff]  ;;  %v6738_v52 = vmul.f32 %v11859_v31, %v13788_v23 }
 0x891   : > { %v6737_v62 = vmul.f32 %v11857_v0, %v13787_v10 }
 0x892   : > { %v6691_v11 = vpop.permute.xlu2 %6690  ;;  %v6766_v40 = vmul.f32 %v6757_v50, %v6738_v52 }
 0x893   : > { %v6765_v14 = vmul.f32 %v6757_v50, %v6737_v62 }
 0x897   : > { %7055 = vperm.xlu0 %7911, %v7877_v6  }
 0x898   : > { %6912 = vrot.lane.b32.xlu1 %v11220_v26, %s8001_s3  ;;  %6993 = vrot.lane.b32.xlu2 %v11220_v26, %s8002_s19  ;;  %v11877_v58 = vpop.f32.mrf.mxu2 }
 0x899   : > { %v6701_v16 = vpop.permute.xlu1 %6700  ;;  %v6615_v12 = vpop.permute.xlu0 %6614 }
 0x89a   : > { %v6709_v43 = vmul.f32 %v6701_v16, %v6681_v59  ;;  %v6710_v6 = vmul.f32 %v6701_v16, %v6682_v56  ;;  %v11875_v19 = vpop.permute.xlu2 %6777  ;;  %v6626_v5 = vmul.f32 %v6615_v12, %v6598_v28  ;;  %v6627_v26 = vmul.f32 %v6615_v12, %v6599_v60  ;;  %v11883_v23 = vpop.f32.mrf.mxu3  ;;  %v7875_v56 = vld [vmem:[%s13368_s16 + $0x108] sm:$0xff]  ;;  %v7876_v16 = vld [vmem:[%s13368_s16 + $0x110] sm:$0xff] }
 0x89b   : > { %v11881_v24 = vpop.f32.mrf.mxu0  ;;  %v11885_v59 = vpop.f32.mrf.mxu1 }
 0x89c   : > { %v6717_v17 = vadd.f32 %v6709_v43, %v6636_v47  ;;  %v6718_v57 = vadd.f32 %v6710_v6, %v6637_v3  ;;  %v6634_v33 = vadd.f32 %v6626_v5, %v11775_v44  ;;  %v6635_v10 = vadd.f32 %v6627_v26, %v11777_v39 }
 0x89d   : > { %v6679_v6 = vmul.f32 %v11848_v53, %v11840_v30  ;;  %v6680_v26 = vmul.f32 %v11850_v46, %v11835_v49  ;;  %v2471_v49 = vadd.f32 %v13791_v25, %v11185_v15  ;;  %v13793_v15 = vld [vmem:[#allocation45_spill] sm:$0xff] }
 0x89e   : > { %v11890_v28 = vadd.f32 %v6765_v14, %v6717_v17  ;;  %v11892_v60 = vadd.f32 %v6766_v40, %v6718_v57  ;;  %v2487_v25 = vadd.f32 %v13793_v15, %v11476_v63  ;;  %v13802_v15 = vld [vmem:[#allocation51_spill] sm:$0xff] }
 0x89f   : > { %6995 = vrot.lane.b32.xlu0 %v11181_v29, %s8002_s19 }
 0x8a0   : > { %7003 = vrot.lane.b32.xlu1 %v11273_v45, %s8002_s19  ;;  %7045 = vperm.xlu2 %7910, %v7875_v56   ;;  %v13790_v56 = vld [vmem:[#allocation9_spill] sm:$0xff] }
 0x8a1   : > { %v6649_v5 = vpop.permute.xlu0 %6648 }
 0x8a2   : > { %v6782_v44 = vpop.permute.xlu1 %6781  ;;  %v6656_v39 = vsel %vm6654_vm7, %v11726_v55, %v6649_v5  ;;  %v6660_v40 = vsel %vm6654_vm7, %v6649_v5, %v11726_v55  ;;  %v11915_v17 = vpop.permute.xlu2 %6926  ;;  %v7870_v55 = vld [vmem:[%s13368_s16 + $0xe8] sm:$0xff]  ;;  %v6597_v5 = vmul.f32 %v11809_v9, %v13790_v56 }
 0x8a3   : > { %v11908_v29 = vsel %vm6791_vm5, %v6782_v44, %v11757_v36  ;;  %v11913_v45 = vsel %vm6791_vm5, %v11757_v36, %v6782_v44  ;;  %v6677_v50 = vmul.f32 %v11848_v53, %v6660_v40  ;;  %v6678_v47 = vmul.f32 %v11850_v46, %v6656_v39  ;;  %v11919_v3 = vpop.f32.mrf.mxu2  ;;  %v7079_v36 = vld [vmem:[%s13370_s18 + $0x8] sm:$0xff] }
 0x8a5   : > { %v6705_v62 = vmul.f32 %v6691_v11, %v6677_v50  ;;  %v6706_v52 = vmul.f32 %v6691_v11, %v6678_v47  ;;  %v13789_v11 = vld [vmem:[#allocation10_spill] sm:$0xff] }
 0x8a6   : > { %v11930_v12 = vpop.f32.mrf.mxu0  ;;  %v11932_v43 = vpop.f32.mrf.mxu3  ;;  %v6596_v57 = vmul.f32 %v11807_v42, %v13789_v11 }
 0x8a7   : > { %v11938_v14 = vpop.f32.mrf.mxu1  ;;  %6964 = vperm.xlu0 %7911, %v7870_v55   ;;  %v13792_v55 = vld [vmem:[#allocation50_spill] sm:$0xff] }
 0x8a8   : > { %7050 = vperm.xlu1 %7909, %v7876_v16   ;;  %7089 = vperm.xlu2 %7910, %v7079_v36   ;;  %v2479_v16 = vadd.f32 %v13792_v55, %v11428_v21 }
 0x8a9   : > { %v6610_v44 = vpop.permute.xlu0 %6609 }
 0x8aa   : > { %v6696_v39 = vpop.permute.xlu1 %6695  ;;  %v6624_v40 = vmul.f32 %v6610_v44, %v6596_v57  ;;  %v6625_v50 = vmul.f32 %v6610_v44, %v6597_v5  ;;  %v6833_v20 = vpop.permute.xlu2 %6832  ;;  %v13797_v5 = vld [vmem:[#allocation52_spill] sm:$0xff] }
 0x8ab   : > { %v6707_v47 = vmul.f32 %v6696_v39, %v6679_v6  ;;  %v6708_v30 = vmul.f32 %v6696_v39, %v6680_v26  ;;  %v7869_v6 = vld [vmem:[%s13368_s16 + $0xe0] sm:$0xff]  ;;  %v2536_v44 = vadd.f32 %v13797_v5, %v2471_v49 }
 0x8ac   : > { %v6632_v36 = vadd.f32 %v6624_v40, %v11785_v27  ;;  %v6633_v11 = vadd.f32 %v6625_v50, %v11787_v61  ;;  %v13798_v39 = vld [vmem:[#allocation46_spill] sm:$0xff]  ;;  %v13799_v50 = vld [vmem:[#allocation8_spill] sm:$0xff] }
 0x8ad   : > { %v11950_v38 = vadd.f32 %v6707_v47, %v6634_v33  ;;  %v11952_v56 = vadd.f32 %v6708_v30, %v6635_v10  ;;  %v11954_v57 = vpop.f32.mrf.mxu2  ;;  %v11972_v10 = vld [vmem:[%s8154_s8 + $0x8] sm:$0xff]  ;;  %v2540_v40 = vadd.f32 %v13798_v39, %v2479_v16  ;;  %v13800_v47 = vld [vmem:[#allocation49_spill] sm:$0xff]  ;;  %v2578_v49 = vadd.f32 %v13802_v15, %v2536_v44  ;;  %v13803_v5 = vld [vmem:[#allocation38_spill] sm:$0xff] }
 0x8ae   : > { %v11961_v26 = vpop.f32.mrf.mxu0  ;;  %v11963_v21 = vpop.f32.mrf.mxu3  ;;  %v11965_v27 = vadd.f32 %v6705_v62, %v6632_v36  ;;  %v11967_v33 = vadd.f32 %v6706_v52, %v6633_v11  ;;  %13796 = vst [vmem:[#allocation7_spill] sm:$0xff] %v11972_v10  ;;  %v2495_v30 = vadd.f32 %v13800_v47, %v13799_v50  ;;  %v13801_v62 = vld [vmem:[#allocation53_spill] sm:$0xff]  ;;  %v7078_v50 = vld [vmem:[%s13370_s18] sm:$0xff] }
 0x8af   : > { %v11969_v61 = vpop.f32.mrf.mxu1  ;;  %7001 = vrot.lane.b32.xlu0 %v11972_v10, %s8002_s19  ;;  %v2544_v55 = vadd.f32 %v13801_v62, %v2487_v25  ;;  %v2583_v16 = vadd.f32 %v13803_v5, %v2540_v40  ;;  %v7874_v25 = vld [vmem:[%s13368_s16 + $0x100] sm:$0xff]  ;;  %v13805_v62 = vld [vmem:[#allocation47_spill] sm:$0xff]  ;;  %v2620_v18 = vadd.f32 %v13806_v2, %v2578_v49 }
 0x8b0   : > { %13794 = vst [vmem:[#allocation4_spill] sm:$0xff] %v11965_v27  ;;  %6959 = vperm.xlu1 %7909, %v7869_v6   ;;  %v7863_v6 = vld [vmem:[%s13375_s23 + $0xa] sm:$0x3]  ;;  %v13812_v10 = vld [vmem:[#allocation54_spill] sm:$0xff]  ;;  %v13825_v27 = vld [vmem:[#allocation64_spill] sm:$0xff] }
 0x8b1   : > { %13795 = vst [vmem:[#allocation3_spill] sm:$0xff] %v11967_v33  ;;  %v6639_v63 = vpop.permute.xlu0 %6638  ;;  %v2588_v44 = vadd.f32 %v13805_v62, %v2544_v55  ;;  %v12006_v40 = vperm.slane %v7863_v6, 0  ;;  %v12008_v15 = vperm.slane %v7863_v6, 1  ;;  %v2626_v32 = vadd.f32 %v13807_v48, %v2583_v16 }
 0x8b2   : > { %v6647_v52 = vpop.permute.xlu1 %6646  ;;  %v12016_v51 = vpop.permute.xlu2 %6783 }
 0x8b3   : > { %v11983_v36 = vsel %vm6654_vm7, %v6639_v63, %v6647_v52  ;;  %v11987_v11 = vsel %vm6654_vm7, %v6647_v52, %v6639_v63  ;;  %v13804_v63 = vld [vmem:[#allocation56_spill] sm:$0xff]  ;;  %13808 = vst [vmem:[#allocation6_spill] sm:$0xff] %v12016_v51  ;;  %v13823_v51 = vld [vmem:[#allocation5_spill] sm:$0xff] }
 0x8b4   : > { %v2548_v47 = vadd.f32 %v13804_v63, %v2495_v30  ;;  %v13809_v30 = vld [vmem:[#allocation12_spill] sm:$0xff]  ;;  %v13810_v63 = vld [vmem:[#allocation11_spill] sm:$0xff] }
 0x8b5   : > { %v11997_v39 = vpop.f32.mrf.mxu2  ;;  %v6594_v55 = vmul.f32 %v11807_v42, %v13809_v30  ;;  %v6595_v62 = vmul.f32 %v11809_v9, %v13810_v63 }
 0x8b6   : > { %v12004_v52 = vpop.f32.mrf.mxu0  ;;  %v12012_v54 = vpop.f32.mrf.mxu3  ;;  %v2593_v37 = vadd.f32 %v13811_v8, %v2548_v47  ;;  %v13814_v8 = vld [vmem:[#allocation59_spill] sm:$0xff] }
 0x8b7   : > { %v12010_v5 = vpop.f32.mrf.mxu1  ;;  %7040 = vperm.xlu0 %7911, %v7874_v25   ;;  %v2632_v25 = vadd.f32 %v13812_v10, %v2588_v44  ;;  %v2675_v47 = vadd.f32 %v13814_v8, %v2626_v32  ;;  %v7080_v10 = vld [vmem:[%s13370_s18 + $0x10] sm:$0xff]  ;;  %v13821_v8 = vld [vmem:[#allocation62_spill] sm:$0xff] }
 0x8b8   : > { %7084 = vperm.xlu1 %7909, %v7078_v50   ;;  %v13813_v50 = vld [vmem:[#allocation57_spill] sm:$0xff] }
 0x8b9   : > { %v6788_v6 = vpop.permute.xlu0 %6787  ;;  %v2671_v30 = vadd.f32 %v13813_v50, %v2620_v18  ;;  %v7081_v18 = vld [vmem:[%s13370_s18 + $0x18] sm:$0xff] }
 0x8ba   : > { %v6605_v4 = vpop.permute.xlu1 %6604  ;;  %v6794_v2 = vsel %vm6791_vm5, %v11817_v41, %v6788_v6  ;;  %v6798_v48 = vsel %vm6791_vm5, %v6788_v6, %v11817_v41 }
 0x8bb   : > { %v6622_v49 = vmul.f32 %v6605_v4, %v6594_v55  ;;  %v6623_v16 = vmul.f32 %v6605_v4, %v6595_v62  ;;  %v6816_v42 = vmul.f32 %v12006_v40, %v6794_v2  ;;  %v6817_v9 = vmul.f32 %v12008_v15, %v6798_v48  ;;  %v13815_v55 = vld [vmem:[#allocation58_spill] sm:$0xff]  ;;  %v13817_v2 = vld [vmem:[#allocation61_spill] sm:$0xff] }
 0x8bc   : > { %v2638_v32 = vadd.f32 %v13815_v55, %v2593_v37  ;;  %v6819_v48 = vmul.f32 %v12008_v15, %v11913_v45  ;;  %v13819_v37 = vld [vmem:[#allocation32_spill] sm:$0xff] }
 0x8bd   : > { %v12038_v44 = vadd.f32 %v6622_v49, %v11789_v13  ;;  %v12041_v63 = vadd.f32 %v6623_v16, %v11791_v1  ;;  %v12043_v41 = vmul.f32 %v6833_v20, %v6816_v42  ;;  %v12045_v4 = vmul.f32 %v6833_v20, %v6817_v9  ;;  %v12053_v6 = vpop.f32.mrf.mxu2  ;;  %v13818_v49 = vld [vmem:[#allocation30_spill] sm:$0xff]  ;;  %v13820_v9 = vld [vmem:[#allocation60_spill] sm:$0xff] }
 0x8be   : > { %v12051_v62 = vpop.f32.mrf.mxu0  ;;  %13816 = vst [vmem:[#allocation27_spill] sm:$0xff] %v12053_v6  ;;  %v2679_v13 = vadd.f32 %v13817_v2, %v2632_v25  ;;  %v6818_v1 = vmul.f32 %v12006_v40, %v11908_v29  ;;  %v6735_v16 = vmul.f32 %v11857_v0, %v13818_v49  ;;  %v6736_v42 = vmul.f32 %v11859_v31, %v13819_v37  ;;  %v12068_v55 = vpop.f32.mrf.mxu3  ;;  %v13822_v2 = vld [vmem:[#allocation63_spill] sm:$0xff] }
 0x8bf   : > { %v12060_v20 = vpop.f32.mrf.mxu1  ;;  %7094 = vperm.xlu0 %7911, %v7080_v10   ;;  %v2708_v50 = vadd.f32 %v13820_v9, %v2671_v30  ;;  %v2712_v25 = vadd.f32 %v13821_v8, %v2675_v47  ;;  %v2683_v45 = vadd.f32 %v13822_v2, %v2638_v32  ;;  %v4471_v10 = vadd.f32 %v11881_v24, %v13823_v51  ;;  %v13826_v30 = vld [vmem:[#allocation14_spill] sm:$0xff] }
 0x8c0   : > { %7099 = vperm.xlu1 %7909, %v7081_v18   ;;  %v12073_v18 = vpop.permute.xlu2 %6999  ;;  %v2716_v37 = vadd.f32 %v13825_v27, %v2679_v13  ;;  %v4463_v47 = vadd.f32 %v11852_v22, %v13826_v30  ;;  %v4479_v32 = vadd.f32 %v11930_v12, %v11474_v34 }
 0x8c1   : > { %v6752_v29 = vpop.permute.xlu0 %6751  ;;  %13824 = vst [vmem:[#allocation26_spill] sm:$0xff] %v12073_v18  ;;  %v4532_v2 = vadd.f32 %v11938_v14, %v4471_v10 }
 0x8c2   : > { %v6838_v6 = vpop.permute.xlu1 %6837  ;;  %v6763_v49 = vmul.f32 %v6752_v29, %v6735_v16  ;;  %v6764_v33 = vmul.f32 %v6752_v29, %v6736_v42  ;;  %v7963_v16 = vld [vmem:[%s8154_s8 + $0x10] sm:$0xff]  ;;  %v4528_v27 = vadd.f32 %v11885_v59, %v4463_v47  ;;  %v4487_v29 = vadd.f32 %v11961_v26, %v11528_v7 }
 0x8c3   : > { %v6846_v9 = vmul.f32 %v6838_v6, %v6818_v1  ;;  %v6847_v8 = vmul.f32 %v6838_v6, %v6819_v48  ;;  %v12084_v42 = vadd.f32 %v7963_v16, %v2712_v25  ;;  %v4536_v6 = vadd.f32 %v11969_v61, %v4479_v32  ;;  %v7964_v1 = vld [vmem:[%s8154_s8] sm:$0xff] }
 0x8c4   : > { %v6771_v24 = vadd.f32 %v6763_v49, %v11950_v38  ;;  %v6772_v18 = vadd.f32 %v6764_v33, %v11952_v56  ;;  %v12095_v14 = vadd.f32 %v7964_v1, %v2708_v50  ;;  %v12098_v38 = vld [vmem:[%s8154_s8 + $0x20] sm:$0xff]  ;;  %v4575_v59 = vadd.f32 %v11919_v3, %v4532_v2  ;;  %v7966_v2 = vld [vmem:[%s8154_s8 + $0x30] sm:$0xff] }
 0x8c5   : > { %v12088_v13 = vadd.f32 %v6846_v9, %v11890_v28  ;;  %v12091_v22 = vadd.f32 %v6847_v8, %v11892_v60  ;;  %v12101_v56 = vadd.f32 %v12098_v38, %v2716_v37  ;;  %v12104_v48 = vpop.f32.mrf.mxu2  ;;  %v13827_v28 = vld [vmem:[#allocation66_spill] sm:$0xff]  ;;  %v4570_v61 = vadd.f32 %v11877_v58, %v4528_v27 }
 0x8c6   : > { %v4670_v12 = vpop.f32.mrf.mxu0  ;;  %v2720_v25 = vadd.f32 %v13827_v28, %v2683_v45  ;;  %v5000_v60 = vadd.f32 %v12084_v42, %v12095_v14  ;;  %v4580_v10 = vadd.f32 %v11954_v57, %v4536_v6  ;;  %v12121_v37 = vpop.f32.mrf.mxu3  ;;  %v4618_v9 = vadd.f32 %v11932_v43, %v4575_v59 }
 0x8c7   : > { %v4703_v33 = vpop.f32.mrf.mxu1  ;;  %v12137_v32 = vadd.f32 %v12043_v41, %v6771_v24  ;;  %v4612_v6 = vadd.f32 %v11883_v23, %v4570_v61  ;;  %v6675_v43 = vmul.f32 %v11848_v53, %v11987_v11 }
 0x8c8   : > { %v5001_v58 = vadd.f32 %v5000_v60, %v12101_v56  ;;  %v6828_v8 = vpop.permute.xlu2 %6827  ;;  %v12140_v27 = vadd.f32 %v7966_v2, %v2720_v25  ;;  %v12144_v60 = vadd.f32 %v12045_v4, %v6772_v18  ;;  %v4667_v41 = vadd.f32 %v12051_v62, %v4618_v9 }
 0x8c9   : > { %v6786_v50 = vpop.permute.xlu0 %6785  ;;  %13828 = vst [vmem:[#allocation10_spill] sm:$0xff] %v12137_v32  ;;  %v4663_v61 = vadd.f32 %v12004_v52, %v4612_v6  ;;  %v13831_v6 = vld [vmem:[#allocation4_spill] sm:$0xff] }
 0x8ca   : > { %v6919_v49 = vpop.permute.xlu1 %6918  ;;  %v6793_v3 = vsel %vm6791_vm5, %v11875_v19, %v6786_v50  ;;  %v6797_v45 = vsel %vm6791_vm5, %v6786_v50, %v11875_v19  ;;  %v4540_v19 = vadd.f32 %v12010_v5, %v4487_v29  ;;  %v6676_v5 = vmul.f32 %v11850_v46, %v11983_v36  ;;  %v13829_v50 = vld [vmem:[#allocation35_spill] sm:$0xff]  ;;  %v13830_v29 = vld [vmem:[#allocation34_spill] sm:$0xff] }
 0x8cb   : > { %v12126_v47 = vsel %vm6928_vm13, %v6919_v49, %v11915_v17  ;;  %v12131_v57 = vsel %vm6928_vm13, %v11915_v17, %v6919_v49  ;;  %v6815_v26 = vmul.f32 %v12008_v15, %v6797_v45  ;;  %v4624_v17 = vadd.f32 %v11963_v21, %v4580_v10 }
 0x8cc   : > { %v5002_v59 = vadd.f32 %v5001_v58, %v12140_v27  ;;  %v4585_v23 = vadd.f32 %v11997_v39, %v4540_v19  ;;  %v4704_v18 = vadd.f32 %v4703_v33, %v4667_v41  ;;  %v6733_v21 = vmul.f32 %v11857_v0, %v13829_v50 }
 0x8cd   : > { %v6843_v28 = vmul.f32 %v6828_v8, %v6815_v26  ;;  %v4671_v4 = vadd.f32 %v4670_v12, %v4624_v17  ;;  %v6734_v53 = vmul.f32 %v11859_v31, %v13830_v29  ;;  %v4700_v46 = vadd.f32 %v12060_v20, %v4663_v61  ;;  %v12160_v62 = vpop.f32.mrf.mxu2 }
 0x8ce   : > { %v4674_v24 = vpop.f32.mrf.mxu0  ;;  %v5003_v39 = vrot.slane %v5002_v59, 4  ;;  %v4630_v12 = vadd.f32 %v12012_v54, %v4585_v23  ;;  %v12163_v33 = vadd.f32 %v7963_v16, %v4704_v18  ;;  %v6814_v20 = vmul.f32 %v12006_v40, %v6793_v3  ;;  %v12172_v19 = vpop.f32.mrf.mxu3 }
 0x8cf   : > { %v4707_v25 = vpop.f32.mrf.mxu1  ;;  %v12176_v41 = vadd.f32 %v7964_v1, %v4700_v46 }
 0x8d0   : > { %v4708_v36 = vadd.f32 %v4707_v25, %v4671_v4  ;;  %v12178_v25 = vpop.permute.xlu2 %6914  ;;  %v4675_v54 = vadd.f32 %v4674_v24, %v4630_v12  ;;  %v5004_v61 = vadd.f32 %v5003_v39, %v5002_v59  ;;  %v6842_v1 = vmul.f32 %v6828_v8, %v6814_v20 }
 0x8d1   : > { %v6686_v11 = vpop.permute.xlu0 %6685  ;;  %v5018_v3 = vadd.f32 %v12163_v33, %v12176_v41 }
 0x8d2   : > { %v6747_v10 = vpop.permute.xlu1 %6746  ;;  %v6703_v49 = vmul.f32 %v6686_v11, %v6675_v43  ;;  %v6704_v45 = vmul.f32 %v6686_v11, %v6676_v5  ;;  %v13832_v43 = vld [vmem:[#allocation3_spill] sm:$0xff]  ;;  %v12181_v16 = vadd.f32 %v12098_v38, %v4708_v36  ;;  %v13835_v36 = vld [vmem:[#allocation28_spill] sm:$0xff] }
 0x8d3   : > { %v6761_v58 = vmul.f32 %v6747_v10, %v6733_v21  ;;  %v6762_v52 = vmul.f32 %v6747_v10, %v6734_v53  ;;  %v5005_v53 = vrot.slane %v5004_v61, 2  ;;  %v13836_v10 = vld [vmem:[#allocation29_spill] sm:$0xff] }
 0x8d4   : > { %v12166_v26 = vadd.f32 %v6703_v49, %v12038_v44  ;;  %v12169_v9 = vadd.f32 %v6704_v45, %v12041_v63  ;;  %v7868_v44 = vld [vmem:[%s13375_s23 + $0xc] sm:$0x3]  ;;  %v5019_v38 = vadd.f32 %v5018_v3, %v12181_v16 }
 0x8d5   : > { %v6769_v17 = vadd.f32 %v6761_v58, %v13831_v6  ;;  %v6770_v5 = vadd.f32 %v6762_v52, %v13832_v43  ;;  %v12190_v18 = vperm.slane %v7868_v44, 0  ;;  %v12192_v50 = vperm.slane %v7868_v44, 1  ;;  %v4764_v46 = vpop.f32.mrf.mxu2  ;;  %v7873_v43 = vld [vmem:[%s13375_s23 + $0xe] sm:$0x3] }
 0x8d6   : > { %v12188_v4 = vpop.f32.mrf.mxu0  ;;  %v5006_v12 = vadd.f32 %v5005_v53, %v5004_v61 }
 0x8d7   : > { %v4711_v63 = vpop.f32.mrf.mxu1  ;;  %13833 = vst [vmem:[#allocation9_spill] sm:$0xff] %v12192_v50  ;;  %v12197_v21 = vadd.f32 %v6842_v1, %v6769_v17  ;;  %v12199_v29 = vadd.f32 %v6843_v28, %v6770_v5  ;;  %v6874_v8 = vmul.f32 %v12190_v18, %v13835_v36  ;;  %v6875_v49 = vmul.f32 %v12192_v50, %v13836_v10 }
 0x8d8   : > { %v4712_v23 = vadd.f32 %v4711_v63, %v4675_v54  ;;  %v12210_v28 = vpop.permute.xlu2 %7005  ;;  %v5007_v63 = vrot.slane %v5006_v12, 1  ;;  %v12223_v1 = vperm.slane %v7873_v43, 1 }
 0x8d9   : > { %13834 = vst [vmem:[#allocation39_spill] sm:$0xff] %v12197_v21  ;;  %v6894_v39 = vpop.permute.xlu0 %6893 }
 0x8da   : > { %v12195_v24 = vadd.f32 %v7966_v2, %v4712_v23  ;;  %v12202_v59 = vpop.permute.xlu1 %6775  ;;  %v12208_v2 = vpop.f32.mrf.mxu3  ;;  %v6902_v58 = vmul.f32 %v6894_v39, %v6874_v8  ;;  %v6903_v52 = vmul.f32 %v6894_v39, %v6875_v49  ;;  %13837 = vst [vmem:[#allocation50_spill] sm:$0xff] %v12210_v28  ;;  %v5008_v53 = vadd.f32 %v5007_v63, %v5006_v12  ;;  %v13840_v8 = vld [vmem:[#allocation27_spill] sm:$0xff] }
 0x8db   : > { %13838 = vst [vmem:[#allocation45_spill] sm:$0xff] %v12223_v1  ;;  %v4741_v10 = vadd.f32 %v13840_v8, %v13826_v30  ;;  %v4749_v49 = vadd.f32 %v12104_v48, %v13823_v51  ;;  %v13843_v48 = vld [vmem:[#allocation40_spill] sm:$0xff] }
 0x8dc   : > { %v5020_v11 = vadd.f32 %v5019_v38, %v12195_v24  ;;  %v12213_v6 = vadd.f32 %v6902_v58, %v12088_v13  ;;  %v12216_v17 = vadd.f32 %v6903_v52, %v12091_v22 }
 0x8dd   : > { %v12221_v23 = vpop.f32.mrf.mxu2  ;;  %v4810_v51 = vadd.f32 %v12121_v37, %v4749_v49 }
 0x8de   : > { %v5021_v45 = vrot.slane %v5020_v11, 4  ;;  %v4852_v54 = vpop.f32.mrf.mxu0 }
 0x8df   : > { %v4889_v44 = vpop.f32.mrf.mxu1 }
 0x8e0   : > { %v5022_v20 = vadd.f32 %v5021_v45, %v5020_v11  ;;  %v12240_v58 = vpop.permute.xlu2 %6969 }
 0x8e1   : > { %v12229_v22 = vpop.permute.xlu0 %6916  ;;  %13841 = vst [vmem:[#allocation46_spill] sm:$0xff] %v12240_v58 }
 0x8e2   : > { %v5023_v5 = vrot.slane %v5022_v20, 2  ;;  %v12225_v38 = vpop.permute.xlu1 %6924  ;;  %v12227_v13 = vpop.f32.mrf.mxu3  ;;  %13839 = vst [vmem:[#allocation52_spill] sm:$0xff] %v12229_v22 }
 0x8e3   : > { %v6935_v36 = vsel %vm6928_vm13, %v12225_v38, %v12229_v22 }
 0x8e4   : > { %v5024_v3 = vadd.f32 %v5023_v5, %v5022_v20  ;;  %v6954_v45 = vmul.f32 %v12223_v1, %v6935_v36  ;;  %v12245_v20 = vperm.slane %v7873_v43, 0  ;;  %v4757_v5 = vadd.f32 %v12160_v62, %v11474_v34 }
 0x8e5   : > { %v4944_v30 = vpop.f32.mrf.mxu2 }
 0x8e6   : > { %v5025_v61 = vrot.slane %v5024_v3, 1  ;;  %v12243_v12 = vmul.f32 %v12240_v58, %v6954_v45  ;;  %13842 = vst [vmem:[#allocation8_spill] sm:$0xff] %v12245_v20  ;;  %v4853_v45 = vadd.f32 %v4852_v54, %v4810_v51 }
 0x8e7   : > { %v4895_v52 = vpop.f32.mrf.mxu1 }
 0x8e8   : > { %v5026_v11 = vadd.f32 %v5025_v61, %v5024_v3  ;;  %v4857_v3 = vpop.f32.mrf.mxu0  ;;  %v4806_v61 = vadd.f32 %v12068_v55, %v4741_v10  ;;  %v6956_v55 = vmul.f32 %v12223_v1, %v12131_v57 }
 0x8ea   : > { %v5036_v39 = vadd.f32 %v5026_v11, %v5008_v53  ;;  %v6732_v53 = vmul.f32 %v11859_v31, %v13843_v48  ;;  %v6955_v11 = vmul.f32 %v12245_v20, %v12126_v47  ;;  %v12264_v62 = vpop.permute.xlu1 %6741  ;;  %v4981_v47 = vpop.f32.mrf.mxu3  ;;  %v4848_v48 = vadd.f32 %v12188_v4, %v4806_v61  ;;  %v13844_v4 = vld [vmem:[#allocation33_spill] sm:$0xff] }
 0x8ec   : > { %v5038_v63 = vmul.f32 0.015625, %v5036_v39  ;;  %v6760_v39 = vmul.f32 %v12264_v62, %v6732_v53  ;;  %v4890_v53 = vadd.f32 %v4889_v44, %v4848_v48 }
 0x8ee   : > { %v12256_v36 = vsub.f32 %v12095_v14, %v5038_v63  ;;  %v12259_v43 = vsub.f32 %v12084_v42, %v5038_v63  ;;  %v12262_v34 = vsub.f32 %v12101_v56, %v5038_v63  ;;  %v12269_v37 = vsub.f32 %v12176_v41, %v5038_v63  ;;  %v12277_v42 = vpop.permute.xlu0 %7007 }
 0x8ef   : > { %v12272_v31 = vsub.f32 %v12163_v33, %v5038_v63  ;;  %v12275_v14 = vsub.f32 %v12181_v16, %v5038_v63  ;;  %v4814_v56 = vadd.f32 %v12172_v19, %v4757_v5  ;;  %v12281_v8 = vsub.f32 %v12140_v27, %v5038_v63  ;;  %v4901_v5 = vpop.f32.mrf.mxu1 }
 0x8f0   : > { %v5056_v57 = vmul.f32 %v12256_v36, %v12256_v36  ;;  %v5058_v41 = vmul.f32 %v12259_v43, %v12259_v43  ;;  %v12288_v33 = vsub.f32 %v12195_v24, %v5038_v63  ;;  %v5082_v16 = vmul.f32 %v12269_v37, %v12269_v37  ;;  %v4862_v20 = vpop.f32.mrf.mxu0 }
 0x8f1   : > { %v5084_v10 = vmul.f32 %v12272_v31, %v12272_v31  ;;  %v4765_v19 = vadd.f32 %v4764_v46, %v11528_v7  ;;  %v5060_v27 = vmul.f32 %v12262_v34, %v12262_v34  ;;  %v5086_v24 = vmul.f32 %v12275_v14, %v12275_v14 }
 0x8f2   : > { %v5064_v49 = vadd.f32 %v5058_v41, %v5056_v57  ;;  %v4858_v21 = vadd.f32 %v4857_v3, %v4814_v56  ;;  %v5062_v58 = vmul.f32 %v12281_v8, %v12281_v8  ;;  %v4896_v7 = vadd.f32 %v4895_v52, %v4853_v45  ;;  %v4948_v57 = vpop.f32.mrf.mxu2  ;;  %v4985_v52 = vpop.f32.mrf.mxu3 }
 0x8f3   : > { %v5090_v63 = vadd.f32 %v5084_v10, %v5082_v16  ;;  %v12304_v46 = vadd.f32 %v6760_v39, %v12169_v9  ;;  %v5088_v54 = vmul.f32 %v12288_v33, %v12288_v33  ;;  %v6975_v10 = vpop.permute.xlu1 %6974  ;;  %v6873_v3 = vmul.f32 %v12192_v50, %v13844_v4  ;;  %v7967_v4 = vld [vmem:[%s8154_s8 + $0x18] sm:$0xff] }
 0x8f4   : > { %v5065_v32 = vadd.f32 %v5064_v49, %v5060_v27  ;;  %v4902_v16 = vadd.f32 %v4901_v5, %v4858_v21  ;;  %v6983_v56 = vmul.f32 %v6975_v10, %v6955_v11  ;;  %v6984_v27 = vmul.f32 %v6975_v10, %v6956_v55  ;;  %v13849_v10 = vld [vmem:[#allocation41_spill] sm:$0xff] }
 0x8f5   : > { %v5091_v51 = vadd.f32 %v5090_v63, %v5086_v24  ;;  %v4818_v45 = vadd.f32 %v12208_v2, %v4765_v19  ;;  %v4945_v39 = vadd.f32 %v4944_v30, %v4896_v7 }
 0x8f6   : > { %v5066_v41 = vadd.f32 %v5065_v32, %v5062_v58  ;;  %v12310_v49 = vpop.permute.xlu0 %6888  ;;  %v4941_v32 = vadd.f32 %v12221_v23, %v4890_v53  ;;  %v12316_v21 = vadd.f32 %v6983_v56, %v12213_v6  ;;  %v12319_v58 = vadd.f32 %v6984_v27, %v12216_v17  ;;  %v13850_v56 = vld [vmem:[#allocation6_spill] sm:$0xff] }
 0x8f7   : > { %v5092_v61 = vadd.f32 %v5091_v51, %v5088_v54  ;;  %13845 = vst [vmem:[#allocation49_spill] sm:$0xff] %v12310_v49  ;;  %v6901_v24 = vmul.f32 %v12310_v49, %v6873_v3  ;;  %v4863_v55 = vadd.f32 %v4862_v20, %v4818_v45  ;;  %v4949_v5 = vadd.f32 %v4948_v57, %v4902_v16  ;;  %v4907_v48 = vpop.f32.mrf.mxu1  ;;  %v13848_v20 = vld [vmem:[#allocation67_spill] sm:$0xff] }
 0x8f8   : > { %v5067_v9 = vrot.slane %v5066_v41, 4  ;;  %13846 = vst [vmem:[#allocation53_spill] sm:$0xff] %v12316_v21  ;;  %v4982_v30 = vadd.f32 %v4981_v47, %v4945_v39  ;;  %v4978_v17 = vadd.f32 %v12227_v13, %v4941_v32  ;;  %v5012_v57 = vrot.slane %v13848_v20, 4  ;;  %v7968_v32 = vld [vmem:[%s8154_s8 + $0x28] sm:$0xff] }
 0x8f9   : > { %v5093_v44 = vrot.slane %v5092_v61, 4  ;;  %v6909_v63 = vadd.f32 %v6901_v24, %v12144_v60  ;;  %v4908_v19 = vadd.f32 %v4907_v48, %v4863_v55  ;;  %v4986_v53 = vadd.f32 %v4985_v52, %v4949_v5  ;;  %v13852_v24 = vld [vmem:[#allocation7_spill] sm:$0xff] }
 0x8fa   : > { %v5068_v11 = vadd.f32 %v5067_v9, %v5066_v41  ;;  %v4952_v6 = vpop.f32.mrf.mxu2  ;;  %v12335_v3 = vadd.f32 %v7967_v4, %v4982_v30  ;;  %v6792_v27 = vsel %vm6791_vm5, %v12202_v59, %v13850_v56  ;;  %v6796_v52 = vsel %vm6791_vm5, %v13850_v56, %v12202_v59  ;;  %v13851_v9 = vld [vmem:[#allocation26_spill] sm:$0xff]  ;;  %v4989_v45 = vpop.f32.mrf.mxu3 }
 0x8fb   : > { %v5094_v54 = vadd.f32 %v5093_v44, %v5092_v61  ;;  %v12323_v7 = vadd.f32 %v12243_v12, %v6909_v63  ;;  %v12326_v41 = vpop.permute.xlu1 %6997  ;;  %v6731_v12 = vmul.f32 %v11857_v0, %v13849_v10  ;;  %v4953_v61 = vadd.f32 %v4952_v6, %v4908_v19  ;;  %v13853_v6 = vld [vmem:[#allocation37_spill] sm:$0xff] }
 0x8fc   : > { %v5069_v2 = vrot.slane %v5068_v11, 2  ;;  %13847 = vst [vmem:[#allocation51_spill] sm:$0xff] %v12326_v41  ;;  %v7017_v0 = vsel %vm7009_vm14, %v12277_v42, %v13851_v9  ;;  %v12350_v44 = vadd.f32 %v13852_v24, %v4978_v17  ;;  %v12359_v55 = vsel %vm7009_vm14, %v12210_v28, %v12326_v41  ;;  %v7969_v17 = vld [vmem:[%s8154_s8 + $0x38] sm:$0xff] }
 0x8fd   : > { %v5095_v23 = vrot.slane %v5094_v54, 2  ;;  %v6759_v5 = vmul.f32 %v12264_v62, %v6731_v12  ;;  %v5013_v63 = vadd.f32 %v5012_v57, %v13848_v20  ;;  %v6812_v48 = vmul.f32 %v12006_v40, %v6792_v27 }
 0x8fe   : > { %v5070_v51 = vadd.f32 %v5069_v2, %v5068_v11  ;;  %v12330_v16 = vpop.permute.xlu0 %6922  ;;  %v12353_v11 = vadd.f32 %v7968_v32, %v4986_v53  ;;  %v5027_v2 = vadd.f32 %v12335_v3, %v12350_v44  ;;  %v4990_v30 = vadd.f32 %v4989_v45, %v4953_v61 }
 0x8ff   : > { %v5096_v60 = vadd.f32 %v5095_v23, %v5094_v54  ;;  %v6813_v54 = vmul.f32 %v12008_v15, %v6796_v52  ;;  %v12370_v23 = vld [vmem:[%s13375_s23 + $0x10] sm:$0x3]  ;;  %v6767_v20 = vadd.f32 %v6759_v5, %v12166_v26  ;;  %v5014_v57 = vrot.slane %v5013_v63, 2 }
 0x900   : > { %v5071_v47 = vrot.slane %v5070_v51, 1  ;;  %v5028_v62 = vadd.f32 %v5027_v2, %v12353_v11  ;;  %v4999_v53 = vadd.f32 %v7969_v17, %v4990_v30  ;;  %v12381_v10 = vperm.slane %v12370_v23, 1 }
 0x901   : > { %v5097_v13 = vrot.slane %v5096_v60, 1 }
 0x902   : > { %v5072_v39 = vadd.f32 %v5071_v47, %v5070_v51  ;;  %v6871_v51 = vmul.f32 %v12192_v50, %v13853_v6  ;;  %13855 = vst [vmem:[#allocation56_spill] sm:$0xff] %v12381_v10  ;;  %v5029_v12 = vadd.f32 %v5028_v62, %v4999_v53  ;;  %v7037_v26 = vmul.f32 %v12381_v10, %v7017_v0 }
 0x903   : > { %v5098_v59 = vadd.f32 %v5097_v13, %v5096_v60  ;;  %v12376_v40 = vpop.permute.xlu1 %6883 }
 0x904   : > { %13854 = vst [vmem:[#allocation38_spill] sm:$0xff] %v12376_v40  ;;  %v6899_v60 = vmul.f32 %v12376_v40, %v6871_v51  ;;  %v5030_v27 = vrot.slane %v5029_v12, 4 }
 0x905   : > { %v5108_v19 = vadd.f32 %v5098_v59, %v5072_v39  ;;  %v5015_v39 = vadd.f32 %v5014_v57, %v5013_v63 }
 0x906   : > { %v6823_v47 = vpop.permute.xlu0 %6822  ;;  %v12384_v56 = vadd.f32 %v6899_v60, %v12199_v29  ;;  %v5031_v24 = vadd.f32 %v5030_v27, %v5029_v12 }
 0x907   : > { %v5110_v15 = vmul.f32 0.015625, %v5108_v19  ;;  %v6840_v4 = vmul.f32 %v6823_v47, %v6812_v48  ;;  %v6841_v61 = vmul.f32 %v6823_v47, %v6813_v54  ;;  %v5016_v48 = vrot.slane %v5015_v39, 1  ;;  %v13863_v47 = vld [vmem:[#allocation19_spill] sm:$0xff] }
 0x908   : > { %v5032_v32 = vrot.slane %v5031_v24, 2 }
 0x909   : > { %v5112_v13 = vadd.f32 1e-05, %v5110_v15  ;;  %v12386_v52 = vadd.f32 %v6840_v4, %v6767_v20  ;;  %v12389_v45 = vadd.f32 %v6841_v61, %v12304_v46  ;;  %v5017_v51 = vadd.f32 %v5016_v48, %v5015_v39  ;;  %v13864_v4 = vld [vmem:[#allocation21_spill] sm:$0xff]  ;;  %v13865_v61 = vld [vmem:[#allocation20_spill] sm:$0xff] }
 0x90a   : > { %v5033_v54 = vadd.f32 %v5032_v32, %v5031_v24 }
 0x90b   : > { %13856 = vst [vmem:[#allocation47_spill] sm:$0xff] %v12386_v52  ;;  %7944 = vrsqrt.f32 %v5112_v13  ;;  %v12392_v59 = vpop.permute.xlu1 %6912  ;;  %vm5120_vm6 = vweird.f32 %v5112_v13  ;;  %v13878_v52 = vld [vmem:[#allocation72_spill] sm:$0xff] }
 0x90c   : > { %13857 = vst [vmem:[#allocation44_spill] sm:$0xff] %v12389_v45  ;;  %v5034_v19 = vrot.slane %v5033_v54, 1 }
 0x90d   : > { %13858 = vst [vmem:[#allocation48_spill] sm:$0xff] %v12392_v59 }
 0x90e   : > { %v12394_v5 = vpop.permute.xlu0 %7055  ;;  %v5035_v0 = vadd.f32 %v5034_v19, %v5033_v54 }
 0x90f   : > { %13859 = vst [vmem:[#allocation12_spill] sm:$0xff] %v12394_v5  ;;  %v7065_v29 = vmul.f32 %v12394_v5, %v7037_v26  ;;  %v13866_v26 = vld [vmem:[#allocation24_spill] sm:$0xff] }
 0x910   : > { %v5037_v62 = vadd.f32 %v5035_v0, %v5017_v51  ;;  %v13868_v51 = vld [vmem:[#allocation2_spill] sm:$0xff]  ;;  %v13883_v5 = vld [vmem:[#allocation68_spill] sm:$0xff] }
 0x911   : > { %v7945_v2 = vpop.eup %7944  ;;  %v12398_v46 = vadd.f32 %v7065_v29, %v12319_v58 }
 0x912   : > { %v5115_v30 = vmul.f32 %v7945_v2, %v5112_v13  ;;  %vm5121_vm12 = vweird.f32 %v7945_v2  ;;  %v5039_v57 = vmul.f32 0.015625, %v5037_v62 }
 0x913   : > { %13860 = vst [vmem:[#allocation11_spill] sm:$0xff] %v12398_v46  ;;  %v12400_v17 = vpop.permute.xlu1 %7003  ;;  %vm5122_vm11 = vmor %vm5120_vm6, %vm5121_vm12 }
 0x914   : > { %v5116_v6 = vmul.f32 %v7945_v2, %v5115_v30  ;;  %13861 = vst [vmem:[#allocation55_spill] sm:$0xff] %v12400_v17  ;;  %v12405_v12 = vsub.f32 %v13863_v47, %v5039_v57  ;;  %v12408_v58 = vsub.f32 %v13864_v4, %v5039_v57  ;;  %v12411_v27 = vsub.f32 %v13865_v61, %v5039_v57 }
 0x915   : > { %v12414_v39 = vsub.f32 %v13866_v26, %v5039_v57  ;;  %v12417_v24 = vsub.f32 %v12350_v44, %v5039_v57  ;;  %v12420_v32 = vsub.f32 %v12335_v3, %v5039_v57  ;;  %v12423_v13 = vsub.f32 %v12353_v11, %v5039_v57 }
 0x916   : > { %v5117_v63 = vmul.f32 0.5, %v5116_v6  ;;  %v12402_v15 = vpop.permute.xlu0 %6995  ;;  %v12427_v54 = vsub.f32 %v4999_v53, %v5039_v57  ;;  %v5057_v29 = vmul.f32 %v12405_v12, %v12405_v12  ;;  %v5059_v30 = vmul.f32 %v12408_v58, %v12408_v58 }
 0x917   : > { %13862 = vst [vmem:[#allocation54_spill] sm:$0xff] %v12402_v15  ;;  %v7035_v3 = vmul.f32 %v12381_v10, %v12359_v55  ;;  %v5083_v11 = vmul.f32 %v12417_v24, %v12417_v24  ;;  %v5085_v19 = vmul.f32 %v12420_v32, %v12420_v32  ;;  %v6934_v55 = vsel %vm6928_vm13, %v12330_v16, %v12178_v25  ;;  %v13877_v10 = vld [vmem:[#allocation15_spill] sm:$0xff] }
 0x918   : > { %v5118_v20 = vsub.f32 1.5, %v5117_v63  ;;  %v5073_v53 = vadd.f32 %v5059_v30, %v5057_v29  ;;  %v5089_v26 = vmul.f32 %v12427_v54, %v12427_v54 }
 0x919   : > { %v5099_v57 = vadd.f32 %v5085_v19, %v5083_v11 }
 0x91a   : > { %v5119_v60 = vmul.f32 %v7945_v2, %v5118_v20  ;;  %v5087_v20 = vmul.f32 %v12423_v13, %v12423_v13 }
 0x91b   : > { %v12443_v6 = vpop.permute.xlu1 %7050 }
 0x91c   : > { %v12425_v48 = vsel %vm5122_vm11, %v7945_v2, %v5119_v60  ;;  %v5061_v2 = vmul.f32 %v12411_v27, %v12411_v27  ;;  %13867 = vst [vmem:[#allocation57_spill] sm:$0xff] %v12443_v6  ;;  %v6952_v60 = vmul.f32 %v12223_v1, %v6934_v55  ;;  %v7063_v47 = vmul.f32 %v12443_v6, %v7035_v3  ;;  %v13872_v55 = vld [vmem:[#allocation65_spill] sm:$0xff] }
 0x91d   : > { %v5212_v44 = vmul.f32 %v12425_v48, %v12288_v33  ;;  %v5063_v33 = vmul.f32 %v12414_v39, %v12414_v39  ;;  %v5210_v4 = vmul.f32 %v12425_v48, %v12275_v14  ;;  %v5100_v29 = vadd.f32 %v5099_v57, %v5087_v20 }
 0x91e   : > { %v12452_v63 = vpop.permute.xlu0 %6964  ;;  %v5074_v62 = vadd.f32 %v5073_v53, %v5061_v2  ;;  %v13871_v2 = vld [vmem:[#allocation25_spill] sm:$0xff] }
 0x91f   : > { %v5244_v0 = vmul.f32 %v13868_v51, %v5212_v44  ;;  %13869 = vst [vmem:[#allocation59_spill] sm:$0xff] %v12452_v63  ;;  %v6980_v30 = vmul.f32 %v12452_v63, %v6952_v60  ;;  %v12464_v44 = vadd.f32 %v7063_v47, %v12323_v7  ;;  %v5101_v19 = vadd.f32 %v5100_v29, %v5089_v26  ;;  %v5283_v26 = vld [vmem:[%s13366_s14 + $0x8] sm:$0xff] }
 0x920   : > { %v5075_v61 = vadd.f32 %v5074_v62, %v5063_v33  ;;  %v5242_v46 = vmul.f32 %v13872_v55, %v5210_v4  ;;  %v5282_v33 = vld [vmem:[%s13366_s14] sm:$0xff]  ;;  %v5206_v29 = vmul.f32 %v12425_v48, %v12269_v37 }
 0x921   : > { %13870 = vst [vmem:[#allocation58_spill] sm:$0xff] %v12464_v44  ;;  %v5276_v53 = vadd.f32 %v13871_v2, %v5244_v0  ;;  %v5102_v45 = vrot.slane %v5101_v19, 4  ;;  %v12469_v14 = vadd.f32 %v6980_v30, %v12384_v56  ;;  %v13874_v0 = vld [vmem:[#allocation69_spill] sm:$0xff]  ;;  %v5287_v60 = vsel %vm1119_vm4, %v5282_v33, 0 }
 0x922   : > { %v5076_v11 = vrot.slane %v5075_v61, 4  ;;  %v5274_v57 = vadd.f32 %v13874_v0, %v5242_v46  ;;  %v12490_v30 = vand.u32 4294901760, %v5287_v60 }
 0x923   : > { %13873 = vst [vmem:[#allocation61_spill] sm:$0xff] %v12469_v14  ;;  %v12474_v62 = vand.u32 4294901760, %v5276_v53  ;;  %v5103_v7 = vadd.f32 %v5102_v45, %v5101_v19  ;;  %v13876_v14 = vld [vmem:[#allocation71_spill] sm:$0xff] }
 0x924   : > { %v5077_v3 = vadd.f32 %v5076_v11, %v5075_v61  ;;  %v5208_v61 = vmul.f32 %v12425_v48, %v12272_v31  ;;  %v12486_v45 = vand.u32 4294901760, %v5274_v57  ;;  %v5238_v37 = vmul.f32 %v13876_v14, %v5206_v29 }
 0x925   : > { %5311 = vmatpush.msra.mxu0 %v12474_v62  ;;  %5462 = vmatpush.msra.mxu3 %v12474_v62  ;;  %v5104_v4 = vrot.slane %v5103_v7, 2  ;;  %v5364_v56 = vsub.f32 %v5276_v53, %v12474_v62  ;;  %v13875_v53 = vld [vmem:[#allocation13_spill] sm:$0xff] }
 0x926   : > { %v5078_v20 = vrot.slane %v5077_v3, 2  ;;  %v5240_v31 = vmul.f32 %v13875_v53, %v5208_v61  ;;  %v5370_v44 = vsub.f32 %v5274_v57, %v12486_v45  ;;  %v5270_v21 = vadd.f32 %v13878_v52, %v5238_v37 }
 0x927   : > { %v5105_v11 = vadd.f32 %v5104_v4, %v5103_v7  ;;  %5418 = vmatpush.msra.mxu2 %v5364_v56  ;;  %5313 = vmatpush.msra.mxu0 %v12486_v45  ;;  %v5365_v19 = vand.u32 4294901760, %v5364_v56  ;;  %v12500_v7 = vsub.f32 %v5287_v60, %v12490_v30 }
 0x928   : > { %v5079_v47 = vadd.f32 %v5078_v20, %v5077_v3  ;;  %5464 = vmatpush.msra.mxu3 %v12486_v45  ;;  %v5290_v3 = vsel %vm1119_vm4, %v5283_v26, 0  ;;  %v5272_v50 = vadd.f32 %v13877_v10, %v5240_v31  ;;  %v12511_v60 = vand.u32 4294901760, %v5270_v21 }
 0x929   : > { %v5106_v20 = vrot.slane %v5105_v11, 1  ;;  %v5366_v4 = vsub.f32 %v5364_v56, %v5365_v19  ;;  %5421 = vmatpush.msra.mxu2 %v5370_v44  ;;  %v12503_v61 = vand.u32 4294901760, %v5290_v3  ;;  %v12509_v57 = vand.u32 4294901760, %v12500_v7 }
 0x92a   : > { %v5080_v46 = vrot.slane %v5079_v47, 1  ;;  %v5314_v26 = vand.u32 4294901760, %v5272_v50  ;;  %v5382_v63 = vsub.f32 %v5270_v21, %v12511_v60 }
 0x92b   : > { %v5107_v1 = vadd.f32 %v5106_v20, %v5105_v11  ;;  %v5367_v29 = vand.u32 4294901760, %v5366_v4  ;;  %v5321_v11 = vsub.f32 %v12500_v7, %v12509_v57 }
 0x92c   : > { %v5081_v33 = vadd.f32 %v5080_v46, %v5079_v47  ;;  %v5284_v47 = vld [vmem:[%s13366_s14 + $0x10] sm:$0xff]  ;;  %v5371_v46 = vand.u32 4294901760, %v5370_v44  ;;  %5315 = vmatpush.msra.mxu0 %v5314_v26  ;;  %5466 = vmatpush.msra.mxu3 %v5314_v26  ;;  %v5376_v56 = vsub.f32 %v5272_v50, %v5314_v26  ;;  %v5285_v50 = vld [vmem:[%s13366_s14 + $0x18] sm:$0xff] }
 0x92d   : > { %v5293_v37 = vsel %vm1119_vm4, %v5284_v47, 0  ;;  %5368 = vmatpush.msra.mxu1 %v5367_v29  ;;  %v12518_v4 = vand.u32 4294901760, %v5321_v11  ;;  %v5383_v29 = vand.u32 4294901760, %v5382_v63 }
 0x92e   : > { %v5109_v31 = vadd.f32 %v5107_v1, %v5081_v33  ;;  %v5372_v20 = vsub.f32 %v5370_v44, %v5371_v46  ;;  %5317 = vmatpush.msra.mxu0 %v12511_v60  ;;  %5424 = vmatpush.msra.mxu2 %v5376_v56  ;;  %v5377_v1 = vand.u32 4294901760, %v5376_v56  ;;  %v12521_v33 = vsub.f32 %v5290_v3, %v12503_v61 }
 0x92f   : > { %5468 = vmatpush.msra.mxu3 %v12511_v60  ;;  %v12527_v21 = vand.u32 4294901760, %v5293_v37  ;;  %5323 = vmatmul.f32.vlgmr.msra.gmra.mxu0 %v12518_v4  ;;  %v5384_v3 = vsub.f32 %v5382_v63, %v5383_v29 }
 0x930   : > { %v5111_v6 = vmul.f32 0.015625, %v5109_v31  ;;  %5509 = vmatpush.msrb.mxu0 %v5365_v19  ;;  %v5373_v47 = vand.u32 4294901760, %v5372_v20  ;;  %5427 = vmatpush.msra.mxu2 %v5382_v63  ;;  %v5378_v31 = vsub.f32 %v5376_v56, %v5377_v1  ;;  %v12531_v11 = vand.u32 4294901760, %v12521_v33 }
 0x931   : > { %v5296_v19 = vsel %vm1119_vm4, %v5285_v50, 0  ;;  %5430 = vmatmul.f32.vlgmr.msra.gmra.mxu2 %v12500_v7  ;;  %5472 = vmatmul.f32.vlgmr.msra.gmra.mxu3 %v12509_v57  ;;  %v5385_v56 = vand.u32 4294901760, %v5384_v3 }
 0x932   : > { %v5113_v44 = vadd.f32 1e-05, %v5111_v6  ;;  %5513 = vmatpush.msrb.mxu0 %v5371_v46  ;;  %5374 = vmatpush.msra.mxu1 %v5373_v47  ;;  %v12534_v6 = vsub.f32 %v5293_v37, %v12527_v21  ;;  %v5379_v20 = vand.u32 4294901760, %v5378_v31  ;;  %v5329_v15 = vsub.f32 %v12521_v33, %v12531_v11 }
 0x933   : > { %v12546_v46 = vand.u32 4294901760, %v5296_v19  ;;  %v5140_v47 = vmul.f32 %v12425_v48, %v12281_v8 }
 0x934   : > { %7946 = vrsqrt.f32 %v5113_v44  ;;  %5517 = vmatpush.msrb.mxu0 %v5377_v1  ;;  %5380 = vmatpush.msra.mxu1 %v5379_v20  ;;  %v12541_v17 = vand.u32 4294901760, %v5329_v15  ;;  %v12544_v63 = vand.u32 4294901760, %v12534_v6  ;;  %v13879_v20 = vld [vmem:[#allocation73_spill] sm:$0xff]  ;;  %vm5130_vm9 = vweird.f32 %v5113_v44 }
 0x935   : > { %v12554_v15 = vsub.f32 %v5296_v19, %v12546_v46 }
 0x936   : > { %5521 = vmatpush.msrb.mxu0 %v5383_v29  ;;  %5386 = vmatpush.msra.mxu1 %v5385_v56  ;;  %v5337_v1 = vsub.f32 %v12534_v6, %v12544_v63  ;;  %v5138_v29 = vmul.f32 %v12425_v48, %v12262_v34  ;;  %v5172_v56 = vmul.f32 %v13879_v20, %v5140_v47 }
 0x937   : > { %5388 = vmatmul.f32.vlgmr.msra.gmra.mxu1 %v12490_v30  ;;  %5331 = vmatmul.f32.gmra.mxu0 %v12541_v17  ;;  %v12566_v19 = vand.u32 4294901760, %v12554_v15  ;;  %v5136_v34 = vmul.f32 %v12425_v48, %v12259_v43  ;;  %v5134_v43 = vmul.f32 %v12425_v48, %v12256_v36 }
 0x938   : > { %5552 = vmatpush.msrb.mxu1 %v12474_v62  ;;  %v12563_v3 = vand.u32 4294901760, %v5337_v1  ;;  %v13881_v1 = vld [vmem:[#allocation74_spill] sm:$0xff] }
 0x939   : > { %5435 = vmatmul.f32.gmra.mxu2 %v12521_v33  ;;  %5478 = vmatmul.f32.gmra.mxu3 %v12531_v11  ;;  %v5204_v47 = vadd.f32 %v13881_v1, %v5172_v56  ;;  %v5168_v40 = vmul.f32 %v13883_v5, %v5136_v34  ;;  %v13884_v34 = vld [vmem:[#allocation22_spill] sm:$0xff] }
 0x93a   : > { %v7947_v37 = vpop.eup %7946  ;;  %5554 = vmatpush.msrb.mxu1 %v12486_v45  ;;  %v13880_v45 = vld [vmem:[#allocation16_spill] sm:$0xff] }
 0x93b   : > { %v5125_v50 = vmul.f32 %v7947_v37, %v5113_v44  ;;  %vm5131_vm2 = vweird.f32 %v7947_v37 }
 0x93c   : > { %5556 = vmatpush.msrb.mxu1 %v5314_v26  ;;  %v5345_v26 = vsub.f32 %v12554_v15, %v12566_v19  ;;  %vm5132_vm0 = vmor %vm5130_vm9, %vm5131_vm2 }
 0x93d   : > { %v5126_v31 = vmul.f32 %v7947_v37, %v5125_v50  ;;  %v5170_v50 = vmul.f32 %v13880_v45, %v5138_v29 }
 0x93e   : > { %5558 = vmatpush.msrb.mxu1 %v12511_v60  ;;  %v13882_v60 = vld [vmem:[#allocation75_spill] sm:$0xff] }
 0x93f   : > { %v5127_v62 = vmul.f32 0.5, %v5126_v31  ;;  %5392 = vmatmul.f32.gmra.mxu1 %v12503_v61  ;;  %5339 = vmatmul.f32.gmra.mxu0 %v12563_v3  ;;  %v5202_v29 = vadd.f32 %v13882_v60, %v5170_v50 }
 0x941   : > { %v5128_v8 = vsub.f32 1.5, %v5127_v62  ;;  %5440 = vmatmul.f32.gmra.mxu2 %v12534_v6  ;;  %5484 = vmatmul.f32.gmra.mxu3 %v12544_v63 }
 0x943   : > { %v5129_v31 = vmul.f32 %v7947_v37, %v5128_v8 }
 0x945   : > { %v5133_v62 = vsel %vm5132_vm0, %v7947_v37, %v5129_v31  ;;  %v12588_v37 = vand.u32 4294901760, %v5345_v26  ;;  %v5166_v26 = vmul.f32 %v13884_v34, %v5134_v43 }
 0x946   : > { %v5213_v44 = vmul.f32 %v5133_v62, %v12427_v54  ;;  %v5211_v8 = vmul.f32 %v5133_v62, %v12423_v13  ;;  %v5209_v59 = vmul.f32 %v5133_v62, %v12420_v32  ;;  %v5207_v56 = vmul.f32 %v5133_v62, %v12417_v24 }
 0x947   : > { %v12591_v31 = vmul.f32 %v5133_v62, %v12414_v39  ;;  %v12594_v50 = vmul.f32 %v5133_v62, %v12411_v27  ;;  %v12597_v36 = vmul.f32 %v5133_v62, %v12408_v58  ;;  %v12603_v24 = vand.u32 4294901760, %v5204_v47  ;;  %5396 = vmatmul.f32.gmra.mxu1 %v12527_v21  ;;  %5347 = vmatmul.f32.gmra.mxu0 %v12588_v37 }
 0x948   : > { %v5245_v48 = vmul.f32 %v13868_v51, %v5213_v44  ;;  %v5243_v54 = vmul.f32 %v13872_v55, %v5211_v8  ;;  %v5241_v13 = vmul.f32 %v13875_v53, %v5209_v59  ;;  %v5239_v32 = vmul.f32 %v13876_v14, %v5207_v56  ;;  %v13885_v14 = vld [vmem:[#allocation17_spill] sm:$0xff] }
 0x949   : > { %v12607_v39 = vmul.f32 %v5133_v62, %v12405_v12  ;;  %v12615_v59 = vand.u32 4294901760, %v5202_v29  ;;  %v5200_v53 = vadd.f32 %v13885_v14, %v5168_v40  ;;  %5445 = vmatmul.f32.gmra.mxu2 %v12554_v15  ;;  %5490 = vmatmul.f32.gmra.mxu3 %v12566_v19 }
 0x94a   : > { %v5277_v58 = vadd.f32 %v13871_v2, %v5245_v48  ;;  %v5275_v27 = vadd.f32 %v13874_v0, %v5243_v54  ;;  %v5273_v51 = vadd.f32 %v13877_v10, %v5241_v13  ;;  %v5271_v55 = vadd.f32 %v13878_v52, %v5239_v32  ;;  %v13886_v52 = vld [vmem:[#allocation70_spill] sm:$0xff] }
 0x94b   : > { %v12628_v10 = vsub.f32 %v5204_v47, %v12603_v24  ;;  %v5198_v2 = vadd.f32 %v13886_v52, %v5166_v26  ;;  %v12637_v56 = vand.u32 4294901760, %v5200_v53  ;;  %v12640_v48 = vsub.f32 %v5202_v29, %v12615_v59 }
 0x94c   : > { %v12618_v43 = vand.u32 4294901760, %v5277_v58  ;;  %v12620_v12 = vand.u32 4294901760, %v5275_v27  ;;  %v12622_v62 = vand.u32 4294901760, %v5273_v51  ;;  %v12624_v44 = vand.u32 4294901760, %v5271_v55 }
 0x94d   : > { %v12646_v26 = vand.u32 4294901760, %v5198_v2 }
 0x94e   : > { %5589 = vmatpush.msrb.mxu2 %v12618_v43  ;;  %5740 = vmatpush.msra.mxu1 %v12618_v43  ;;  %v5642_v40 = vsub.f32 %v5277_v58, %v12618_v43  ;;  %v5648_v0 = vsub.f32 %v5275_v27, %v12620_v12  ;;  %v5654_v8 = vsub.f32 %v5273_v51, %v12622_v62  ;;  %v5939_v51 = vand.u32 4294901760, %v12640_v48 }
 0x94f   : > { %v5660_v54 = vsub.f32 %v5271_v55, %v12624_v44  ;;  %5400 = vmatmul.f32.gmra.mxu1 %v12546_v46  ;;  %5523 = vmatmul.f32.vlgmr.msrb.gmra.mxu0 %v12490_v30  ;;  %v12654_v55 = vsub.f32 %v5200_v53, %v12637_v56  ;;  %v12663_v49 = vsub.f32 %v5198_v2, %v12646_v26 }
 0x950   : > { %5591 = vmatpush.msrb.mxu2 %v12620_v12  ;;  %5696 = vmatpush.msra.mxu0 %v5642_v40  ;;  %v5643_v47 = vand.u32 4294901760, %v5642_v40  ;;  %v5649_v13 = vand.u32 4294901760, %v5648_v0  ;;  %v5655_v29 = vand.u32 4294901760, %v5654_v8 }
 0x951   : > { %5742 = vmatpush.msra.mxu1 %v12620_v12  ;;  %v5661_v41 = vand.u32 4294901760, %v5660_v54  ;;  %v5945_v22 = vand.u32 4294901760, %v12654_v55  ;;  %v5951_v2 = vand.u32 4294901760, %v12663_v49 }
 0x952   : > { %5593 = vmatpush.msrb.mxu2 %v12622_v62  ;;  %v5644_v58 = vsub.f32 %v5642_v40, %v5643_v47  ;;  %v5650_v27 = vsub.f32 %v5648_v0, %v5649_v13  ;;  %5699 = vmatpush.msra.mxu0 %v5648_v0  ;;  %v13887_v40 = vand.u32 4294901760, %v12628_v10  ;;  %v5656_v53 = vsub.f32 %v5654_v8, %v5655_v29 }
 0x953   : > { %5744 = vmatpush.msra.mxu1 %v12622_v62 }
 0x954   : > { %5595 = vmatpush.msrb.mxu2 %v12624_v44  ;;  %v5645_v32 = vand.u32 4294901760, %v5644_v58  ;;  %v5934_v28 = vsub.f32 %v12628_v10, %v13887_v40  ;;  %5702 = vmatpush.msra.mxu0 %v5654_v8  ;;  %v5651_v0 = vand.u32 4294901760, %v5650_v27  ;;  %v5940_v58 = vsub.f32 %v12640_v48, %v5939_v51  ;;  %v5279_v27 = vld [vmem:[%s13365_s13 + $0x8] sm:$0xff] }
 0x955   : > { %5746 = vmatpush.msra.mxu1 %v12624_v44  ;;  %5601 = vmatmul.f32.vlgmr.msrb.gmra.mxu2 %v12518_v4  ;;  %v5662_v4 = vsub.f32 %v5660_v54, %v5661_v41  ;;  %v5657_v8 = vand.u32 4294901760, %v5656_v53 }
 0x956   : > { %5787 = vmatpush.msra.mxu2 %v5643_v47  ;;  %5646 = vmatpush.msrb.mxu3 %v5645_v32  ;;  %v5935_v40 = vand.u32 4294901760, %v5934_v28  ;;  %v5941_v47 = vand.u32 4294901760, %v5940_v58  ;;  %v5946_v32 = vsub.f32 %v12654_v55, %v5945_v22  ;;  %v5952_v28 = vsub.f32 %v12663_v49, %v5951_v2 }
 0x957   : > { %5705 = vmatpush.msra.mxu0 %v5660_v54  ;;  %5560 = vmatmul.f32.vlgmr.msrb.gmra.mxu1 %v12490_v30  ;;  %v5663_v54 = vand.u32 4294901760, %v5662_v4 }
 0x958   : > { %5791 = vmatpush.msra.mxu2 %v5649_v13  ;;  %5652 = vmatpush.msrb.mxu3 %v5651_v0  ;;  %v5947_v13 = vand.u32 4294901760, %v5946_v32 }
 0x959   : > { %5879 = vmatpush.msrb.mxu0 %v12603_v24  ;;  %5936 = vmatpush.msrb.mxu1 %v5935_v40 }
 0x95a   : > { %5795 = vmatpush.msra.mxu2 %v5655_v29  ;;  %5527 = vmatmul.f32.gmra.mxu0 %v12503_v61 }
 0x95b   : > { %5881 = vmatpush.msrb.mxu0 %v12615_v59  ;;  %5658 = vmatpush.msrb.mxu3 %v5657_v8 }
 0x95c   : > { %5799 = vmatpush.msra.mxu2 %v5661_v41  ;;  %5942 = vmatpush.msrb.mxu1 %v5941_v47  ;;  %v5953_v41 = vand.u32 4294901760, %v5952_v28 }
 0x95d   : > { %5883 = vmatpush.msrb.mxu0 %v12637_v56  ;;  %5664 = vmatpush.msrb.mxu3 %v5663_v54 }
 0x95e   : > { %5986 = vmatpush.msrb.mxu2 %v12628_v10  ;;  %5666 = vmatmul.f32.vlgmr.msrb.gmra.mxu3 %v12490_v30 }
 0x95f   : > { %5609 = vmatmul.f32.gmra.mxu2 %v12541_v17  ;;  %5830 = vmatpush.msra.mxu3 %v12618_v43  ;;  %v5173_v17 = vmul.f32 %v13879_v20, %v12591_v31  ;;  %v5171_v43 = vmul.f32 %v13880_v45, %v12594_v50  ;;  %v5167_v31 = vmul.f32 %v13884_v34, %v12607_v39 }
 0x960   : > { %5885 = vmatpush.msrb.mxu0 %v12646_v26  ;;  %5948 = vmatpush.msrb.mxu1 %v5947_v13 }
 0x961   : > { %5989 = vmatpush.msrb.mxu2 %v12640_v48  ;;  %5832 = vmatpush.msra.mxu3 %v12620_v12  ;;  %v5205_v12 = vadd.f32 %v13881_v1, %v5173_v17  ;;  %v5203_v20 = vadd.f32 %v13882_v60, %v5171_v43  ;;  %v5199_v1 = vadd.f32 %v13886_v52, %v5167_v31  ;;  %v13889_v43 = vld [vmem:[#allocation31_spill] sm:$0xff] }
 0x962   : > { %5954 = vmatpush.msrb.mxu1 %v5953_v41  ;;  %5531 = vmatmul.f32.gmra.mxu0 %v12527_v21  ;;  %v7013_v41 = vsel %vm7009_vm14, %v13851_v9, %v12277_v42  ;;  %v12867_v42 = vpop.permute.xlu0 %7001  ;;  %v13890_v9 = vld [vmem:[#allocation52_spill] sm:$0xff] }
 0x963   : > { %5992 = vmatpush.msrb.mxu2 %v12654_v55  ;;  %5564 = vmatmul.f32.gmra.mxu1 %v12503_v61  ;;  %v12713_v45 = vand.u32 4294901760, %v5205_v12 }
 0x964   : > { %5834 = vmatpush.msra.mxu3 %v12622_v62  ;;  %v12717_v62 = vand.u32 4294901760, %v5203_v20 }
 0x965   : > { %5995 = vmatpush.msrb.mxu2 %v12663_v49  ;;  %v12725_v60 = vsub.f32 %v5205_v12, %v12713_v45  ;;  %v6930_v12 = vsel %vm6928_vm13, %v12178_v25, %v12330_v16  ;;  %v13892_v25 = vld [vmem:[#allocation50_spill] sm:$0xff]  ;;  %v13893_v16 = vld [vmem:[#allocation51_spill] sm:$0xff] }
 0x966   : > { %5836 = vmatpush.msra.mxu3 %v12624_v44  ;;  %v12734_v34 = vsub.f32 %v5203_v20, %v12717_v62 }
 0x967   : > { %5617 = vmatmul.f32.gmra.mxu2 %v12563_v3  ;;  %5670 = vmatmul.f32.gmra.mxu3 %v12503_v61  ;;  %v5169_v3 = vmul.f32 %v13883_v5, %v12597_v36  ;;  %v13888_v5 = vand.u32 4294901760, %v12628_v10  ;;  %v12731_v36 = vand.u32 4294901760, %v5199_v1 }
 0x968   : > { %6030 = vmatpush.msrb.mxu3 %v12603_v24  ;;  %v6217_v44 = vand.u32 4294901760, %v12734_v34 }
 0x969   : > { %v5201_v50 = vadd.f32 %v13885_v14, %v5169_v3  ;;  %v5278_v14 = vld [vmem:[%s13365_s13] sm:$0xff]  ;;  %v6931_v3 = vsel %vm6928_vm13, %v13890_v9, %v12225_v38 }
 0x96a   : > { %6032 = vmatpush.msrb.mxu3 %v12615_v59  ;;  %5535 = vmatmul.f32.gmra.mxu0 %v12546_v46  ;;  %v5855_v49 = vsel %vm1119_vm4, %v5278_v14, 0  ;;  %v6218_v48 = vsub.f32 %v12734_v34, %v6217_v44 }
 0x96b   : > { %5568 = vmatmul.f32.gmra.mxu1 %v12527_v21 }
 0x96c   : > { %6034 = vmatpush.msrb.mxu3 %v12637_v56 }
 0x96e   : > { %6036 = vmatpush.msrb.mxu3 %v12646_v26 }
 0x96f   : > { %5625 = vmatmul.f32.gmra.mxu2 %v12588_v37  ;;  %5674 = vmatmul.f32.gmra.mxu3 %v12527_v21  ;;  %v12727_v37 = vand.u32 4294901760, %v5201_v50 }
 0x971   : > { %v12741_v39 = vsub.f32 %v5201_v50, %v12727_v37  ;;  %v13891_v50 = vld [vmem:[#allocation49_spill] sm:$0xff] }
 0x972   : > { %5708 = vmatmul.f32.vlgmr.msra.gmra.mxu0 %v12500_v7  ;;  %v6211_v7 = vand.u32 4294901760, %v12725_v60 }
 0x973   : > { %5572 = vmatmul.f32.gmra.mxu1 %v12546_v46  ;;  %6077 = vmatpush.msra.mxu0 %v13888_v5  ;;  %v6223_v52 = vand.u32 4294901760, %v12741_v39  ;;  %v7012_v5 = vsel %vm7009_vm14, %v13893_v16, %v13892_v25 }
 0x974   : > { %v6212_v10 = vsub.f32 %v12725_v60, %v6211_v7 }
 0x975   : > { %6081 = vmatpush.msra.mxu0 %v5939_v51 }
 0x976   : > { %v6213_v29 = vand.u32 4294901760, %v6212_v10  ;;  %v13896_v10 = vld [vmem:[#allocation48_spill] sm:$0xff] }
 0x977   : > { %5801 = vmatmul.f32.vlgmr.msra.gmra.mxu2 %v12490_v30  ;;  %6085 = vmatpush.msra.mxu0 %v5945_v22  ;;  %v12752_v22 = vsub.f32 %v5199_v1, %v12731_v36 }
 0x978   : > { %5678 = vmatmul.f32.gmra.mxu3 %v12546_v46  ;;  %6157 = vmatpush.msra.mxu2 %v12713_v45 }
 0x979   : > { %6089 = vmatpush.msra.mxu0 %v5951_v2 }
 0x97a   : > { %6159 = vmatpush.msra.mxu2 %v12717_v62  ;;  %5713 = vmatmul.f32.gmra.mxu0 %v12521_v33  ;;  %v6229_v33 = vand.u32 4294901760, %v12752_v22 }
 0x97b   : > { %5750 = vmatmul.f32.vlgmr.msra.gmra.mxu1 %v12509_v57  ;;  %v12770_v57 = vand.u32 4294901760, %v5855_v49 }
 0x97c   : > { %6120 = vmatpush.msra.mxu1 %v12603_v24  ;;  %6161 = vmatpush.msra.mxu2 %v12727_v37  ;;  %v6224_v24 = vsub.f32 %v12741_v39, %v6223_v52  ;;  %v6230_v51 = vsub.f32 %v12752_v22, %v6229_v33 }
 0x97d   : > { %v12787_v55 = vsub.f32 %v5855_v49, %v12770_v57 }
 0x97e   : > { %6122 = vmatpush.msra.mxu1 %v12615_v59  ;;  %6163 = vmatpush.msra.mxu2 %v12731_v36  ;;  %v6219_v59 = vand.u32 4294901760, %v6218_v48  ;;  %v6231_v53 = vand.u32 4294901760, %v6230_v51  ;;  %v13897_v48 = vld [vmem:[#allocation38_spill] sm:$0xff] }
 0x97f   : > { %5805 = vmatmul.f32.gmra.mxu2 %v12503_v61  ;;  %v12792_v0 = vand.u32 4294901760, %v12787_v55  ;;  %v13901_v51 = vld [vmem:[#allocation54_spill] sm:$0xff] }
 0x980   : > { %5838 = vmatmul.f32.vlgmr.msra.gmra.mxu3 %v12490_v30  ;;  %6124 = vmatpush.msra.mxu1 %v12637_v56  ;;  %v6225_v30 = vand.u32 4294901760, %v6224_v24  ;;  %v5858_v56 = vsel %vm1119_vm4, %v5279_v27, 0  ;;  %v13899_v24 = vld [vmem:[#allocation12_spill] sm:$0xff] }
 0x981   : > { %6214 = vmatpush.msra.mxu3 %v6213_v29  ;;  %v12794_v58 = vand.u32 4294901760, %v5858_v56 }
 0x982   : > { %6126 = vmatpush.msra.mxu1 %v12646_v26  ;;  %5718 = vmatmul.f32.gmra.mxu0 %v12534_v6  ;;  %v5280_v6 = vld [vmem:[%s13365_s13 + $0x10] sm:$0xff]  ;;  %v5889_v26 = vsub.f32 %v12787_v55, %v12792_v0 }
 0x983   : > { %6220 = vmatpush.msra.mxu3 %v6219_v59  ;;  %5756 = vmatmul.f32.gmra.mxu1 %v12531_v11  ;;  %v12801_v11 = vpop.permute.xlu2 %6920  ;;  %v12807_v4 = vsub.f32 %v5858_v56, %v12794_v58  ;;  %v5861_v40 = vsel %vm1119_vm4, %v5280_v6, 0  ;;  %v13900_v59 = vld [vmem:[#allocation55_spill] sm:$0xff] }
 0x984   : > { %v12811_v2 = vand.u32 4294901760, %v5889_v26  ;;  %v12816_v8 = vand.u32 4294901760, %v5861_v40  ;;  %v13902_v6 = vld [vmem:[#allocation59_spill] sm:$0xff] }
 0x985   : > { %6226 = vmatpush.msra.mxu3 %v6225_v30  ;;  %v7011_v30 = vsel %vm7009_vm14, %v13901_v51, %v13900_v59 }
 0x986   : > { %v12827_v47 = vsub.f32 %v5861_v40, %v12816_v8 }
 0x987   : > { %6232 = vmatpush.msra.mxu3 %v6231_v53  ;;  %5809 = vmatmul.f32.gmra.mxu2 %v12527_v21 }
 0x988   : > { %5842 = vmatmul.f32.gmra.mxu3 %v12503_v61  ;;  %v12814_v61 = vand.u32 4294901760, %v12807_v4  ;;  %v12838_v28 = vand.u32 4294901760, %v12827_v47 }
 0x98a   : > { %5723 = vmatmul.f32.gmra.mxu0 %v12554_v15  ;;  %v5281_v15 = vld [vmem:[%s13365_s13 + $0x18] sm:$0xff] }
 0x98b   : > { %5762 = vmatmul.f32.gmra.mxu1 %v12544_v63  ;;  %v5897_v63 = vsub.f32 %v12807_v4, %v12814_v61  ;;  %v12829_v32 = vpop.permute.xlu2 %6878 }
 0x98d   : > { %v12835_v54 = vand.u32 4294901760, %v5897_v63 }
 0x98f   : > { %5813 = vmatmul.f32.gmra.mxu2 %v12546_v46 }
 0x990   : > { %5846 = vmatmul.f32.gmra.mxu3 %v12527_v21  ;;  %v5864_v21 = vsel %vm1119_vm4, %v5281_v15, 0  ;;  %v13903_v15 = vld [vmem:[#allocation46_spill] sm:$0xff] }
 0x991   : > { %v12840_v13 = vand.u32 4294901760, %v5864_v21 }
 0x992   : > { %5891 = vmatmul.f32.vlgmr.msrb.gmra.mxu0 %v12811_v2 }
 0x993   : > { %5768 = vmatmul.f32.gmra.mxu1 %v12566_v19  ;;  %6264 = vmatpush.msrb.mxu0 %v12725_v60  ;;  %v7026_v19 = vperm.slane %v12370_v23, 0  ;;  %v12859_v17 = vsub.f32 %v5864_v21, %v12840_v13  ;;  %v6872_v23 = vmul.f32 %v12190_v18, %v13889_v43  ;;  %v12877_v31 = vpop.permute.xlu2 %6993  ;;  %v13894_v60 = vld [vmem:[#allocation8_spill] sm:$0xff]  ;;  %v13904_v21 = vld [vmem:[#allocation42_spill] sm:$0xff] }
 0x994   : > { %v7010_v56 = vsel %vm7009_vm14, %v12877_v31, %v12867_v42 }
 0x995   : > { %6267 = vmatpush.msrb.mxu0 %v12734_v34  ;;  %v7036_v20 = vmul.f32 %v7026_v19, %v7013_v41  ;;  %v6900_v1 = vmul.f32 %v13891_v50, %v6872_v23  ;;  %v6951_v34 = vmul.f32 %v13894_v60, %v6930_v12  ;;  %v12893_v14 = vand.u32 4294901760, %v12859_v17  ;;  %v13906_v12 = vld [vmem:[#allocation57_spill] sm:$0xff] }
 0x996   : > { %v7034_v49 = vmul.f32 %v7026_v19, %v7012_v5  ;;  %v6868_v41 = vmul.f32 %v12190_v18, %v13904_v21  ;;  %v7032_v23 = vmul.f32 %v7026_v19, %v7011_v30 }
 0x997   : > { %5998 = vmatmul.f32.vlgmr.msrb.gmra.mxu2 %v12787_v55  ;;  %6270 = vmatpush.msrb.mxu0 %v12741_v39  ;;  %v7064_v27 = vmul.f32 %v13899_v24, %v7036_v20  ;;  %v6979_v26 = vmul.f32 %v13902_v6, %v6951_v34  ;;  %v5913_v40 = vsub.f32 %v12859_v17, %v12893_v14 }
 0x998   : > { %5850 = vmatmul.f32.gmra.mxu3 %v12546_v46  ;;  %6355 = vmatpush.msrb.mxu2 %v6211_v7  ;;  %v5905_v46 = vsub.f32 %v12827_v47, %v12838_v28  ;;  %v13895_v7 = vld [vmem:[#allocation36_spill] sm:$0xff]  ;;  %v7062_v9 = vmul.f32 %v13906_v12, %v7034_v49  ;;  %v6896_v20 = vmul.f32 %v12829_v32, %v6868_v41 }
 0x999   : > { %6273 = vmatpush.msrb.mxu0 %v12752_v22  ;;  %v6870_v38 = vmul.f32 %v12190_v18, %v13895_v7  ;;  %v13898_v22 = vld [vmem:[#allocation10_spill] sm:$0xff]  ;;  %v13907_v18 = vld [vmem:[#allocation53_spill] sm:$0xff]  ;;  %v12936_v5 = vand.u32 4294901760, %v5913_v40  ;;  %v13908_v7 = vld [vmem:[#allocation47_spill] sm:$0xff] }
 0x99a   : > { %6359 = vmatpush.msrb.mxu2 %v6217_v44  ;;  %5899 = vmatmul.f32.gmra.mxu0 %v12835_v54  ;;  %v12890_v39 = vand.u32 4294901760, %v5905_v46  ;;  %v6953_v44 = vmul.f32 %v13894_v60, %v6931_v3  ;;  %v12924_v46 = vpop.permute.xlu1 %6959  ;;  %v7030_v3 = vmul.f32 %v7026_v19, %v7010_v56  ;;  %v7072_v25 = vadd.f32 %v7064_v27, %v13907_v18 }
 0x99b   : > { %5956 = vmatmul.f32.vlgmr.msrb.gmra.mxu1 %v12770_v57  ;;  %v6898_v29 = vmul.f32 %v13897_v48, %v6870_v38  ;;  %v6904_v38 = vadd.f32 %v6896_v20, %v13908_v7 }
 0x99c   : > { %6308 = vmatpush.msrb.mxu1 %v12713_v45  ;;  %6363 = vmatpush.msrb.mxu2 %v6223_v52  ;;  %v6929_v52 = vsel %vm6928_vm13, %v13896_v10, %v12801_v11  ;;  %v6981_v63 = vmul.f32 %v13903_v15, %v6953_v44  ;;  %v12946_v44 = vand.u32 4294901760, %v7072_v25 }
 0x99d   : > { %v6949_v53 = vmul.f32 %v13894_v60, %v6929_v52  ;;  %v12938_v60 = vpop.permute.xlu2 %7045 }
 0x99e   : > { %6310 = vmatpush.msrb.mxu1 %v12717_v62  ;;  %6367 = vmatpush.msrb.mxu2 %v6229_v33  ;;  %v6908_v33 = vadd.f32 %v6900_v1, %v13898_v22  ;;  %v12931_v1 = vpop.permute.xlu0 %7040  ;;  %v7060_v19 = vmul.f32 %v12938_v60, %v7032_v23 }
 0x99f   : > { %6003 = vmatmul.f32.gmra.mxu2 %v12807_v4 }
 0x9a0   : > { %6040 = vmatmul.f32.vlgmr.msrb.gmra.mxu3 %v12792_v0  ;;  %6312 = vmatpush.msrb.mxu1 %v12727_v37  ;;  %v6989_v50 = vadd.f32 %v6981_v63, %v6908_v33 }
 0x9a1   : > { %6398 = vmatpush.msrb.mxu3 %v12713_v45  ;;  %v13905_v45 = vld [vmem:[#allocation39_spill] sm:$0xff] }
 0x9a2   : > { %6314 = vmatpush.msrb.mxu1 %v12731_v36  ;;  %5907 = vmatmul.f32.gmra.mxu0 %v12890_v39  ;;  %v6906_v43 = vadd.f32 %v6898_v29, %v13905_v45  ;;  %v7070_v34 = vadd.f32 %v7062_v9, %v6989_v50  ;;  %v12953_v29 = vsub.f32 %v7072_v25, %v12946_v44 }
 0x9a3   : > { %6400 = vmatpush.msrb.mxu3 %v12717_v62  ;;  %5960 = vmatmul.f32.gmra.mxu1 %v12794_v58  ;;  %v6977_v62 = vmul.f32 %v12924_v46, %v6949_v53 }
 0x9a4   : > { %v6987_v16 = vadd.f32 %v6979_v26, %v6906_v43  ;;  %v7181_v30 = vand.u32 4294901760, %v12953_v29 }
 0x9a5   : > { %6402 = vmatpush.msrb.mxu3 %v12727_v37  ;;  %v7058_v37 = vmul.f32 %v12931_v1, %v7030_v3  ;;  %v6985_v49 = vadd.f32 %v6977_v62, %v6904_v38  ;;  %v7015_v38 = vsel %vm7009_vm14, %v13900_v59, %v13901_v51  ;;  %v13912_v51 = vld [vmem:[#allocation56_spill] sm:$0xff] }
 0x9a6   : > { %v7068_v52 = vadd.f32 %v7060_v19, %v6987_v16  ;;  %v7182_v40 = vsub.f32 %v12953_v29, %v7181_v30 }
 0x9a7   : > { %6404 = vmatpush.msrb.mxu3 %v12731_v36  ;;  %6008 = vmatmul.f32.gmra.mxu2 %v12827_v47  ;;  %v12950_v36 = vand.u32 4294901760, %v7070_v34  ;;  %v7066_v48 = vadd.f32 %v7058_v37, %v6985_v49  ;;  %v7014_v37 = vsel %vm7009_vm14, %v12867_v42, %v12877_v31  ;;  %v13909_v49 = vld [vmem:[#allocation45_spill] sm:$0xff] }
 0x9a8   : > { %6046 = vmatmul.f32.gmra.mxu3 %v12814_v61  ;;  %v12955_v22 = vand.u32 4294901760, %v7068_v52  ;;  %v7031_v35 = vmul.f32 %v13912_v51, %v7014_v37 }
 0x9a9   : > { %v12958_v24 = vand.u32 4294901760, %v7066_v48  ;;  %v12962_v27 = vsub.f32 %v7070_v34, %v12950_v36 }
 0x9aa   : > { %5915 = vmatmul.f32.gmra.mxu0 %v12936_v5  ;;  %v12967_v56 = vsub.f32 %v7068_v52, %v12955_v22 }
 0x9ab   : > { %5964 = vmatmul.f32.gmra.mxu1 %v12816_v8  ;;  %v7187_v53 = vand.u32 4294901760, %v12962_v27  ;;  %v12973_v6 = vsub.f32 %v7066_v48, %v12958_v24 }
 0x9ac   : > { %v5324_v33 = vpop.f32.mrf.mxu0  ;;  %v7193_v15 = vand.u32 4294901760, %v12967_v56 }
 0x9ad   : > { %v7188_v45 = vsub.f32 %v12962_v27, %v7187_v53  ;;  %v7199_v43 = vand.u32 4294901760, %v12973_v6 }
 0x9ae   : > { %v7194_v12 = vsub.f32 %v12967_v56, %v7193_v15 }
 0x9af   : > { %6013 = vmatmul.f32.gmra.mxu2 %v12859_v17  ;;  %v7189_v3 = vand.u32 4294901760, %v7188_v45  ;;  %v7200_v20 = vsub.f32 %v12973_v6, %v7199_v43 }
 0x9b0   : > { %6052 = vmatmul.f32.gmra.mxu3 %v12838_v28  ;;  %v7195_v50 = vand.u32 4294901760, %v7194_v12 }
 0x9b1   : > { %v7201_v19 = vand.u32 4294901760, %v7200_v20  ;;  %v13914_v20 = vld [vmem:[#allocation11_spill] sm:$0xff] }
 0x9b2   : > { %6091 = vmatmul.f32.vlgmr.msra.gmra.mxu0 %v12770_v57 }
 0x9b3   : > { %5968 = vmatmul.f32.gmra.mxu1 %v12840_v13  ;;  %7127 = vmatpush.msra.mxu0 %v12946_v44 }
 0x9b4   : > { %v5389_v26 = vpop.f32.mrf.mxu1  ;;  %v5332_v63 = vpop.f32.mrf.mxu0 }
 0x9b5   : > { %7129 = vmatpush.msra.mxu0 %v12950_v36  ;;  %v5390_v21 = vadd.f32 %v5389_v26, %v5324_v33  ;;  %v5431_v41 = vpop.f32.mrf.mxu2  ;;  %v12996_v9 = vpop.f32.mrf.mxu3  ;;  %v13910_v26 = vld [vmem:[#allocation43_spill] sm:$0xff] }
 0x9b7   : > { %6169 = vmatmul.f32.vlgmr.msra.gmra.mxu2 %v12811_v2  ;;  %7131 = vmatpush.msra.mxu0 %v12955_v22  ;;  %v12989_v23 = vadd.f32 %v5431_v41, %v5390_v21  ;;  %v7183_v2 = vand.u32 4294901760, %v7182_v40  ;;  %v13911_v40 = vld [vmem:[#allocation9_spill] sm:$0xff]  ;;  %v13913_v41 = vld [vmem:[#allocation44_spill] sm:$0xff] }
 0x9b8   : > { %6058 = vmatmul.f32.gmra.mxu3 %v12893_v14  ;;  %7234 = vmatpush.msra.mxu2 %v12953_v29  ;;  %v6869_v59 = vmul.f32 %v13911_v40, %v13910_v26 }
 0x9b9   : > { %7133 = vmatpush.msra.mxu0 %v12958_v24 }
 0x9ba   : > { %7237 = vmatpush.msra.mxu2 %v12962_v27  ;;  %6095 = vmatmul.f32.gmra.mxu0 %v12794_v58  ;;  %v6897_v31 = vmul.f32 %v12829_v32, %v6869_v59 }
 0x9bb   : > { %6128 = vmatmul.f32.vlgmr.msra.gmra.mxu1 %v12770_v57 }
 0x9bc   : > { %7184 = vmatpush.msra.mxu1 %v7183_v2  ;;  %7240 = vmatpush.msra.mxu2 %v12967_v56  ;;  %v5393_v18 = vpop.f32.mrf.mxu1  ;;  %v5340_v25 = vpop.f32.mrf.mxu0  ;;  %v6905_v45 = vadd.f32 %v6897_v31, %v13913_v41  ;;  %v7059_v2 = vmul.f32 %v12931_v1, %v7031_v35 }
 0x9bd   : > { %v5394_v16 = vadd.f32 %v5393_v18, %v5332_v63  ;;  %v5436_v62 = vpop.f32.mrf.mxu2  ;;  %v13016_v7 = vpop.f32.mrf.mxu3  ;;  %v7033_v63 = vmul.f32 %v13912_v51, %v7015_v38  ;;  %v13915_v18 = vld [vmem:[#allocation61_spill] sm:$0xff] }
 0x9be   : > { %7190 = vmatpush.msra.mxu1 %v7189_v3  ;;  %7243 = vmatpush.msra.mxu2 %v12973_v6 }
 0x9bf   : > { %6177 = vmatmul.f32.gmra.mxu2 %v12835_v54  ;;  %v13007_v34 = vadd.f32 %v5436_v62, %v5394_v16  ;;  %v6933_v54 = vsel %vm6928_vm13, %v12801_v11, %v13896_v10  ;;  %v7061_v21 = vmul.f32 %v12938_v60, %v7033_v63  ;;  %v13916_v60 = vld [vmem:[#allocation58_spill] sm:$0xff] }
 0x9c0   : > { %6234 = vmatmul.f32.vlgmr.msra.gmra.mxu3 %v12770_v57  ;;  %7196 = vmatpush.msra.mxu1 %v7195_v50  ;;  %v6950_v48 = vmul.f32 %v13909_v49, %v6933_v54  ;;  %v13047_v50 = vand.u32 4294901760, %v13914_v20 }
 0x9c1   : > { %7278 = vmatpush.msra.mxu3 %v12946_v44 }
 0x9c2   : > { %7202 = vmatpush.msra.mxu1 %v7201_v19  ;;  %6099 = vmatmul.f32.gmra.mxu0 %v12816_v8  ;;  %v13055_v19 = vand.u32 4294901760, %v13916_v60  ;;  %v13062_v38 = vsub.f32 %v13914_v20, %v13047_v50 }
 0x9c3   : > { %7280 = vmatpush.msra.mxu3 %v12950_v36  ;;  %6132 = vmatmul.f32.gmra.mxu1 %v12794_v58 }
 0x9c4   : > { %v5397_v52 = vpop.f32.mrf.mxu1  ;;  %v5348_v11 = vpop.f32.mrf.mxu0  ;;  %v13071_v37 = vsub.f32 %v13916_v60, %v13055_v19 }
 0x9c5   : > { %7282 = vmatpush.msra.mxu3 %v12955_v22  ;;  %v5398_v10 = vadd.f32 %v5397_v52, %v5340_v25  ;;  %v5441_v33 = vpop.f32.mrf.mxu2  ;;  %v13044_v3 = vpop.f32.mrf.mxu3  ;;  %v7069_v25 = vadd.f32 %v7061_v21, %v13915_v18 }
 0x9c7   : > { %7284 = vmatpush.msra.mxu3 %v12958_v24  ;;  %6185 = vmatmul.f32.gmra.mxu2 %v12890_v39  ;;  %v13035_v42 = vadd.f32 %v5441_v33, %v5398_v10  ;;  %v6978_v39 = vmul.f32 %v12924_v46, %v6950_v48 }
 0x9c8   : > { %6238 = vmatmul.f32.gmra.mxu3 %v12794_v58 }
 0x9c9   : > { %v6986_v16 = vadd.f32 %v6978_v39, %v6905_v45 }
 0x9ca   : > { %6103 = vmatmul.f32.gmra.mxu0 %v12840_v13 }
 0x9cb   : > { %6136 = vmatmul.f32.gmra.mxu1 %v12816_v8  ;;  %v7067_v1 = vadd.f32 %v7059_v2, %v6986_v16 }
 0x9cc   : > { %v5401_v12 = vpop.f32.mrf.mxu1  ;;  %v13051_v46 = vpop.f32.mrf.mxu0 }
 0x9cd   : > { %v5402_v32 = vadd.f32 %v5401_v12, %v5348_v11  ;;  %v5446_v62 = vpop.f32.mrf.mxu2  ;;  %v13073_v52 = vand.u32 4294901760, %v7067_v1  ;;  %v13098_v56 = vpop.f32.mrf.mxu3 }
 0x9cf   : > { %6193 = vmatmul.f32.gmra.mxu2 %v12936_v5  ;;  %v13057_v54 = vadd.f32 %v5446_v62, %v5402_v32  ;;  %v13067_v5 = vand.u32 4294901760, %v7069_v25  ;;  %v13094_v48 = vsub.f32 %v7067_v1, %v13073_v52 }
 0x9d0   : > { %6242 = vmatmul.f32.gmra.mxu3 %v12816_v8 }
 0x9d1   : > { %v13086_v49 = vsub.f32 %v7069_v25, %v13067_v5 }
 0x9d2   : > { %6276 = vmatmul.f32.vlgmr.msrb.gmra.mxu0 %v12787_v55 }
 0x9d3   : > { %6140 = vmatmul.f32.gmra.mxu1 %v12840_v13  ;;  %7325 = vmatpush.msrb.mxu0 %v7181_v30  ;;  %v7459_v30 = vand.u32 4294901760, %v13062_v38  ;;  %v7471_v10 = vand.u32 4294901760, %v13086_v49 }
 0x9d4   : > { %v13077_v55 = vpop.f32.mrf.mxu1 }
 0x9d5   : > { %7329 = vmatpush.msrb.mxu0 %v7187_v53  ;;  %v7074_v53 = vld [vmem:[%s13369_s17] sm:$0xff]  ;;  %v7460_v11 = vsub.f32 %v13062_v38, %v7459_v30 }
 0x9d6   : > { %v7103_v33 = vsel %vm1119_vm4, %v7074_v53, 0 }
 0x9d7   : > { %6369 = vmatmul.f32.vlgmr.msrb.gmra.mxu2 %v12770_v57  ;;  %7333 = vmatpush.msrb.mxu0 %v7193_v15  ;;  %v13082_v29 = vpop.f32.mrf.mxu0  ;;  %v7465_v15 = vand.u32 4294901760, %v13071_v37 }
 0x9d8   : > { %6246 = vmatmul.f32.gmra.mxu3 %v12840_v13  ;;  %7405 = vmatpush.msrb.mxu2 %v13047_v50  ;;  %v5602_v27 = vpop.f32.mrf.mxu2 }
 0x9d9   : > { %7337 = vmatpush.msrb.mxu0 %v7199_v43  ;;  %v7466_v6 = vsub.f32 %v13071_v37, %v7465_v15  ;;  %v7461_v43 = vand.u32 4294901760, %v7460_v11 }
 0x9da   : > { %7407 = vmatpush.msrb.mxu2 %v13055_v19  ;;  %6281 = vmatmul.f32.gmra.mxu0 %v12807_v4  ;;  %v7477_v4 = vand.u32 4294901760, %v13094_v48 }
 0x9db   : > { %6318 = vmatmul.f32.vlgmr.msrb.gmra.mxu1 %v12792_v0  ;;  %v13117_v0 = vand.u32 4294901760, %v7103_v33  ;;  %v7467_v59 = vand.u32 4294901760, %v7466_v6 }
 0x9dc   : > { %7368 = vmatpush.msrb.mxu1 %v12946_v44  ;;  %7409 = vmatpush.msrb.mxu2 %v13067_v5  ;;  %v7472_v44 = vsub.f32 %v13086_v49, %v7471_v10  ;;  %v7478_v63 = vsub.f32 %v13094_v48, %v7477_v4 }
 0x9de   : > { %7370 = vmatpush.msrb.mxu1 %v12950_v36  ;;  %7411 = vmatpush.msrb.mxu2 %v13073_v52  ;;  %v7075_v36 = vld [vmem:[%s13369_s17 + $0x8] sm:$0xff]  ;;  %v7479_v21 = vand.u32 4294901760, %v7478_v63 }
 0x9df   : > { %6373 = vmatmul.f32.gmra.mxu2 %v12794_v58  ;;  %v13120_v26 = vpop.f32.mrf.mxu0  ;;  %v7106_v39 = vsel %vm1119_vm4, %v7075_v36, 0 }
 0x9e0   : > { %6406 = vmatmul.f32.vlgmr.msrb.gmra.mxu3 %v12770_v57  ;;  %7372 = vmatpush.msrb.mxu1 %v12955_v22  ;;  %v13127_v40 = vpop.f32.mrf.mxu1  ;;  %v13138_v57 = vsub.f32 %v7103_v33, %v13117_v0  ;;  %v7473_v22 = vand.u32 4294901760, %v7472_v44  ;;  %v13145_v45 = vand.u32 4294901760, %v7106_v39 }
 0x9e1   : > { %7462 = vmatpush.msrb.mxu3 %v7461_v43  ;;  %v5667_v51 = vpop.f32.mrf.mxu3 }
 0x9e2   : > { %7374 = vmatpush.msrb.mxu1 %v12958_v24  ;;  %v5610_v35 = vpop.f32.mrf.mxu2  ;;  %v5668_v31 = vadd.f32 %v5667_v51, %v5602_v27  ;;  %6286 = vmatmul.f32.gmra.mxu0 %v12827_v47  ;;  %v13143_v41 = vand.u32 4294901760, %v13138_v57  ;;  %v13160_v20 = vsub.f32 %v7106_v39, %v13145_v45 }
 0x9e3   : > { %7468 = vmatpush.msrb.mxu3 %v7467_v59  ;;  %6324 = vmatmul.f32.gmra.mxu1 %v12814_v61  ;;  %v7076_v61 = vld [vmem:[%s13369_s17 + $0x10] sm:$0xff] }
 0x9e4   : > { %v7137_v12 = vsub.f32 %v13138_v57, %v13143_v41  ;;  %v13167_v32 = vand.u32 4294901760, %v13160_v20 }
 0x9e5   : > { %7474 = vmatpush.msrb.mxu3 %v7473_v22 }
 0x9e6   : > { %v13164_v16 = vand.u32 4294901760, %v7137_v12  ;;  %v7145_v27 = vsub.f32 %v13160_v20, %v13167_v32 }
 0x9e7   : > { %7480 = vmatpush.msrb.mxu3 %v7479_v21  ;;  %6377 = vmatmul.f32.gmra.mxu2 %v12816_v8  ;;  %v13148_v47 = vpop.f32.mrf.mxu0 }
 0x9e8   : > { %6410 = vmatmul.f32.gmra.mxu3 %v12794_v58  ;;  %v13151_v24 = vpop.f32.mrf.mxu1  ;;  %v7109_v58 = vsel %vm1119_vm4, %v7076_v61, 0  ;;  %v13188_v6 = vand.u32 4294901760, %v7145_v27 }
 0x9e9   : > { %v13169_v62 = vand.u32 4294901760, %v7109_v58 }
 0x9ea   : > { %v5618_v2 = vpop.f32.mrf.mxu2  ;;  %6291 = vmatmul.f32.gmra.mxu0 %v12859_v17  ;;  %v5671_v18 = vpop.f32.mrf.mxu3 }
 0x9eb   : > { %6330 = vmatmul.f32.gmra.mxu1 %v12838_v28  ;;  %v5672_v25 = vadd.f32 %v5671_v18, %v5610_v35  ;;  %v7077_v28 = vld [vmem:[%s13369_s17 + $0x18] sm:$0xff]  ;;  %v13182_v53 = vsub.f32 %v7109_v58, %v13169_v62 }
 0x9ed   : > { %v13191_v43 = vand.u32 4294901760, %v13182_v53 }
 0x9ef   : > { %6381 = vmatmul.f32.gmra.mxu2 %v12840_v13  ;;  %v5709_v17 = vpop.f32.mrf.mxu0  ;;  %v7153_v35 = vsub.f32 %v13182_v53, %v13191_v43 }
 0x9f0   : > { %6414 = vmatmul.f32.gmra.mxu3 %v12816_v8  ;;  %v13173_v60 = vpop.f32.mrf.mxu1  ;;  %v7112_v8 = vsel %vm1119_vm4, %v7077_v28, 0  ;;  %v5710_v36 = vadd.f32 %v5709_v17, %v5668_v31 }
 0x9f1   : > { %v13193_v44 = vand.u32 4294901760, %v7112_v8 }
 0x9f2   : > { %v5626_v1 = vpop.f32.mrf.mxu2  ;;  %7139 = vmatmul.f32.vlgmr.msra.gmra.mxu0 %v13164_v16  ;;  %v5675_v11 = vpop.f32.mrf.mxu3 }
 0x9f3   : > { %6336 = vmatmul.f32.gmra.mxu1 %v12893_v14  ;;  %7512 = vmatpush.msra.mxu0 %v13062_v38  ;;  %v5676_v33 = vadd.f32 %v5675_v11, %v5618_v2  ;;  %v13207_v31 = vsub.f32 %v7112_v8, %v13193_v44 }
 0x9f5   : > { %7515 = vmatpush.msra.mxu0 %v13071_v37  ;;  %v13216_v37 = vand.u32 4294901760, %v7153_v35 }
 0x9f7   : > { %7246 = vmatmul.f32.vlgmr.msra.gmra.mxu2 %v13138_v57  ;;  %7518 = vmatpush.msra.mxu0 %v13086_v49  ;;  %v5714_v14 = vpop.f32.mrf.mxu0 }
 0x9f8   : > { %6418 = vmatmul.f32.gmra.mxu3 %v12840_v13  ;;  %7603 = vmatpush.msra.mxu2 %v7459_v30  ;;  %v5751_v59 = vpop.f32.mrf.mxu1  ;;  %v13219_v30 = vand.u32 4294901760, %v13207_v31 }
 0x9f9   : > { %v5752_v51 = vadd.f32 %v5751_v59, %v5710_v36  ;;  %7521 = vmatpush.msra.mxu0 %v13094_v48 }
 0x9fa   : > { %7607 = vmatpush.msra.mxu2 %v7465_v15  ;;  %v5802_v63 = vpop.f32.mrf.mxu2  ;;  %7147 = vmatmul.f32.gmra.mxu0 %v13188_v6  ;;  %v5715_v15 = vadd.f32 %v5714_v14, %v5672_v25 }
 0x9fb   : > { %v5679_v13 = vpop.f32.mrf.mxu3  ;;  %v5803_v22 = vadd.f32 %v5802_v63, %v5752_v51  ;;  %7204 = vmatmul.f32.vlgmr.msra.gmra.mxu1 %v13117_v0 }
 0x9fc   : > { %v5680_v38 = vadd.f32 %v5679_v13, %v5626_v1  ;;  %7556 = vmatpush.msra.mxu1 %v13047_v50  ;;  %7611 = vmatpush.msra.mxu2 %v7471_v10 }
 0x9fe   : > { %7558 = vmatpush.msra.mxu1 %v13055_v19  ;;  %7615 = vmatpush.msra.mxu2 %v7477_v4  ;;  %v7161_v4 = vsub.f32 %v13207_v31, %v13219_v30 }
 0x9ff   : > { %7251 = vmatmul.f32.gmra.mxu2 %v13160_v20  ;;  %v5719_v39 = vpop.f32.mrf.mxu0 }
 0xa00   : > { %7288 = vmatmul.f32.vlgmr.msra.gmra.mxu3 %v13143_v41  ;;  %7560 = vmatpush.msra.mxu1 %v13067_v5  ;;  %v5757_v49 = vpop.f32.mrf.mxu1  ;;  %v5720_v12 = vadd.f32 %v5719_v39, %v5676_v33  ;;  %v5474_v39 = vadd.f32 %v12996_v9, %v12989_v23  ;;  %v5480_v23 = vadd.f32 %v13016_v7, %v13007_v34 }
 0xa01   : > { %7646 = vmatpush.msra.mxu3 %v13047_v50  ;;  %v5758_v10 = vadd.f32 %v5757_v49, %v5715_v15  ;;  %v7162_v50 = vand.u32 4294901760, %v7161_v4  ;;  %v5486_v34 = vadd.f32 %v13044_v3, %v13035_v42  ;;  %v13917_v3 = vld [vmem:[#allocation23_spill] sm:$0xff] }
 0xa02   : > { %7562 = vmatpush.msra.mxu1 %v13073_v52  ;;  %v5806_v48 = vpop.f32.mrf.mxu2  ;;  %7155 = vmatmul.f32.gmra.mxu0 %v13216_v37 }
 0xa03   : > { %7648 = vmatpush.msra.mxu3 %v13055_v19  ;;  %v5807_v21 = vadd.f32 %v5806_v48, %v5758_v10  ;;  %v5839_v61 = vpop.f32.mrf.mxu3  ;;  %7208 = vmatmul.f32.gmra.mxu1 %v13145_v45  ;;  %v5525_v10 = vadd.f32 %v13051_v46, %v5474_v39  ;;  %v5529_v46 = vadd.f32 %v13082_v29, %v5480_v23 }
 0xa04   : > { %v13231_v2 = vadd.f32 %v5839_v61, %v5803_v22 }
 0xa05   : > { %7650 = vmatpush.msra.mxu3 %v13067_v5  ;;  %v5562_v4 = vadd.f32 %v13077_v55, %v5525_v10  ;;  %v5566_v55 = vadd.f32 %v13127_v40, %v5529_v46  ;;  %v5533_v40 = vadd.f32 %v13120_v26, %v5486_v34 }
 0xa07   : > { %7652 = vmatpush.msra.mxu3 %v13073_v52  ;;  %7256 = vmatmul.f32.gmra.mxu2 %v13182_v53  ;;  %v5724_v18 = vpop.f32.mrf.mxu0 }
 0xa08   : > { %7294 = vmatmul.f32.gmra.mxu3 %v13167_v32  ;;  %v5763_v58 = vpop.f32.mrf.mxu1  ;;  %v5725_v5 = vadd.f32 %v5724_v18, %v5680_v38 }
 0xa09   : > { %v5764_v25 = vadd.f32 %v5763_v58, %v5720_v12 }
 0xa0a   : > { %v5810_v19 = vpop.f32.mrf.mxu2  ;;  %7163 = vmatmul.f32.gmra.mxu0 %v7162_v50 }
 0xa0b   : > { %v5811_v17 = vadd.f32 %v5810_v19, %v5764_v25  ;;  %v5843_v28 = vpop.f32.mrf.mxu3  ;;  %7212 = vmatmul.f32.gmra.mxu1 %v13169_v62 }
 0xa0c   : > { %v13238_v1 = vadd.f32 %v5843_v28, %v5807_v21 }
 0xa0f   : > { %7261 = vmatmul.f32.gmra.mxu2 %v13207_v31  ;;  %v5892_v27 = vpop.f32.mrf.mxu0 }
 0xa10   : > { %7300 = vmatmul.f32.gmra.mxu3 %v13191_v43  ;;  %v5769_v52 = vpop.f32.mrf.mxu1  ;;  %v5893_v61 = vadd.f32 %v5892_v27, %v5562_v4  ;;  %v5570_v27 = vadd.f32 %v13151_v24, %v5533_v40 }
 0xa11   : > { %v5770_v11 = vadd.f32 %v5769_v52, %v5725_v5 }
 0xa12   : > { %v5814_v8 = vpop.f32.mrf.mxu2  ;;  %7339 = vmatmul.f32.vlgmr.msrb.gmra.mxu0 %v13117_v0 }
 0xa13   : > { %v5815_v33 = vadd.f32 %v5814_v8, %v5770_v11  ;;  %v5847_v36 = vpop.f32.mrf.mxu3  ;;  %7216 = vmatmul.f32.gmra.mxu1 %v13193_v44 }
 0xa14   : > { %v13244_v14 = vadd.f32 %v5847_v36, %v5811_v17 }
 0xa17   : > { %7417 = vmatmul.f32.vlgmr.msrb.gmra.mxu2 %v13164_v16  ;;  %v5900_v59 = vpop.f32.mrf.mxu0 }
 0xa18   : > { %7306 = vmatmul.f32.gmra.mxu3 %v13219_v30  ;;  %v5957_v51 = vpop.f32.mrf.mxu1  ;;  %v5901_v19 = vadd.f32 %v5900_v59, %v5566_v55 }
 0xa19   : > { %v5958_v9 = vadd.f32 %v5957_v51, %v5893_v61 }
 0xa1a   : > { %v5999_v63 = vpop.f32.mrf.mxu2  ;;  %7343 = vmatmul.f32.gmra.mxu0 %v13145_v45 }
 0xa1b   : > { %v5851_v35 = vpop.f32.mrf.mxu3  ;;  %7376 = vmatmul.f32.vlgmr.msrb.gmra.mxu1 %v13117_v0  ;;  %v6000_v58 = vadd.f32 %v5999_v63, %v5958_v9 }
 0xa1c   : > { %v13250_v13 = vadd.f32 %v5851_v35, %v5815_v33  ;;  %v7970_v33 = vld [vmem:[%s8154_s8] sm:$0xff] }
 0xa1f   : > { %7425 = vmatmul.f32.gmra.mxu2 %v13188_v6  ;;  %v5908_v22 = vpop.f32.mrf.mxu0 }
 0xa20   : > { %7482 = vmatmul.f32.vlgmr.msrb.gmra.mxu3 %v13117_v0  ;;  %v5961_v38 = vpop.f32.mrf.mxu1  ;;  %v5909_v26 = vadd.f32 %v5908_v22, %v5570_v27 }
 0xa21   : > { %v5962_v7 = vadd.f32 %v5961_v38, %v5901_v19 }
 0xa22   : > { %v6004_v15 = vpop.f32.mrf.mxu2  ;;  %7347 = vmatmul.f32.gmra.mxu0 %v13169_v62 }
 0xa23   : > { %v6041_v16 = vpop.f32.mrf.mxu3  ;;  %7380 = vmatmul.f32.gmra.mxu1 %v13145_v45  ;;  %v6005_v42 = vadd.f32 %v6004_v15, %v5962_v7 }
 0xa24   : > { %v6042_v17 = vadd.f32 %v6041_v16, %v6000_v58  ;;  %v13920_v58 = vld [vmem:[#allocation18_spill] sm:$0xff] }
 0xa27   : > { %7433 = vmatmul.f32.gmra.mxu2 %v13216_v37  ;;  %v13259_v49 = vpop.f32.mrf.mxu0 }
 0xa28   : > { %7486 = vmatmul.f32.gmra.mxu3 %v13145_v45  ;;  %v5965_v6 = vpop.f32.mrf.mxu1 }
 0xa29   : > { %v5966_v24 = vadd.f32 %v5965_v6, %v5909_v26 }
 0xa2a   : > { %v6009_v48 = vpop.f32.mrf.mxu2  ;;  %7351 = vmatmul.f32.gmra.mxu0 %v13193_v44 }
 0xa2b   : > { %v6047_v21 = vpop.f32.mrf.mxu3  ;;  %7384 = vmatmul.f32.gmra.mxu1 %v13169_v62 }
 0xa2c   : > { %v6048_v8 = vadd.f32 %v6047_v21, %v6005_v42 }
 0xa2f   : > { %7441 = vmatmul.f32.gmra.mxu2 %v7162_v50  ;;  %v6092_v37 = vpop.f32.mrf.mxu0 }
 0xa30   : > { %7490 = vmatmul.f32.gmra.mxu3 %v13169_v62  ;;  %v5969_v12 = vpop.f32.mrf.mxu1  ;;  %v6093_v50 = vadd.f32 %v6092_v37, %v6042_v17  ;;  %v7972_v37 = vld [vmem:[%s8154_s8 + $0x20] sm:$0xff] }
 0xa32   : > { %v6014_v18 = vpop.f32.mrf.mxu2  ;;  %7524 = vmatmul.f32.vlgmr.msra.gmra.mxu0 %v13138_v57 }
 0xa33   : > { %v6053_v25 = vpop.f32.mrf.mxu3  ;;  %7388 = vmatmul.f32.gmra.mxu1 %v13193_v44 }
 0xa37   : > { %7617 = vmatmul.f32.vlgmr.msra.gmra.mxu2 %v13117_v0  ;;  %v6096_v29 = vpop.f32.mrf.mxu0 }
 0xa38   : > { %7494 = vmatmul.f32.gmra.mxu3 %v13193_v44  ;;  %v6129_v57 = vpop.f32.mrf.mxu1  ;;  %v6097_v59 = vadd.f32 %v6096_v29, %v6048_v8 }
 0xa39   : > { %v6130_v28 = vadd.f32 %v6129_v57, %v6093_v50 }
 0xa3a   : > { %v13278_v5 = vpop.f32.mrf.mxu2  ;;  %7529 = vmatmul.f32.gmra.mxu0 %v13160_v20  ;;  %v5492_v20 = vadd.f32 %v13098_v56, %v13057_v54  ;;  %v6010_v54 = vadd.f32 %v6009_v48, %v5966_v24  ;;  %v13918_v56 = vld [vmem:[#allocation77_spill] sm:$0xff]  ;;  %v7974_v24 = vld [vmem:[%s8154_s8 + $0x8] sm:$0xff] }
 0xa3b   : > { %v6446_v52 = vadd.f32 %v13917_v3, %v6130_v28  ;;  %v6059_v11 = vpop.f32.mrf.mxu3  ;;  %7566 = vmatmul.f32.vlgmr.msra.gmra.mxu1 %v13143_v41  ;;  %v6171_v7 = vadd.f32 %v13278_v5, %v13231_v2 }
 0xa3c   : > { %v5537_v63 = vadd.f32 %v13148_v47, %v5492_v20  ;;  %v6054_v6 = vadd.f32 %v6053_v25, %v6010_v54 }
 0xa3d   : > { %v6454_v36 = vadd.f32 %v7970_v33, %v6446_v52 }
 0xa3e   : > { %v5574_v38 = vadd.f32 %v13173_v60, %v5537_v63 }
 0xa3f   : > { %6462 = vst [vmem:[%s13288_s5] sm:$0xff] %v6454_v36  ;;  %7621 = vmatmul.f32.gmra.mxu2 %v13145_v45  ;;  %v6100_v41 = vpop.f32.mrf.mxu0 }
 0xa40   : > { %7654 = vmatmul.f32.vlgmr.msra.gmra.mxu3 %v13117_v0  ;;  %v6133_v51 = vpop.f32.mrf.mxu1  ;;  %v5917_v39 = vadd.f32 %v13259_v49, %v5574_v38  ;;  %v7971_v0 = vld [vmem:[%s8154_s8 + $0x10] sm:$0xff]  ;;  %v6101_v47 = vadd.f32 %v6100_v41, %v6054_v6 }
 0xa41   : > { %v6134_v35 = vadd.f32 %v6133_v51, %v6097_v59  ;;  %v13919_v49 = vld [vmem:[#allocation76_spill] sm:$0xff] }
 0xa42   : > { %v6178_v22 = vpop.f32.mrf.mxu2  ;;  %7534 = vmatmul.f32.gmra.mxu0 %v13182_v53  ;;  %v5970_v4 = vadd.f32 %v5969_v12, %v5917_v39  ;;  %v7975_v39 = vld [vmem:[%s8154_s8 + $0x18] sm:$0xff] }
 0xa43   : > { %v6448_v15 = vadd.f32 %v13918_v56, %v6134_v35  ;;  %v6235_v16 = vpop.f32.mrf.mxu3  ;;  %7572 = vmatmul.f32.gmra.mxu1 %v13167_v32  ;;  %v6179_v42 = vadd.f32 %v6178_v22, %v13238_v1 }
 0xa44   : > { %v6015_v32 = vadd.f32 %v6014_v18, %v5970_v4  ;;  %v6236_v29 = vadd.f32 %v6235_v16, %v6171_v7  ;;  %v7085_v7 = vpop.permute.xlu1 %7084 }
 0xa45   : > { %v6456_v10 = vadd.f32 %v7971_v0, %v6448_v15 }
 0xa46   : > { %v6060_v9 = vadd.f32 %v6059_v11, %v6015_v32  ;;  %v7976_v32 = vld [vmem:[%s8154_s8 + $0x28] sm:$0xff] }
 0xa47   : > { %6464 = vst [vmem:[%s13288_s5 + $0x10] sm:$0xff] %v6456_v10  ;;  %7625 = vmatmul.f32.gmra.mxu2 %v13169_v62  ;;  %v6104_v53 = vpop.f32.mrf.mxu0 }
 0xa48   : > { %7658 = vmatmul.f32.gmra.mxu3 %v13145_v45  ;;  %v6137_v60 = vpop.f32.mrf.mxu1  ;;  %v6105_v46 = vadd.f32 %v6104_v53, %v6060_v9 }
 0xa49   : > { %v6138_v48 = vadd.f32 %v6137_v60, %v6101_v47 }
 0xa4a   : > { %v6186_v21 = vpop.f32.mrf.mxu2  ;;  %7539 = vmatmul.f32.gmra.mxu0 %v13207_v31 }
 0xa4b   : > { %v6450_v61 = vadd.f32 %v13919_v49, %v6138_v48  ;;  %v6239_v23 = vpop.f32.mrf.mxu3  ;;  %7578 = vmatmul.f32.gmra.mxu1 %v13191_v43  ;;  %v7973_v43 = vld [vmem:[%s8154_s8 + $0x30] sm:$0xff]  ;;  %v6187_v20 = vadd.f32 %v6186_v21, %v13244_v14 }
 0xa4c   : > { %v6240_v52 = vadd.f32 %v6239_v23, %v6179_v42 }
 0xa4d   : > { %v6458_v12 = vadd.f32 %v7972_v37, %v6450_v61 }
 0xa4f   : > { %6466 = vst [vmem:[%s13288_s5 + $0x20] sm:$0xff] %v6458_v12  ;;  %7629 = vmatmul.f32.gmra.mxu2 %v13193_v44  ;;  %v6277_v45 = vpop.f32.mrf.mxu0 }
 0xa50   : > { %7662 = vmatmul.f32.gmra.mxu3 %v13169_v62  ;;  %v6141_v55 = vpop.f32.mrf.mxu1  ;;  %v6278_v40 = vadd.f32 %v6277_v45, %v6236_v29 }
 0xa51   : > { %v6142_v31 = vadd.f32 %v6141_v55, %v6105_v46  ;;  %v7977_v55 = vld [vmem:[%s8154_s8 + $0x38] sm:$0xff] }
 0xa52   : > { %v6194_v18 = vpop.f32.mrf.mxu2 }
 0xa53   : > { %v6452_v25 = vadd.f32 %v13920_v58, %v6142_v31  ;;  %v6243_v19 = vpop.f32.mrf.mxu3  ;;  %7584 = vmatmul.f32.gmra.mxu1 %v13219_v30  ;;  %v6195_v16 = vadd.f32 %v6194_v18, %v13250_v13 }
 0xa54   : > { %v6244_v51 = vadd.f32 %v6243_v19, %v6187_v20  ;;  %v7095_v20 = vpop.permute.xlu0 %7094 }
 0xa55   : > { %v6460_v17 = vadd.f32 %v7973_v43, %v6452_v25 }
 0xa57   : > { %6468 = vst [vmem:[%s13288_s5 + $0x30] sm:$0xff] %v6460_v17  ;;  %v6282_v34 = vpop.f32.mrf.mxu0 }
 0xa58   : > { %7666 = vmatmul.f32.gmra.mxu3 %v13193_v44  ;;  %v6319_v50 = vpop.f32.mrf.mxu1  ;;  %v6283_v33 = vadd.f32 %v6282_v34, %v6240_v52 }
 0xa59   : > { %v6320_v28 = vadd.f32 %v6319_v50, %v6278_v40 }
 0xa5a   : > { %v6370_v62 = vpop.f32.mrf.mxu2 }
 0xa5b   : > { %v6247_v57 = vpop.f32.mrf.mxu3  ;;  %v6371_v11 = vadd.f32 %v6370_v62, %v6320_v28 }
 0xa5c   : > { %v6248_v0 = vadd.f32 %v6247_v57, %v6195_v16 }
 0xa5f   : > { %v6287_v27 = vpop.f32.mrf.mxu0 }
 0xa60   : > { %v6325_v30 = vpop.f32.mrf.mxu1  ;;  %v6288_v22 = vadd.f32 %v6287_v27, %v6244_v51  ;;  %v7090_v27 = vpop.permute.xlu2 %7089 }
 0xa61   : > { %v6326_v5 = vadd.f32 %v6325_v30, %v6283_v33 }
 0xa62   : > { %v6374_v26 = vpop.f32.mrf.mxu2 }
 0xa63   : > { %v6407_v8 = vpop.f32.mrf.mxu3  ;;  %v6375_v1 = vadd.f32 %v6374_v26, %v6326_v5 }
 0xa64   : > { %v6408_v2 = vadd.f32 %v6407_v8, %v6371_v11 }
 0xa66   : > { %v6447_v44 = vadd.f32 %v13917_v3, %v6408_v2 }
 0xa67   : > { %v6292_v36 = vpop.f32.mrf.mxu0 }
 0xa68   : > { %v6455_v59 = vadd.f32 %v7974_v24, %v6447_v44  ;;  %v6331_v41 = vpop.f32.mrf.mxu1  ;;  %v6293_v53 = vadd.f32 %v6292_v36, %v6248_v0 }
 0xa69   : > { %v6332_v54 = vadd.f32 %v6331_v41, %v6288_v22 }
 0xa6a   : > { %6463 = vst [vmem:[%s13288_s5 + $0x8] sm:$0xff] %v6455_v59  ;;  %v6378_v63 = vpop.f32.mrf.mxu2 }
 0xa6b   : > { %v6411_v35 = vpop.f32.mrf.mxu3  ;;  %v6379_v10 = vadd.f32 %v6378_v63, %v6332_v54 }
 0xa6c   : > { %v6412_v38 = vadd.f32 %v6411_v35, %v6375_v1 }
 0xa6e   : > { %v6449_v15 = vadd.f32 %v13918_v56, %v6412_v38 }
 0xa6f   : > { %v7140_v3 = vpop.f32.mrf.mxu0 }
 0xa70   : > { %v6457_v14 = vadd.f32 %v7975_v39, %v6449_v15  ;;  %v6337_v6 = vpop.f32.mrf.mxu1  ;;  %v7141_v50 = vadd.f32 %v7140_v3, %v7085_v7  ;;  %v7100_v3 = vpop.permute.xlu1 %7099 }
 0xa71   : > { %v6338_v48 = vadd.f32 %v6337_v6, %v6293_v53 }
 0xa72   : > { %6465 = vst [vmem:[%s13288_s5 + $0x18] sm:$0xff] %v6457_v14  ;;  %v6382_v4 = vpop.f32.mrf.mxu2 }
 0xa73   : > { %v6415_v47 = vpop.f32.mrf.mxu3  ;;  %v6383_v23 = vadd.f32 %v6382_v4, %v6338_v48 }
 0xa74   : > { %v6416_v60 = vadd.f32 %v6415_v47, %v6379_v10 }
 0xa76   : > { %v6451_v56 = vadd.f32 %v13919_v49, %v6416_v60 }
 0xa77   : > { %v7148_v21 = vpop.f32.mrf.mxu0 }
 0xa78   : > { %v6459_v61 = vadd.f32 %v7976_v32, %v6451_v56  ;;  %v7205_v13 = vpop.f32.mrf.mxu1  ;;  %v7149_v42 = vadd.f32 %v7148_v21, %v7090_v27 }
 0xa79   : > { %v7206_v29 = vadd.f32 %v7205_v13, %v7141_v50 }
 0xa7a   : > { %6467 = vst [vmem:[%s13288_s5 + $0x28] sm:$0xff] %v6459_v61  ;;  %v7247_v9 = vpop.f32.mrf.mxu2 }
 0xa7b   : > { %v6419_v37 = vpop.f32.mrf.mxu3  ;;  %v7248_v28 = vadd.f32 %v7247_v9, %v7206_v29 }
 0xa7c   : > { %v6420_v12 = vadd.f32 %v6419_v37, %v6383_v23 }
 0xa7e   : > { %v6453_v46 = vadd.f32 %v13920_v58, %v6420_v12 }
 0xa7f   : > { %v7156_v45 = vpop.f32.mrf.mxu0 }
 0xa80   : > { %v6461_v31 = vadd.f32 %v7977_v55, %v6453_v46  ;;  %v7209_v18 = vpop.f32.mrf.mxu1  ;;  %v7157_v24 = vadd.f32 %v7156_v45, %v7095_v20 }
 0xa81   : > { %v7210_v52 = vadd.f32 %v7209_v18, %v7149_v42 }
 0xa82   : > { %6469 = vst [vmem:[%s13288_s5 + $0x38] sm:$0xff] %v6461_v31  ;;  %v7252_v25 = vpop.f32.mrf.mxu2 }
 0xa83   : > { %v7289_v19 = vpop.f32.mrf.mxu3  ;;  %v7253_v5 = vadd.f32 %v7252_v25, %v7210_v52 }
 0xa84   : > { %v7290_v30 = vadd.f32 %v7289_v19, %v7248_v28 }
 0xa87   : > { %v7164_v43 = vpop.f32.mrf.mxu0 }
 0xa88   : > { %v7213_v49 = vpop.f32.mrf.mxu1  ;;  %v7165_v16 = vadd.f32 %v7164_v43, %v7100_v3 }
 0xa89   : > { %v7214_v41 = vadd.f32 %v7213_v49, %v7157_v24 }
 0xa8a   : > { %v7257_v17 = vpop.f32.mrf.mxu2 }
 0xa8b   : > { %v7295_v34 = vpop.f32.mrf.mxu3  ;;  %v7258_v38 = vadd.f32 %v7257_v17, %v7214_v41 }
 0xa8c   : > { %v7296_v59 = vadd.f32 %v7295_v34, %v7253_v5 }
 0xa8f   : > { %v7340_v62 = vpop.f32.mrf.mxu0 }
 0xa90   : > { %v7217_v57 = vpop.f32.mrf.mxu1  ;;  %v7341_v11 = vadd.f32 %v7340_v62, %v7290_v30 }
 0xa91   : > { %v7218_v14 = vadd.f32 %v7217_v57, %v7165_v16 }
 0xa92   : > { %v7262_v40 = vpop.f32.mrf.mxu2 }
 0xa93   : > { %v7301_v58 = vpop.f32.mrf.mxu3  ;;  %v7263_v53 = vadd.f32 %v7262_v40, %v7218_v14 }
 0xa94   : > { %v7302_v39 = vadd.f32 %v7301_v58, %v7258_v38 }
 0xa97   : > { %v7344_v26 = vpop.f32.mrf.mxu0 }
 0xa98   : > { %v7377_v8 = vpop.f32.mrf.mxu1  ;;  %v7345_v51 = vadd.f32 %v7344_v26, %v7296_v59 }
 0xa99   : > { %v7378_v33 = vadd.f32 %v7377_v8, %v7341_v11 }
 0xa9a   : > { %v7418_v2 = vpop.f32.mrf.mxu2 }
 0xa9b   : > { %v7670_v44 = vmax.f32 %v7378_v33, 0.0  ;;  %v7307_v36 = vpop.f32.mrf.mxu3  ;;  %v7419_v12 = vadd.f32 %v7418_v2, %v7085_v7 }
 0xa9c   : > { %v7308_v56 = vadd.f32 %v7307_v36, %v7263_v53 }
 0xa9d   : > { %7678 = vst [vmem:[%s13339_s30] sm:$0xff] %v7670_v44 }
 0xa9f   : > { %v7348_v1 = vpop.f32.mrf.mxu0 }
 0xaa0   : > { %v7381_v63 = vpop.f32.mrf.mxu1  ;;  %v7349_v6 = vadd.f32 %v7348_v1, %v7302_v39 }
 0xaa1   : > { %v7382_v35 = vadd.f32 %v7381_v63, %v7345_v51 }
 0xaa2   : > { %v7426_v22 = vpop.f32.mrf.mxu2 }
 0xaa3   : > { %v7672_v54 = vmax.f32 %v7382_v35, 0.0  ;;  %v7483_v15 = vpop.f32.mrf.mxu3  ;;  %v7427_v43 = vadd.f32 %v7426_v22, %v7090_v27 }
 0xaa4   : > { %v7484_v45 = vadd.f32 %v7483_v15, %v7419_v12 }
 0xaa5   : > { %7680 = vst [vmem:[%s13339_s30 + $0x10] sm:$0xff] %v7672_v54 }
 0xaa7   : > { %v7352_v10 = vpop.f32.mrf.mxu0 }
 0xaa8   : > { %v7385_v0 = vpop.f32.mrf.mxu1  ;;  %v7353_v21 = vadd.f32 %v7352_v10, %v7308_v56 }
 0xaa9   : > { %v7386_v4 = vadd.f32 %v7385_v0, %v7349_v6 }
 0xaaa   : > { %v7434_v47 = vpop.f32.mrf.mxu2 }
 0xaab   : > { %v7674_v60 = vmax.f32 %v7386_v4, 0.0  ;;  %v7487_v48 = vpop.f32.mrf.mxu3  ;;  %v7435_v58 = vadd.f32 %v7434_v47, %v7095_v20 }
 0xaac   : > { %v7488_v17 = vadd.f32 %v7487_v48, %v7427_v43 }
 0xaad   : > { %7682 = vst [vmem:[%s13339_s30 + $0x20] sm:$0xff] %v7674_v60 }
 0xaaf   : > { %v7525_v9 = vpop.f32.mrf.mxu0 }
 0xab0   : > { %v7389_v32 = vpop.f32.mrf.mxu1  ;;  %v7526_v18 = vadd.f32 %v7525_v9, %v7484_v45 }
 0xab1   : > { %v7390_v61 = vadd.f32 %v7389_v32, %v7353_v21 }
 0xab2   : > { %v7442_v13 = vpop.f32.mrf.mxu2 }
 0xab3   : > { %v7676_v23 = vmax.f32 %v7390_v61, 0.0  ;;  %v7491_v37 = vpop.f32.mrf.mxu3  ;;  %v7443_v5 = vadd.f32 %v7442_v13, %v7100_v3 }
 0xab4   : > { %v7492_v30 = vadd.f32 %v7491_v37, %v7435_v58 }
 0xab5   : > { %7684 = vst [vmem:[%s13339_s30 + $0x30] sm:$0xff] %v7676_v23 }
 0xab7   : > { %v7530_v25 = vpop.f32.mrf.mxu0 }
 0xab8   : > { %v7567_v46 = vpop.f32.mrf.mxu1  ;;  %v7531_v62 = vadd.f32 %v7530_v25, %v7488_v17 }
 0xab9   : > { %v7568_v19 = vadd.f32 %v7567_v46, %v7526_v18 }
 0xaba   : > { %v7618_v55 = vpop.f32.mrf.mxu2 }
 0xabb   : > { %v7495_v31 = vpop.f32.mrf.mxu3  ;;  %v7619_v34 = vadd.f32 %v7618_v55, %v7568_v19 }
 0xabc   : > { %v7496_v36 = vadd.f32 %v7495_v31, %v7443_v5 }
 0xabf   : > { %v7535_v7 = vpop.f32.mrf.mxu0 }
 0xac0   : > { %v7573_v49 = vpop.f32.mrf.mxu1  ;;  %v7536_v26 = vadd.f32 %v7535_v7, %v7492_v30 }
 0xac1   : > { %v7574_v40 = vadd.f32 %v7573_v49, %v7531_v62 }
 0xac2   : > { %v7622_v50 = vpop.f32.mrf.mxu2 }
 0xac3   : > { %v7655_v29 = vpop.f32.mrf.mxu3  ;;  %v7623_v52 = vadd.f32 %v7622_v50, %v7574_v40 }
 0xac4   : > { %v7656_v57 = vadd.f32 %v7655_v29, %v7619_v34 }
 0xac6   : > { %v7671_v28 = vmax.f32 %v7656_v57, 0.0 }
 0xac7   : > { %v7540_v44 = vpop.f32.mrf.mxu0 }
 0xac8   : > { %7679 = vst [vmem:[%s13339_s30 + $0x8] sm:$0xff] %v7671_v28  ;;  %v7579_v42 = vpop.f32.mrf.mxu1  ;;  %v7541_v20 = vadd.f32 %v7540_v44, %v7496_v36 }
 0xac9   : > { %v7580_v33 = vadd.f32 %v7579_v42, %v7536_v26 }
 0xaca   : > { %v7626_v27 = vpop.f32.mrf.mxu2 }
 0xacb   : > { %v7659_v11 = vpop.f32.mrf.mxu3  ;;  %v7627_v24 = vadd.f32 %v7626_v27, %v7580_v33 }
 0xacc   : > { %v7660_v8 = vadd.f32 %v7659_v11, %v7623_v52 }
 0xace   : > { %v7673_v2 = vmax.f32 %v7660_v8, 0.0 }
 0xad0   : > { %7681 = vst [vmem:[%s13339_s30 + $0x18] sm:$0xff] %v7673_v2  ;;  %v7585_v59 = vpop.f32.mrf.mxu1 }
 0xad1   : > { %v7586_v1 = vadd.f32 %v7585_v59, %v7541_v20 }
 0xad2   : > { %v7630_v35 = vpop.f32.mrf.mxu2 }
 0xad3   : > { %v7663_v41 = vpop.f32.mrf.mxu3  ;;  %v7631_v22 = vadd.f32 %v7630_v35, %v7586_v1 }
 0xad4   : > { %v7664_v51 = vadd.f32 %v7663_v41, %v7627_v24 }
 0xad6   : > { %v7675_v63 = vmax.f32 %v7664_v51, 0.0 }
 0xad8   : > { %7683 = vst [vmem:[%s13339_s30 + $0x28] sm:$0xff] %v7675_v63 }
 0xadb   : > { %v7667_v38 = vpop.f32.mrf.mxu3 }
 0xadc   : > { %v7668_v54 = vadd.f32 %v7667_v38, %v7631_v22 }
 0xade   : > { %v7677_v15 = vmax.f32 %v7668_v54, 0.0 }
 0xae0   : > { %7685 = vst [vmem:[%s13339_s30 + $0x38] sm:$0xff] %v7677_v15 }
 0xae1 PF: > { %s36_s29 = sadd.s32 1, %s7984_s29  }
 0xae2   : > { %p33_p4 = scmp.ge.s32.totalorder %s36_s29, 4  }
 0xae4   :  { %35 = sbr.rel (!%p33_p4) target bundleno = 13 (0xd), region = 185 }

</bundles_post_ra>
